<compile_context>
chip_gen: v7x
topology: tpu7x:2x2x1
jax: 0.10.0
libtpu: 0.0.40
codegen_flags: <defaults>
</compile_context>

<pallas_src>
import functools

import jax
import jax.numpy as jnp
from jax import lax
from jax.experimental import pallas as pl
from jax.experimental.pallas import tpu as pltpu

EPS = 1e-5
_MIB = 1024 * 1024


def _vmem_cap_bytes():
    try:
        return int(pltpu.get_tpu_info().vmem_capacity_bytes)
    except Exception:
        return 64 * _MIB  # v7x per-core floor


# ----------------------------------------------------------------------------
# Fused kernel: [optional BN+ReLU of previous stage on the input tile]
#               -> 3x3 SAME conv as 9 accumulating MXU matmuls (f32 accumulate)
#               -> per-step partial BN statistics (sum, sumsq) as outputs.
# One batch item per grid step; no cross-step state -> grid axis is "parallel".
# ----------------------------------------------------------------------------
def _conv_bn_kernel(x_ref, w_ref, in_scale_ref, in_shift_ref,
                    y_ref, psum_ref, psumsq_ref,
                    pad_sc,
                    *, H, W, Cin, Cout, apply_input_bnrelu):
    # Zero only the 1-pixel halo ring (O(perimeter)); done every step so it is
    # correct on every core under a megacore-parallel grid.
    zrow = jnp.zeros((1, W + 2, Cin), pad_sc.dtype)
    zcol = jnp.zeros((H + 2, 1, Cin), pad_sc.dtype)
    pad_sc[0:1, :, :] = zrow
    pad_sc[H + 1:H + 2, :, :] = zrow
    pad_sc[:, 0:1, :] = zcol
    pad_sc[:, W + 1:W + 2, :] = zcol

    x = x_ref[0]                                             # (H, W, Cin)
    if apply_input_bnrelu:
        # Fused BatchNorm-apply + ReLU of the previous stage (f32 math).
        xf = jnp.maximum(x.astype(jnp.float32) * in_scale_ref[0]
                         + in_shift_ref[0], 0.0)
        x = xf
    pad_sc[1:H + 1, 1:W + 1, :] = x.astype(pad_sc.dtype)     # in-kernel SAME halo

    # 3x3 conv = 9 accumulating matmuls straight off the halo'd tile.
    # No materialized im2col buffer; bf16 x bf16 -> f32 accumulate.
    y = None
    for dy in range(3):
        for dx in range(3):
            tap = pad_sc[dy:dy + H, dx:dx + W, :].reshape(H * W, Cin)
            d = jnp.dot(tap, w_ref[dy * 3 + dx],
                        preferred_element_type=jnp.float32)
            y = d if y is None else y + d

    y16 = y.astype(jnp.bfloat16)
    y_ref[0] = y16.reshape(H, W, Cout)

    # Partial BN statistics of the *rounded* values the consumer will normalize
    # (keeps stats consistent with the bf16 tensor read back from HBM).
    yq = y16.astype(jnp.float32)
    psum_ref[0] = jnp.sum(yq, axis=0).reshape(1, Cout)
    psumsq_ref[0] = jnp.sum(yq * yq, axis=0).reshape(1, Cout)


def conv_bn_partial_stats(x, w9, in_scale=None, in_shift=None):
    """3x3 SAME conv (no bias) emitting per-step partial BN statistics.

    If in_scale/in_shift are given, the previous stage's folded BN-apply + ReLU
    is fused onto the input tile before the convolution.
    Returns (y_bf16, partial_sum, partial_sumsq) with partials of shape
    (N, 1, Cout); the tiny finalize runs in plain JAX (finalize_bn).
    """
    N, H, W, Cin = x.shape
    Cout = w9.shape[-1]
    apply_in = in_scale is not None
    if not apply_in:
        in_scale = jnp.ones((1, Cin), jnp.float32)
        in_shift = jnp.zeros((1, Cin), jnp.float32)

    kernel = functools.partial(
        _conv_bn_kernel, H=H, W=W, Cin=Cin, Cout=Cout,
        apply_input_bnrelu=apply_in)

    # VMEM budget from actual tile sizes (double-buffered blocks + halo scratch
    # + weights + slack for the per-tap materialized slices and f32 accumulator).
    in_blk = H * W * Cin * x.dtype.itemsize
    out_blk = H * W * Cout * 2
    pad_blk = (H + 2) * (W + 2) * Cin * 2
    w_blk = 9 * Cin * Cout * 2
    tap_slack = 2 * H * W * (Cin * 2 + Cout * 4)
    est = 2 * in_blk + 2 * out_blk + pad_blk + 2 * w_blk + tap_slack + 2 * _MIB
    vmem_limit = min(int(0.8 * _vmem_cap_bytes()),
                     max(32 * _MIB, int(1.25 * est)))

    cost = pl.CostEstimate(
        flops=2 * N * H * W * 9 * Cin * Cout,
        transcendentals=0,
        bytes_accessed=int(N * in_blk + w_blk + N * out_blk
                           + 2 * N * Cout * 4 + 2 * Cin * 4))

    return pl.pallas_call(
        kernel,
        out_shape=(jax.ShapeDtypeStruct((N, H, W, Cout), jnp.bfloat16),
                   jax.ShapeDtypeStruct((N, 1, Cout), jnp.float32),
                   jax.ShapeDtypeStruct((N, 1, Cout), jnp.float32)),
        grid_spec=pltpu.PrefetchScalarGridSpec(
            num_scalar_prefetch=0,
            grid=(N,),
            in_specs=[
                pl.BlockSpec((1, H, W, Cin), lambda n: (n, 0, 0, 0)),
                pl.BlockSpec((9, Cin, Cout), lambda n: (0, 0, 0)),
                pl.BlockSpec((1, Cin), lambda n: (0, 0)),
                pl.BlockSpec((1, Cin), lambda n: (0, 0)),
            ],
            out_specs=[
                pl.BlockSpec((1, H, W, Cout), lambda n: (n, 0, 0, 0)),
                pl.BlockSpec((1, 1, Cout), lambda n: (n, 0, 0)),
                pl.BlockSpec((1, 1, Cout), lambda n: (n, 0, 0)),
            ],
            scratch_shapes=[
                pltpu.VMEM((H + 2, W + 2, Cin), jnp.bfloat16),  # halo'd input tile
            ],
        ),
        # No cross-step state -> batch axis can shard across v7x's 2 TCs.
        compiler_params=pltpu.CompilerParams(
            dimension_semantics=("parallel",),
            vmem_limit_bytes=vmem_limit),
        cost_estimate=cost,
    )(x, w9, in_scale, in_shift)


# ----------------------------------------------------------------------------
# Tiny BN finalize in plain JAX: reduce per-step partials, fold gamma/beta into
# (scale, shift) = (gamma*invstd, beta - mean*gamma*invstd).
# ----------------------------------------------------------------------------
def finalize_bn(psum, psumsq, gamma, beta, count):
    s = jnp.sum(psum[:, 0, :], axis=0)
    ss = jnp.sum(psumsq[:, 0, :], axis=0)
    mean = s / count
    var = jnp.maximum(ss / count - mean * mean, 0.0)   # biased (training-mode) var
    scale = gamma[0] * lax.rsqrt(var + EPS)
    shift = beta[0] - mean * scale
    return scale.reshape(1, -1), shift.reshape(1, -1)


# ----------------------------------------------------------------------------
# Final BN-apply + ReLU (only needed for the *last* stage; earlier stages are
# fused into the next conv kernel).  bf16 output, row-band tiled, parallel grid.
# ----------------------------------------------------------------------------
def _bn_relu_kernel(y_ref, scale_ref, shift_ref, o_ref):
    y = y_ref[...].astype(jnp.float32)
    o_ref[...] = jnp.maximum(y * scale_ref[0] + shift_ref[0], 0.0).astype(o_ref.dtype)


def _pick_band(H, row_bytes, budget=2 * _MIB):
    band = H
    while band % 2 == 0 and band > 8 and band * row_bytes > budget:
        band //= 2
    return band


def bn_relu(y, scale, shift, out_dtype=jnp.bfloat16):
    N, H, W, C = y.shape
    band = _pick_band(H, W * C * (y.dtype.itemsize + jnp.dtype(out_dtype).itemsize))
    vec = pl.BlockSpec((1, C), lambda n, h: (0, 0))
    return pl.pallas_call(
        _bn_relu_kernel,
        out_shape=jax.ShapeDtypeStruct((N, H, W, C), out_dtype),
        grid_spec=pltpu.PrefetchScalarGridSpec(
            num_scalar_prefetch=0,
            grid=(N, H // band),
            in_specs=[pl.BlockSpec((1, band, W, C), lambda n, h: (n, h, 0, 0)),
                      vec, vec],
            out_specs=pl.BlockSpec((1, band, W, C), lambda n, h: (n, h, 0, 0)),
        ),
        compiler_params=pltpu.CompilerParams(
            dimension_semantics=("parallel", "parallel")),
    )(y, scale, shift)


# ----------------------------------------------------------------------------
# DoubleConv forward: conv -> BN -> ReLU -> conv -> BN -> ReLU   (3 pallas_calls
# plus two O(Cout) JAX finalizes).
# ----------------------------------------------------------------------------
def double_conv(x, w1, g1, b1, w2, g2, b2):
    N, H, W, Cin = x.shape
    Cmid, Cout = w1.shape[3], w2.shape[3]
    count = float(N * H * W)
    # HWIO -> (9, Cin, Cout), tap index t = dy*3 + dx, bf16 for the MXU.
    w1_9 = w1.reshape(9, Cin, Cmid).astype(jnp.bfloat16)
    w2_9 = w2.reshape(9, Cmid, Cout).astype(jnp.bfloat16)

    # Stage 1: conv1 + BN1 partial stats (BN1 apply is deferred into stage 2).
    y1, s1, ss1 = conv_bn_partial_stats(x, w1_9)
    scale1, shift1 = finalize_bn(s1, ss1, g1, b1, count)
    # Stage 2: fused BN1-apply+ReLU on the input tile, conv2, BN2 partial stats.
    y2, s2, ss2 = conv_bn_partial_stats(y1, w2_9, in_scale=scale1, in_shift=shift1)
    scale2, shift2 = finalize_bn(s2, ss2, g2, b2, count)
    # Stage 3: final BN2-apply + ReLU (bf16 out).
    return bn_relu(y2, scale2, shift2)


# ----------------------------------------------------------------------------
# Pure-JAX f32 reference for verification (training-mode BN, biased variance).
# ----------------------------------------------------------------------------
def reference(x, w1, g1, b1, w2, g2, b2):
    def conv(xx, ww):
        return lax.conv_general_dilated(
            xx, ww, (1, 1), 'SAME',
            dimension_numbers=('NHWC', 'HWIO', 'NHWC'))

    def bnr(yy, g, b):
        mean = jnp.mean(yy, axis=(0, 1, 2))
        var = jnp.mean((yy - mean) ** 2, axis=(0, 1, 2))
        return jnp.maximum((yy - mean) * lax.rsqrt(var + EPS) * g[0] + b[0], 0.0)

    y = bnr(conv(x, w1), g1, b1)
    return bnr(conv(y, w2), g2, b2)


if __name__ == "__main__":
    N, H, W = 2, 16, 16
    Cin, Cout = 4, 8

    key = jax.random.PRNGKey(0)
    kx, kw1, kw2 = jax.random.split(key, 3)

    # NHWC input (equivalent to a PyTorch NCHW input of shape (2, 4, 16, 16)).
    x = jax.random.normal(kx, (N, H, W, Cin), jnp.float32)

    # Conv weights (HWIO); BN gamma=1, beta=0 (PyTorch default init).
    w1 = 0.1 * jax.random.normal(kw1, (3, 3, Cin, Cout), jnp.float32)
    w2 = 0.1 * jax.random.normal(kw2, (3, 3, Cout, Cout), jnp.float32)
    g1 = jnp.ones((1, Cout), jnp.float32)
    b1 = jnp.zeros((1, Cout), jnp.float32)
    g2 = jnp.ones((1, Cout), jnp.float32)
    b2 = jnp.zeros((1, Cout), jnp.float32)

    fwd = jax.jit(double_conv)
    out = jax.block_until_ready(fwd(x, w1, g1, b1, w2, g2, b2))

    ref = reference(x, w1, g1, b1, w2, g2, b2)
    assert out.shape == (N, H, W, Cout)
    assert bool(jnp.all(jnp.isfinite(out)))
    # Tolerance covers bf16 MXU operands / bf16 intermediates & output vs the
    # f32 reference.
    assert bool(jnp.allclose(out.astype(jnp.float32), ref, rtol=3e-2, atol=3e-2)), (
        f"max abs err = {float(jnp.max(jnp.abs(out.astype(jnp.float32) - ref)))}")

    print("KERNEL_OK")
</pallas_src>

<mosaic_0001>
module attributes {stable_mosaic.version = 11 : i64} {
  func.func @_conv_bn_kernel(%arg0: i32, %arg1: memref<1x16x16x4xf32, #tpu.memory_space<vmem>>, %arg2: memref<9x4x8xbf16, #tpu.memory_space<vmem>>, %arg3: memref<1x4xf32, #tpu.memory_space<vmem>>, %arg4: memref<1x4xf32, #tpu.memory_space<vmem>>, %arg5: memref<1x16x16x8xbf16, #tpu.memory_space<vmem>>, %arg6: memref<1x1x8xf32, #tpu.memory_space<vmem>>, %arg7: memref<1x1x8xf32, #tpu.memory_space<vmem>>, %arg8: memref<18x18x4xbf16, #tpu.memory_space<vmem>>) attributes {dimension_semantics = [#tpu.dimension_semantics<parallel>], iteration_bounds = array<i64: 2>, scalar_prefetch = 0 : i64, scratch_operands = 1 : i64, tpu.core_type = #tpu.core_type<tc>, window_params = [{transform_indices = @transform_0, window_bounds = array<i64: 1, 16, 16, 4>}, {pipeline_mode = #tpu.pipeline_mode<synchronous>, transform_indices = @transform_1, window_bounds = array<i64: 9, 4, 8>}, {pipeline_mode = #tpu.pipeline_mode<synchronous>, transform_indices = @transform_2, window_bounds = array<i64: 1, 4>}, {pipeline_mode = #tpu.pipeline_mode<synchronous>, transform_indices = @transform_3, window_bounds = array<i64: 1, 4>}, {transform_indices = @transform_4, window_bounds = array<i64: 1, 16, 16, 8>}, {transform_indices = @transform_5, window_bounds = array<i64: 1, 1, 8>}, {transform_indices = @transform_6, window_bounds = array<i64: 1, 1, 8>}]} {
    %cst = arith.constant 0.000000e+00 : bf16
    %0 = vector.broadcast %cst : bf16 to vector<1x18x4xbf16>
    %cst_0 = arith.constant 0.000000e+00 : bf16
    %1 = vector.broadcast %cst_0 : bf16 to vector<18x1x4xbf16>
    %c0 = arith.constant 0 : index
    %c0_1 = arith.constant 0 : index
    %c0_2 = arith.constant 0 : index
    %2 = vector.load %arg8[%c0, %c0_1, %c0_2] : memref<18x18x4xbf16, #tpu.memory_space<vmem>>, vector<1x18x4xbf16>
    tpu.vector_store %arg8[%c0, %c0_1, %c0_2], %0 {strides = array<i32>} : memref<18x18x4xbf16, #tpu.memory_space<vmem>>, vector<1x18x4xbf16>,
    %c17 = arith.constant 17 : index
    %c0_3 = arith.constant 0 : index
    %c0_4 = arith.constant 0 : index
    %3 = vector.load %arg8[%c17, %c0_3, %c0_4] : memref<18x18x4xbf16, #tpu.memory_space<vmem>>, vector<1x18x4xbf16>
    tpu.vector_store %arg8[%c17, %c0_3, %c0_4], %0 {strides = array<i32>} : memref<18x18x4xbf16, #tpu.memory_space<vmem>>, vector<1x18x4xbf16>,
    %c0_5 = arith.constant 0 : index
    %c0_6 = arith.constant 0 : index
    %c0_7 = arith.constant 0 : index
    %4 = vector.load %arg8[%c0_5, %c0_6, %c0_7] : memref<18x18x4xbf16, #tpu.memory_space<vmem>>, vector<18x1x4xbf16>
    tpu.vector_store %arg8[%c0_5, %c0_6, %c0_7], %1 {strides = array<i32>} : memref<18x18x4xbf16, #tpu.memory_space<vmem>>, vector<18x1x4xbf16>,
    %c0_8 = arith.constant 0 : index
    %c17_9 = arith.constant 17 : index
    %c0_10 = arith.constant 0 : index
    %5 = vector.load %arg8[%c0_8, %c17_9, %c0_10] : memref<18x18x4xbf16, #tpu.memory_space<vmem>>, vector<18x1x4xbf16>
    tpu.vector_store %arg8[%c0_8, %c17_9, %c0_10], %1 {strides = array<i32>} : memref<18x18x4xbf16, #tpu.memory_space<vmem>>, vector<18x1x4xbf16>,
    %c0_11 = arith.constant 0 : index
    %c0_12 = arith.constant 0 : index
    %c0_13 = arith.constant 0 : index
    %c0_14 = arith.constant 0 : index
    %6 = vector.load %arg1[%c0_11, %c0_12, %c0_13, %c0_14] : memref<1x16x16x4xf32, #tpu.memory_space<vmem>>, vector<1x16x16x4xf32>
    %7 = vector.shape_cast %6 : vector<1x16x16x4xf32> to vector<16x16x4xf32>
    %8 = arith.truncf %7 : vector<16x16x4xf32> to vector<16x16x4xbf16>
    %c1 = arith.constant 1 : index
    %c1_15 = arith.constant 1 : index
    %c0_16 = arith.constant 0 : index
    %9 = vector.load %arg8[%c1, %c1_15, %c0_16] : memref<18x18x4xbf16, #tpu.memory_space<vmem>>, vector<16x16x4xbf16>
    tpu.vector_store %arg8[%c1, %c1_15, %c0_16], %8 {strides = array<i32>} : memref<18x18x4xbf16, #tpu.memory_space<vmem>>, vector<16x16x4xbf16>,
    %c0_17 = arith.constant 0 : index
    %c0_18 = arith.constant 0 : index
    %c0_19 = arith.constant 0 : index
    %10 = vector.load %arg8[%c0_17, %c0_18, %c0_19] : memref<18x18x4xbf16, #tpu.memory_space<vmem>>, vector<16x16x4xbf16>
    %11 = vector.shape_cast %10 : vector<16x16x4xbf16> to vector<256x4xbf16>
    %c0_20 = arith.constant 0 : index
    %c0_21 = arith.constant 0 : index
    %c0_22 = arith.constant 0 : index
    %12 = vector.load %arg2[%c0_20, %c0_21, %c0_22] : memref<9x4x8xbf16, #tpu.memory_space<vmem>>, vector<1x4x8xbf16>
    %13 = vector.shape_cast %12 : vector<1x4x8xbf16> to vector<4x8xbf16>
    %cst_23 = arith.constant dense<0.000000e+00> : vector<256x8xf32>
    %14 = tpu.matmul %11, %13, %cst_23 {dimension_numbers = #tpu.dot_dimension_numbers<[1], [0], [0], [1], [0, 0, 1, 1], [], []>} : vector<256x4xbf16>, vector<4x8xbf16>, vector<256x8xf32> -> vector<256x8xf32>
    %c0_24 = arith.constant 0 : index
    %c1_25 = arith.constant 1 : index
    %c0_26 = arith.constant 0 : index
    %15 = vector.load %arg8[%c0_24, %c1_25, %c0_26] : memref<18x18x4xbf16, #tpu.memory_space<vmem>>, vector<16x16x4xbf16>
    %16 = vector.shape_cast %15 : vector<16x16x4xbf16> to vector<256x4xbf16>
    %c1_27 = arith.constant 1 : index
    %c0_28 = arith.constant 0 : index
    %c0_29 = arith.constant 0 : index
    %17 = vector.load %arg2[%c1_27, %c0_28, %c0_29] : memref<9x4x8xbf16, #tpu.memory_space<vmem>>, vector<1x4x8xbf16>
    %18 = vector.shape_cast %17 : vector<1x4x8xbf16> to vector<4x8xbf16>
    %cst_30 = arith.constant dense<0.000000e+00> : vector<256x8xf32>
    %19 = tpu.matmul %16, %18, %cst_30 {dimension_numbers = #tpu.dot_dimension_numbers<[1], [0], [0], [1], [0, 0, 1, 1], [], []>} : vector<256x4xbf16>, vector<4x8xbf16>, vector<256x8xf32> -> vector<256x8xf32>
    %20 = arith.addf %14, %19 : vector<256x8xf32>
    %c0_31 = arith.constant 0 : index
    %c2 = arith.constant 2 : index
    %c0_32 = arith.constant 0 : index
    %21 = vector.load %arg8[%c0_31, %c2, %c0_32] : memref<18x18x4xbf16, #tpu.memory_space<vmem>>, vector<16x16x4xbf16>
    %22 = vector.shape_cast %21 : vector<16x16x4xbf16> to vector<256x4xbf16>
    %c2_33 = arith.constant 2 : index
    %c0_34 = arith.constant 0 : index
    %c0_35 = arith.constant 0 : index
    %23 = vector.load %arg2[%c2_33, %c0_34, %c0_35] : memref<9x4x8xbf16, #tpu.memory_space<vmem>>, vector<1x4x8xbf16>
    %24 = vector.shape_cast %23 : vector<1x4x8xbf16> to vector<4x8xbf16>
    %cst_36 = arith.constant dense<0.000000e+00> : vector<256x8xf32>
    %25 = tpu.matmul %22, %24, %cst_36 {dimension_numbers = #tpu.dot_dimension_numbers<[1], [0], [0], [1], [0, 0, 1, 1], [], []>} : vector<256x4xbf16>, vector<4x8xbf16>, vector<256x8xf32> -> vector<256x8xf32>
    %26 = arith.addf %20, %25 : vector<256x8xf32>
    %c1_37 = arith.constant 1 : index
    %c0_38 = arith.constant 0 : index
    %c0_39 = arith.constant 0 : index
    %27 = vector.load %arg8[%c1_37, %c0_38, %c0_39] : memref<18x18x4xbf16, #tpu.memory_space<vmem>>, vector<16x16x4xbf16>
    %28 = vector.shape_cast %27 : vector<16x16x4xbf16> to vector<256x4xbf16>
    %c3 = arith.constant 3 : index
    %c0_40 = arith.constant 0 : index
    %c0_41 = arith.constant 0 : index
    %29 = vector.load %arg2[%c3, %c0_40, %c0_41] : memref<9x4x8xbf16, #tpu.memory_space<vmem>>, vector<1x4x8xbf16>
    %30 = vector.shape_cast %29 : vector<1x4x8xbf16> to vector<4x8xbf16>
    %cst_42 = arith.constant dense<0.000000e+00> : vector<256x8xf32>
    %31 = tpu.matmul %28, %30, %cst_42 {dimension_numbers = #tpu.dot_dimension_numbers<[1], [0], [0], [1], [0, 0, 1, 1], [], []>} : vector<256x4xbf16>, vector<4x8xbf16>, vector<256x8xf32> -> vector<256x8xf32>
    %32 = arith.addf %26, %31 : vector<256x8xf32>
    %c1_43 = arith.constant 1 : index
    %c1_44 = arith.constant 1 : index
    %c0_45 = arith.constant 0 : index
    %33 = vector.load %arg8[%c1_43, %c1_44, %c0_45] : memref<18x18x4xbf16, #tpu.memory_space<vmem>>, vector<16x16x4xbf16>
    %34 = vector.shape_cast %33 : vector<16x16x4xbf16> to vector<256x4xbf16>
    %c4 = arith.constant 4 : index
    %c0_46 = arith.constant 0 : index
    %c0_47 = arith.constant 0 : index
    %35 = vector.load %arg2[%c4, %c0_46, %c0_47] : memref<9x4x8xbf16, #tpu.memory_space<vmem>>, vector<1x4x8xbf16>
    %36 = vector.shape_cast %35 : vector<1x4x8xbf16> to vector<4x8xbf16>
    %cst_48 = arith.constant dense<0.000000e+00> : vector<256x8xf32>
    %37 = tpu.matmul %34, %36, %cst_48 {dimension_numbers = #tpu.dot_dimension_numbers<[1], [0], [0], [1], [0, 0, 1, 1], [], []>} : vector<256x4xbf16>, vector<4x8xbf16>, vector<256x8xf32> -> vector<256x8xf32>
    %38 = arith.addf %32, %37 : vector<256x8xf32>
    %c1_49 = arith.constant 1 : index
    %c2_50 = arith.constant 2 : index
    %c0_51 = arith.constant 0 : index
    %39 = vector.load %arg8[%c1_49, %c2_50, %c0_51] : memref<18x18x4xbf16, #tpu.memory_space<vmem>>, vector<16x16x4xbf16>
    %40 = vector.shape_cast %39 : vector<16x16x4xbf16> to vector<256x4xbf16>
    %c5 = arith.constant 5 : index
    %c0_52 = arith.constant 0 : index
    %c0_53 = arith.constant 0 : index
    %41 = vector.load %arg2[%c5, %c0_52, %c0_53] : memref<9x4x8xbf16, #tpu.memory_space<vmem>>, vector<1x4x8xbf16>
    %42 = vector.shape_cast %41 : vector<1x4x8xbf16> to vector<4x8xbf16>
    %cst_54 = arith.constant dense<0.000000e+00> : vector<256x8xf32>
    %43 = tpu.matmul %40, %42, %cst_54 {dimension_numbers = #tpu.dot_dimension_numbers<[1], [0], [0], [1], [0, 0, 1, 1], [], []>} : vector<256x4xbf16>, vector<4x8xbf16>, vector<256x8xf32> -> vector<256x8xf32>
    %44 = arith.addf %38, %43 : vector<256x8xf32>
    %c2_55 = arith.constant 2 : index
    %c0_56 = arith.constant 0 : index
    %c0_57 = arith.constant 0 : index
    %45 = vector.load %arg8[%c2_55, %c0_56, %c0_57] : memref<18x18x4xbf16, #tpu.memory_space<vmem>>, vector<16x16x4xbf16>
    %46 = vector.shape_cast %45 : vector<16x16x4xbf16> to vector<256x4xbf16>
    %c6 = arith.constant 6 : index
    %c0_58 = arith.constant 0 : index
    %c0_59 = arith.constant 0 : index
    %47 = vector.load %arg2[%c6, %c0_58, %c0_59] : memref<9x4x8xbf16, #tpu.memory_space<vmem>>, vector<1x4x8xbf16>
    %48 = vector.shape_cast %47 : vector<1x4x8xbf16> to vector<4x8xbf16>
    %cst_60 = arith.constant dense<0.000000e+00> : vector<256x8xf32>
    %49 = tpu.matmul %46, %48, %cst_60 {dimension_numbers = #tpu.dot_dimension_numbers<[1], [0], [0], [1], [0, 0, 1, 1], [], []>} : vector<256x4xbf16>, vector<4x8xbf16>, vector<256x8xf32> -> vector<256x8xf32>
    %50 = arith.addf %44, %49 : vector<256x8xf32>
    %c2_61 = arith.constant 2 : index
    %c1_62 = arith.constant 1 : index
    %c0_63 = arith.constant 0 : index
    %51 = vector.load %arg8[%c2_61, %c1_62, %c0_63] : memref<18x18x4xbf16, #tpu.memory_space<vmem>>, vector<16x16x4xbf16>
    %52 = vector.shape_cast %51 : vector<16x16x4xbf16> to vector<256x4xbf16>
    %c7 = arith.constant 7 : index
    %c0_64 = arith.constant 0 : index
    %c0_65 = arith.constant 0 : index
    %53 = vector.load %arg2[%c7, %c0_64, %c0_65] : memref<9x4x8xbf16, #tpu.memory_space<vmem>>, vector<1x4x8xbf16>
    %54 = vector.shape_cast %53 : vector<1x4x8xbf16> to vector<4x8xbf16>
    %cst_66 = arith.constant dense<0.000000e+00> : vector<256x8xf32>
    %55 = tpu.matmul %52, %54, %cst_66 {dimension_numbers = #tpu.dot_dimension_numbers<[1], [0], [0], [1], [0, 0, 1, 1], [], []>} : vector<256x4xbf16>, vector<4x8xbf16>, vector<256x8xf32> -> vector<256x8xf32>
    %56 = arith.addf %50, %55 : vector<256x8xf32>
    %c2_67 = arith.constant 2 : index
    %c2_68 = arith.constant 2 : index
    %c0_69 = arith.constant 0 : index
    %57 = vector.load %arg8[%c2_67, %c2_68, %c0_69] : memref<18x18x4xbf16, #tpu.memory_space<vmem>>, vector<16x16x4xbf16>
    %58 = vector.shape_cast %57 : vector<16x16x4xbf16> to vector<256x4xbf16>
    %c8 = arith.constant 8 : index
    %c0_70 = arith.constant 0 : index
    %c0_71 = arith.constant 0 : index
    %59 = vector.load %arg2[%c8, %c0_70, %c0_71] : memref<9x4x8xbf16, #tpu.memory_space<vmem>>, vector<1x4x8xbf16>
    %60 = vector.shape_cast %59 : vector<1x4x8xbf16> to vector<4x8xbf16>
    %cst_72 = arith.constant dense<0.000000e+00> : vector<256x8xf32>
    %61 = tpu.matmul %58, %60, %cst_72 {dimension_numbers = #tpu.dot_dimension_numbers<[1], [0], [0], [1], [0, 0, 1, 1], [], []>} : vector<256x4xbf16>, vector<4x8xbf16>, vector<256x8xf32> -> vector<256x8xf32>
    %62 = arith.addf %56, %61 : vector<256x8xf32>
    %63 = arith.truncf %62 : vector<256x8xf32> to vector<256x8xbf16>
    %64 = vector.shape_cast %63 : vector<256x8xbf16> to vector<16x16x8xbf16>
    %c0_73 = arith.constant 0 : index
    %c0_74 = arith.constant 0 : index
    %c0_75 = arith.constant 0 : index
    %c0_76 = arith.constant 0 : index
    %65 = vector.load %arg5[%c0_73, %c0_74, %c0_75, %c0_76] : memref<1x16x16x8xbf16, #tpu.memory_space<vmem>>, vector<1x16x16x8xbf16>
    %66 = vector.shape_cast %65 : vector<1x16x16x8xbf16> to vector<16x16x8xbf16>
    %67 = vector.shape_cast %64 : vector<16x16x8xbf16> to vector<1x16x16x8xbf16>
    tpu.vector_store %arg5[%c0_73, %c0_74, %c0_75, %c0_76], %67 {strides = array<i32>} : memref<1x16x16x8xbf16, #tpu.memory_space<vmem>>, vector<1x16x16x8xbf16>,
    %68 = arith.extf %63 : vector<256x8xbf16> to vector<256x8xf32>
    %cst_77 = arith.constant dense<0.000000e+00> : vector<8xf32>
    %69 = vector.multi_reduction <add>, %68, %cst_77 [0] : vector<256x8xf32> to vector<8xf32>
    %70 = vector.shape_cast %69 : vector<8xf32> to vector<1x8xf32>
    %c0_78 = arith.constant 0 : index
    %c0_79 = arith.constant 0 : index
    %c0_80 = arith.constant 0 : index
    %71 = vector.load %arg6[%c0_78, %c0_79, %c0_80] : memref<1x1x8xf32, #tpu.memory_space<vmem>>, vector<1x1x8xf32>
    %72 = vector.shape_cast %71 : vector<1x1x8xf32> to vector<1x8xf32>
    %73 = vector.shape_cast %70 : vector<1x8xf32> to vector<1x1x8xf32>
    tpu.vector_store %arg6[%c0_78, %c0_79, %c0_80], %73 {strides = array<i32>} : memref<1x1x8xf32, #tpu.memory_space<vmem>>, vector<1x1x8xf32>,
    %74 = arith.mulf %68, %68 : vector<256x8xf32>
    %cst_81 = arith.constant dense<0.000000e+00> : vector<8xf32>
    %75 = vector.multi_reduction <add>, %74, %cst_81 [0] : vector<256x8xf32> to vector<8xf32>
    %76 = vector.shape_cast %75 : vector<8xf32> to vector<1x8xf32>
    %c0_82 = arith.constant 0 : index
    %c0_83 = arith.constant 0 : index
    %c0_84 = arith.constant 0 : index
    %77 = vector.load %arg7[%c0_82, %c0_83, %c0_84] : memref<1x1x8xf32, #tpu.memory_space<vmem>>, vector<1x1x8xf32>
    %78 = vector.shape_cast %77 : vector<1x1x8xf32> to vector<1x8xf32>
    %79 = vector.shape_cast %76 : vector<1x8xf32> to vector<1x1x8xf32>
    tpu.vector_store %arg7[%c0_82, %c0_83, %c0_84], %79 {strides = array<i32>} : memref<1x1x8xf32, #tpu.memory_space<vmem>>, vector<1x1x8xf32>,
    return
  }
  func.func @transform_0(%arg0: i32) -> (i32, i32, i32, i32) {
    %c0_i32 = arith.constant 0 : i32
    %c0_i32_0 = arith.constant 0 : i32
    %c0_i32_1 = arith.constant 0 : i32
    %c0_i32_2 = arith.constant 0 : i32
    return %arg0, %c0_i32, %c0_i32_0, %c0_i32_1 : i32, i32, i32, i32
  }
  func.func @transform_1(%arg0: i32) -> (i32, i32, i32) {
    %c0_i32 = arith.constant 0 : i32
    %c0_i32_0 = arith.constant 0 : i32
    %c0_i32_1 = arith.constant 0 : i32
    %c0_i32_2 = arith.constant 0 : i32
    return %c0_i32, %c0_i32_0, %c0_i32_1 : i32, i32, i32
  }
  func.func @transform_2(%arg0: i32) -> (i32, i32) {
    %c0_i32 = arith.constant 0 : i32
    %c0_i32_0 = arith.constant 0 : i32
    %c0_i32_1 = arith.constant 0 : i32
    return %c0_i32, %c0_i32_0 : i32, i32
  }
  func.func @transform_3(%arg0: i32) -> (i32, i32) {
    %c0_i32 = arith.constant 0 : i32
    %c0_i32_0 = arith.constant 0 : i32
    %c0_i32_1 = arith.constant 0 : i32
    return %c0_i32, %c0_i32_0 : i32, i32
  }
  func.func @transform_4(%arg0: i32) -> (i32, i32, i32, i32) {
    %c0_i32 = arith.constant 0 : i32
    %c0_i32_0 = arith.constant 0 : i32
    %c0_i32_1 = arith.constant 0 : i32
    %c0_i32_2 = arith.constant 0 : i32
    return %arg0, %c0_i32, %c0_i32_0, %c0_i32_1 : i32, i32, i32, i32
  }
  func.func @transform_5(%arg0: i32) -> (i32, i32, i32) {
    %c0_i32 = arith.constant 0 : i32
    %c0_i32_0 = arith.constant 0 : i32
    %c0_i32_1 = arith.constant 0 : i32
    return %arg0, %c0_i32, %c0_i32_0 : i32, i32, i32
  }
  func.func @transform_6(%arg0: i32) -> (i32, i32, i32) {
    %c0_i32 = arith.constant 0 : i32
    %c0_i32_0 = arith.constant 0 : i32
    %c0_i32_1 = arith.constant 0 : i32
    return %arg0, %c0_i32, %c0_i32_0 : i32, i32, i32
  }
}

module attributes {stable_mosaic.version = 11 : i64} {
  func.func @_bn_relu_kernel(%arg0: i32, %arg1: i32, %arg2: memref<1x16x16x8xbf16, #tpu.memory_space<vmem>>, %arg3: memref<1x8xf32, #tpu.memory_space<vmem>>, %arg4: memref<1x8xf32, #tpu.memory_space<vmem>>, %arg5: memref<1x16x16x8xbf16, #tpu.memory_space<vmem>>) attributes {dimension_semantics = [#tpu.dimension_semantics<parallel>, #tpu.dimension_semantics<parallel>], iteration_bounds = array<i64: 2, 1>, scalar_prefetch = 0 : i64, scratch_operands = 0 : i64, tpu.core_type = #tpu.core_type<tc>, window_params = [{transform_indices = @transform_0, window_bounds = array<i64: 1, 16, 16, 8>}, {pipeline_mode = #tpu.pipeline_mode<synchronous>, transform_indices = @transform_1, window_bounds = array<i64: 1, 8>}, {pipeline_mode = #tpu.pipeline_mode<synchronous>, transform_indices = @transform_2, window_bounds = array<i64: 1, 8>}, {transform_indices = @transform_3, window_bounds = array<i64: 1, 16, 16, 8>}]} {
    %c0 = arith.constant 0 : index
    %c0_0 = arith.constant 0 : index
    %c0_1 = arith.constant 0 : index
    %c0_2 = arith.constant 0 : index
    %0 = vector.load %arg2[%c0, %c0_0, %c0_1, %c0_2] : memref<1x16x16x8xbf16, #tpu.memory_space<vmem>>, vector<1x16x16x8xbf16>
    %1 = arith.extf %0 : vector<1x16x16x8xbf16> to vector<1x16x16x8xf32>
    %c0_3 = arith.constant 0 : index
    %c0_4 = arith.constant 0 : index
    %2 = vector.load %arg3[%c0_3, %c0_4] : memref<1x8xf32, #tpu.memory_space<vmem>>, vector<1x8xf32>
    %3 = vector.shape_cast %2 : vector<1x8xf32> to vector<8xf32>
    %4 = vector.shape_cast %3 : vector<8xf32> to vector<1x1x1x8xf32>
    %5 = vector.broadcast %4 : vector<1x1x1x8xf32> to vector<1x16x16x8xf32>
    %6 = arith.mulf %1, %5 : vector<1x16x16x8xf32>
    %c0_5 = arith.constant 0 : index
    %c0_6 = arith.constant 0 : index
    %7 = vector.load %arg4[%c0_5, %c0_6] : memref<1x8xf32, #tpu.memory_space<vmem>>, vector<1x8xf32>
    %8 = vector.shape_cast %7 : vector<1x8xf32> to vector<8xf32>
    %9 = vector.shape_cast %8 : vector<8xf32> to vector<1x1x1x8xf32>
    %10 = vector.broadcast %9 : vector<1x1x1x8xf32> to vector<1x16x16x8xf32>
    %11 = arith.addf %6, %10 : vector<1x16x16x8xf32>
    %cst = arith.constant 0.000000e+00 : f32
    %12 = vector.broadcast %cst : f32 to vector<1x16x16x8xf32>
    %13 = arith.maximumf %11, %12 : vector<1x16x16x8xf32>
    %14 = arith.truncf %13 : vector<1x16x16x8xf32> to vector<1x16x16x8xbf16>
    %c0_7 = arith.constant 0 : index
    %c0_8 = arith.constant 0 : index
    %c0_9 = arith.constant 0 : index
    %c0_10 = arith.constant 0 : index
    %15 = vector.load %arg5[%c0_7, %c0_8, %c0_9, %c0_10] : memref<1x16x16x8xbf16, #tpu.memory_space<vmem>>, vector<1x16x16x8xbf16>
    tpu.vector_store %arg5[%c0_7, %c0_8, %c0_9, %c0_10], %14 {strides = array<i32>} : memref<1x16x16x8xbf16, #tpu.memory_space<vmem>>, vector<1x16x16x8xbf16>,
    return
  }
  func.func @transform_0(%arg0: i32, %arg1: i32) -> (i32, i32, i32, i32) {
    %c0_i32 = arith.constant 0 : i32
    %c0_i32_0 = arith.constant 0 : i32
    %c0_i32_1 = arith.constant 0 : i32
    return %arg0, %arg1, %c0_i32, %c0_i32_0 : i32, i32, i32, i32
  }
  func.func @transform_1(%arg0: i32, %arg1: i32) -> (i32, i32) {
    %c0_i32 = arith.constant 0 : i32
    %c0_i32_0 = arith.constant 0 : i32
    %c0_i32_1 = arith.constant 0 : i32
    return %c0_i32, %c0_i32_0 : i32, i32
  }
  func.func @transform_2(%arg0: i32, %arg1: i32) -> (i32, i32) {
    %c0_i32 = arith.constant 0 : i32
    %c0_i32_0 = arith.constant 0 : i32
    %c0_i32_1 = arith.constant 0 : i32
    return %c0_i32, %c0_i32_0 : i32, i32
  }
  func.func @transform_3(%arg0: i32, %arg1: i32) -> (i32, i32, i32, i32) {
    %c0_i32 = arith.constant 0 : i32
    %c0_i32_0 = arith.constant 0 : i32
    %c0_i32_1 = arith.constant 0 : i32
    return %arg0, %arg1, %c0_i32, %c0_i32_0 : i32, i32, i32, i32
  }
}

module attributes {stable_mosaic.version = 11 : i64} {
  func.func @_conv_bn_kernel(%arg0: i32, %arg1: memref<1x16x16x8xbf16, #tpu.memory_space<vmem>>, %arg2: memref<9x8x8xbf16, #tpu.memory_space<vmem>>, %arg3: memref<1x8xf32, #tpu.memory_space<vmem>>, %arg4: memref<1x8xf32, #tpu.memory_space<vmem>>, %arg5: memref<1x16x16x8xbf16, #tpu.memory_space<vmem>>, %arg6: memref<1x1x8xf32, #tpu.memory_space<vmem>>, %arg7: memref<1x1x8xf32, #tpu.memory_space<vmem>>, %arg8: memref<18x18x8xbf16, #tpu.memory_space<vmem>>) attributes {dimension_semantics = [#tpu.dimension_semantics<parallel>], iteration_bounds = array<i64: 2>, scalar_prefetch = 0 : i64, scratch_operands = 1 : i64, tpu.core_type = #tpu.core_type<tc>, window_params = [{transform_indices = @transform_0, window_bounds = array<i64: 1, 16, 16, 8>}, {pipeline_mode = #tpu.pipeline_mode<synchronous>, transform_indices = @transform_1, window_bounds = array<i64: 9, 8, 8>}, {pipeline_mode = #tpu.pipeline_mode<synchronous>, transform_indices = @transform_2, window_bounds = array<i64: 1, 8>}, {pipeline_mode = #tpu.pipeline_mode<synchronous>, transform_indices = @transform_3, window_bounds = array<i64: 1, 8>}, {transform_indices = @transform_4, window_bounds = array<i64: 1, 16, 16, 8>}, {transform_indices = @transform_5, window_bounds = array<i64: 1, 1, 8>}, {transform_indices = @transform_6, window_bounds = array<i64: 1, 1, 8>}]} {
    %cst = arith.constant 0.000000e+00 : bf16
    %0 = vector.broadcast %cst : bf16 to vector<1x18x8xbf16>
    %cst_0 = arith.constant 0.000000e+00 : bf16
    %1 = vector.broadcast %cst_0 : bf16 to vector<18x1x8xbf16>
    %c0 = arith.constant 0 : index
    %c0_1 = arith.constant 0 : index
    %c0_2 = arith.constant 0 : index
    %2 = vector.load %arg8[%c0, %c0_1, %c0_2] : memref<18x18x8xbf16, #tpu.memory_space<vmem>>, vector<1x18x8xbf16>
    tpu.vector_store %arg8[%c0, %c0_1, %c0_2], %0 {strides = array<i32>} : memref<18x18x8xbf16, #tpu.memory_space<vmem>>, vector<1x18x8xbf16>,
    %c17 = arith.constant 17 : index
    %c0_3 = arith.constant 0 : index
    %c0_4 = arith.constant 0 : index
    %3 = vector.load %arg8[%c17, %c0_3, %c0_4] : memref<18x18x8xbf16, #tpu.memory_space<vmem>>, vector<1x18x8xbf16>
    tpu.vector_store %arg8[%c17, %c0_3, %c0_4], %0 {strides = array<i32>} : memref<18x18x8xbf16, #tpu.memory_space<vmem>>, vector<1x18x8xbf16>,
    %c0_5 = arith.constant 0 : index
    %c0_6 = arith.constant 0 : index
    %c0_7 = arith.constant 0 : index
    %4 = vector.load %arg8[%c0_5, %c0_6, %c0_7] : memref<18x18x8xbf16, #tpu.memory_space<vmem>>, vector<18x1x8xbf16>
    tpu.vector_store %arg8[%c0_5, %c0_6, %c0_7], %1 {strides = array<i32>} : memref<18x18x8xbf16, #tpu.memory_space<vmem>>, vector<18x1x8xbf16>,
    %c0_8 = arith.constant 0 : index
    %c17_9 = arith.constant 17 : index
    %c0_10 = arith.constant 0 : index
    %5 = vector.load %arg8[%c0_8, %c17_9, %c0_10] : memref<18x18x8xbf16, #tpu.memory_space<vmem>>, vector<18x1x8xbf16>
    tpu.vector_store %arg8[%c0_8, %c17_9, %c0_10], %1 {strides = array<i32>} : memref<18x18x8xbf16, #tpu.memory_space<vmem>>, vector<18x1x8xbf16>,
    %c0_11 = arith.constant 0 : index
    %c0_12 = arith.constant 0 : index
    %c0_13 = arith.constant 0 : index
    %c0_14 = arith.constant 0 : index
    %6 = vector.load %arg1[%c0_11, %c0_12, %c0_13, %c0_14] : memref<1x16x16x8xbf16, #tpu.memory_space<vmem>>, vector<1x16x16x8xbf16>
    %7 = vector.shape_cast %6 : vector<1x16x16x8xbf16> to vector<16x16x8xbf16>
    %8 = arith.extf %7 : vector<16x16x8xbf16> to vector<16x16x8xf32>
    %c0_15 = arith.constant 0 : index
    %c0_16 = arith.constant 0 : index
    %9 = vector.load %arg3[%c0_15, %c0_16] : memref<1x8xf32, #tpu.memory_space<vmem>>, vector<1x8xf32>
    %10 = vector.shape_cast %9 : vector<1x8xf32> to vector<8xf32>
    %11 = vector.shape_cast %10 : vector<8xf32> to vector<1x1x8xf32>
    %12 = vector.broadcast %11 : vector<1x1x8xf32> to vector<16x16x8xf32>
    %13 = arith.mulf %8, %12 : vector<16x16x8xf32>
    %c0_17 = arith.constant 0 : index
    %c0_18 = arith.constant 0 : index
    %14 = vector.load %arg4[%c0_17, %c0_18] : memref<1x8xf32, #tpu.memory_space<vmem>>, vector<1x8xf32>
    %15 = vector.shape_cast %14 : vector<1x8xf32> to vector<8xf32>
    %16 = vector.shape_cast %15 : vector<8xf32> to vector<1x1x8xf32>
    %17 = vector.broadcast %16 : vector<1x1x8xf32> to vector<16x16x8xf32>
    %18 = arith.addf %13, %17 : vector<16x16x8xf32>
    %cst_19 = arith.constant 0.000000e+00 : f32
    %19 = vector.broadcast %cst_19 : f32 to vector<16x16x8xf32>
    %20 = arith.maximumf %18, %19 : vector<16x16x8xf32>
    %21 = arith.truncf %20 : vector<16x16x8xf32> to vector<16x16x8xbf16>
    %c1 = arith.constant 1 : index
    %c1_20 = arith.constant 1 : index
    %c0_21 = arith.constant 0 : index
    %22 = vector.load %arg8[%c1, %c1_20, %c0_21] : memref<18x18x8xbf16, #tpu.memory_space<vmem>>, vector<16x16x8xbf16>
    tpu.vector_store %arg8[%c1, %c1_20, %c0_21], %21 {strides = array<i32>} : memref<18x18x8xbf16, #tpu.memory_space<vmem>>, vector<16x16x8xbf16>,
    %c0_22 = arith.constant 0 : index
    %c0_23 = arith.constant 0 : index
    %c0_24 = arith.constant 0 : index
    %23 = vector.load %arg8[%c0_22, %c0_23, %c0_24] : memref<18x18x8xbf16, #tpu.memory_space<vmem>>, vector<16x16x8xbf16>
    %24 = vector.shape_cast %23 : vector<16x16x8xbf16> to vector<256x8xbf16>
    %c0_25 = arith.constant 0 : index
    %c0_26 = arith.constant 0 : index
    %c0_27 = arith.constant 0 : index
    %25 = vector.load %arg2[%c0_25, %c0_26, %c0_27] : memref<9x8x8xbf16, #tpu.memory_space<vmem>>, vector<1x8x8xbf16>
    %26 = vector.shape_cast %25 : vector<1x8x8xbf16> to vector<8x8xbf16>
    %cst_28 = arith.constant dense<0.000000e+00> : vector<256x8xf32>
    %27 = tpu.matmul %24, %26, %cst_28 {dimension_numbers = #tpu.dot_dimension_numbers<[1], [0], [0], [1], [0, 0, 1, 1], [], []>} : vector<256x8xbf16>, vector<8x8xbf16>, vector<256x8xf32> -> vector<256x8xf32>
    %c0_29 = arith.constant 0 : index
    %c1_30 = arith.constant 1 : index
    %c0_31 = arith.constant 0 : index
    %28 = vector.load %arg8[%c0_29, %c1_30, %c0_31] : memref<18x18x8xbf16, #tpu.memory_space<vmem>>, vector<16x16x8xbf16>
    %29 = vector.shape_cast %28 : vector<16x16x8xbf16> to vector<256x8xbf16>
    %c1_32 = arith.constant 1 : index
    %c0_33 = arith.constant 0 : index
    %c0_34 = arith.constant 0 : index
    %30 = vector.load %arg2[%c1_32, %c0_33, %c0_34] : memref<9x8x8xbf16, #tpu.memory_space<vmem>>, vector<1x8x8xbf16>
    %31 = vector.shape_cast %30 : vector<1x8x8xbf16> to vector<8x8xbf16>
    %cst_35 = arith.constant dense<0.000000e+00> : vector<256x8xf32>
    %32 = tpu.matmul %29, %31, %cst_35 {dimension_numbers = #tpu.dot_dimension_numbers<[1], [0], [0], [1], [0, 0, 1, 1], [], []>} : vector<256x8xbf16>, vector<8x8xbf16>, vector<256x8xf32> -> vector<256x8xf32>
    %33 = arith.addf %27, %32 : vector<256x8xf32>
    %c0_36 = arith.constant 0 : index
    %c2 = arith.constant 2 : index
    %c0_37 = arith.constant 0 : index
    %34 = vector.load %arg8[%c0_36, %c2, %c0_37] : memref<18x18x8xbf16, #tpu.memory_space<vmem>>, vector<16x16x8xbf16>
    %35 = vector.shape_cast %34 : vector<16x16x8xbf16> to vector<256x8xbf16>
    %c2_38 = arith.constant 2 : index
    %c0_39 = arith.constant 0 : index
    %c0_40 = arith.constant 0 : index
    %36 = vector.load %arg2[%c2_38, %c0_39, %c0_40] : memref<9x8x8xbf16, #tpu.memory_space<vmem>>, vector<1x8x8xbf16>
    %37 = vector.shape_cast %36 : vector<1x8x8xbf16> to vector<8x8xbf16>
    %cst_41 = arith.constant dense<0.000000e+00> : vector<256x8xf32>
    %38 = tpu.matmul %35, %37, %cst_41 {dimension_numbers = #tpu.dot_dimension_numbers<[1], [0], [0], [1], [0, 0, 1, 1], [], []>} : vector<256x8xbf16>, vector<8x8xbf16>, vector<256x8xf32> -> vector<256x8xf32>
    %39 = arith.addf %33, %38 : vector<256x8xf32>
    %c1_42 = arith.constant 1 : index
    %c0_43 = arith.constant 0 : index
    %c0_44 = arith.constant 0 : index
    %40 = vector.load %arg8[%c1_42, %c0_43, %c0_44] : memref<18x18x8xbf16, #tpu.memory_space<vmem>>, vector<16x16x8xbf16>
    %41 = vector.shape_cast %40 : vector<16x16x8xbf16> to vector<256x8xbf16>
    %c3 = arith.constant 3 : index
    %c0_45 = arith.constant 0 : index
    %c0_46 = arith.constant 0 : index
    %42 = vector.load %arg2[%c3, %c0_45, %c0_46] : memref<9x8x8xbf16, #tpu.memory_space<vmem>>, vector<1x8x8xbf16>
    %43 = vector.shape_cast %42 : vector<1x8x8xbf16> to vector<8x8xbf16>
    %cst_47 = arith.constant dense<0.000000e+00> : vector<256x8xf32>
    %44 = tpu.matmul %41, %43, %cst_47 {dimension_numbers = #tpu.dot_dimension_numbers<[1], [0], [0], [1], [0, 0, 1, 1], [], []>} : vector<256x8xbf16>, vector<8x8xbf16>, vector<256x8xf32> -> vector<256x8xf32>
    %45 = arith.addf %39, %44 : vector<256x8xf32>
    %c1_48 = arith.constant 1 : index
    %c1_49 = arith.constant 1 : index
    %c0_50 = arith.constant 0 : index
    %46 = vector.load %arg8[%c1_48, %c1_49, %c0_50] : memref<18x18x8xbf16, #tpu.memory_space<vmem>>, vector<16x16x8xbf16>
    %47 = vector.shape_cast %46 : vector<16x16x8xbf16> to vector<256x8xbf16>
    %c4 = arith.constant 4 : index
    %c0_51 = arith.constant 0 : index
    %c0_52 = arith.constant 0 : index
    %48 = vector.load %arg2[%c4, %c0_51, %c0_52] : memref<9x8x8xbf16, #tpu.memory_space<vmem>>, vector<1x8x8xbf16>
    %49 = vector.shape_cast %48 : vector<1x8x8xbf16> to vector<8x8xbf16>
    %cst_53 = arith.constant dense<0.000000e+00> : vector<256x8xf32>
    %50 = tpu.matmul %47, %49, %cst_53 {dimension_numbers = #tpu.dot_dimension_numbers<[1], [0], [0], [1], [0, 0, 1, 1], [], []>} : vector<256x8xbf16>, vector<8x8xbf16>, vector<256x8xf32> -> vector<256x8xf32>
    %51 = arith.addf %45, %50 : vector<256x8xf32>
    %c1_54 = arith.constant 1 : index
    %c2_55 = arith.constant 2 : index
    %c0_56 = arith.constant 0 : index
    %52 = vector.load %arg8[%c1_54, %c2_55, %c0_56] : memref<18x18x8xbf16, #tpu.memory_space<vmem>>, vector<16x16x8xbf16>
    %53 = vector.shape_cast %52 : vector<16x16x8xbf16> to vector<256x8xbf16>
    %c5 = arith.constant 5 : index
    %c0_57 = arith.constant 0 : index
    %c0_58 = arith.constant 0 : index
    %54 = vector.load %arg2[%c5, %c0_57, %c0_58] : memref<9x8x8xbf16, #tpu.memory_space<vmem>>, vector<1x8x8xbf16>
    %55 = vector.shape_cast %54 : vector<1x8x8xbf16> to vector<8x8xbf16>
    %cst_59 = arith.constant dense<0.000000e+00> : vector<256x8xf32>
    %56 = tpu.matmul %53, %55, %cst_59 {dimension_numbers = #tpu.dot_dimension_numbers<[1], [0], [0], [1], [0, 0, 1, 1], [], []>} : vector<256x8xbf16>, vector<8x8xbf16>, vector<256x8xf32> -> vector<256x8xf32>
    %57 = arith.addf %51, %56 : vector<256x8xf32>
    %c2_60 = arith.constant 2 : index
    %c0_61 = arith.constant 0 : index
    %c0_62 = arith.constant 0 : index
    %58 = vector.load %arg8[%c2_60, %c0_61, %c0_62] : memref<18x18x8xbf16, #tpu.memory_space<vmem>>, vector<16x16x8xbf16>
    %59 = vector.shape_cast %58 : vector<16x16x8xbf16> to vector<256x8xbf16>
    %c6 = arith.constant 6 : index
    %c0_63 = arith.constant 0 : index
    %c0_64 = arith.constant 0 : index
    %60 = vector.load %arg2[%c6, %c0_63, %c0_64] : memref<9x8x8xbf16, #tpu.memory_space<vmem>>, vector<1x8x8xbf16>
    %61 = vector.shape_cast %60 : vector<1x8x8xbf16> to vector<8x8xbf16>
    %cst_65 = arith.constant dense<0.000000e+00> : vector<256x8xf32>
    %62 = tpu.matmul %59, %61, %cst_65 {dimension_numbers = #tpu.dot_dimension_numbers<[1], [0], [0], [1], [0, 0, 1, 1], [], []>} : vector<256x8xbf16>, vector<8x8xbf16>, vector<256x8xf32> -> vector<256x8xf32>
    %63 = arith.addf %57, %62 : vector<256x8xf32>
    %c2_66 = arith.constant 2 : index
    %c1_67 = arith.constant 1 : index
    %c0_68 = arith.constant 0 : index
    %64 = vector.load %arg8[%c2_66, %c1_67, %c0_68] : memref<18x18x8xbf16, #tpu.memory_space<vmem>>, vector<16x16x8xbf16>
    %65 = vector.shape_cast %64 : vector<16x16x8xbf16> to vector<256x8xbf16>
    %c7 = arith.constant 7 : index
    %c0_69 = arith.constant 0 : index
    %c0_70 = arith.constant 0 : index
    %66 = vector.load %arg2[%c7, %c0_69, %c0_70] : memref<9x8x8xbf16, #tpu.memory_space<vmem>>, vector<1x8x8xbf16>
    %67 = vector.shape_cast %66 : vector<1x8x8xbf16> to vector<8x8xbf16>
    %cst_71 = arith.constant dense<0.000000e+00> : vector<256x8xf32>
    %68 = tpu.matmul %65, %67, %cst_71 {dimension_numbers = #tpu.dot_dimension_numbers<[1], [0], [0], [1], [0, 0, 1, 1], [], []>} : vector<256x8xbf16>, vector<8x8xbf16>, vector<256x8xf32> -> vector<256x8xf32>
    %69 = arith.addf %63, %68 : vector<256x8xf32>
    %c2_72 = arith.constant 2 : index
    %c2_73 = arith.constant 2 : index
    %c0_74 = arith.constant 0 : index
    %70 = vector.load %arg8[%c2_72, %c2_73, %c0_74] : memref<18x18x8xbf16, #tpu.memory_space<vmem>>, vector<16x16x8xbf16>
    %71 = vector.shape_cast %70 : vector<16x16x8xbf16> to vector<256x8xbf16>
    %c8 = arith.constant 8 : index
    %c0_75 = arith.constant 0 : index
    %c0_76 = arith.constant 0 : index
    %72 = vector.load %arg2[%c8, %c0_75, %c0_76] : memref<9x8x8xbf16, #tpu.memory_space<vmem>>, vector<1x8x8xbf16>
    %73 = vector.shape_cast %72 : vector<1x8x8xbf16> to vector<8x8xbf16>
    %cst_77 = arith.constant dense<0.000000e+00> : vector<256x8xf32>
    %74 = tpu.matmul %71, %73, %cst_77 {dimension_numbers = #tpu.dot_dimension_numbers<[1], [0], [0], [1], [0, 0, 1, 1], [], []>} : vector<256x8xbf16>, vector<8x8xbf16>, vector<256x8xf32> -> vector<256x8xf32>
    %75 = arith.addf %69, %74 : vector<256x8xf32>
    %76 = arith.truncf %75 : vector<256x8xf32> to vector<256x8xbf16>
    %77 = vector.shape_cast %76 : vector<256x8xbf16> to vector<16x16x8xbf16>
    %c0_78 = arith.constant 0 : index
    %c0_79 = arith.constant 0 : index
    %c0_80 = arith.constant 0 : index
    %c0_81 = arith.constant 0 : index
    %78 = vector.load %arg5[%c0_78, %c0_79, %c0_80, %c0_81] : memref<1x16x16x8xbf16, #tpu.memory_space<vmem>>, vector<1x16x16x8xbf16>
    %79 = vector.shape_cast %78 : vector<1x16x16x8xbf16> to vector<16x16x8xbf16>
    %80 = vector.shape_cast %77 : vector<16x16x8xbf16> to vector<1x16x16x8xbf16>
    tpu.vector_store %arg5[%c0_78, %c0_79, %c0_80, %c0_81], %80 {strides = array<i32>} : memref<1x16x16x8xbf16, #tpu.memory_space<vmem>>, vector<1x16x16x8xbf16>,
    %81 = arith.extf %76 : vector<256x8xbf16> to vector<256x8xf32>
    %cst_82 = arith.constant dense<0.000000e+00> : vector<8xf32>
    %82 = vector.multi_reduction <add>, %81, %cst_82 [0] : vector<256x8xf32> to vector<8xf32>
    %83 = vector.shape_cast %82 : vector<8xf32> to vector<1x8xf32>
    %c0_83 = arith.constant 0 : index
    %c0_84 = arith.constant 0 : index
    %c0_85 = arith.constant 0 : index
    %84 = vector.load %arg6[%c0_83, %c0_84, %c0_85] : memref<1x1x8xf32, #tpu.memory_space<vmem>>, vector<1x1x8xf32>
    %85 = vector.shape_cast %84 : vector<1x1x8xf32> to vector<1x8xf32>
    %86 = vector.shape_cast %83 : vector<1x8xf32> to vector<1x1x8xf32>
    tpu.vector_store %arg6[%c0_83, %c0_84, %c0_85], %86 {strides = array<i32>} : memref<1x1x8xf32, #tpu.memory_space<vmem>>, vector<1x1x8xf32>,
    %87 = arith.mulf %81, %81 : vector<256x8xf32>
    %cst_86 = arith.constant dense<0.000000e+00> : vector<8xf32>
    %88 = vector.multi_reduction <add>, %87, %cst_86 [0] : vector<256x8xf32> to vector<8xf32>
    %89 = vector.shape_cast %88 : vector<8xf32> to vector<1x8xf32>
    %c0_87 = arith.constant 0 : index
    %c0_88 = arith.constant 0 : index
    %c0_89 = arith.constant 0 : index
    %90 = vector.load %arg7[%c0_87, %c0_88, %c0_89] : memref<1x1x8xf32, #tpu.memory_space<vmem>>, vector<1x1x8xf32>
    %91 = vector.shape_cast %90 : vector<1x1x8xf32> to vector<1x8xf32>
    %92 = vector.shape_cast %89 : vector<1x8xf32> to vector<1x1x8xf32>
    tpu.vector_store %arg7[%c0_87, %c0_88, %c0_89], %92 {strides = array<i32>} : memref<1x1x8xf32, #tpu.memory_space<vmem>>, vector<1x1x8xf32>,
    return
  }
  func.func @transform_0(%arg0: i32) -> (i32, i32, i32, i32) {
    %c0_i32 = arith.constant 0 : i32
    %c0_i32_0 = arith.constant 0 : i32
    %c0_i32_1 = arith.constant 0 : i32
    %c0_i32_2 = arith.constant 0 : i32
    return %arg0, %c0_i32, %c0_i32_0, %c0_i32_1 : i32, i32, i32, i32
  }
  func.func @transform_1(%arg0: i32) -> (i32, i32, i32) {
    %c0_i32 = arith.constant 0 : i32
    %c0_i32_0 = arith.constant 0 : i32
    %c0_i32_1 = arith.constant 0 : i32
    %c0_i32_2 = arith.constant 0 : i32
    return %c0_i32, %c0_i32_0, %c0_i32_1 : i32, i32, i32
  }
  func.func @transform_2(%arg0: i32) -> (i32, i32) {
    %c0_i32 = arith.constant 0 : i32
    %c0_i32_0 = arith.constant 0 : i32
    %c0_i32_1 = arith.constant 0 : i32
    return %c0_i32, %c0_i32_0 : i32, i32
  }
  func.func @transform_3(%arg0: i32) -> (i32, i32) {
    %c0_i32 = arith.constant 0 : i32
    %c0_i32_0 = arith.constant 0 : i32
    %c0_i32_1 = arith.constant 0 : i32
    return %c0_i32, %c0_i32_0 : i32, i32
  }
  func.func @transform_4(%arg0: i32) -> (i32, i32, i32, i32) {
    %c0_i32 = arith.constant 0 : i32
    %c0_i32_0 = arith.constant 0 : i32
    %c0_i32_1 = arith.constant 0 : i32
    %c0_i32_2 = arith.constant 0 : i32
    return %arg0, %c0_i32, %c0_i32_0, %c0_i32_1 : i32, i32, i32, i32
  }
  func.func @transform_5(%arg0: i32) -> (i32, i32, i32) {
    %c0_i32 = arith.constant 0 : i32
    %c0_i32_0 = arith.constant 0 : i32
    %c0_i32_1 = arith.constant 0 : i32
    return %arg0, %c0_i32, %c0_i32_0 : i32, i32, i32
  }
  func.func @transform_6(%arg0: i32) -> (i32, i32, i32) {
    %c0_i32 = arith.constant 0 : i32
    %c0_i32_0 = arith.constant 0 : i32
    %c0_i32_1 = arith.constant 0 : i32
    return %arg0, %c0_i32, %c0_i32_0 : i32, i32, i32
  }
}

</mosaic_0001>

<bundles_post_ra>
// kernel: double_conv.5
= control target key start
LH: loop header
LB: loop body
LE: loop exit
PB: predicated region body
PF: predicated region fallthrough
CT: control target
= control target key end

     0   :  { %s872_s12 = smov 0   ;;  %s874_s13 = smov 0   ;;  %s1070_s0 = inlined_call_operand.vmem [shape: bf16[2,16,16,8], index: 0, kind: input, shape index: {}]   ;;  %s1071_s1 = inlined_call_operand.vmem [shape: f32[1,8], index: 1, kind: input, shape index: {}]   ;;  %s1072_s2 = inlined_call_operand.vmem [shape: f32[1,8], index: 2, kind: input, shape index: {}]   ;;  %s1073_s3 = inlined_call_operand.vmem [shape: bf16[2,16,16,8], index: 3, kind: output, shape index: {}]  }
   0x1   :  { %s876_s14 = smov 0  }
   0x2 LB: > { %s25_s15 = sadd.s32 1, %s846_s13  ;;  %p650_p0 = scmp.ge.s32.totalorder %s850_s14, 1  ;;  %s850_s14 = sphi %s876_s14, %s13_s14   ;;  %s846_s13 = sphi %s874_s13, %s1075_s13   ;;  %s842_s12 = sphi %s872_s12, %s1074_s12  }
   0x3   : > { %p27_p1 = scmp.ge.s32.totalorder %s25_s15, 2  ;;  %p159_p2 = scmp.lt.s32.totalorder %s850_s14, 3 }
   0x5   : > { %s1077_s15 = smov (%p27_p1, %s25_s15), 0  ;;  %p160_p3 = pnand %p650_p0, %p159_p2 }
   0x6   : > { %p194_p4 = scmp.lt.s32.totalorder (!%p160_p3), %s842_s12, 1  ;;  %v903_v0 = vld [vmem:[%s1071_s1] ss:$0 sm:$0xff] (!%p160_p3)  ;;  %vm517_vm0 = vcmask (!%p160_p3), 60416  }
   0x7   : > { %163 = sbr.rel (%p160_p3) target bundleno = 62 (0x3e), region = 32  ;;  %v912_v9 = vld [vmem:[%s1072_s2] ss:$0 sm:$0xff] (!%p160_p3) }
   0xe   : > { %s1079_s12 = smov (!%p194_p4, %s842_s12), 1 }
   0xf   : > { %s691_s16 = sshll.u32 %s1079_s12, 7 }
  0x10   : > { %s898_s19 = scalar_lea.vmem %s1070_s0, %s691_s16  ;;  %s935_s26 = scalar_lea.vmem %s1073_s3, %s691_s16 }
  0x11   : > { %v726_v1 = vld [vmem:[%s898_s19] sm:$0xff]   ;;  %v789_v2 = vld [vmem:[%s898_s19 + $0x8] sm:$0xff]   ;;  %v790_v3 = vld [vmem:[%s898_s19 + $0x10] sm:$0xff]  }
  0x12   : > { %v727_v4 = vunpack.c.l.bf16 %v726_v1  ;;  %v728_v5 = vunpack.c.h.bf16 %v726_v1  ;;  %v731_v6 = vunpack.c.l.bf16 %v789_v2  ;;  %v732_v7 = vunpack.c.h.bf16 %v789_v2  ;;  %v791_v8 = vld [vmem:[%s898_s19 + $0x18] sm:$0xff]   ;;  %v792_v38 = vld [vmem:[%s898_s19 + $0x20] sm:$0xff]   ;;  %v793_v39 = vld [vmem:[%s898_s19 + $0x28] sm:$0xff]  }
  0x13   : > { %v735_v10 = vunpack.c.l.bf16 %v790_v3  ;;  %v736_v11 = vunpack.c.h.bf16 %v790_v3  ;;  %v739_v12 = vunpack.c.l.bf16 %v791_v8  ;;  %v740_v13 = vunpack.c.h.bf16 %v791_v8  ;;  %v794_v44 = vld [vmem:[%s898_s19 + $0x30] sm:$0xff]   ;;  %v795_v45 = vld [vmem:[%s898_s19 + $0x38] sm:$0xff]  }
  0x14   : > { %v286_v14 = vmul.f32 %v727_v4, %v903_v0  ;;  %v287_v15 = vmul.f32 %v728_v5, %v903_v0  ;;  %v288_v16 = vmul.f32 %v731_v6, %v903_v0  ;;  %v289_v17 = vmul.f32 %v732_v7, %v903_v0 }
  0x15   : > { %v290_v18 = vmul.f32 %v735_v10, %v903_v0  ;;  %v291_v19 = vmul.f32 %v736_v11, %v903_v0  ;;  %v292_v20 = vmul.f32 %v739_v12, %v903_v0  ;;  %v293_v21 = vmul.f32 %v740_v13, %v903_v0 }
  0x16   : > { %v325_v22 = vadd.f32 %v912_v9, %v286_v14  ;;  %v326_v23 = vadd.f32 %v912_v9, %v287_v15  ;;  %v327_v24 = vadd.f32 %v912_v9, %v288_v16  ;;  %v328_v25 = vadd.f32 %v912_v9, %v289_v17 }
  0x17   : > { %v329_v26 = vadd.f32 %v912_v9, %v290_v18  ;;  %v330_v27 = vadd.f32 %v912_v9, %v291_v19  ;;  %v331_v28 = vadd.f32 %v912_v9, %v292_v20  ;;  %v332_v29 = vadd.f32 %v912_v9, %v293_v21  ;;  %v796_v20 = vld [vmem:[%s898_s19 + $0x40] sm:$0xff]   ;;  %v797_v21 = vld [vmem:[%s898_s19 + $0x48] sm:$0xff]  }
  0x18   : > { %v357_v30 = vmax.f32 %v325_v22, 0.0  ;;  %v358_v31 = vmax.f32 %v326_v23, 0.0  ;;  %v359_v32 = vmax.f32 %v327_v24, 0.0  ;;  %v360_v33 = vmax.f32 %v328_v25, 0.0 }
  0x19   : > { %v361_v34 = vmax.f32 %v329_v26, 0.0  ;;  %v362_v35 = vmax.f32 %v330_v27, 0.0  ;;  %v363_v36 = vmax.f32 %v331_v28, 0.0  ;;  %v364_v37 = vmax.f32 %v332_v29, 0.0  ;;  %v798_v26 = vld [vmem:[%s898_s19 + $0x50] sm:$0xff]   ;;  %v799_v27 = vld [vmem:[%s898_s19 + $0x58] sm:$0xff]  }
  0x1a   : > { %v693_v40 = vpack.c.bf16 %v357_v30, %v357_v30  ;;  %v694_v41 = vpack.c.bf16 %v358_v31, %v358_v31  ;;  %v695_v42 = vpack.c.bf16 %v359_v32, %v359_v32  ;;  %v696_v43 = vpack.c.bf16 %v360_v33, %v360_v33 }
  0x1b   : > { %v697_v46 = vpack.c.bf16 %v361_v34, %v361_v34  ;;  %v698_v47 = vpack.c.bf16 %v362_v35, %v362_v35  ;;  %v699_v48 = vpack.c.bf16 %v363_v36, %v363_v36  ;;  %v700_v49 = vpack.c.bf16 %v364_v37, %v364_v37 }
  0x1c   : > { %518 = vst.msk [vmem:[%s935_s26] sm:$0xf] %vm517_vm0, %v693_v40  ;;  %519 = vst.msk [vmem:[%s935_s26 + $0x4] sm:$0xf] %vm517_vm0, %v694_v41  ;;  %v743_v50 = vunpack.c.l.bf16 %v792_v38  ;;  %v744_v51 = vunpack.c.h.bf16 %v792_v38  ;;  %v747_v52 = vunpack.c.l.bf16 %v793_v39  ;;  %v748_v53 = vunpack.c.h.bf16 %v793_v39 }
  0x1d   : > { %520 = vst.msk [vmem:[%s935_s26 + $0x8] sm:$0xf] %vm517_vm0, %v695_v42  ;;  %521 = vst.msk [vmem:[%s935_s26 + $0xc] sm:$0xf] %vm517_vm0, %v696_v43  ;;  %v751_v54 = vunpack.c.l.bf16 %v794_v44  ;;  %v752_v55 = vunpack.c.h.bf16 %v794_v44  ;;  %v755_v56 = vunpack.c.l.bf16 %v795_v45  ;;  %v756_v57 = vunpack.c.h.bf16 %v795_v45 }
  0x1e   : > { %522 = vst.msk [vmem:[%s935_s26 + $0x10] sm:$0xf] %vm517_vm0, %v697_v46  ;;  %523 = vst.msk [vmem:[%s935_s26 + $0x14] sm:$0xf] %vm517_vm0, %v698_v47  ;;  %v294_v58 = vmul.f32 %v743_v50, %v903_v0  ;;  %v295_v59 = vmul.f32 %v744_v51, %v903_v0  ;;  %v296_v60 = vmul.f32 %v747_v52, %v903_v0  ;;  %v759_v32 = vunpack.c.l.bf16 %v796_v20 }
  0x1f   : > { %524 = vst.msk [vmem:[%s935_s26 + $0x18] sm:$0xf] %vm517_vm0, %v699_v48  ;;  %525 = vst.msk [vmem:[%s935_s26 + $0x1c] sm:$0xf] %vm517_vm0, %v700_v49  ;;  %v297_v61 = vmul.f32 %v748_v53, %v903_v0  ;;  %v298_v62 = vmul.f32 %v751_v54, %v903_v0  ;;  %v299_v63 = vmul.f32 %v752_v55, %v903_v0  ;;  %v760_v33 = vunpack.c.h.bf16 %v796_v20 }
  0x20   : > { %v300_v1 = vmul.f32 %v755_v56, %v903_v0  ;;  %v301_v2 = vmul.f32 %v756_v57, %v903_v0  ;;  %v333_v3 = vadd.f32 %v912_v9, %v294_v58  ;;  %v334_v4 = vadd.f32 %v912_v9, %v295_v59 }
  0x21   : > { %v335_v5 = vadd.f32 %v912_v9, %v296_v60  ;;  %v336_v6 = vadd.f32 %v912_v9, %v297_v61  ;;  %v337_v7 = vadd.f32 %v912_v9, %v298_v62  ;;  %v338_v8 = vadd.f32 %v912_v9, %v299_v63 }
  0x22   : > { %v339_v10 = vadd.f32 %v912_v9, %v300_v1  ;;  %v340_v11 = vadd.f32 %v912_v9, %v301_v2  ;;  %v365_v12 = vmax.f32 %v333_v3, 0.0  ;;  %v366_v13 = vmax.f32 %v334_v4, 0.0  ;;  %v800_v1 = vld [vmem:[%s898_s19 + $0x60] sm:$0xff]   ;;  %v801_v2 = vld [vmem:[%s898_s19 + $0x68] sm:$0xff]  }
  0x23   : > { %v367_v14 = vmax.f32 %v335_v5, 0.0  ;;  %v368_v15 = vmax.f32 %v336_v6, 0.0  ;;  %v369_v16 = vmax.f32 %v337_v7, 0.0  ;;  %v370_v17 = vmax.f32 %v338_v8, 0.0  ;;  %v802_v7 = vld [vmem:[%s898_s19 + $0x70] sm:$0xff]   ;;  %v803_v8 = vld [vmem:[%s898_s19 + $0x78] sm:$0xff]  }
  0x24   : > { %v371_v18 = vmax.f32 %v339_v10, 0.0  ;;  %v372_v19 = vmax.f32 %v340_v11, 0.0  ;;  %v701_v22 = vpack.c.bf16 %v365_v12, %v365_v12  ;;  %v702_v23 = vpack.c.bf16 %v366_v13, %v366_v13 }
  0x25   : > { %v703_v24 = vpack.c.bf16 %v367_v14, %v367_v14  ;;  %v704_v25 = vpack.c.bf16 %v368_v15, %v368_v15  ;;  %v705_v28 = vpack.c.bf16 %v369_v16, %v369_v16  ;;  %v706_v29 = vpack.c.bf16 %v370_v17, %v370_v17 }
  0x26   : > { %v707_v30 = vpack.c.bf16 %v371_v18, %v371_v18  ;;  %v708_v31 = vpack.c.bf16 %v372_v19, %v372_v19  ;;  %526 = vst.msk [vmem:[%s935_s26 + $0x20] sm:$0xf] %vm517_vm0, %v701_v22  ;;  %527 = vst.msk [vmem:[%s935_s26 + $0x24] sm:$0xf] %vm517_vm0, %v702_v23  ;;  %v763_v34 = vunpack.c.l.bf16 %v797_v21  ;;  %v764_v35 = vunpack.c.h.bf16 %v797_v21 }
  0x27   : > { %528 = vst.msk [vmem:[%s935_s26 + $0x28] sm:$0xf] %vm517_vm0, %v703_v24  ;;  %529 = vst.msk [vmem:[%s935_s26 + $0x2c] sm:$0xf] %vm517_vm0, %v704_v25  ;;  %v767_v36 = vunpack.c.l.bf16 %v798_v26  ;;  %v768_v37 = vunpack.c.h.bf16 %v798_v26  ;;  %v771_v38 = vunpack.c.l.bf16 %v799_v27  ;;  %v772_v39 = vunpack.c.h.bf16 %v799_v27 }
  0x28   : > { %530 = vst.msk [vmem:[%s935_s26 + $0x30] sm:$0xf] %vm517_vm0, %v705_v28  ;;  %531 = vst.msk [vmem:[%s935_s26 + $0x34] sm:$0xf] %vm517_vm0, %v706_v29  ;;  %v302_v40 = vmul.f32 %v759_v32, %v903_v0  ;;  %v303_v41 = vmul.f32 %v760_v33, %v903_v0  ;;  %v304_v42 = vmul.f32 %v763_v34, %v903_v0  ;;  %v775_v14 = vunpack.c.l.bf16 %v800_v1 }
  0x29   : > { %532 = vst.msk [vmem:[%s935_s26 + $0x38] sm:$0xf] %vm517_vm0, %v707_v30  ;;  %533 = vst.msk [vmem:[%s935_s26 + $0x3c] sm:$0xf] %vm517_vm0, %v708_v31  ;;  %v305_v43 = vmul.f32 %v764_v35, %v903_v0  ;;  %v306_v44 = vmul.f32 %v767_v36, %v903_v0  ;;  %v307_v45 = vmul.f32 %v768_v37, %v903_v0  ;;  %v776_v15 = vunpack.c.h.bf16 %v800_v1 }
  0x2a   : > { %v308_v46 = vmul.f32 %v771_v38, %v903_v0  ;;  %v309_v47 = vmul.f32 %v772_v39, %v903_v0  ;;  %v341_v48 = vadd.f32 %v912_v9, %v302_v40  ;;  %v342_v49 = vadd.f32 %v912_v9, %v303_v41 }
  0x2b   : > { %v343_v50 = vadd.f32 %v912_v9, %v304_v42  ;;  %v344_v51 = vadd.f32 %v912_v9, %v305_v43  ;;  %v345_v52 = vadd.f32 %v912_v9, %v306_v44  ;;  %v346_v53 = vadd.f32 %v912_v9, %v307_v45 }
  0x2c   : > { %v347_v54 = vadd.f32 %v912_v9, %v308_v46  ;;  %v348_v55 = vadd.f32 %v912_v9, %v309_v47  ;;  %v373_v56 = vmax.f32 %v341_v48, 0.0  ;;  %v374_v57 = vmax.f32 %v342_v49, 0.0 }
  0x2d   : > { %v375_v58 = vmax.f32 %v343_v50, 0.0  ;;  %v376_v59 = vmax.f32 %v344_v51, 0.0  ;;  %v377_v60 = vmax.f32 %v345_v52, 0.0  ;;  %v378_v61 = vmax.f32 %v346_v53, 0.0 }
  0x2e   : > { %v379_v62 = vmax.f32 %v347_v54, 0.0  ;;  %v380_v63 = vmax.f32 %v348_v55, 0.0  ;;  %v709_v3 = vpack.c.bf16 %v373_v56, %v373_v56  ;;  %v710_v4 = vpack.c.bf16 %v374_v57, %v374_v57 }
  0x2f   : > { %v711_v5 = vpack.c.bf16 %v375_v58, %v375_v58  ;;  %v712_v6 = vpack.c.bf16 %v376_v59, %v376_v59  ;;  %v713_v10 = vpack.c.bf16 %v377_v60, %v377_v60  ;;  %v714_v11 = vpack.c.bf16 %v378_v61, %v378_v61 }
  0x30   : > { %v715_v12 = vpack.c.bf16 %v379_v62, %v379_v62  ;;  %v716_v13 = vpack.c.bf16 %v380_v63, %v380_v63  ;;  %534 = vst.msk [vmem:[%s935_s26 + $0x40] sm:$0xf] %vm517_vm0, %v709_v3  ;;  %535 = vst.msk [vmem:[%s935_s26 + $0x44] sm:$0xf] %vm517_vm0, %v710_v4  ;;  %v779_v16 = vunpack.c.l.bf16 %v801_v2  ;;  %v780_v17 = vunpack.c.h.bf16 %v801_v2 }
  0x31   : > { %536 = vst.msk [vmem:[%s935_s26 + $0x48] sm:$0xf] %vm517_vm0, %v711_v5  ;;  %537 = vst.msk [vmem:[%s935_s26 + $0x4c] sm:$0xf] %vm517_vm0, %v712_v6  ;;  %v783_v18 = vunpack.c.l.bf16 %v802_v7  ;;  %v784_v19 = vunpack.c.h.bf16 %v802_v7  ;;  %v787_v20 = vunpack.c.l.bf16 %v803_v8  ;;  %v788_v21 = vunpack.c.h.bf16 %v803_v8 }
  0x32   : > { %538 = vst.msk [vmem:[%s935_s26 + $0x50] sm:$0xf] %vm517_vm0, %v713_v10  ;;  %539 = vst.msk [vmem:[%s935_s26 + $0x54] sm:$0xf] %vm517_vm0, %v714_v11  ;;  %v310_v22 = vmul.f32 %v775_v14, %v903_v0  ;;  %v311_v23 = vmul.f32 %v776_v15, %v903_v0  ;;  %v312_v24 = vmul.f32 %v779_v16, %v903_v0 }
  0x33   : > { %540 = vst.msk [vmem:[%s935_s26 + $0x58] sm:$0xf] %vm517_vm0, %v715_v12  ;;  %541 = vst.msk [vmem:[%s935_s26 + $0x5c] sm:$0xf] %vm517_vm0, %v716_v13  ;;  %v313_v25 = vmul.f32 %v780_v17, %v903_v0  ;;  %v314_v26 = vmul.f32 %v783_v18, %v903_v0  ;;  %v315_v27 = vmul.f32 %v784_v19, %v903_v0 }
  0x34   : > { %v316_v28 = vmul.f32 %v787_v20, %v903_v0  ;;  %v317_v29 = vmul.f32 %v788_v21, %v903_v0  ;;  %v349_v30 = vadd.f32 %v912_v9, %v310_v22  ;;  %v350_v31 = vadd.f32 %v912_v9, %v311_v23 }
  0x35   : > { %v351_v32 = vadd.f32 %v912_v9, %v312_v24  ;;  %v352_v33 = vadd.f32 %v912_v9, %v313_v25  ;;  %v353_v34 = vadd.f32 %v912_v9, %v314_v26  ;;  %v354_v35 = vadd.f32 %v912_v9, %v315_v27 }
  0x36   : > { %v355_v36 = vadd.f32 %v912_v9, %v316_v28  ;;  %v356_v37 = vadd.f32 %v912_v9, %v317_v29  ;;  %v381_v38 = vmax.f32 %v349_v30, 0.0  ;;  %v382_v39 = vmax.f32 %v350_v31, 0.0 }
  0x37   : > { %v383_v0 = vmax.f32 %v351_v32, 0.0  ;;  %v384_v40 = vmax.f32 %v352_v33, 0.0  ;;  %v385_v41 = vmax.f32 %v353_v34, 0.0  ;;  %v386_v42 = vmax.f32 %v354_v35, 0.0 }
  0x38   : > { %v387_v43 = vmax.f32 %v355_v36, 0.0  ;;  %v388_v44 = vmax.f32 %v356_v37, 0.0  ;;  %v717_v45 = vpack.c.bf16 %v381_v38, %v381_v38  ;;  %v718_v46 = vpack.c.bf16 %v382_v39, %v382_v39 }
  0x39   : > { %v719_v47 = vpack.c.bf16 %v383_v0, %v383_v0  ;;  %v720_v9 = vpack.c.bf16 %v384_v40, %v384_v40  ;;  %v721_v48 = vpack.c.bf16 %v385_v41, %v385_v41  ;;  %v722_v49 = vpack.c.bf16 %v386_v42, %v386_v42 }
  0x3a   : > { %v723_v50 = vpack.c.bf16 %v387_v43, %v387_v43  ;;  %v724_v51 = vpack.c.bf16 %v388_v44, %v388_v44  ;;  %542 = vst.msk [vmem:[%s935_s26 + $0x60] sm:$0xf] %vm517_vm0, %v717_v45  ;;  %543 = vst.msk [vmem:[%s935_s26 + $0x64] sm:$0xf] %vm517_vm0, %v718_v46 }
  0x3b   : > { %544 = vst.msk [vmem:[%s935_s26 + $0x68] sm:$0xf] %vm517_vm0, %v719_v47  ;;  %545 = vst.msk [vmem:[%s935_s26 + $0x6c] sm:$0xf] %vm517_vm0, %v720_v9 }
  0x3c   : > { %546 = vst.msk [vmem:[%s935_s26 + $0x70] sm:$0xf] %vm517_vm0, %v721_v48  ;;  %547 = vst.msk [vmem:[%s935_s26 + $0x74] sm:$0xf] %vm517_vm0, %v722_v49 }
  0x3d   : > { %548 = vst.msk [vmem:[%s935_s26 + $0x78] sm:$0xf] %vm517_vm0, %v723_v50  ;;  %549 = vst.msk [vmem:[%s935_s26 + $0x7c] sm:$0xf] %vm517_vm0, %v724_v51 }
  0x3e PF: > { %s13_s14 = sadd.s32 1, %s850_s14   ;;  %s1074_s12 = smov %s846_s13 }
  0x3f   : > { %p10_p5 = scmp.ge.s32.totalorder %s13_s14, 4   ;;  %s1075_s13 = smov %s1077_s15 }
  0x41   :  { %12 = sbr.rel (!%p10_p5) target bundleno = 2 (0x2), region = 62 }

// kernel: double_conv.4
= control target key start
LH: loop header
LB: loop body
LE: loop exit
PB: predicated region body
PF: predicated region fallthrough
CT: control target
= control target key end

     0   :  { %s7567_s21 = smov 0   ;;  %s9660_s0 = inlined_call_operand.vmem [shape: bf16[2,16,16,8], index: 0, kind: input, shape index: {}]   ;;  %s9661_s1 = inlined_call_operand.vmem [shape: bf16[9,8,8], index: 1, kind: input, shape index: {}]   ;;  %s9662_s2 = inlined_call_operand.vmem [shape: f32[1,8], index: 2, kind: input, shape index: {}]   ;;  %s9663_s3 = inlined_call_operand.vmem [shape: f32[1,8], index: 3, kind: input, shape index: {}]   ;;  %s9664_s4 = inlined_call_operand.vmem [shape: bf16[2,16,16,8], index: 4, kind: output, shape index: {0}]   ;;  %s9665_s5 = inlined_call_operand.vmem [shape: f32[2,1,8], index: 5, kind: output, shape index: {1}]   ;;  %s9666_s6 = inlined_call_operand.vmem [shape: f32[2,1,8], index: 6, kind: output, shape index: {2}]  }
   0x1 LB: > { %s6126_s22 = sadd.s32 4294967295, %s7529_s21   ;;  %p6130_p0 = scmp.ge.s32.totalorder %s7529_s21, 1  ;;  %s7529_s21 = sphi %s7567_s21, %s17_s21  }
   0x2   : > { %p217_p1 = scmp.lt.s32.totalorder %s7529_s21, 3 }
   0x4   : > { %p218_p2 = pnand %p6130_p0, %p217_p1 }
   0x6   : > { %221 = sbr.rel (%p218_p2) target bundleno = 725 (0x2d5), region = 36 }
   0xd   : > { %v6169_v0 = vld [vmem:[%s9661_s1 + $0x4] sm:$0xf]  ;;  %vm1634_vm0 = vcmask 1043456   ;;  %v6316_v1 = vld [vmem:[%s9661_s1 + $0x10] sm:$0xf]  ;;  %vm270_vm1 = vcmask 60416  }
   0xe   : > { %7409 = vmatprep.subr.msk.bf16.mxu1 %vm1634_vm0, %v6169_v0  ;;  %7413 = vmatprep.subr.msk.bf16.mxu0 %vm1634_vm0, %v6316_v1  ;;  %v1636_v2 = vsel %vm1634_vm0, %v6169_v0, 0  ;;  %v7585_v3 = vsel %vm1634_vm0, %v6316_v1, 0  ;;  %vm273_vm2 = vcmask 57344   ;;  %p253_p3 = scmp.lt.s32.totalorder %s6126_s22, 1  ;;  %v7531_v4 = vmov 0  }
   0xf   : > { %9681 = vst [vmem:[#allocation3_spill] sm:$0xff] %v7585_v3  ;;  %6846 = vmatpush3.bf16.msra.mxu1 %v1636_v2  ;;  %6982 = vmatpush3.bf16.msra.mxu0 %v7585_v3  ;;  %271 = vst.msk [vmem:[#allocation2] sm:$0xf] %vm270_vm1, %v7531_v4  ;;  %vm280_vm3 = vsmask.f32 256  ;;  %v9684_v7 = vmov 0 }
  0x10   : > { %272 = vst.msk [vmem:[#allocation2 + $0x4] sm:$0xf] %vm270_vm1, %v7531_v4  ;;  %vm336_vm4 = vsmask.f32 7938  ;;  %276 = vst.msk [vmem:[#allocation2 + $0xcc] sm:$0xf] %vm270_vm1, %v7531_v4 }
  0x11   : > { %274 = vst.msk [vmem:[#allocation2 + $0x8] sm:$0x1] %vm273_vm2, %v7531_v4  ;;  %278 = vst.msk [vmem:[#allocation2 + $0xd4] sm:$0x1] %vm273_vm2, %v7531_v4  ;;  %s9753_s22 = smov (!%p253_p3, %s6126_s22), 1  ;;  %vm1585_vm10 = vcmask 64512  }
  0x12   : > { %277 = vst.msk [vmem:[#allocation2 + $0xd0] sm:$0xf] %vm270_vm1, %v7531_v4  ;;  %vm7596_vm5 = vmand %vm273_vm2, %vm280_vm3  ;;  %v285_v6 = vld [vmem:[#allocation2 + $0xc] sm:$0x1]  ;;  %v341_v9 = vld [vmem:[#allocation2 + $0x14] sm:$0x1]  ;;  %s265_s24 = scalar_lea.vmem %s9665_s5, %s9753_s22  ;;  %s268_s28 = scalar_lea.vmem %s9666_s6, %s9753_s22 }
  0x13   : > { %vm7604_vm6 = vmand %vm273_vm2, %vm336_vm4  ;;  %v286_v8 = vsel %vm7596_vm5, 0, %v285_v6  ;;  %s6547_s27 = sshll.u32 %s9753_s22, 7  ;;  %v7623_v11 = vld [vmem:[%s9661_s1] sm:$0xf]  ;;  %v7628_v12 = vld [vmem:[%s9661_s1 + $0x14] sm:$0xf] }
  0x14   : > { %v9685_v7 = vsel %vm7604_vm6, 4294967295, %v9684_v7  ;;  %287 = vst [vmem:[#allocation2 + $0xc] sm:$0x1] %v286_v8  ;;  %v342_v10 = vsel %vm7604_vm6, 0, %v341_v9  ;;  %s7618_s30 = scalar_lea.vmem %s9660_s0, %s6547_s27  ;;  %v7634_v14 = vld [vmem:[%s9662_s2] ss:$0 sm:$0xff]  ;;  %7410 = vmatprep.subr.msk.bf16.mxu1 %vm1634_vm0, %v7623_v11  ;;  %7415 = vmatprep.subr.msk.bf16.mxu0 %vm1634_vm0, %v7628_v12  ;;  %vm7692_vm12 = vmand %vm270_vm1, %vm336_vm4  ;;  %s9509_s20 = scalar_lea.vmem %s9664_s4, %s6547_s27 }
  0x15   : > { %9686 = vst [vmem:[#allocation4_spill] sm:$0xff] %v9685_v7  ;;  %343 = vst [vmem:[#allocation2 + $0x14] sm:$0x1] %v342_v10  ;;  %v6614_v13 = vld [vmem:[%s7618_s30] sm:$0xff]   ;;  %v288_v15 = vld [vmem:[#allocation2 + $0x18] sm:$0x1] }
  0x16   : > { %v6615_v16 = vunpack.c.l.bf16 %v6614_v13  ;;  %v6616_v17 = vunpack.c.h.bf16 %v6614_v13  ;;  %v7643_v18 = vld [vmem:[%s9663_s3] ss:$0 sm:$0xff]  ;;  %v289_v19 = vsel %vm7596_vm5, 0, %v288_v15  ;;  %v6677_v21 = vld [vmem:[%s7618_s30 + $0x8] sm:$0xff]   ;;  %v291_v22 = vld [vmem:[#allocation2 + $0x24] sm:$0x1] }
  0x17   : > { %v344_v20 = vld [vmem:[#allocation2 + $0x20] sm:$0x1]  ;;  %v1100_v25 = vld [vmem:[#allocation2 + $0x4] sm:$0xf]  ;;  %vm1148_vm7 = vsmask.f32 3328  ;;  %v6619_v26 = vunpack.c.l.bf16 %v6677_v21  ;;  %v6620_v27 = vunpack.c.h.bf16 %v6677_v21 }
  0x18   : > { %v282_v23 = vld [vmem:[#allocation2] sm:$0x1]  ;;  %v338_v24 = vld [vmem:[#allocation2 + $0x8] sm:$0x1]  ;;  %vm1149_vm8 = vsmask.f32 7440  ;;  %v463_v33 = vmul.f32 %v6615_v16, %v7634_v14  ;;  %v464_v34 = vmul.f32 %v6616_v17, %v7634_v14 }
  0x19   : > { %290 = vst [vmem:[#allocation2 + $0x18] sm:$0x1] %v289_v19  ;;  %v283_v28 = vsel %vm7596_vm5, 0, %v282_v23  ;;  %v339_v29 = vsel %vm7604_vm6, 0, %v338_v24  ;;  %v1161_v30 = vshll.u32 %v1100_v25, 16  ;;  %v1165_v31 = vshrl.u32 %v1100_v25, 16  ;;  %vm7686_vm11 = vmor %vm1148_vm7, %vm1149_vm8 }
  0x1a   : > { %v347_v32 = vld [vmem:[#allocation2 + $0x2c] sm:$0x1]  ;;  %284 = vst [vmem:[#allocation2] sm:$0x1] %v283_v28  ;;  %340 = vst [vmem:[#allocation2 + $0x8] sm:$0x1] %v339_v29  ;;  %v465_v36 = vmul.f32 %v6619_v26, %v7634_v14  ;;  %v466_v40 = vmul.f32 %v6620_v27, %v7634_v14  ;;  %v502_v43 = vadd.f32 %v7643_v18, %v463_v33 }
  0x1b   : > { %v345_v35 = vsel %vm7604_vm6, 0, %v344_v20  ;;  %v6678_v37 = vld [vmem:[%s7618_s30 + $0x10] sm:$0xff]   ;;  %v7658_v38 = vrot.slane %v1161_v30, 5  ;;  %v1167_v39 = vrot.slane %v1165_v31, 4  ;;  %v292_v41 = vsel %vm7596_vm5, 0, %v291_v22  ;;  %v7675_v59 = vld [vmem:[%s7618_s30 + $0x18] sm:$0xff]  }
  0x1c   : > { %346 = vst [vmem:[#allocation2 + $0x20] sm:$0x1] %v345_v35  ;;  %v294_v42 = vld [vmem:[#allocation2 + $0x30] sm:$0x1]  ;;  %v503_v44 = vadd.f32 %v7643_v18, %v464_v34  ;;  %v504_v45 = vadd.f32 %v7643_v18, %v465_v36  ;;  %293 = vst [vmem:[#allocation2 + $0x24] sm:$0x1] %v292_v41  ;;  %v505_v48 = vadd.f32 %v7643_v18, %v466_v40  ;;  %v6623_v49 = vunpack.c.l.bf16 %v6678_v37 }
  0x1d   : > { %v348_v46 = vsel %vm7604_vm6, 0, %v347_v32  ;;  %v1168_v47 = vor.u32 %v1167_v39, %v7658_v38  ;;  %v6624_v50 = vunpack.c.h.bf16 %v6678_v37  ;;  %v350_v51 = vld [vmem:[#allocation2 + $0x38] sm:$0x1]  ;;  %v534_v52 = vmax.f32 %v502_v43, 0.0  ;;  %v987_v34 = vld [vmem:[#allocation2 + $0xc] sm:$0xf] }
  0x1e   : > { %349 = vst [vmem:[#allocation2 + $0x2c] sm:$0x1] %v348_v46  ;;  %v535_v53 = vmax.f32 %v503_v44, 0.0  ;;  %v536_v54 = vmax.f32 %v504_v45, 0.0  ;;  %v295_v55 = vsel %vm7596_vm5, 0, %v294_v42  ;;  %v537_v56 = vmax.f32 %v505_v48, 0.0 }
  0x1f   : > { %vm662_vm9 = vsmask.f32 4368  ;;  %v467_v57 = vmul.f32 %v6623_v49, %v7634_v14  ;;  %v468_v58 = vmul.f32 %v6624_v50, %v7634_v14  ;;  %296 = vst [vmem:[#allocation2 + $0x30] sm:$0x1] %v295_v55  ;;  %v6549_v60 = vpack.c.bf16 %v534_v52, %v534_v52  ;;  %v991_v35 = vld [vmem:[#allocation2 + $0x14] sm:$0x1] }
  0x20   : > { %v6550_v61 = vpack.c.bf16 %v535_v53, %v535_v53  ;;  %v6551_v62 = vpack.c.bf16 %v536_v54, %v536_v54  ;;  %v351_v63 = vsel %vm7604_vm6, 0, %v350_v51  ;;  %v1169_v2 = vrot.slane %v1168_v47, 4  ;;  %vm7700_vm13 = vmor %vm280_vm3, %vm662_vm9  ;;  %v994_v43 = vld [vmem:[#allocation2 + $0x18] sm:$0xf]  ;;  %v297_v53 = vld [vmem:[#allocation2 + $0x3c] sm:$0x1] }
  0x21   : > { %v1099_v0 = vld [vmem:[#allocation2] sm:$0xf]  ;;  %v1132_v1 = vld [vmem:[#allocation2 + $0x8] sm:$0x1]  ;;  %v6552_v4 = vpack.c.bf16 %v537_v56, %v537_v56  ;;  %v506_v6 = vadd.f32 %v7643_v18, %v467_v57  ;;  %v7681_v8 = vadd.f32 %v7643_v18, %v468_v58  ;;  %352 = vst [vmem:[#allocation2 + $0x38] sm:$0x1] %v351_v63  ;;  %v6627_v15 = vunpack.c.l.bf16 %v7675_v59 }
  0x22   : > { %v1152_v9 = vshrl.u32 %v1099_v0, 16  ;;  %v1155_v10 = vshll.u32 %v1099_v0, 16  ;;  %v1171_v13 = vshll.u32 %v1132_v1, 16  ;;  %v665_v17 = vshrl.u32 %v6549_v60, 16  ;;  %v353_v63 = vld [vmem:[#allocation2 + $0x44] sm:$0x1] }
  0x23   : > { %v668_v19 = vshll.u32 %v6549_v60, 16  ;;  %v673_v20 = vshrl.u32 %v6550_v61, 16  ;;  %v676_v21 = vshll.u32 %v6550_v61, 16  ;;  %v682_v25 = vshrl.u32 %v6551_v62, 16  ;;  %v998_v51 = vld [vmem:[#allocation2 + $0x20] sm:$0x1] }
  0x24   : > { %v1154_v22 = vrot.slane %v1152_v9, 4  ;;  %v1157_v23 = vrot.slane %v1155_v10, 5  ;;  %v1173_v24 = vrot.slane %v1171_v13, 5  ;;  %v667_v27 = vrot.slane %v665_v17, 7  ;;  %v6680_v0 = vld [vmem:[%s7618_s30 + $0x20] sm:$0xff]  }
  0x25   : > { %v675_v28 = vrot.slane %v673_v20, 7  ;;  %v685_v29 = vshll.u32 %v6551_v62, 16  ;;  %v690_v30 = vshrl.u32 %v6552_v4, 16  ;;  %v684_v36 = vrot.slane %v682_v25, 7  ;;  %v300_v10 = vld [vmem:[#allocation2 + $0x48] sm:$0x1] }
  0x26   : > { %v1158_v31 = vor.u32 %v1157_v23, %v1154_v22  ;;  %v1174_v32 = vsel %vm7686_vm11, %v1169_v2, %v1173_v24  ;;  %v693_v37 = vshll.u32 %v6552_v4, 16  ;;  %v670_v39 = vor.u32 %v668_v19, %v667_v27  ;;  %v7737_v20 = vld [vmem:[%s7618_s30 + $0x28] sm:$0xff]  }
  0x27   : > { %v671_v40 = vrot.slane %v667_v27, 4  ;;  %v678_v41 = vor.u32 %v676_v21, %v675_v28  ;;  %v680_v42 = vrot.slane %v675_v28, 4  ;;  %v687_v45 = vor.u32 %v685_v29, %v684_v36  ;;  %v7758_v29 = vld [vmem:[%s7618_s30 + $0x30] sm:$0xff]  }
  0x28   : > { %v1159_v44 = vrot.slane %v1158_v31, 4  ;;  %v688_v46 = vrot.slane %v684_v36, 4  ;;  %v692_v47 = vrot.slane %v690_v30, 7  ;;  %v988_v49 = vsel %vm7692_vm12, %v670_v39, %v987_v34 }
  0x29   : > { %v679_v48 = vsel %vm7700_vm13, %v671_v40, %v678_v41  ;;  %v992_v50 = vsel %vm7596_vm5, %v680_v42, %v991_v35  ;;  %v538_v52 = vmax.f32 %v506_v6, 0.0  ;;  %989 = vst [vmem:[#allocation2 + $0xc] sm:$0xf] %v988_v49  ;;  %v995_v57 = vsel %vm7692_vm12, %v687_v45, %v994_v43 }
  0x2a   : > { %v1164_v54 = vsel %vm7686_vm11, %v1159_v44, %v7658_v38  ;;  %990 = vst.msk [vmem:[#allocation2 + $0x10] sm:$0xf] %vm270_vm1, %v679_v48  ;;  %993 = vst [vmem:[#allocation2 + $0x14] sm:$0x1] %v992_v50  ;;  %v695_v55 = vor.u32 %v693_v37, %v692_v47  ;;  %v697_v56 = vrot.slane %v692_v47, 4  ;;  %v539_v60 = vmax.f32 %v7681_v8, 0.0 }
  0x2b   : > { %v6170_v58 = vcombine.low %v1164_v54, %v1174_v32  ;;  %996 = vst [vmem:[#allocation2 + $0x18] sm:$0xf] %v995_v57  ;;  %v6553_v61 = vpack.c.bf16 %v538_v52, %v538_v52  ;;  %v6628_v62 = vunpack.c.h.bf16 %v7675_v59  ;;  %v469_v2 = vmul.f32 %v6627_v15, %v7634_v14 }
  0x2c   : > { %v696_v38 = vsel %vm7700_vm13, %v688_v46, %v695_v55  ;;  %v999_v1 = vsel %vm7596_vm5, %v697_v56, %v998_v51  ;;  %v298_v4 = vsel %vm7596_vm5, 0, %v297_v53  ;;  %v7728_v59 = vpack.c.bf16 %v539_v60, %v539_v60 }
  0x2d   : > { %6847 = vmatprep.mubr.msk.bf16.mxu1 %vm1585_vm10, %v6170_v58  ;;  %997 = vst.msk [vmem:[#allocation2 + $0x1c] sm:$0xf] %vm270_vm1, %v696_v38  ;;  %1000 = vst [vmem:[#allocation2 + $0x20] sm:$0x1] %v999_v1  ;;  %v699_v6 = vshrl.u32 %v6553_v61, 16  ;;  %v702_v8 = vshll.u32 %v6553_v61, 16  ;;  %v470_v9 = vmul.f32 %v6628_v62, %v7634_v14  ;;  %v7732_v13 = vadd.f32 %v7643_v18, %v469_v2 }
  0x2e   : > { %299 = vst [vmem:[#allocation2 + $0x3c] sm:$0x1] %v298_v4  ;;  %v354_v15 = vsel %vm7604_vm6, 0, %v353_v63  ;;  %v6631_v17 = vunpack.c.l.bf16 %v6680_v0  ;;  %v6632_v19 = vunpack.c.h.bf16 %v6680_v0  ;;  %v7741_v21 = vsel %vm1634_vm0, %v7623_v11, 0 }
  0x2f   : > { %v7745_v22 = vsel %vm1634_vm0, %v7628_v12, 0  ;;  %v7747_v23 = vrot.slane %v699_v6, 7  ;;  %v707_v24 = vshrl.u32 %v7728_v59, 16  ;;  %355 = vst [vmem:[#allocation2 + $0x44] sm:$0x1] %v354_v15  ;;  %v710_v25 = vshll.u32 %v7728_v59, 16 }
  0x30   : > { %v7752_v27 = vadd.f32 %v7643_v18, %v470_v9  ;;  %v540_v28 = vmax.f32 %v7732_v13, 0.0  ;;  %v301_v11 = vsel %vm7596_vm5, 0, %v300_v10  ;;  %v1101_v30 = vld [vmem:[#allocation2 + $0xc] sm:$0xf]  ;;  %v7764_v34 = vmul.f32 %v6631_v17, %v7634_v14 }
  0x31   : > { %v1102_v12 = vld [vmem:[#allocation2 + $0x10] sm:$0xf]  ;;  %v1133_v31 = vld [vmem:[#allocation2 + $0x14] sm:$0x1]  ;;  %v7761_v32 = vor.u32 %v702_v8, %v7747_v23  ;;  %v7767_v35 = vmul.f32 %v6632_v19, %v7634_v14  ;;  %302 = vst [vmem:[#allocation2 + $0x48] sm:$0x1] %v301_v11  ;;  %v6635_v36 = vunpack.c.l.bf16 %v7737_v20  ;;  %v6636_v46 = vunpack.c.h.bf16 %v7737_v20 }
  0x32   : > { %v1176_v37 = vshrl.u32 %v1101_v30, 16  ;;  %v1179_v39 = vshll.u32 %v1101_v30, 16  ;;  %v1185_v40 = vshll.u32 %v1102_v12, 16  ;;  %v1189_v41 = vshrl.u32 %v1102_v12, 16  ;;  %v2906_v42 = vld [vmem:[#allocation2 + $0xc] sm:$0xf] }
  0x33   : > { %v1195_v43 = vshll.u32 %v1133_v31, 16  ;;  %v7770_v44 = vld [vmem:[#allocation2 + $0x10] sm:$0xf]  ;;  %v2955_v45 = vshrl.u32 %v2906_v42, 16  ;;  %v6639_v47 = vunpack.c.l.bf16 %v7758_v29  ;;  %v7774_v52 = vld [vmem:[#allocation2 + $0x14] sm:$0x1] }
  0x34   : > { %v1178_v48 = vrot.slane %v1176_v37, 4  ;;  %v1181_v49 = vrot.slane %v1179_v39, 5  ;;  %v1187_v50 = vrot.slane %v1185_v40, 5  ;;  %v1191_v51 = vrot.slane %v1189_v41, 4  ;;  %v2909_v62 = vld [vmem:[#allocation2 + $0x18] sm:$0xf] }
  0x35   : > { %v1197_v53 = vrot.slane %v1195_v43, 5  ;;  %v2957_v54 = vrot.slane %v2955_v45, 4  ;;  %v2958_v55 = vshll.u32 %v2906_v42, 16  ;;  %v2964_v56 = vshll.u32 %v7770_v44, 16  ;;  %v7779_v63 = vld [vmem:[#allocation2 + $0x1c] sm:$0xf] }
  0x36   : > { %v1182_v57 = vor.u32 %v1181_v49, %v1178_v48  ;;  %v1192_v58 = vor.u32 %v1191_v51, %v1187_v50  ;;  %v2968_v60 = vshrl.u32 %v7770_v44, 16  ;;  %v2974_v61 = vshll.u32 %v7774_v52, 16  ;;  %v7783_v15 = vld [vmem:[#allocation2 + $0x20] sm:$0x1]  ;;  %v1103_v43 = vld [vmem:[#allocation2 + $0x18] sm:$0xf] }
  0x37   : > { %v2960_v0 = vrot.slane %v2958_v55, 5  ;;  %v2966_v38 = vrot.slane %v2964_v56, 5  ;;  %v3698_v1 = vrot.slane %v7770_v44, 5  ;;  %v3701_v2 = vrot.slane %v7774_v52, 5  ;;  %v1104_v56 = vld [vmem:[#allocation2 + $0x1c] sm:$0xf] }
  0x38   : > { %v1183_v4 = vrot.slane %v1182_v57, 4  ;;  %v1193_v6 = vrot.slane %v1192_v58, 4  ;;  %v2970_v8 = vrot.slane %v2968_v60, 4  ;;  %v2976_v9 = vrot.slane %v2974_v61, 5  ;;  %v1134_v61 = vld [vmem:[#allocation2 + $0x20] sm:$0x1] }
  0x39   : > { %v2961_v10 = vor.u32 %v2960_v0, %v2957_v54  ;;  %v2979_v17 = vshrl.u32 %v2909_v62, 16  ;;  %v2982_v19 = vshll.u32 %v2909_v62, 16  ;;  %v2988_v11 = vshll.u32 %v7779_v63, 16 }
  0x3a   : > { %v1188_v30 = vsel %vm7686_vm11, %v1183_v4, %v1187_v50  ;;  %v1198_v12 = vsel %vm7686_vm11, %v1193_v6, %v1197_v53  ;;  %v2971_v31 = vor.u32 %v2970_v8, %v2966_v38  ;;  %v2992_v37 = vshrl.u32 %v7779_v63, 16 }
  0x3b   : > { %v6171_v39 = vcombine.low %v1188_v30, %v1198_v12  ;;  %v2962_v40 = vrot.slane %v2961_v10, 4  ;;  %v2981_v41 = vrot.slane %v2979_v17, 4  ;;  %v2984_v42 = vrot.slane %v2982_v19, 5 }
  0x3c   : > { %v2972_v45 = vrot.slane %v2971_v31, 4  ;;  %v2990_v48 = vrot.slane %v2988_v11, 5  ;;  %v2994_v49 = vrot.slane %v2992_v37, 4  ;;  %v2998_v51 = vshll.u32 %v7783_v15, 16  ;;  %v1001_v11 = vld [vmem:[#allocation2 + $0x24] sm:$0xf] }
  0x3d   : > { %6848 = vmatmul.mubr.msk.bf16.vlgmr.msra.gmra.mrb[0].mxu1 %vm1585_vm10, %v6171_v39  ;;  %v2967_v50 = vsel %vm7686_vm11, %v2962_v40, %v2966_v38  ;;  %v2985_v54 = vor.u32 %v2984_v42, %v2981_v41  ;;  %v3705_v53 = vrot.slane %v7779_v63, 5  ;;  %v3708_v55 = vrot.slane %v7783_v15, 5  ;;  %v1005_v31 = vld [vmem:[#allocation2 + $0x2c] sm:$0x1]  ;;  %v7815_v42 = vld [vmem:[%s9661_s1 + $0x18] sm:$0xf] }
  0x3e   : > { %v2977_v57 = vsel %vm7686_vm11, %v2972_v45, %v2976_v9  ;;  %6880 = vmatpush3.bf16.msra.mxu1 %v7741_v21  ;;  %v2995_v58 = vor.u32 %v2994_v49, %v2990_v48  ;;  %v3000_v60 = vrot.slane %v2998_v51, 5  ;;  %v1200_v62 = vshrl.u32 %v1103_v43, 16 }
  0x3f   : > { %v6317_v0 = vcombine.low %v2967_v50, %v2977_v57  ;;  %v2986_v4 = vrot.slane %v2985_v54, 4  ;;  %v7802_v38 = vrot.slane %v3705_v53, 4  ;;  %v1203_v6 = vshll.u32 %v1103_v43, 16 }
  0x40   : > { %v2996_v8 = vrot.slane %v2995_v58, 4  ;;  %v1202_v10 = vrot.slane %v1200_v62, 4  ;;  %v1209_v17 = vshll.u32 %v1104_v56, 16  ;;  %v1213_v19 = vshrl.u32 %v1104_v56, 16 }
  0x41   : > { %6983 = vmatprep.mubr.msk.bf16.mxu0 %vm1585_vm10, %v6317_v0  ;;  %v2991_v21 = vsel %vm7686_vm11, %v2986_v4, %v2990_v48  ;;  %v1205_v9 = vrot.slane %v1203_v6, 5  ;;  %v1219_v30 = vshll.u32 %v1134_v61, 16  ;;  %v705_v12 = vrot.slane %v7747_v23, 4 }
  0x42   : > { %v3001_v37 = vsel %vm7686_vm11, %v2996_v8, %v3000_v60  ;;  %v1211_v39 = vrot.slane %v1209_v17, 5  ;;  %v1215_v40 = vrot.slane %v1213_v19, 4  ;;  %v709_v41 = vrot.slane %v707_v24, 7  ;;  %v356_v60 = vld [vmem:[#allocation2 + $0x50] sm:$0x1] }
  0x43   : > { %v6318_v43 = vcombine.low %v2991_v21, %v3001_v37  ;;  %v1206_v45 = vor.u32 %v1205_v9, %v1202_v10  ;;  %v1221_v48 = vrot.slane %v1219_v30, 5  ;;  %v1002_v23 = vsel %vm7692_vm12, %v7761_v32, %v1001_v11  ;;  %v1008_v19 = vld [vmem:[#allocation2 + $0x30] sm:$0xf] }
  0x44   : > { %v1216_v49 = vor.u32 %v1215_v40, %v1211_v39  ;;  %v712_v51 = vor.u32 %v710_v25, %v709_v41  ;;  %v714_v50 = vrot.slane %v709_v41, 4  ;;  %1003 = vst [vmem:[#allocation2 + $0x24] sm:$0xf] %v1002_v23  ;;  %v541_v24 = vmax.f32 %v7752_v27, 0.0 }
  0x45   : > { %6984 = vmatmul.mubr.msk.bf16.vlgmr.msra.gmra.mrb[0].mxu0 %vm1585_vm10, %v6318_v43  ;;  %v1207_v54 = vrot.slane %v1206_v45, 4  ;;  %v6555_v56 = vpack.c.bf16 %v540_v28, %v540_v28  ;;  %v510_v57 = vadd.f32 %v7643_v18, %v7764_v34  ;;  %v511_v32 = vadd.f32 %v7643_v18, %v7767_v35 }
  0x46   : > { %7016 = vmatpush3.bf16.msra.mxu0 %v7745_v22  ;;  %v1217_v59 = vrot.slane %v1216_v49, 4  ;;  %v713_v25 = vsel %vm7700_vm13, %v705_v12, %v712_v51  ;;  %v1006_v27 = vsel %vm7596_vm5, %v714_v50, %v1005_v31  ;;  %v6556_v58 = vpack.c.bf16 %v541_v24, %v541_v24 }
  0x47   : > { %v1212_v13 = vsel %vm7686_vm11, %v1207_v54, %v1211_v39  ;;  %1004 = vst.msk [vmem:[#allocation2 + $0x28] sm:$0xf] %vm270_vm1, %v713_v25  ;;  %1007 = vst [vmem:[#allocation2 + $0x2c] sm:$0x1] %v1006_v27  ;;  %v716_v28 = vshrl.u32 %v6555_v56, 16  ;;  %v719_v34 = vshll.u32 %v6555_v56, 16  ;;  %7416 = vmatprep.subr.msk.bf16.mxu0 %vm1634_vm0, %v7815_v42  ;;  %v473_v21 = vmul.f32 %v6635_v36, %v7634_v14 }
  0x48   : > { %v542_v35 = vmax.f32 %v510_v57, 0.0  ;;  %v1222_v22 = vsel %vm7686_vm11, %v1217_v59, %v1221_v48  ;;  %v724_v61 = vshrl.u32 %v6556_v58, 16  ;;  %v727_v62 = vshll.u32 %v6556_v58, 16  ;;  %v1012_v54 = vld [vmem:[#allocation2 + $0x38] sm:$0x1] }
  0x49   : > { %v543_v0 = vmax.f32 %v511_v32, 0.0  ;;  %v6172_v4 = vcombine.low %v1212_v13, %v1222_v22  ;;  %v718_v6 = vrot.slane %v716_v28, 7  ;;  %v357_v10 = vsel %vm7604_vm6, 0, %v356_v60 }
  0x4a   : > { %v7843_v8 = vpack.c.bf16 %v542_v35, %v542_v35  ;;  %v726_v17 = vrot.slane %v724_v61, 7  ;;  %358 = vst [vmem:[#allocation2 + $0x50] sm:$0x1] %v357_v10  ;;  %v474_v9 = vmul.f32 %v6636_v46, %v7634_v14  ;;  %v6640_v40 = vunpack.c.h.bf16 %v7758_v29 }
  0x4b   : > { %v7847_v11 = vpack.c.bf16 %v543_v0, %v543_v0  ;;  %6851 = vmatprep.mubr.msk.bf16.mxu1 %vm1585_vm10, %v6172_v4  ;;  %v1105_v30 = vld [vmem:[#allocation2 + $0x24] sm:$0xf]  ;;  %v721_v31 = vor.u32 %v719_v34, %v718_v6  ;;  %v722_v37 = vrot.slane %v718_v6, 4  ;;  %v7863_v56 = vadd.f32 %v7643_v18, %v473_v21 }
  0x4c   : > { %v2912_v12 = vld [vmem:[#allocation2 + $0x24] sm:$0xf]  ;;  %v733_v39 = vshrl.u32 %v7843_v8, 16  ;;  %v1224_v41 = vshrl.u32 %v1105_v30, 16  ;;  %v1227_v43 = vshll.u32 %v1105_v30, 16  ;;  %v729_v23 = vor.u32 %v727_v62, %v726_v17 }
  0x4d   : > { %v3003_v45 = vshrl.u32 %v2912_v12, 16  ;;  %v3006_v48 = vshll.u32 %v2912_v12, 16  ;;  %v731_v36 = vrot.slane %v726_v17, 4  ;;  %v1009_v20 = vsel %vm7692_vm12, %v721_v31, %v1008_v19 }
  0x4e   : > { %v7860_v46 = vrot.slane %v733_v39, 7  ;;  %v1106_v49 = vld [vmem:[#allocation2 + $0x28] sm:$0xf]  ;;  %v1135_v51 = vld [vmem:[#allocation2 + $0x2c] sm:$0x1]  ;;  %v1226_v50 = vrot.slane %v1224_v41, 4  ;;  %v7866_v57 = vadd.f32 %v7643_v18, %v474_v9  ;;  %v730_v9 = vsel %vm7700_vm13, %v722_v37, %v729_v23 }
  0x4f   : > { %v1229_v24 = vrot.slane %v1227_v43, 5  ;;  %1010 = vst [vmem:[#allocation2 + $0x30] sm:$0xf] %v1009_v20  ;;  %v1233_v32 = vshll.u32 %v1106_v49, 16  ;;  %v1237_v59 = vshrl.u32 %v1106_v49, 16  ;;  %v1243_v25 = vshll.u32 %v1135_v51, 16 }
  0x50   : > { %v7868_v27 = vld [vmem:[#allocation2 + $0x28] sm:$0xf]  ;;  %v3005_v58 = vrot.slane %v3003_v45, 4  ;;  %v7870_v13 = vld [vmem:[#allocation2 + $0x2c] sm:$0x1]  ;;  %v3008_v28 = vrot.slane %v3006_v48, 5  ;;  %v1013_v30 = vsel %vm7596_vm5, %v731_v36, %v1012_v54  ;;  %v475_v37 = vmul.f32 %v6639_v47, %v7634_v14 }
  0x51   : > { %v1230_v60 = vor.u32 %v1229_v24, %v1226_v50  ;;  %v3012_v34 = vshll.u32 %v7868_v27, 16  ;;  %v3016_v35 = vshrl.u32 %v7868_v27, 16  ;;  %v1235_v22 = vrot.slane %v1233_v32, 5  ;;  %1011 = vst.msk [vmem:[#allocation2 + $0x34] sm:$0xf] %vm270_vm1, %v730_v9 }
  0x52   : > { %v1239_v61 = vrot.slane %v1237_v59, 4  ;;  %v1245_v62 = vrot.slane %v1243_v25, 5  ;;  %v3022_v0 = vshll.u32 %v7870_v13, 16  ;;  %v3009_v6 = vor.u32 %v3008_v28, %v3005_v58  ;;  %1014 = vst [vmem:[#allocation2 + $0x38] sm:$0x1] %v1013_v30  ;;  %v7896_v58 = vld [vmem:[%s7618_s30 + $0x38] sm:$0xff]  }
  0x53   : > { %v1231_v4 = vrot.slane %v1230_v60, 4  ;;  %v3014_v10 = vrot.slane %v3012_v34, 5  ;;  %v3018_v17 = vrot.slane %v3016_v35, 4  ;;  %v736_v41 = vshll.u32 %v7843_v8, 16  ;;  %v1015_v24 = vld [vmem:[#allocation2 + $0x3c] sm:$0xf] }
  0x54   : > { %v1240_v19 = vor.u32 %v1239_v61, %v1235_v22  ;;  %v3024_v21 = vrot.slane %v3022_v0, 5  ;;  %v3010_v31 = vrot.slane %v3009_v6, 4  ;;  %v739_v20 = vrot.slane %v7860_v46, 4 }
  0x55   : > { %v1236_v12 = vsel %vm7686_vm11, %v1231_v4, %v1235_v22  ;;  %v3019_v39 = vor.u32 %v3018_v17, %v3014_v10  ;;  %v476_v23 = vmul.f32 %v6640_v40, %v7634_v14  ;;  %v738_v59 = vor.u32 %v736_v41, %v7860_v46  ;;  %v359_v46 = vld [vmem:[#allocation2 + $0x5c] sm:$0x1] }
  0x56   : > { %v1241_v43 = vrot.slane %v1240_v19, 4  ;;  %v2915_v45 = vld [vmem:[#allocation2 + $0x30] sm:$0xf]  ;;  %v3015_v36 = vsel %vm7686_vm11, %v3010_v31, %v3014_v10  ;;  %v741_v35 = vshrl.u32 %v7847_v11, 16  ;;  %v744_v61 = vshll.u32 %v7847_v11, 16 }
  0x57   : > { %v1107_v48 = vld [vmem:[#allocation2 + $0x30] sm:$0xf]  ;;  %v3020_v49 = vrot.slane %v3019_v39, 4  ;;  %v3027_v51 = vshrl.u32 %v2915_v45, 16  ;;  %v3030_v50 = vshll.u32 %v2915_v45, 16  ;;  %v544_v0 = vmax.f32 %v7863_v56, 0.0 }
  0x58   : > { %v1246_v8 = vsel %vm7686_vm11, %v1241_v43, %v1245_v62  ;;  %v1248_v54 = vshrl.u32 %v1107_v48, 16  ;;  %v1251_v32 = vshll.u32 %v1107_v48, 16  ;;  %v1016_v62 = vsel %vm7692_vm12, %v738_v59, %v1015_v24  ;;  %v7905_v4 = vld [vmem:[#allocation2 + $0x34] sm:$0xf] }
  0x59   : > { %v6173_v25 = vcombine.low %v1236_v12, %v1246_v8  ;;  %v3025_v29 = vsel %vm7686_vm11, %v3020_v49, %v3024_v21  ;;  %v3029_v47 = vrot.slane %v3027_v51, 4  ;;  %v3032_v40 = vrot.slane %v3030_v50, 5  ;;  %v7907_v6 = vld [vmem:[#allocation2 + $0x38] sm:$0x1]  ;;  %v1108_v10 = vld [vmem:[#allocation2 + $0x34] sm:$0xf] }
  0x5a   : > { %v6319_v60 = vcombine.low %v3015_v36, %v3025_v29  ;;  %v1250_v28 = vrot.slane %v1248_v54, 4  ;;  %v1253_v34 = vrot.slane %v1251_v32, 5  ;;  %1017 = vst [vmem:[#allocation2 + $0x3c] sm:$0xf] %v1016_v62  ;;  %v7910_v19 = vadd.f32 %v7643_v18, %v475_v37  ;;  %v1136_v31 = vld [vmem:[#allocation2 + $0x38] sm:$0x1] }
  0x5b   : > { %6852 = vmatmul.mubr.msk.bf16.gmra.mrb[4].mxu1 %vm1585_vm10, %v6173_v25  ;;  %v3033_v22 = vor.u32 %v3032_v40, %v3029_v47  ;;  %v7913_v21 = vadd.f32 %v7643_v18, %v476_v23  ;;  %v6643_v11 = vunpack.c.l.bf16 %v7896_v58  ;;  %v3036_v56 = vshll.u32 %v7905_v4, 16  ;;  %v303_v48 = vld [vmem:[#allocation2 + $0x54] sm:$0x1]  ;;  %v1019_v8 = vld [vmem:[#allocation2 + $0x44] sm:$0x1] }
  0x5c   : > { %6987 = vmatprep.mubr.msk.bf16.mxu0 %vm1585_vm10, %v6319_v60  ;;  %v1254_v17 = vor.u32 %v1253_v34, %v1250_v28  ;;  %v3040_v30 = vshrl.u32 %v7905_v4, 16  ;;  %v3046_v12 = vshll.u32 %v7907_v6, 16  ;;  %v1257_v41 = vshll.u32 %v1108_v10, 16 }
  0x5d   : > { %v3034_v9 = vrot.slane %v3033_v22, 4  ;;  %v1261_v43 = vshrl.u32 %v1108_v10, 16  ;;  %v1267_v45 = vshll.u32 %v1136_v31, 16  ;;  %v3038_v37 = vrot.slane %v3036_v56, 5 }
  0x5e   : > { %v1255_v39 = vrot.slane %v1254_v17, 4  ;;  %v3042_v36 = vrot.slane %v3040_v30, 4  ;;  %v3048_v49 = vrot.slane %v3046_v12, 5  ;;  %v743_v23 = vrot.slane %v741_v35, 7 }
  0x5f   : > { %v1259_v51 = vrot.slane %v1257_v41, 5  ;;  %v1263_v50 = vrot.slane %v1261_v43, 4  ;;  %v1269_v24 = vrot.slane %v1267_v45, 5  ;;  %v545_v54 = vmax.f32 %v7866_v57, 0.0 }
  0x60   : > { %v3039_v32 = vsel %vm7686_vm11, %v3034_v9, %v3038_v37  ;;  %v3043_v59 = vor.u32 %v3042_v36, %v3038_v37  ;;  %v746_v25 = vor.u32 %v744_v61, %v743_v23  ;;  %v748_v29 = vrot.slane %v743_v23, 4  ;;  %v306_v23 = vld [vmem:[#allocation2 + $0x60] sm:$0x1] }
  0x61   : > { %v1260_v47 = vsel %vm7686_vm11, %v1255_v39, %v1259_v51  ;;  %v1264_v40 = vor.u32 %v1263_v50, %v1259_v51  ;;  %v6559_v60 = vpack.c.bf16 %v544_v0, %v544_v0  ;;  %v6560_v28 = vpack.c.bf16 %v545_v54, %v545_v54  ;;  %v1109_v22 = vld [vmem:[#allocation2 + $0x3c] sm:$0xf] }
  0x62   : > { %v3044_v34 = vrot.slane %v3043_v59, 4  ;;  %v747_v35 = vsel %vm7700_vm13, %v739_v20, %v746_v25  ;;  %v1020_v57 = vsel %vm7596_vm5, %v748_v29, %v1019_v8  ;;  %v2918_v62 = vld [vmem:[#allocation2 + $0x3c] sm:$0xf]  ;;  %v304_v61 = vsel %vm7596_vm5, 0, %v303_v48 }
  0x63   : > { %v1265_v10 = vrot.slane %v1264_v40, 4  ;;  %1018 = vst.msk [vmem:[#allocation2 + $0x40] sm:$0xf] %vm270_vm1, %v747_v35  ;;  %1021 = vst [vmem:[#allocation2 + $0x44] sm:$0x1] %v1020_v57  ;;  %v1272_v0 = vshrl.u32 %v1109_v22, 16 }
  0x64   : > { %v1275_v17 = vshll.u32 %v1109_v22, 16  ;;  %v3051_v9 = vshrl.u32 %v2918_v62, 16  ;;  %305 = vst [vmem:[#allocation2 + $0x54] sm:$0x1] %v304_v61  ;;  %v3049_v20 = vsel %vm7686_vm11, %v3044_v34, %v3048_v49  ;;  %v3054_v56 = vshll.u32 %v2918_v62, 16 }
  0x65   : > { %v750_v30 = vshrl.u32 %v6559_v60, 16  ;;  %v753_v12 = vshll.u32 %v6559_v60, 16  ;;  %v6320_v31 = vcombine.low %v3039_v32, %v3049_v20  ;;  %v1270_v39 = vsel %vm7686_vm11, %v1265_v10, %v1269_v24  ;;  %v1022_v49 = vld [vmem:[#allocation2 + $0x48] sm:$0xf] }
  0x66   : > { %v1274_v41 = vrot.slane %v1272_v0, 4  ;;  %v1277_v43 = vrot.slane %v1275_v17, 5  ;;  %v6174_v45 = vcombine.low %v1260_v47, %v1270_v39  ;;  %v3053_v48 = vrot.slane %v3051_v9, 4 }
  0x67   : > { %v3056_v37 = vrot.slane %v3054_v56, 5  ;;  %v752_v36 = vrot.slane %v750_v30, 7  ;;  %6988 = vmatmul.mubr.msk.bf16.gmra.mrb[4].mxu0 %vm1585_vm10, %v6320_v31  ;;  %v758_v50 = vshrl.u32 %v6560_v28, 16  ;;  %v761_v8 = vshll.u32 %v6560_v28, 16  ;;  %v1026_v30 = vld [vmem:[#allocation2 + $0x50] sm:$0x1] }
  0x68   : > { %v1278_v51 = vor.u32 %v1277_v43, %v1274_v41  ;;  %v360_v54 = vsel %vm7604_vm6, 0, %v359_v46  ;;  %6855 = vmatprep.mubr.msk.bf16.mxu1 %vm1585_vm10, %v6174_v45  ;;  %v546_v25 = vmax.f32 %v7910_v19, 0.0  ;;  %v547_v40 = vmax.f32 %v7913_v21, 0.0 }
  0x69   : > { %v3057_v32 = vor.u32 %v3056_v37, %v3053_v48  ;;  %v755_v24 = vor.u32 %v753_v12, %v752_v36  ;;  %v756_v59 = vrot.slane %v752_v36, 4  ;;  %361 = vst [vmem:[#allocation2 + $0x5c] sm:$0x1] %v360_v54  ;;  %v760_v47 = vrot.slane %v758_v50, 7  ;;  %v362_v12 = vld [vmem:[#allocation2 + $0x68] sm:$0x1] }
  0x6a   : > { %v1279_v29 = vrot.slane %v1278_v51, 4  ;;  %v307_v60 = vsel %vm7596_vm5, 0, %v306_v23  ;;  %v1110_v28 = vld [vmem:[#allocation2 + $0x40] sm:$0xf]  ;;  %v1137_v34 = vld [vmem:[#allocation2 + $0x44] sm:$0x1]  ;;  %v6561_v22 = vpack.c.bf16 %v546_v25, %v546_v25  ;;  %v6644_v62 = vunpack.c.h.bf16 %v7896_v58 }
  0x6b   : > { %v7945_v35 = vld [vmem:[#allocation2 + $0x40] sm:$0xf]  ;;  %v1023_v57 = vsel %vm7692_vm12, %v755_v24, %v1022_v49  ;;  %308 = vst [vmem:[#allocation2 + $0x60] sm:$0x1] %v307_v60  ;;  %v477_v19 = vmul.f32 %v6643_v11, %v7634_v14  ;;  %v1281_v61 = vshll.u32 %v1110_v28, 16  ;;  %v1285_v21 = vshrl.u32 %v1110_v28, 16 }
  0x6c   : > { %v1291_v10 = vshll.u32 %v1137_v34, 16  ;;  %v7953_v0 = vld [vmem:[#allocation2 + $0x44] sm:$0x1]  ;;  %v3058_v17 = vrot.slane %v3057_v32, 4  ;;  %1024 = vst [vmem:[#allocation2 + $0x48] sm:$0xf] %v1023_v57  ;;  %v763_v56 = vor.u32 %v761_v8, %v760_v47  ;;  %v7965_v51 = vpack.c.bf16 %v547_v40, %v547_v40 }
  0x6d   : > { %v3060_v9 = vshll.u32 %v7945_v35, 16  ;;  %v3064_v46 = vshrl.u32 %v7945_v35, 16  ;;  %v3070_v20 = vshll.u32 %v7953_v0, 16  ;;  %v1283_v31 = vrot.slane %v1281_v61, 5 }
  0x6e   : > { %v1287_v39 = vrot.slane %v1285_v21, 4  ;;  %v1293_v58 = vrot.slane %v1291_v10, 5  ;;  %v765_v11 = vrot.slane %v760_v47, 4  ;;  %v764_v48 = vsel %vm7700_vm13, %v756_v59, %v763_v56  ;;  %v1029_v10 = vld [vmem:[#allocation2 + $0x54] sm:$0xf]  ;;  %v7983_v56 = vld [vmem:[%s7618_s30 + $0x40] sm:$0xff]  }
  0x6f   : > { %v3062_v41 = vrot.slane %v3060_v9, 5  ;;  %v3066_v43 = vrot.slane %v3064_v46, 4  ;;  %v3072_v45 = vrot.slane %v3070_v20, 5  ;;  %v1284_v37 = vsel %vm7686_vm11, %v1279_v29, %v1283_v31  ;;  %1025 = vst.msk [vmem:[#allocation2 + $0x4c] sm:$0xf] %vm270_vm1, %v764_v48 }
  0x70   : > { %v1288_v36 = vor.u32 %v1287_v39, %v1283_v31  ;;  %v1027_v23 = vsel %vm7596_vm5, %v765_v11, %v1026_v30  ;;  %v767_v49 = vshrl.u32 %v6561_v22, 16  ;;  %v770_v54 = vshll.u32 %v6561_v22, 16  ;;  %v7994_v11 = vld [vmem:[%s9663_s3] ss:$0 sm:$0xff] }
  0x71   : > { %v3063_v50 = vsel %vm7686_vm11, %v3058_v17, %v3062_v41  ;;  %v3067_v8 = vor.u32 %v3066_v43, %v3062_v41  ;;  %1028 = vst [vmem:[#allocation2 + $0x50] sm:$0x1] %v1027_v23  ;;  %v775_v24 = vshrl.u32 %v7965_v51, 16  ;;  %v778_v59 = vshll.u32 %v7965_v51, 16 }
  0x72   : > { %v1289_v32 = vrot.slane %v1288_v36, 4  ;;  %v363_v25 = vsel %vm7604_vm6, 0, %v362_v12  ;;  %v7973_v60 = vrot.slane %v767_v49, 7  ;;  %v478_v28 = vmul.f32 %v6644_v62, %v7634_v14 }
  0x73   : > { %v3068_v29 = vrot.slane %v3067_v8, 4  ;;  %v2921_v47 = vld [vmem:[#allocation2 + $0x48] sm:$0xf]  ;;  %364 = vst [vmem:[#allocation2 + $0x68] sm:$0x1] %v363_v25  ;;  %v516_v34 = vadd.f32 %v7643_v18, %v477_v19  ;;  %v6647_v23 = vunpack.c.l.bf16 %v7983_v56  ;;  %vm2139_vm14 = vcmask 1042432  }
  0x74   : > { %v1111_v40 = vld [vmem:[#allocation2 + $0x48] sm:$0xf]  ;;  %v1294_v57 = vsel %vm7686_vm11, %v1289_v32, %v1293_v58  ;;  %v3075_v22 = vshrl.u32 %v2921_v47, 16  ;;  %v3078_v61 = vshll.u32 %v2921_v47, 16  ;;  %v772_v20 = vor.u32 %v770_v54, %v7973_v60 }
  0x75   : > { %v1296_v21 = vshrl.u32 %v1111_v40, 16  ;;  %v6175_v17 = vcombine.low %v1284_v37, %v1294_v57  ;;  %v3073_v9 = vsel %vm7686_vm11, %v3068_v29, %v3072_v45  ;;  %v1299_v46 = vshll.u32 %v1111_v40, 16  ;;  %v7477_v26 = vld [vmem:[#allocation2 + $0x48] sm:$0xf] }
  0x76   : > { %v6321_v30 = vcombine.low %v3063_v50, %v3073_v9  ;;  %v3077_v14 = vrot.slane %v3075_v22, 4  ;;  %v3080_v62 = vrot.slane %v3078_v61, 5  ;;  %v7986_v19 = vld [vmem:[#allocation2 + $0x4c] sm:$0xf]  ;;  %v773_v39 = vrot.slane %v7973_v60, 4 }
  0x77   : > { %v1298_v18 = vrot.slane %v1296_v21, 4  ;;  %6856 = vmatmul.mubr.msk.bf16.gmra.mrb[8].mxu1 %vm1585_vm10, %v6175_v17  ;;  %v1112_v12 = vld [vmem:[#allocation2 + $0x4c] sm:$0xf]  ;;  %v1301_v31 = vrot.slane %v1299_v46, 5  ;;  %v1030_v58 = vsel %vm7692_vm12, %v772_v20, %v1029_v10  ;;  %v517_v41 = vadd.f32 %v7994_v11, %v478_v28  ;;  %v365_v9 = vld [vmem:[#allocation2 + $0x74] sm:$0x1] }
  0x78   : > { %6991 = vmatprep.mubr.msk.bf16.mxu0 %vm1585_vm10, %v6321_v30  ;;  %v7998_v43 = vld [vmem:[#allocation2 + $0x50] sm:$0x1]  ;;  %v3081_v45 = vor.u32 %v3080_v62, %v3077_v14  ;;  %v3084_v48 = vshll.u32 %v7986_v19, 16  ;;  %v3088_v37 = vshrl.u32 %v7986_v19, 16  ;;  %1031 = vst [vmem:[#allocation2 + $0x54] sm:$0xf] %v1030_v58 }
  0x79   : > { %v1138_v36 = vld [vmem:[#allocation2 + $0x50] sm:$0x1]  ;;  %v3094_v50 = vshll.u32 %v7998_v43, 16  ;;  %v1302_v8 = vor.u32 %v1301_v31, %v1298_v18  ;;  %v1305_v49 = vshll.u32 %v1112_v12, 16  ;;  %v1309_v54 = vshrl.u32 %v1112_v12, 16 }
  0x7a   : > { %v3082_v32 = vrot.slane %v3081_v45, 4  ;;  %v3086_v25 = vrot.slane %v3084_v48, 5  ;;  %v3090_v29 = vrot.slane %v3088_v37, 4  ;;  %v1315_v47 = vshll.u32 %v1138_v36, 16  ;;  %v309_v22 = vld [vmem:[#allocation2 + $0x6c] sm:$0x1] }
  0x7b   : > { %v3096_v40 = vrot.slane %v3094_v50, 5  ;;  %v1303_v60 = vrot.slane %v1302_v8, 4  ;;  %v1307_v28 = vrot.slane %v1305_v49, 5  ;;  %v1311_v57 = vrot.slane %v1309_v54, 4  ;;  %v1033_v30 = vld [vmem:[#allocation2 + $0x5c] sm:$0x1] }
  0x7c   : > { %v3087_v61 = vsel %vm7686_vm11, %v3082_v32, %v3086_v25  ;;  %v3091_v21 = vor.u32 %v3090_v29, %v3086_v25  ;;  %v1317_v10 = vrot.slane %v1315_v47, 5  ;;  %v777_v17 = vrot.slane %v775_v24, 7 }
  0x7d   : > { %v1308_v46 = vsel %vm7686_vm11, %v1303_v60, %v1307_v28  ;;  %v1312_v20 = vor.u32 %v1311_v57, %v1307_v28  ;;  %v548_v14 = vmax.f32 %v516_v34, 0.0  ;;  %v549_v62 = vmax.f32 %v517_v41, 0.0 }
  0x7e   : > { %v3092_v18 = vrot.slane %v3091_v21, 4  ;;  %v780_v12 = vor.u32 %v778_v59, %v777_v17  ;;  %v782_v31 = vrot.slane %v777_v17, 4  ;;  %v310_v58 = vsel %vm7596_vm5, 0, %v309_v22 }
  0x7f   : > { %v1313_v45 = vrot.slane %v1312_v20, 4  ;;  %v1113_v48 = vld [vmem:[#allocation2 + $0x54] sm:$0xf]  ;;  %v6563_v24 = vpack.c.bf16 %v548_v14, %v548_v14  ;;  %v6564_v36 = vpack.c.bf16 %v549_v62, %v549_v62  ;;  %311 = vst [vmem:[#allocation2 + $0x6c] sm:$0x1] %v310_v58  ;;  %v366_v50 = vsel %vm7604_vm6, 0, %v365_v9 }
  0x80   : > { %v2924_v37 = vld [vmem:[#allocation2 + $0x54] sm:$0xf]  ;;  %v3097_v34 = vsel %vm7686_vm11, %v3092_v18, %v3096_v40  ;;  %v781_v51 = vsel %vm7700_vm13, %v773_v39, %v780_v12  ;;  %v1034_v59 = vsel %vm7596_vm5, %v782_v31, %v1033_v30  ;;  %v1320_v41 = vshrl.u32 %v1113_v48, 16  ;;  %367 = vst [vmem:[#allocation2 + $0x74] sm:$0x1] %v366_v50  ;;  %v8039_v62 = vld [vmem:[%s7618_s30 + $0x48] sm:$0xff]  }
  0x81   : > { %v6322_v8 = vcombine.low %v3087_v61, %v3097_v34  ;;  %v1318_v49 = vsel %vm7686_vm11, %v1313_v45, %v1317_v10  ;;  %1032 = vst.msk [vmem:[#allocation2 + $0x58] sm:$0xf] %vm270_vm1, %v781_v51  ;;  %1035 = vst [vmem:[#allocation2 + $0x5c] sm:$0x1] %v1034_v59  ;;  %v1323_v54 = vshll.u32 %v1113_v48, 16  ;;  %v3099_v32 = vshrl.u32 %v2924_v37, 16 }
  0x82   : > { %v6176_v25 = vcombine.low %v1308_v46, %v1318_v49  ;;  %v1322_v29 = vrot.slane %v1320_v41, 4  ;;  %v3102_v47 = vshll.u32 %v2924_v37, 16  ;;  %v784_v40 = vshrl.u32 %v6563_v24, 16  ;;  %v6250_v39 = vld [vmem:[%s9661_s1 + $0x8] sm:$0xf] }
  0x83   : > { %6992 = vmatmul.mubr.msk.bf16.gmra.mrb[8].mxu0 %vm1585_vm10, %v6322_v8  ;;  %v1325_v60 = vrot.slane %v1323_v54, 5  ;;  %v3101_v28 = vrot.slane %v3099_v32, 4  ;;  %v787_v57 = vshll.u32 %v6563_v24, 16  ;;  %v792_v22 = vshrl.u32 %v6564_v36, 16  ;;  %7411 = vmatprep.subr.msk.bf16.mxu1 %vm1634_vm0, %v6250_v39  ;;  %v1036_v20 = vld [vmem:[#allocation2 + $0x60] sm:$0xf] }
  0x84   : > { %6859 = vmatprep.mubr.msk.bf16.mxu1 %vm1585_vm10, %v6176_v25  ;;  %v3104_v61 = vrot.slane %v3102_v47, 5  ;;  %v786_v21 = vrot.slane %v784_v40, 7  ;;  %v795_v10 = vshll.u32 %v6564_v36, 16  ;;  %v6648_v17 = vunpack.c.h.bf16 %v7983_v56  ;;  %v8033_v30 = vld [vmem:[%s9662_s2] ss:$0 sm:$0xff] }
  0x85   : > { %v1326_v9 = vor.u32 %v1325_v60, %v1322_v29  ;;  %v794_v46 = vrot.slane %v792_v22, 7  ;;  %v479_v14 = vmul.f32 %v8033_v30, %v6647_v23  ;;  %v1040_v24 = vld [vmem:[#allocation2 + $0x68] sm:$0x1]  ;;  %v6651_v59 = vunpack.c.l.bf16 %v8039_v62  ;;  %v3632_v29 = vld [vmem:[#allocation2 + $0xc] sm:$0xe] }
  0x86   : > { %v3105_v18 = vor.u32 %v3104_v61, %v3101_v28  ;;  %v789_v12 = vor.u32 %v787_v57, %v786_v21  ;;  %v790_v31 = vrot.slane %v786_v21, 4  ;;  %v480_v58 = vmul.f32 %v8033_v30, %v6648_v17 }
  0x87   : > { %v1327_v45 = vrot.slane %v1326_v9, 4  ;;  %v797_v48 = vor.u32 %v795_v10, %v794_v46  ;;  %v799_v37 = vrot.slane %v794_v46, 4  ;;  %v518_v36 = vadd.f32 %v7994_v11, %v479_v14  ;;  %v8060_v46 = vld [vmem:[#allocation2 + $0x18] sm:$0xe] }
  0x88   : > { %v1114_v50 = vld [vmem:[#allocation2 + $0x58] sm:$0xf]  ;;  %v1139_v34 = vld [vmem:[#allocation2 + $0x5c] sm:$0x1]  ;;  %v1037_v56 = vsel %vm7692_vm12, %v789_v12, %v1036_v20  ;;  %v519_v23 = vadd.f32 %v7994_v11, %v480_v58  ;;  %v3106_v25 = vrot.slane %v3105_v18, 4  ;;  %vm2140_vm15 = vcmask 1046532  }
  0x89   : > { %v8043_v51 = vld [vmem:[#allocation2 + $0x58] sm:$0xf]  ;;  %v1329_v8 = vshll.u32 %v1114_v50, 16  ;;  %v1333_v49 = vshrl.u32 %v1114_v50, 16  ;;  %v1339_v54 = vshll.u32 %v1139_v34, 16  ;;  %v798_v60 = vsel %vm7700_vm13, %v790_v31, %v797_v48  ;;  %vm8067_vm3 = vmor %vm2139_vm14, %vm2140_vm15 }
  0x8a   : > { %v8050_v32 = vld [vmem:[#allocation2 + $0x5c] sm:$0x1]  ;;  %1038 = vst [vmem:[#allocation2 + $0x60] sm:$0xf] %v1037_v56  ;;  %v3108_v47 = vshll.u32 %v8043_v51, 16  ;;  %v3112_v40 = vshrl.u32 %v8043_v51, 16  ;;  %v1041_v61 = vsel %vm7596_vm5, %v799_v37, %v1040_v24 }
  0x8b   : > { %v3118_v39 = vshll.u32 %v8050_v32, 16  ;;  %v1331_v28 = vrot.slane %v1329_v8, 5  ;;  %v1335_v57 = vrot.slane %v1333_v49, 4  ;;  %v1341_v22 = vrot.slane %v1339_v54, 5  ;;  %1039 = vst.msk [vmem:[#allocation2 + $0x64] sm:$0xf] %vm270_vm1, %v798_v60 }
  0x8c   : > { %v3110_v21 = vrot.slane %v3108_v47, 5  ;;  %v3114_v10 = vrot.slane %v3112_v40, 4  ;;  %1042 = vst [vmem:[#allocation2 + $0x68] sm:$0x1] %v1041_v61  ;;  %v550_v9 = vmax.f32 %v518_v36, 0.0  ;;  %v551_v18 = vmax.f32 %v519_v23, 0.0 }
  0x8d   : > { %v3120_v17 = vrot.slane %v3118_v39, 5  ;;  %v1332_v20 = vsel %vm7686_vm11, %v1327_v45, %v1331_v28  ;;  %v1336_v14 = vor.u32 %v1335_v57, %v1331_v28  ;;  %v6349_v37 = vrot.slane %v3632_v29, 9 }
  0x8e   : > { %v3111_v12 = vsel %vm7686_vm11, %v3106_v25, %v3110_v21  ;;  %v3115_v31 = vor.u32 %v3114_v10, %v3110_v21  ;;  %v6565_v58 = vpack.c.bf16 %v550_v9, %v550_v9  ;;  %v8071_v36 = vpack.c.bf16 %v551_v18, %v551_v18 }
  0x8f   : > { %v1337_v24 = vrot.slane %v1336_v14, 4  ;;  %v3700_v45 = vrot.slane %v3698_v1, 4  ;;  %v6350_v50 = vrot.slane %v8060_v46, 9  ;;  %v8080_v49 = vsel %vm8067_vm3, %v6349_v37, %v3698_v1  ;;  %v371_v46 = vld [vmem:[#allocation2 + $0x8c] sm:$0x1] }
  0x90   : > { %v3116_v34 = vrot.slane %v3115_v31, 4  ;;  %v801_v8 = vshrl.u32 %v6565_v58, 16  ;;  %v8087_v54 = vsel %vm8067_vm3, %v7802_v38, %v3708_v55 }
  0x91   : > { %v2927_v56 = vld [vmem:[#allocation2 + $0x60] sm:$0xf]  ;;  %v1342_v25 = vsel %vm7686_vm11, %v1337_v24, %v1341_v22  ;;  %v8127_v52 = vsel %vm8067_vm3, %v6350_v50, %v3705_v53  ;;  %v481_v50 = vmul.f32 %v8033_v30, %v6651_v59 }
  0x92   : > { %v1115_v23 = vld [vmem:[#allocation2 + $0x60] sm:$0xf]  ;;  %v3123_v29 = vshrl.u32 %v2927_v56, 16  ;;  %v3126_v47 = vshll.u32 %v2927_v56, 16  ;;  %v6177_v39 = vcombine.low %v1332_v20, %v1342_v25  ;;  %v3121_v44 = vsel %vm7686_vm11, %v3116_v34, %v3120_v17  ;;  %v8093_v60 = vld [vmem:[#allocation2 + $0x64] sm:$0xf] }
  0x93   : > { %v1344_v40 = vshrl.u32 %v1115_v23, 16  ;;  %v1116_v1 = vld [vmem:[#allocation2 + $0x64] sm:$0xf]  ;;  %v1347_v28 = vshll.u32 %v1115_v23, 16  ;;  %v8095_v15 = vrot.slane %v801_v8, 7  ;;  %v6323_v57 = vcombine.low %v3111_v12, %v3121_v44 }
  0x94   : > { %v8097_v61 = vld [vmem:[#allocation2 + $0x68] sm:$0x1]  ;;  %v3125_v55 = vrot.slane %v3123_v29, 4  ;;  %v3128_v38 = vrot.slane %v3126_v47, 5  ;;  %v3132_v22 = vshll.u32 %v8093_v60, 16  ;;  %6860 = vmatmul.mubr.msk.bf16.gmra.mrb[12].mxu1 %vm1585_vm10, %v6177_v39  ;;  %v3136_v21 = vshrl.u32 %v8093_v60, 16 }
  0x95   : > { %v3142_v10 = vshll.u32 %v8097_v61, 16  ;;  %v1140_v17 = vld [vmem:[#allocation2 + $0x68] sm:$0x1]  ;;  %v1346_v9 = vrot.slane %v1344_v40, 4  ;;  %v1349_v20 = vrot.slane %v1347_v28, 5  ;;  %6995 = vmatprep.mubr.msk.bf16.mxu0 %vm1585_vm10, %v6323_v57  ;;  %v1353_v12 = vshll.u32 %v1116_v1, 16 }
  0x96   : > { %v3129_v14 = vor.u32 %v3128_v38, %v3125_v55  ;;  %v3134_v18 = vrot.slane %v3132_v22, 5  ;;  %v1357_v31 = vshrl.u32 %v1116_v1, 16  ;;  %v3138_v37 = vrot.slane %v3136_v21, 4  ;;  %v1043_v23 = vld [vmem:[#allocation2 + $0x6c] sm:$0xf]  ;;  %v7434_v7 = vld [vmem:[#allocation2 + $0x60] sm:$0xff]  }
  0x97   : > { %v3144_v24 = vrot.slane %v3142_v10, 5  ;;  %v1350_v34 = vor.u32 %v1349_v20, %v1346_v9  ;;  %v1363_v56 = vshll.u32 %v1140_v17, 16  ;;  %v1355_v25 = vrot.slane %v1353_v12, 5  ;;  %v312_v38 = vld [vmem:[#allocation2 + $0x78] sm:$0x1] }
  0x98   : > { %v3130_v8 = vrot.slane %v3129_v14, 4  ;;  %v1359_v29 = vrot.slane %v1357_v31, 4  ;;  %v804_v47 = vshll.u32 %v6565_v58, 16  ;;  %v3139_v39 = vor.u32 %v3138_v37, %v3134_v18  ;;  %v368_v14 = vld [vmem:[#allocation2 + $0x80] sm:$0x1] }
  0x99   : > { %v1351_v44 = vrot.slane %v1350_v34, 4  ;;  %v1365_v41 = vrot.slane %v1363_v56, 5  ;;  %v807_v40 = vrot.slane %v8095_v15, 4  ;;  %v809_v55 = vshrl.u32 %v8071_v36, 16  ;;  %v1047_v12 = vld [vmem:[#allocation2 + $0x74] sm:$0x1] }
  0x9a   : > { %v3135_v28 = vsel %vm7686_vm11, %v3130_v8, %v3134_v18  ;;  %v1360_v57 = vor.u32 %v1359_v29, %v1355_v25  ;;  %v806_v1 = vor.u32 %v804_v47, %v8095_v15  ;;  %v3140_v22 = vrot.slane %v3139_v39, 4  ;;  %v3634_v56 = vld [vmem:[#allocation2 + $0x24] sm:$0xe]  ;;  %v3635_v29 = vld [vmem:[#allocation2 + $0x30] sm:$0xe] }
  0x9b   : > { %v1356_v21 = vsel %vm7686_vm11, %v1351_v44, %v1355_v25  ;;  %v812_v58 = vshll.u32 %v8071_v36, 16  ;;  %v3702_v10 = vsel %vm8067_vm3, %v3700_v45, %v3701_v2  ;;  %v811_v9 = vrot.slane %v809_v55, 7  ;;  %v315_v45 = vld [vmem:[#allocation2 + $0x84] sm:$0x1] }
  0x9c   : > { %v1361_v17 = vrot.slane %v1360_v57, 4  ;;  %v1044_v20 = vsel %vm7692_vm12, %v806_v1, %v1043_v23  ;;  %v6366_v15 = vcombine.low %v8080_v49, %v3702_v10  ;;  %v3145_v18 = vsel %vm7686_vm11, %v3140_v22, %v3144_v24  ;;  %v6686_v24 = vld [vmem:[%s7618_s30 + $0x50] sm:$0xff]  }
  0x9d   : > { %1045 = vst [vmem:[#allocation2 + $0x6c] sm:$0xf] %v1044_v20  ;;  %v8131_v2 = vsel %vm1634_vm0, %v7815_v42, 0  ;;  %v313_v36 = vsel %vm7596_vm5, 0, %v312_v38  ;;  %v6324_v49 = vcombine.low %v3135_v28, %v3145_v18  ;;  %v814_v37 = vor.u32 %v812_v58, %v811_v9 }
  0x9e   : > { %v1366_v31 = vsel %vm7686_vm11, %v1361_v17, %v1365_v41  ;;  %v816_v63 = vrot.slane %v811_v9, 4  ;;  %314 = vst [vmem:[#allocation2 + $0x78] sm:$0x1] %v313_v36  ;;  %v6367_v53 = vcombine.low %v8127_v52, %v8087_v54  ;;  %v369_v42 = vsel %vm7604_vm6, 0, %v368_v14 }
  0x9f   : > { %v6178_v34 = vcombine.low %v1356_v21, %v1366_v31  ;;  %6996 = vmatmul.mubr.msk.bf16.gmra.mrb[12].mxu0 %vm1585_vm10, %v6324_v49  ;;  %v815_v41 = vsel %vm7700_vm13, %v807_v40, %v814_v37  ;;  %370 = vst [vmem:[#allocation2 + $0x80] sm:$0x1] %v369_v42  ;;  %v9695_v8 = vunpack.c.h.bf16 %v8039_v62  ;;  %v316_v25 = vsel %vm7596_vm5, 0, %v315_v45  ;;  %v6431_v37 = vld [vmem:[%s9661_s1 + $0x1c] sm:$0xf] }
  0xa0   : > { %v1048_v23 = vsel %vm7596_vm5, %v816_v63, %v1047_v12  ;;  %1046 = vst.msk [vmem:[#allocation2 + $0x70] sm:$0xf] %vm270_vm1, %v815_v41  ;;  %7017 = vmatprep.mubr.msk.bf16.mxu0 %vm1585_vm10, %v6366_v15  ;;  %v520_v59 = vadd.f32 %v7994_v11, %v481_v50  ;;  %317 = vst [vmem:[#allocation2 + $0x84] sm:$0x1] %v316_v25  ;;  %v372_v47 = vsel %vm7604_vm6, 0, %v371_v46  ;;  %v6655_v62 = vunpack.c.l.bf16 %v6686_v24 }
  0xa1   : > { %v482_v54 = vmul.f32 %v8033_v30, %v9695_v8  ;;  %6863 = vmatprep.mubr.msk.bf16.mxu1 %vm1585_vm10, %v6178_v34  ;;  %1049 = vst [vmem:[#allocation2 + $0x74] sm:$0x1] %v1048_v23  ;;  %v6656_v39 = vunpack.c.h.bf16 %v6686_v24  ;;  %373 = vst [vmem:[#allocation2 + $0x8c] sm:$0x1] %v372_v47  ;;  %v6351_v40 = vrot.slane %v3634_v56, 9  ;;  %v3712_v28 = vrot.slane %v7868_v27, 5 }
  0xa2   : > { %v3715_v57 = vrot.slane %v7870_v13, 5  ;;  %v552_v1 = vmax.f32 %v520_v59, 0.0  ;;  %v483_v55 = vmul.f32 %v8033_v30, %v6655_v62  ;;  %v6352_v22 = vrot.slane %v3635_v29, 9  ;;  %v8171_v13 = vld [vmem:[%s7618_s30 + $0x58] sm:$0xff]  }
  0xa3   : > { %v521_v44 = vadd.f32 %v7994_v11, %v482_v54  ;;  %v484_v38 = vmul.f32 %v8033_v30, %v6656_v39  ;;  %v3713_v10 = vsel %vm8067_vm3, %v6351_v40, %v3712_v28  ;;  %v3714_v17 = vrot.slane %v3712_v28, 4 }
  0xa4   : > { %v1117_v21 = vld [vmem:[#allocation2 + $0x6c] sm:$0xf]  ;;  %v3719_v9 = vrot.slane %v7905_v4, 5  ;;  %v6567_v14 = vpack.c.bf16 %v552_v1, %v552_v1  ;;  %v522_v27 = vadd.f32 %v7994_v11, %v483_v55  ;;  %v6659_v50 = vunpack.c.l.bf16 %v8171_v13 }
  0xa5   : > { %v553_v58 = vmax.f32 %v521_v44, 0.0  ;;  %v1368_v20 = vshrl.u32 %v1117_v21, 16  ;;  %v1371_v15 = vshll.u32 %v1117_v21, 16  ;;  %v523_v12 = vadd.f32 %v7994_v11, %v484_v38  ;;  %v1050_v29 = vld [vmem:[#allocation2 + $0x78] sm:$0xf] }
  0xa6   : > { %v3716_v52 = vsel %vm8067_vm3, %v3714_v17, %v3715_v57  ;;  %v8178_v36 = vsel %vm8067_vm3, %v6352_v22, %v3719_v9  ;;  %v818_v4 = vshrl.u32 %v6567_v14, 16  ;;  %v821_v31 = vshll.u32 %v6567_v14, 16  ;;  %v1054_v40 = vld [vmem:[#allocation2 + $0x80] sm:$0x1]  ;;  %v318_v38 = vld [vmem:[#allocation2 + $0x90] sm:$0x1] }
  0xa7   : > { %v6568_v18 = vpack.c.bf16 %v553_v58, %v553_v58  ;;  %v1370_v45 = vrot.slane %v1368_v20, 4  ;;  %v1373_v49 = vrot.slane %v1371_v15, 5  ;;  %v1118_v63 = vld [vmem:[#allocation2 + $0x70] sm:$0xf]  ;;  %7018 = vmatmul.mubr.msk.bf16.vlgmr.msra.gmra.mrb[0].mxu0 %vm1585_vm10, %v6367_v53  ;;  %v6368_v42 = vcombine.low %v3713_v10, %v3716_v52  ;;  %v374_v10 = vld [vmem:[#allocation2 + $0x98] sm:$0x1] }
  0xa8   : > { %v1141_v46 = vld [vmem:[#allocation2 + $0x74] sm:$0x1]  ;;  %v1377_v41 = vshll.u32 %v1118_v63, 16  ;;  %v1381_v23 = vshrl.u32 %v1118_v63, 16  ;;  %7050 = vmatpush3.bf16.msra.mxu0 %v8131_v2  ;;  %v820_v54 = vrot.slane %v818_v4, 7  ;;  %v554_v59 = vmax.f32 %v522_v27, 0.0 }
  0xa9   : > { %v826_v24 = vshrl.u32 %v6568_v18, 16  ;;  %v829_v34 = vshll.u32 %v6568_v18, 16  ;;  %v1374_v56 = vor.u32 %v1373_v49, %v1370_v45  ;;  %v1387_v8 = vshll.u32 %v1141_v46, 16  ;;  %7021 = vmatprep.mubr.msk.bf16.mxu0 %vm1585_vm10, %v6368_v42  ;;  %7417 = vmatprep.subr.msk.bf16.mxu0 %vm1634_vm0, %v6431_v37  ;;  %v321_v45 = vld [vmem:[#allocation2 + $0x9c] sm:$0x1] }
  0xaa   : > { %v555_v47 = vmax.f32 %v523_v12, 0.0  ;;  %v1379_v62 = vrot.slane %v1377_v41, 5  ;;  %v1383_v39 = vrot.slane %v1381_v23, 4  ;;  %v823_v28 = vor.u32 %v821_v31, %v820_v54 }
  0xab   : > { %v828_v25 = vrot.slane %v826_v24, 7  ;;  %v1375_v53 = vrot.slane %v1374_v56, 4  ;;  %v1389_v44 = vrot.slane %v1387_v8, 5  ;;  %v824_v57 = vrot.slane %v820_v54, 4  ;;  %v1061_v56 = vld [vmem:[#allocation2 + $0x8c] sm:$0x1] }
  0xac   : > { %v1384_v22 = vor.u32 %v1383_v39, %v1379_v62  ;;  %v6569_v21 = vpack.c.bf16 %v554_v59, %v554_v59  ;;  %v6570_v58 = vpack.c.bf16 %v555_v47, %v555_v47  ;;  %v1051_v20 = vsel %vm7692_vm12, %v823_v28, %v1050_v29  ;;  %v6688_v54 = vld [vmem:[%s7618_s30 + $0x60] sm:$0xff]  }
  0xad   : > { %v831_v1 = vor.u32 %v829_v34, %v828_v25  ;;  %v833_v55 = vrot.slane %v828_v25, 4  ;;  %v1380_v2 = vsel %vm7686_vm11, %v1375_v53, %v1379_v62  ;;  %v3721_v14 = vrot.slane %v3719_v9, 4  ;;  %1052 = vst [vmem:[#allocation2 + $0x78] sm:$0xf] %v1051_v20  ;;  %v377_v34 = vld [vmem:[#allocation2 + $0xa4] sm:$0x1] }
  0xae   : > { %v1385_v27 = vrot.slane %v1384_v22, 4  ;;  %v835_v18 = vshrl.u32 %v6569_v21, 16  ;;  %v838_v12 = vshll.u32 %v6569_v21, 16  ;;  %v843_v52 = vshrl.u32 %v6570_v58, 16  ;;  %v8212_v53 = vld [vmem:[%s7618_s30 + $0x68] sm:$0xff]  }
  0xaf   : > { %v832_v17 = vsel %vm7700_vm13, %v824_v57, %v831_v1  ;;  %v1055_v15 = vsel %vm7596_vm5, %v833_v55, %v1054_v40  ;;  %v846_v49 = vshll.u32 %v6570_v58, 16  ;;  %v3722_v4 = vrot.slane %v7907_v6, 5  ;;  %v1057_v6 = vld [vmem:[#allocation2 + $0x84] sm:$0xf] }
  0xb0   : > { %1053 = vst.msk [vmem:[#allocation2 + $0x7c] sm:$0xf] %vm270_vm1, %v832_v17  ;;  %1056 = vst [vmem:[#allocation2 + $0x80] sm:$0x1] %v1055_v15  ;;  %v319_v31 = vsel %vm7596_vm5, 0, %v318_v38  ;;  %v375_v37 = vsel %vm7604_vm6, 0, %v374_v10  ;;  %v1390_v9 = vsel %vm7686_vm11, %v1385_v27, %v1389_v44  ;;  %v6660_v24 = vunpack.c.h.bf16 %v8171_v13 }
  0xb1   : > { %v837_v63 = vrot.slane %v835_v18, 7  ;;  %v845_v46 = vrot.slane %v843_v52, 7  ;;  %320 = vst [vmem:[#allocation2 + $0x90] sm:$0x1] %v319_v31  ;;  %376 = vst [vmem:[#allocation2 + $0x98] sm:$0x1] %v375_v37  ;;  %v6179_v42 = vcombine.low %v1380_v2, %v1390_v9  ;;  %v3723_v41 = vsel %vm8067_vm3, %v3721_v14, %v3722_v4 }
  0xb2   : > { %v485_v23 = vmul.f32 %v8033_v30, %v6659_v50  ;;  %v322_v8 = vsel %vm7596_vm5, 0, %v321_v45  ;;  %v6369_v13 = vcombine.low %v8178_v36, %v3723_v41  ;;  %v486_v62 = vmul.f32 %v8033_v30, %v6660_v24 }
  0xb3   : > { %v840_v25 = vor.u32 %v838_v12, %v837_v63  ;;  %v841_v29 = vrot.slane %v837_v63, 4  ;;  %v848_v59 = vor.u32 %v846_v49, %v845_v46  ;;  %v850_v47 = vrot.slane %v845_v46, 4  ;;  %323 = vst [vmem:[#allocation2 + $0x9c] sm:$0x1] %v322_v8  ;;  %6864 = vmatmul.mubr.msk.bf16.gmra.mrb[16].mxu1 %vm1585_vm10, %v6179_v42  ;;  %v3636_v12 = vld [vmem:[#allocation2 + $0x3c] sm:$0xe] }
  0xb4   : > { %v524_v39 = vadd.f32 %v7994_v11, %v485_v23  ;;  %v378_v50 = vsel %vm7604_vm6, 0, %v377_v34  ;;  %v6663_v57 = vunpack.c.l.bf16 %v6688_v54  ;;  %v8226_v1 = vld [vmem:[#allocation2 + $0x78] sm:$0xf]  ;;  %7022 = vmatmul.mubr.msk.bf16.gmra.mrb[4].mxu0 %vm1585_vm10, %v6369_v13  ;;  %v525_v38 = vadd.f32 %v7994_v11, %v486_v62 }
  0xb5   : > { %v849_v44 = vsel %vm7700_vm13, %v841_v29, %v848_v59  ;;  %v1058_v40 = vsel %vm7692_vm12, %v840_v25, %v1057_v6  ;;  %v1062_v28 = vsel %vm7596_vm5, %v850_v47, %v1061_v56  ;;  %379 = vst [vmem:[#allocation2 + $0xa4] sm:$0x1] %v378_v50  ;;  %v6664_v2 = vunpack.c.h.bf16 %v6688_v54 }
  0xb6   : > { %1059 = vst [vmem:[#allocation2 + $0x84] sm:$0xf] %v1058_v40  ;;  %1060 = vst.msk [vmem:[#allocation2 + $0x88] sm:$0xf] %vm270_vm1, %v849_v44  ;;  %v6667_v22 = vunpack.c.l.bf16 %v8212_v53  ;;  %v6668_v21 = vunpack.c.h.bf16 %v8212_v53  ;;  %v1392_v58 = vshrl.u32 %v8226_v1, 16  ;;  %v1395_v10 = vshll.u32 %v8226_v1, 16 }
  0xb7   : > { %v8228_v36 = vld [vmem:[#allocation2 + $0x7c] sm:$0xf]  ;;  %v1142_v55 = vld [vmem:[#allocation2 + $0x80] sm:$0x1]  ;;  %1063 = vst [vmem:[#allocation2 + $0x8c] sm:$0x1] %v1062_v28  ;;  %v487_v18 = vmul.f32 %v8033_v30, %v6663_v57  ;;  %v488_v63 = vmul.f32 %v8033_v30, %v6664_v2 }
  0xb8   : > { %v1401_v17 = vshll.u32 %v8228_v36, 16  ;;  %v1405_v20 = vshrl.u32 %v8228_v36, 16  ;;  %v1411_v15 = vshll.u32 %v1142_v55, 16  ;;  %v556_v14 = vmax.f32 %v524_v39, 0.0 }
  0xb9   : > { %v557_v27 = vmax.f32 %v525_v38, 0.0  ;;  %v1394_v52 = vrot.slane %v1392_v58, 4  ;;  %v1397_v45 = vrot.slane %v1395_v10, 5  ;;  %v526_v34 = vadd.f32 %v7994_v11, %v487_v18  ;;  %v1064_v10 = vld [vmem:[#allocation2 + $0x90] sm:$0xf] }
  0xba   : > { %v1403_v49 = vrot.slane %v1401_v17, 5  ;;  %v1407_v4 = vrot.slane %v1405_v20, 4  ;;  %v1413_v31 = vrot.slane %v1411_v15, 5  ;;  %v6571_v37 = vpack.c.bf16 %v556_v14, %v556_v14 }
  0xbb   : > { %v6572_v9 = vpack.c.bf16 %v557_v27, %v557_v27  ;;  %v1398_v46 = vor.u32 %v1397_v45, %v1394_v52  ;;  %v6353_v42 = vrot.slane %v3636_v12, 9  ;;  %v527_v59 = vadd.f32 %v7994_v11, %v488_v63 }
  0xbc   : > { %v1408_v24 = vor.u32 %v1407_v4, %v1403_v49  ;;  %v852_v6 = vshrl.u32 %v6571_v37, 16  ;;  %v855_v56 = vshll.u32 %v6571_v37, 16  ;;  %v8248_v47 = vmul.f32 %v8033_v30, %v6667_v22  ;;  %v1068_v4 = vld [vmem:[#allocation2 + $0x98] sm:$0x1] }
  0xbd   : > { %v860_v41 = vshrl.u32 %v6572_v9, 16  ;;  %v863_v23 = vshll.u32 %v6572_v9, 16  ;;  %v1399_v8 = vrot.slane %v1398_v46, 4  ;;  %v8242_v25 = vld [vmem:[#allocation2 + $0x84] sm:$0xf]  ;;  %v558_v12 = vmax.f32 %v526_v34, 0.0 }
  0xbe   : > { %v1409_v54 = vrot.slane %v1408_v24, 4  ;;  %v8244_v29 = vld [vmem:[#allocation2 + $0x88] sm:$0xf]  ;;  %v1143_v13 = vld [vmem:[#allocation2 + $0x8c] sm:$0x1]  ;;  %v1416_v62 = vshrl.u32 %v8242_v25, 16 }
  0xbf   : > { %v1419_v39 = vshll.u32 %v8242_v25, 16  ;;  %v1425_v50 = vshll.u32 %v8244_v29, 16  ;;  %v1429_v44 = vshrl.u32 %v8244_v29, 16  ;;  %v1404_v40 = vsel %vm7686_vm11, %v1399_v8, %v1403_v49  ;;  %v3637_v8 = vld [vmem:[#allocation2 + $0x48] sm:$0xe] }
  0xc0   : > { %v1414_v28 = vsel %vm7686_vm11, %v1409_v54, %v1413_v31  ;;  %v1435_v57 = vshll.u32 %v1143_v13, 16  ;;  %v854_v55 = vrot.slane %v852_v6, 7  ;;  %v1418_v2 = vrot.slane %v1416_v62, 4  ;;  %v324_v54 = vld [vmem:[#allocation2 + $0xa8] sm:$0x1] }
  0xc1   : > { %v6180_v38 = vcombine.low %v1404_v40, %v1414_v28  ;;  %v1421_v22 = vrot.slane %v1419_v39, 5  ;;  %v1427_v58 = vrot.slane %v1425_v50, 5  ;;  %v1431_v17 = vrot.slane %v1429_v44, 4  ;;  %v380_v13 = vld [vmem:[#allocation2 + $0xb0] sm:$0x1] }
  0xc2   : > { %v1437_v20 = vrot.slane %v1435_v57, 5  ;;  %v857_v15 = vor.u32 %v855_v56, %v854_v55  ;;  %v858_v14 = vrot.slane %v854_v55, 4  ;;  %v862_v18 = vrot.slane %v860_v41, 7 }
  0xc3   : > { %6867 = vmatprep.mubr.msk.bf16.mxu1 %vm1585_vm10, %v6180_v38  ;;  %v1422_v27 = vor.u32 %v1421_v22, %v1418_v2  ;;  %v559_v52 = vmax.f32 %v527_v59, 0.0  ;;  %v1432_v45 = vor.u32 %v1431_v17, %v1427_v58  ;;  %v3726_v31 = vrot.slane %v7945_v35, 5  ;;  %v1071_v38 = vld [vmem:[#allocation2 + $0x9c] sm:$0xf] }
  0xc4   : > { %v1065_v49 = vsel %vm7692_vm12, %v857_v15, %v1064_v10  ;;  %v3729_v37 = vrot.slane %v7953_v0, 5  ;;  %v865_v63 = vor.u32 %v863_v23, %v862_v18  ;;  %v867_v46 = vrot.slane %v862_v18, 4 }
  0xc5   : > { %v1423_v9 = vrot.slane %v1422_v27, 4  ;;  %1066 = vst [vmem:[#allocation2 + $0x90] sm:$0xf] %v1065_v49  ;;  %v6573_v24 = vpack.c.bf16 %v558_v12, %v558_v12  ;;  %v1433_v6 = vrot.slane %v1432_v45, 4  ;;  %v6574_v56 = vpack.c.bf16 %v559_v52, %v559_v52 }
  0xc6   : > { %v3727_v34 = vsel %vm8067_vm3, %v6353_v42, %v3726_v31  ;;  %v3728_v41 = vrot.slane %v3726_v31, 4  ;;  %v866_v35 = vsel %vm7700_vm13, %v858_v14, %v865_v63  ;;  %v1069_v0 = vsel %vm7596_vm5, %v867_v46, %v1068_v4  ;;  %v327_v46 = vld [vmem:[#allocation2 + $0xb4] sm:$0x1] }
  0xc7   : > { %v1428_v59 = vsel %vm7686_vm11, %v1423_v9, %v1427_v58  ;;  %v869_v23 = vshrl.u32 %v6573_v24, 16  ;;  %v1438_v62 = vsel %vm7686_vm11, %v1433_v6, %v1437_v20  ;;  %1067 = vst.msk [vmem:[#allocation2 + $0x94] sm:$0xf] %vm270_vm1, %v866_v35  ;;  %1070 = vst [vmem:[#allocation2 + $0x98] sm:$0x1] %v1069_v0  ;;  %v872_v42 = vshll.u32 %v6573_v24, 16 }
  0xc8   : > { %v877_v39 = vshrl.u32 %v6574_v56, 16  ;;  %v880_v50 = vshll.u32 %v6574_v56, 16  ;;  %v6181_v44 = vcombine.low %v1428_v59, %v1438_v62  ;;  %v3730_v28 = vsel %vm8067_vm3, %v3728_v41, %v3729_v37  ;;  %v1075_v20 = vld [vmem:[#allocation2 + $0xa4] sm:$0x1]  ;;  %v383_v24 = vld [vmem:[#allocation2 + $0xbc] sm:$0x1] }
  0xc9   : > { %v871_v40 = vrot.slane %v869_v23, 7  ;;  %v6354_v57 = vrot.slane %v3637_v8, 9  ;;  %v6370_v2 = vcombine.low %v3727_v34, %v3730_v28  ;;  %v3733_v22 = vrot.slane %v7986_v19, 5 }
  0xca   : > { %v879_v55 = vrot.slane %v877_v39, 7  ;;  %v3736_v58 = vrot.slane %v7998_v43, 5  ;;  %6868 = vmatmul.mubr.msk.bf16.gmra.mrb[20].mxu1 %vm1585_vm10, %v6181_v44  ;;  %v325_v15 = vsel %vm7596_vm5, 0, %v324_v54  ;;  %v381_v14 = vsel %vm7604_vm6, 0, %v380_v13 }
  0xcb   : > { %v874_v10 = vor.u32 %v872_v42, %v871_v40  ;;  %v875_v17 = vrot.slane %v871_v40, 4  ;;  %7025 = vmatprep.mubr.msk.bf16.mxu0 %vm1585_vm10, %v6370_v2  ;;  %v3734_v19 = vsel %vm8067_vm3, %v6354_v57, %v3733_v22  ;;  %v3735_v43 = vrot.slane %v3733_v22, 4  ;;  %326 = vst [vmem:[#allocation2 + $0xa8] sm:$0x1] %v325_v15  ;;  %382 = vst [vmem:[#allocation2 + $0xb0] sm:$0x1] %v381_v14 }
  0xcc   : > { %v8283_v27 = vld [vmem:[#allocation2 + $0x90] sm:$0xf]  ;;  %v882_v18 = vor.u32 %v880_v50, %v879_v55  ;;  %v884_v12 = vrot.slane %v879_v55, 4  ;;  %v490_v4 = vmul.f32 %v8033_v30, %v6668_v21  ;;  %v528_v63 = vadd.f32 %v7994_v11, %v8248_v47  ;;  %v3638_v50 = vld [vmem:[#allocation2 + $0x54] sm:$0xe] }
  0xcd   : > { %v1440_v52 = vshrl.u32 %v8283_v27, 16  ;;  %v1443_v45 = vshll.u32 %v8283_v27, 16  ;;  %v1072_v49 = vsel %vm7692_vm12, %v874_v10, %v1071_v38  ;;  %v3737_v9 = vsel %vm8067_vm3, %v3735_v43, %v3736_v58  ;;  %v6690_v47 = vld [vmem:[%s7618_s30 + $0x70] sm:$0xff]  }
  0xce   : > { %v883_v31 = vsel %vm7700_vm13, %v875_v17, %v882_v18  ;;  %1073 = vst [vmem:[#allocation2 + $0x9c] sm:$0xf] %v1072_v49  ;;  %v1076_v37 = vsel %vm7596_vm5, %v884_v12, %v1075_v20  ;;  %v8303_v6 = vld [vmem:[#allocation2 + $0x94] sm:$0xf]  ;;  %v1144_v53 = vld [vmem:[#allocation2 + $0x98] sm:$0x1]  ;;  %v6371_v34 = vcombine.low %v3734_v19, %v3737_v9  ;;  %v529_v41 = vadd.f32 %v7994_v11, %v490_v4 }
  0xcf   : > { %v1442_v21 = vrot.slane %v1440_v52, 4  ;;  %v1445_v56 = vrot.slane %v1443_v45, 5  ;;  %1074 = vst.msk [vmem:[#allocation2 + $0xa0] sm:$0xf] %vm270_vm1, %v883_v31  ;;  %1077 = vst [vmem:[#allocation2 + $0xa4] sm:$0x1] %v1076_v37  ;;  %v6671_v28 = vunpack.c.l.bf16 %v6690_v47  ;;  %v6672_v57 = vunpack.c.h.bf16 %v6690_v47 }
  0xd0   : > { %v1449_v8 = vshll.u32 %v8303_v6, 16  ;;  %v1453_v54 = vshrl.u32 %v8303_v6, 16  ;;  %v1459_v59 = vshll.u32 %v1144_v53, 16  ;;  %v560_v35 = vmax.f32 %v528_v63, 0.0  ;;  %7026 = vmatmul.mubr.msk.bf16.gmra.mrb[8].mxu0 %vm1585_vm10, %v6371_v34 }
  0xd1   : > { %v1446_v0 = vor.u32 %v1445_v56, %v1442_v21  ;;  %v561_v23 = vmax.f32 %v529_v41, 0.0  ;;  %v328_v13 = vsel %vm7596_vm5, 0, %v327_v46  ;;  %v384_v62 = vsel %vm7604_vm6, 0, %v383_v24 }
  0xd2   : > { %v1451_v42 = vrot.slane %v1449_v8, 5  ;;  %v1455_v39 = vrot.slane %v1453_v54, 4  ;;  %v6575_v11 = vpack.c.bf16 %v560_v35, %v560_v35  ;;  %329 = vst [vmem:[#allocation2 + $0xb4] sm:$0x1] %v328_v13  ;;  %385 = vst [vmem:[#allocation2 + $0xbc] sm:$0x1] %v384_v62  ;;  %v491_v43 = vmul.f32 %v8033_v30, %v6671_v28 }
  0xd3   : > { %v1447_v44 = vrot.slane %v1446_v0, 4  ;;  %v6576_v40 = vpack.c.bf16 %v561_v23, %v561_v23  ;;  %v1461_v38 = vrot.slane %v1459_v59, 5  ;;  %v6355_v15 = vrot.slane %v3638_v50, 9  ;;  %v1078_v34 = vld [vmem:[#allocation2 + $0xa8] sm:$0xf] }
  0xd4   : > { %v1456_v55 = vor.u32 %v1455_v39, %v1451_v42  ;;  %v886_v2 = vshrl.u32 %v6575_v11, 16  ;;  %v889_v22 = vshll.u32 %v6575_v11, 16  ;;  %v492_v52 = vmul.f32 %v8033_v30, %v6672_v57  ;;  %v1082_v59 = vld [vmem:[#allocation2 + $0xb0] sm:$0x1]  ;;  %v8333_v23 = vld [vmem:[%s9663_s3] ss:$0 sm:$0xff] }
  0xd5   : > { %v1452_v58 = vsel %vm7686_vm11, %v1447_v44, %v1451_v42  ;;  %v8317_v10 = vld [vmem:[#allocation2 + $0x9c] sm:$0xf]  ;;  %v894_v17 = vshrl.u32 %v6576_v40, 16  ;;  %v897_v20 = vshll.u32 %v6576_v40, 16  ;;  %v530_v13 = vadd.f32 %v8333_v23, %v491_v43  ;;  %v3639_v50 = vld [vmem:[#allocation2 + $0x60] sm:$0xe] }
  0xd6   : > { %v1457_v14 = vrot.slane %v1456_v55, 4  ;;  %v8319_v18 = vld [vmem:[#allocation2 + $0xa0] sm:$0xf]  ;;  %v1145_v12 = vld [vmem:[#allocation2 + $0xa4] sm:$0x1]  ;;  %v1464_v19 = vshrl.u32 %v8317_v10, 16  ;;  %v531_v39 = vadd.f32 %v8333_v23, %v492_v52 }
  0xd7   : > { %v1467_v45 = vshll.u32 %v8317_v10, 16  ;;  %v1473_v49 = vshll.u32 %v8319_v18, 16  ;;  %v1477_v4 = vshrl.u32 %v8319_v18, 16  ;;  %v1483_v31 = vshll.u32 %v1145_v12, 16  ;;  %v3640_v52 = vld [vmem:[#allocation2 + $0x6c] sm:$0xe] }
  0xd8   : > { %v1462_v37 = vsel %vm7686_vm11, %v1457_v14, %v1461_v38  ;;  %v1466_v9 = vrot.slane %v1464_v19, 4  ;;  %v888_v63 = vrot.slane %v886_v2, 7  ;;  %v896_v46 = vrot.slane %v894_v17, 7 }
  0xd9   : > { %v6182_v24 = vcombine.low %v1452_v58, %v1462_v37  ;;  %v1469_v53 = vrot.slane %v1467_v45, 5  ;;  %v1475_v21 = vrot.slane %v1473_v49, 5  ;;  %v1479_v56 = vrot.slane %v1477_v4, 4  ;;  %v2931_v49 = vld [vmem:[#allocation2 + $0x70] sm:$0xf] }
  0xda   : > { %v1485_v41 = vrot.slane %v1483_v31, 5  ;;  %v891_v30 = vor.u32 %v889_v22, %v888_v63  ;;  %v892_v8 = vrot.slane %v888_v63, 4  ;;  %v899_v54 = vor.u32 %v897_v20, %v896_v46 }
  0xdb   : > { %6871 = vmatprep.mubr.msk.bf16.mxu1 %vm1585_vm10, %v6182_v24  ;;  %v1470_v35 = vor.u32 %v1469_v53, %v1466_v9  ;;  %v1480_v47 = vor.u32 %v1479_v56, %v1475_v21  ;;  %v901_v0 = vrot.slane %v896_v46, 4  ;;  %v3740_v11 = vrot.slane %v8043_v51, 5  ;;  %v1085_v46 = vld [vmem:[#allocation2 + $0xb4] sm:$0xf] }
  0xdc   : > { %v900_v62 = vsel %vm7700_vm13, %v892_v8, %v899_v54  ;;  %v1079_v42 = vsel %vm7692_vm12, %v891_v30, %v1078_v34  ;;  %v562_v57 = vmax.f32 %v530_v13, 0.0  ;;  %v563_v55 = vmax.f32 %v531_v39, 0.0  ;;  %v2932_v24 = vld [vmem:[#allocation2 + $0x74] sm:$0x1] }
  0xdd   : > { %v1471_v44 = vrot.slane %v1470_v35, 4  ;;  %v1481_v40 = vrot.slane %v1480_v47, 4  ;;  %1080 = vst [vmem:[#allocation2 + $0xa8] sm:$0xf] %v1079_v42  ;;  %1081 = vst.msk [vmem:[#allocation2 + $0xac] sm:$0xf] %vm270_vm1, %v900_v62  ;;  %v1083_v28 = vsel %vm7596_vm5, %v901_v0, %v1082_v59  ;;  %v3741_v38 = vsel %vm8067_vm3, %v6355_v15, %v3740_v11 }
  0xde   : > { %1084 = vst [vmem:[#allocation2 + $0xb0] sm:$0x1] %v1083_v28  ;;  %v3742_v2 = vrot.slane %v3740_v11, 4  ;;  %v3743_v22 = vrot.slane %v8050_v32, 5  ;;  %v6577_v17 = vpack.c.bf16 %v562_v57, %v562_v57  ;;  %v6356_v20 = vrot.slane %v3639_v50, 9 }
  0xdf   : > { %v1476_v51 = vsel %vm7686_vm11, %v1471_v44, %v1475_v21  ;;  %v1486_v58 = vsel %vm7686_vm11, %v1481_v40, %v1485_v41  ;;  %v6578_v12 = vpack.c.bf16 %v563_v55, %v563_v55  ;;  %v3747_v43 = vrot.slane %v8093_v60, 5  ;;  %v1089_v44 = vld [vmem:[#allocation2 + $0xbc] sm:$0x1] }
  0xe0   : > { %v6183_v14 = vcombine.low %v1476_v51, %v1486_v58  ;;  %v3744_v19 = vsel %vm8067_vm3, %v3742_v2, %v3743_v22  ;;  %v903_v15 = vshrl.u32 %v6577_v17, 16  ;;  %v3750_v32 = vrot.slane %v8097_v61, 5  ;;  %v8378_v58 = vld [vmem:[#allocation2 + $0x7c] sm:$0xf] }
  0xe1   : > { %v6372_v45 = vcombine.low %v3741_v38, %v3744_v19  ;;  %v906_v4 = vshll.u32 %v6577_v17, 16  ;;  %v911_v31 = vshrl.u32 %v6578_v12, 16  ;;  %v914_v37 = vshll.u32 %v6578_v12, 16  ;;  %v3641_v17 = vld [vmem:[#allocation2 + $0x78] sm:$0xe] }
  0xe2   : > { %6872 = vmatmul.mubr.msk.bf16.gmra.mrb[24].mxu1 %vm1585_vm10, %v6183_v14  ;;  %v3749_v9 = vrot.slane %v3747_v43, 4  ;;  %v905_v63 = vrot.slane %v903_v15, 7  ;;  %v6357_v53 = vrot.slane %v3640_v52, 9  ;;  %v3748_v61 = vsel %vm8067_vm3, %v6356_v20, %v3747_v43  ;;  %v8387_v15 = vld [vmem:[#allocation2 + $0x80] sm:$0x1] }
  0xe3   : > { %7029 = vmatprep.mubr.msk.bf16.mxu0 %vm1585_vm10, %v6372_v45  ;;  %v913_v56 = vrot.slane %v911_v31, 7  ;;  %v3754_v41 = vrot.slane %v2931_v49, 5  ;;  %v3757_v55 = vrot.slane %v2932_v24, 5  ;;  %v6358_v45 = vrot.slane %v3641_v17, 9  ;;  %v3642_v49 = vld [vmem:[#allocation2 + $0x84] sm:$0xe] }
  0xe4   : > { %v8358_v21 = vld [vmem:[#allocation2 + $0xa8] sm:$0xf]  ;;  %v8360_v60 = vld [vmem:[#allocation2 + $0xac] sm:$0xf]  ;;  %v3751_v34 = vsel %vm8067_vm3, %v3749_v9, %v3750_v32  ;;  %v908_v0 = vor.u32 %v906_v4, %v905_v63  ;;  %v909_v13 = vrot.slane %v905_v63, 4  ;;  %v3761_v32 = vrot.slane %v8378_v58, 5 }
  0xe5   : > { %v8366_v30 = vld [vmem:[#allocation2 + $0xb0] sm:$0x1]  ;;  %v1488_v8 = vshrl.u32 %v8358_v21, 16  ;;  %v1491_v54 = vshll.u32 %v8358_v21, 16  ;;  %v1497_v59 = vshll.u32 %v8360_v60, 16  ;;  %v1501_v35 = vshrl.u32 %v8360_v60, 16 }
  0xe6   : > { %v1507_v47 = vshll.u32 %v8366_v30, 16  ;;  %v916_v62 = vor.u32 %v914_v37, %v913_v56  ;;  %v918_v28 = vrot.slane %v913_v56, 4  ;;  %v1086_v57 = vsel %vm7692_vm12, %v908_v0, %v1085_v46  ;;  %v2937_v9 = vld [vmem:[#allocation2 + $0x88] sm:$0xf]  ;;  %v2938_v63 = vld [vmem:[#allocation2 + $0x8c] sm:$0x1] }
  0xe7   : > { %v1490_v42 = vrot.slane %v1488_v8, 4  ;;  %v1493_v39 = vrot.slane %v1491_v54, 5  ;;  %v1499_v11 = vrot.slane %v1497_v59, 5  ;;  %v1503_v50 = vrot.slane %v1501_v35, 4  ;;  %1087 = vst [vmem:[#allocation2 + $0xb4] sm:$0xf] %v1086_v57 }
  0xe8   : > { %v917_v40 = vsel %vm7700_vm13, %v909_v13, %v916_v62  ;;  %v1509_v22 = vrot.slane %v1507_v47, 5  ;;  %v6373_v51 = vcombine.low %v3748_v61, %v3751_v34  ;;  %v1090_v20 = vsel %vm7596_vm5, %v918_v28, %v1089_v44  ;;  %v3643_v61 = vld [vmem:[#allocation2 + $0x90] sm:$0xe]  ;;  %v2940_v35 = vld [vmem:[#allocation2 + $0x94] sm:$0xf] }
  0xe9   : > { %v1494_v38 = vor.u32 %v1493_v39, %v1490_v42  ;;  %v1504_v2 = vor.u32 %v1503_v50, %v1499_v11  ;;  %1088 = vst.msk [vmem:[#allocation2 + $0xb8] sm:$0xf] %vm270_vm1, %v917_v40  ;;  %v3755_v14 = vsel %vm8067_vm3, %v6357_v53, %v3754_v41  ;;  %v3756_v12 = vrot.slane %v3754_v41, 4  ;;  %1091 = vst [vmem:[#allocation2 + $0xbc] sm:$0x1] %v1090_v20 }
  0xea   : > { %7030 = vmatmul.mubr.msk.bf16.gmra.mrb[12].mxu0 %vm1585_vm10, %v6373_v51  ;;  %v3763_v24 = vrot.slane %v3761_v32, 4  ;;  %v3764_v53 = vrot.slane %v8387_v15, 5  ;;  %v6359_v56 = vrot.slane %v3642_v49, 9  ;;  %v3762_v8 = vsel %vm8067_vm3, %v6358_v45, %v3761_v32  ;;  %v2941_v42 = vld [vmem:[#allocation2 + $0x98] sm:$0x1] }
  0xeb   : > { %v1495_v19 = vrot.slane %v1494_v38, 4  ;;  %v1505_v43 = vrot.slane %v1504_v2, 4  ;;  %v3758_v52 = vsel %vm8067_vm3, %v3756_v12, %v3757_v55  ;;  %v3768_v54 = vrot.slane %v2937_v9, 5  ;;  %v3644_v40 = vld [vmem:[#allocation2 + $0x9c] sm:$0xe] }
  0xec   : > { %v6374_v37 = vcombine.low %v3755_v14, %v3758_v52  ;;  %v3771_v59 = vrot.slane %v2938_v63, 5  ;;  %v2943_v2 = vld [vmem:[#allocation2 + $0xa0] sm:$0xf]  ;;  %v6360_v20 = vrot.slane %v3643_v61, 9  ;;  %v2944_v52 = vld [vmem:[#allocation2 + $0xa4] sm:$0x1] }
  0xed   : > { %v1500_v4 = vsel %vm7686_vm11, %v1495_v19, %v1499_v11  ;;  %v1510_v31 = vsel %vm7686_vm11, %v1505_v43, %v1509_v22  ;;  %v3765_v11 = vsel %vm8067_vm3, %v3763_v24, %v3764_v53  ;;  %v3769_v50 = vsel %vm8067_vm3, %v6359_v56, %v3768_v54  ;;  %v2947_v24 = vld [vmem:[#allocation2 + $0xb0] sm:$0x1]  ;;  %v8420_v53 = vld [vmem:[#allocation2 + $0x4] sm:$0xf]  ;;  %v7464_v56 = vld [vmem:[#allocation2] sm:$0xf] }
  0xee   : > { %v6184_v46 = vcombine.low %v1500_v4, %v1510_v31  ;;  %7033 = vmatprep.mubr.msk.bf16.mxu0 %vm1585_vm10, %v6374_v37  ;;  %v8397_v34 = vld [vmem:[#allocation2 + $0xb4] sm:$0xf]  ;;  %v3770_v44 = vrot.slane %v3768_v54, 4  ;;  %v6375_v51 = vcombine.low %v3762_v8, %v3765_v11  ;;  %v3775_v43 = vrot.slane %v2940_v35, 5  ;;  %v2946_v31 = vld [vmem:[#allocation2 + $0xac] sm:$0xf] }
  0xef   : > { %v1512_v47 = vshrl.u32 %v8397_v34, 16  ;;  %v1515_v0 = vshll.u32 %v8397_v34, 16  ;;  %v3778_v32 = vrot.slane %v2941_v42, 5  ;;  %v6361_v49 = vrot.slane %v3644_v40, 9  ;;  %v3645_v35 = vld [vmem:[#allocation2 + $0xa8] sm:$0xe] }
  0xf0   : > { %6875 = vmatprep.mubr.msk.bf16.mxu1 %vm1585_vm10, %v6184_v46  ;;  %v8399_v41 = vld [vmem:[#allocation2 + $0xb8] sm:$0xf]  ;;  %v8407_v39 = vld [vmem:[#allocation2 + $0xbc] sm:$0x1]  ;;  %v3772_v17 = vsel %vm8067_vm3, %v3770_v44, %v3771_v59  ;;  %v3782_v4 = vrot.slane %v2943_v2, 5  ;;  %v3776_v63 = vsel %vm8067_vm3, %v6360_v20, %v3775_v43  ;;  %v3777_v46 = vrot.slane %v3775_v43, 4 }
  0xf1   : > { %v1521_v13 = vshll.u32 %v8399_v41, 16  ;;  %v1525_v62 = vshrl.u32 %v8399_v41, 16  ;;  %v1514_v28 = vrot.slane %v1512_v47, 4  ;;  %v1517_v57 = vrot.slane %v1515_v0, 5  ;;  %v2949_v47 = vld [vmem:[#allocation2 + $0xb8] sm:$0xf] }
  0xf2   : > { %v1531_v22 = vshll.u32 %v8407_v39, 16  ;;  %v6376_v19 = vcombine.low %v3769_v50, %v3772_v17  ;;  %7034 = vmatmul.mubr.msk.bf16.gmra.mrb[16].mxu0 %vm1585_vm10, %v6375_v51  ;;  %v6202_v61 = vcombine.low %v7464_v56, %v8420_v53  ;;  %v3783_v8 = vsel %vm8067_vm3, %v6361_v49, %v3782_v4  ;;  %v2950_v11 = vld [vmem:[#allocation2 + $0xbc] sm:$0x1]  ;;  %v3646_v50 = vld [vmem:[#allocation2 + $0xb4] sm:$0xe] }
  0xf3   : > { %v1523_v55 = vrot.slane %v1521_v13, 5  ;;  %v1527_v38 = vrot.slane %v1525_v62, 4  ;;  %v1518_v14 = vor.u32 %v1517_v57, %v1514_v28  ;;  %v3784_v54 = vrot.slane %v3782_v4, 4  ;;  %v330_v57 = vld [vmem:[#allocation2 + $0xc0] sm:$0x1]  ;;  %v6691_v2 = vld [vmem:[%s7618_s30 + $0x78] sm:$0xff]  }
  0xf4   : > { %v1533_v45 = vrot.slane %v1531_v22, 5  ;;  %7037 = vmatprep.mubr.msk.bf16.mxu0 %vm1585_vm10, %v6376_v19  ;;  %v3785_v59 = vrot.slane %v2944_v52, 5  ;;  %v3779_v62 = vsel %vm8067_vm3, %v3777_v46, %v3778_v32  ;;  %v3789_v42 = vrot.slane %v2946_v31, 5  ;;  %v7465_v31 = vld [vmem:[%s9662_s2] ss:$0 sm:$0xff] }
  0xf5   : > { %v1528_v12 = vor.u32 %v1527_v38, %v1523_v55  ;;  %v1519_v37 = vrot.slane %v1518_v14, 4  ;;  %v6377_v40 = vcombine.low %v3776_v63, %v3779_v62  ;;  %v386_v38 = vld [vmem:[#allocation2 + $0xc8] sm:$0x1]  ;;  %v6362_v51 = vrot.slane %v3645_v35, 9  ;;  %v8449_v63 = vld [vmem:[#allocation2 + $0x10] sm:$0xf] }
  0xf6   : > { %v3786_v28 = vsel %vm8067_vm3, %v3784_v54, %v3785_v59  ;;  %v3792_v17 = vrot.slane %v2947_v24, 5  ;;  %v6363_v20 = vrot.slane %v3646_v50, 9  ;;  %v3796_v14 = vrot.slane %v2949_v47, 5  ;;  %v8456_v54 = vld [vmem:[#allocation2 + $0x1c] sm:$0xf] }
  0xf7   : > { %v1529_v9 = vrot.slane %v1528_v12, 4  ;;  %v1524_v0 = vsel %vm7686_vm11, %v1519_v37, %v1523_v55  ;;  %v6378_v22 = vcombine.low %v3783_v8, %v3786_v28  ;;  %v3791_v55 = vrot.slane %v3789_v42, 4  ;;  %v7468_v8 = vld [vmem:[#allocation2 + $0x18] sm:$0xf]  ;;  %v7470_v47 = vld [vmem:[%s9661_s1 + $0x8] sm:$0xf] }
  0xf8   : > { %v3799_v12 = vrot.slane %v2950_v11, 5  ;;  %v331_v19 = vsel %vm7596_vm5, 0, %v330_v57  ;;  %v387_v43 = vsel %vm7604_vm6, 0, %v386_v38  ;;  %v6675_v52 = vunpack.c.l.bf16 %v6691_v2  ;;  %v8468_v50 = vld [vmem:[%s9661_s1 + $0xc] sm:$0xf] }
  0xf9   : > { %v1534_v13 = vsel %vm7686_vm11, %v1529_v9, %v1533_v45  ;;  %v3798_v45 = vrot.slane %v3796_v14, 4  ;;  %332 = vst [vmem:[#allocation2 + $0xc0] sm:$0x1] %v331_v19  ;;  %388 = vst [vmem:[#allocation2 + $0xc8] sm:$0x1] %v387_v43  ;;  %v6676_v32 = vunpack.c.h.bf16 %v6691_v2  ;;  %v3790_v49 = vsel %vm8067_vm3, %v6362_v51, %v3789_v42 }
  0xfa   : > { %v6185_v44 = vcombine.low %v1524_v0, %v1534_v13  ;;  %7038 = vmatmul.mubr.msk.bf16.gmra.mrb[20].mxu0 %vm1585_vm10, %v6377_v40  ;;  %v3793_v4 = vsel %vm8067_vm3, %v3791_v55, %v3792_v17  ;;  %v493_v37 = vmul.f32 %v7465_v31, %v6675_v52  ;;  %v7466_v9 = vld [vmem:[#allocation2 + $0xc] sm:$0xf]  ;;  %v3797_v24 = vsel %vm8067_vm3, %v6363_v20, %v3796_v14  ;;  %v7471_v38 = vld [vmem:[#allocation2 + $0x24] sm:$0xf]  ;;  %v8476_v2 = vld [vmem:[#allocation2 + $0x28] sm:$0xf] }
  0xfb   : > { %7041 = vmatprep.mubr.msk.bf16.mxu0 %vm1585_vm10, %v6378_v22  ;;  %v6203_v46 = vcombine.low %v7466_v9, %v8449_v63  ;;  %v3800_v56 = vsel %vm8067_vm3, %v3798_v45, %v3799_v12  ;;  %v6204_v59 = vcombine.low %v7468_v8, %v8456_v54  ;;  %v2353_v0 = vsel %vm1634_vm0, %v7470_v47, 0  ;;  %v7473_v17 = vld [vmem:[#allocation2 + $0x30] sm:$0xf]  ;;  %v8479_v20 = vld [vmem:[#allocation2 + $0x34] sm:$0xf] }
  0xfc   : > { %6876 = vmatmul.mubr.msk.bf16.gmra.mrb[28].mxu1 %vm1585_vm10, %v6185_v44  ;;  %v532_v35 = vadd.f32 %v8333_v23, %v493_v37  ;;  %v6379_v13 = vcombine.low %v3790_v49, %v3793_v4  ;;  %v6380_v42 = vcombine.low %v3797_v24, %v3800_v56  ;;  %v6205_v22 = vcombine.low %v7471_v38, %v8476_v2  ;;  %v7475_v24 = vld [vmem:[#allocation2 + $0x3c] sm:$0xf]  ;;  %v8491_v56 = vld [vmem:[#allocation2 + $0x40] sm:$0xf] }
  0xfd   : > { %6881 = vmatprep.mubr.msk.bf16.mxu1 %vm1585_vm10, %v6202_v61  ;;  %v494_v61 = vmul.f32 %v7465_v31, %v6676_v32  ;;  %v6206_v14 = vcombine.low %v7473_v17, %v8479_v20  ;;  %v3180_v8 = vshll.u32 %v8378_v58, 16 }
  0xfe   : > { %v564_v11 = vmax.f32 %v532_v35, 0.0  ;;  %v3184_v35 = vshrl.u32 %v8378_v58, 16 }
  0xff   : > { %v533_v62 = vadd.f32 %v8333_v23, %v494_v61  ;;  %v6207_v61 = vcombine.low %v7475_v24, %v8491_v56 }
 0x100   : > { %v6579_v40 = vpack.c.bf16 %v564_v11, %v564_v11  ;;  %v1092_v43 = vld [vmem:[#allocation2 + $0xc0] sm:$0xf]  ;;  %v1096_v32 = vld [vmem:[#allocation2 + $0xc8] sm:$0x1] }
 0x101   : > { %v565_v44 = vmax.f32 %v533_v62, 0.0  ;;  %v3186_v62 = vrot.slane %v3184_v35, 4  ;;  %v6212_v35 = vcombine.low %v8226_v1, %v8228_v36 }
 0x102   : > { %7042 = vmatmul.mubr.msk.bf16.gmra.mrb[24].mxu0 %vm1585_vm10, %v6379_v13  ;;  %v920_v23 = vshrl.u32 %v6579_v40, 16  ;;  %v923_v57 = vshll.u32 %v6579_v40, 16 }
 0x103   : > { %v6580_v28 = vpack.c.bf16 %v565_v44, %v565_v44  ;;  %7045 = vmatprep.mubr.msk.bf16.mxu0 %vm1585_vm10, %v6380_v42 }
 0x104   : > { %6882 = vmatmul.mubr.msk.bf16.vlgmr.msra.gmra.mrb[0].mxu1 %vm1585_vm10, %v6203_v46  ;;  %v922_v12 = vrot.slane %v920_v23, 7  ;;  %v333_v46 = vld [vmem:[#allocation2 + $0xcc] sm:$0x1]  ;;  %v7479_v23 = vld [vmem:[#allocation2 + $0x54] sm:$0xf] }
 0x105   : > { %6914 = vmatpush3.bf16.msra.mxu1 %v2353_v0  ;;  %6885 = vmatprep.mubr.msk.bf16.mxu1 %vm1585_vm10, %v6204_v59  ;;  %v928_v51 = vshrl.u32 %v6580_v28, 16  ;;  %v931_v55 = vshll.u32 %v6580_v28, 16  ;;  %v8495_v59 = vld [vmem:[#allocation2 + $0x4c] sm:$0xf]  ;;  %v334_v47 = vsel %vm7596_vm5, 0, %v333_v46  ;;  %v8502_v0 = vrot.slane %v3180_v8, 5 }
 0x106   : > { %7412 = vmatprep.subr.msk.bf16.mxu1 %vm1634_vm0, %v8468_v50  ;;  %v925_v52 = vor.u32 %v923_v57, %v922_v12  ;;  %v926_v45 = vrot.slane %v922_v12, 4  ;;  %v6208_v33 = vcombine.low %v7477_v26, %v8495_v59  ;;  %335 = vst [vmem:[#allocation2 + $0xcc] sm:$0x1] %v334_v47  ;;  %v8505_v57 = vld [vmem:[#allocation2 + $0x58] sm:$0xf] }
 0x107   : > { %v930_v19 = vrot.slane %v928_v51, 7  ;;  %9696 = vst [vmem:[#allocation5_spill] sm:$0xff] %v8502_v0  ;;  %v6209_v5 = vcombine.low %v7479_v23, %v8505_v57  ;;  %v8510_v51 = vld [vmem:[#allocation2 + $0x64] sm:$0xf]  ;;  %v3187_v17 = vor.u32 %v3186_v62, %v8502_v0  ;;  %v7485_v8 = vld [vmem:[#allocation2 + $0x6c] sm:$0xf] }
 0x108   : > { %v1093_v31 = vsel %vm7692_vm12, %v925_v52, %v1092_v43  ;;  %v7483_v43 = vld [vmem:[#allocation2 + $0x8] sm:$0x1]  ;;  %v8528_v26 = vld [vmem:[#allocation2 + $0x70] sm:$0xf]  ;;  %v2094_v47 = vld [vmem:[#allocation2 + $0x24] sm:$0xe] }
 0x109   : > { %v933_v49 = vor.u32 %v931_v55, %v930_v19  ;;  %v935_v4 = vrot.slane %v930_v19, 4  ;;  %1094 = vst [vmem:[#allocation2 + $0xc0] sm:$0xf] %v1093_v31  ;;  %v7428_v19 = vld [vmem:[#allocation2 + $0x18] sm:$0xff]   ;;  %v2147_v52 = vrot.slane %v7483_v43, 5  ;;  %v8522_v46 = vrot.slane %v3187_v17, 4 }
 0x10a   : > { %v2092_v31 = vld [vmem:[#allocation2 + $0xc] sm:$0xe]  ;;  %v6237_v1 = vrot.slane %v2094_v47, 9  ;;  %v7430_v17 = vld [vmem:[#allocation2 + $0x30] sm:$0xff]   ;;  %v7490_v43 = vld [vmem:[#allocation2 + $0x38] sm:$0x1] }
 0x10b   : > { %v934_v37 = vsel %vm7700_vm13, %v926_v45, %v933_v49  ;;  %v1097_v9 = vsel %vm7596_vm5, %v935_v4, %v1096_v32  ;;  %v2151_v45 = vrot.slane %v8449_v63, 5  ;;  %v2091_v49 = vld [vmem:[#allocation2] sm:$0xe]  ;;  %v2144_v4 = vrot.slane %v8420_v53, 5  ;;  %9697 = vst [vmem:[#allocation6_spill] sm:$0xff] %v8522_v46 }
 0x10c   : > { %6886 = vmatmul.mubr.msk.bf16.gmra.mrb[4].mxu1 %vm1585_vm10, %v6205_v22  ;;  %1095 = vst.msk [vmem:[#allocation2 + $0xc4] sm:$0xf] %vm270_vm1, %v934_v37  ;;  %1098 = vst [vmem:[#allocation2 + $0xc8] sm:$0x1] %v1097_v9  ;;  %v7481_v22 = vld [vmem:[#allocation2 + $0x60] sm:$0xf] }
 0x10d   : > { %6889 = vmatprep.mubr.msk.bf16.mxu1 %vm1585_vm10, %v6206_v14  ;;  %v6210_v55 = vcombine.low %v7481_v22, %v8510_v51  ;;  %v3190_v14 = vshll.u32 %v8387_v15, 16  ;;  %v2158_v37 = vrot.slane %v8456_v54, 5  ;;  %v7484_v15 = vld [vmem:[#allocation2 + $0x14] sm:$0x1]  ;;  %v2093_v63 = vld [vmem:[#allocation2 + $0x18] sm:$0xe]  ;;  %v6214_v22 = vcombine.low %v8283_v27, %v8303_v6 }
 0x10e   : > { %v2154_v9 = vrot.slane %v7484_v15, 5  ;;  %v7487_v53 = vld [vmem:[%s9661_s1 + $0x1c] sm:$0xf]  ;;  %v6234_v62 = vrot.slane %v2091_v49, 9  ;;  %v4461_v49 = vld [vmem:[#allocation2 + $0x18] sm:$0xf] }
 0x10f   : > { %v8524_v24 = vrot.slane %v3190_v14, 5  ;;  %v4992_v54 = vsel %vm1634_vm0, %v7487_v53, 0  ;;  %v2160_v23 = vrot.slane %v2158_v37, 4  ;;  %v4462_v53 = vld [vmem:[#allocation2 + $0x1c] sm:$0xf]  ;;  %v2207_v27 = vrot.slane %v8528_v26, 5 }
 0x110   : > { %v3647_v13 = vld [vmem:[#allocation2 + $0xc0] sm:$0xe]  ;;  %v7494_v14 = vld [vmem:[#allocation2 + $0x68] sm:$0x1]  ;;  %v7495_v0 = vld [vmem:[#allocation2 + $0x74] sm:$0x1] }
 0x111   : > { %v6364_v44 = vrot.slane %v3647_v13, 9  ;;  %9698 = vst [vmem:[#allocation7_spill] sm:$0xff] %v8524_v24  ;;  %v2172_v13 = vrot.slane %v8479_v20, 5 }
 0x113   : > { %v2952_v42 = vld [vmem:[#allocation2 + $0xc4] sm:$0xf]  ;;  %v2953_v11 = vld [vmem:[#allocation2 + $0xc8] sm:$0x1] }
 0x114   : > { %6890 = vmatmul.mubr.msk.bf16.gmra.mrb[8].mxu1 %vm1585_vm10, %v6207_v61  ;;  %v3803_v40 = vrot.slane %v2952_v42, 5  ;;  %v3806_v28 = vrot.slane %v2953_v11, 5  ;;  %v2165_v61 = vrot.slane %v8476_v2, 5  ;;  %v6213_v2 = vcombine.low %v8242_v25, %v8244_v29  ;;  %v2099_v29 = vld [vmem:[#allocation2 + $0x60] sm:$0xe] }
 0x115   : > { %6893 = vmatprep.mubr.msk.bf16.mxu1 %vm1585_vm10, %v6208_v33  ;;  %v6211_v33 = vcombine.low %v7485_v8, %v8528_v26  ;;  %v6235_v42 = vrot.slane %v2092_v31, 9  ;;  %v2153_v11 = vrot.slane %v2151_v45, 4  ;;  %v2210_v26 = vrot.slane %v7495_v0, 5 }
 0x116   : > { %v3804_v58 = vsel %vm8067_vm3, %v6364_v44, %v3803_v40  ;;  %v3805_v38 = vrot.slane %v3803_v40, 4  ;;  %v2095_v44 = vld [vmem:[#allocation2 + $0x30] sm:$0xe]  ;;  %v2146_v40 = vrot.slane %v2144_v4, 4  ;;  %v2167_v36 = vrot.slane %v2165_v61, 4 }
 0x117   : > { %v8556_v8 = vsel %vm8067_vm3, %v6235_v42, %v2151_v45  ;;  %v8565_v47 = vsel %vm8067_vm3, %v2153_v11, %v2154_v9  ;;  %v8578_v45 = vld [vmem:[%s9661_s1 + $0x20] sm:$0xf] }
 0x118   : > { %v3807_v12 = vsel %vm8067_vm3, %v3805_v38, %v3806_v28  ;;  %v6236_v28 = vrot.slane %v2093_v63, 9  ;;  %v7429_v38 = vld [vmem:[#allocation2 + $0x24] sm:$0xff]   ;;  %v8552_v63 = vsel %vm8067_vm3, %v6234_v62, %v2144_v4  ;;  %v4513_v62 = vshll.u32 %v4461_v49, 16 }
 0x119   : > { %v6381_v32 = vcombine.low %v3804_v58, %v3807_v12  ;;  %v6238_v12 = vrot.slane %v2095_v44, 9 }
 0x11a   : > { %v8569_v44 = vsel %vm8067_vm3, %v6236_v28, %v2158_v37  ;;  %v2096_v37 = vld [vmem:[#allocation2 + $0x3c] sm:$0xe]  ;;  %v4523_v28 = vshrl.u32 %v4462_v53, 16 }
 0x11b   : > { %7046 = vmatmul.mubr.msk.bf16.gmra.mrb[28].mxu0 %vm1585_vm10, %v6381_v32  ;;  %v2175_v32 = vrot.slane %v7490_v43, 5  ;;  %v8592_v42 = vsel %vm8067_vm3, %v6238_v12, %v2172_v13  ;;  %v7431_v12 = vld [vmem:[#allocation2 + $0x3c] sm:$0xff]   ;;  %v2098_v43 = vld [vmem:[#allocation2 + $0x54] sm:$0xe] }
 0x11c   : > { %6894 = vmatmul.mubr.msk.bf16.gmra.mrb[12].mxu1 %vm1585_vm10, %v6209_v5  ;;  %7051 = vmatprep.mubr.msk.bf16.mxu0 %vm1585_vm10, %v7428_v19  ;;  %v7488_v5 = vld [vmem:[#allocation2 + $0x20] sm:$0x1]  ;;  %v2174_v19 = vrot.slane %v2172_v13, 4  ;;  %v2186_v13 = vrot.slane %v8495_v59, 5  ;;  %v6241_v25 = vrot.slane %v2098_v43, 9 }
 0x11d   : > { %6897 = vmatprep.mubr.msk.bf16.mxu1 %vm1585_vm10, %v6210_v55  ;;  %v2161_v58 = vrot.slane %v7488_v5, 5  ;;  %v7489_v55 = vld [vmem:[#allocation2 + $0x2c] sm:$0x1]  ;;  %v8606_v5 = vsel %vm1634_vm0, %v8468_v50, 0 }
 0x11e   : > { %v2168_v20 = vrot.slane %v7489_v55, 5  ;;  %v8596_v11 = vsel %vm8067_vm3, %v2174_v19, %v2175_v32  ;;  %v7491_v55 = vld [vmem:[#allocation2 + $0x44] sm:$0x1] }
 0x11f   : > { %v8573_v4 = vsel %vm8067_vm3, %v2160_v23, %v2161_v58  ;;  %v4464_v58 = vld [vmem:[#allocation2 + $0x24] sm:$0xf] }
 0x120   : > { %v8587_v9 = vsel %vm8067_vm3, %v2167_v36, %v2168_v20  ;;  %v2179_v36 = vrot.slane %v8491_v56, 5  ;;  %v2182_v20 = vrot.slane %v7491_v55, 5  ;;  %v4525_v56 = vrot.slane %v4523_v28, 4  ;;  %v4463_v55 = vld [vmem:[#allocation2 + $0x20] sm:$0x1] }
 0x121   : > { %v4534_v50 = vshrl.u32 %v4464_v58, 16  ;;  %v2200_v28 = vrot.slane %v8510_v51, 5  ;;  %v2203_v51 = vrot.slane %v7494_v14, 5  ;;  %v9699_v14 = vcombine.low %v8317_v10, %v8319_v18 }
 0x123   : > { %7052 = vmatmul.mubr.msk.bf16.vlgmr.msra.gmra.mrb[0].mxu0 %vm1585_vm10, %v7429_v38  ;;  %v2193_v38 = vrot.slane %v8505_v57, 5  ;;  %v2181_v57 = vrot.slane %v2179_v36, 4  ;;  %v4536_v43 = vrot.slane %v4534_v50, 4 }
 0x124   : > { %6898 = vmatmul.mubr.msk.bf16.gmra.mrb[16].mxu1 %vm1585_vm10, %v6211_v33  ;;  %v8561_v33 = vsel %vm8067_vm3, %v2146_v40, %v2147_v52  ;;  %v8583_v52 = vsel %vm8067_vm3, %v6237_v1, %v2165_v61  ;;  %7084 = vmatpush3.bf16.msra.mxu0 %v4992_v54  ;;  %v8598_v61 = vld [vmem:[#allocation2 + $0x48] sm:$0xe]  ;;  %v4519_v40 = vshll.u32 %v4462_v53, 16  ;;  %v6239_v1 = vrot.slane %v2096_v37, 9 }
 0x125   : > { %6901 = vmatprep.mubr.msk.bf16.mxu1 %vm1585_vm10, %v6212_v35  ;;  %v4510_v35 = vshrl.u32 %v4461_v49, 16  ;;  %7055 = vmatprep.mubr.msk.bf16.mxu0 %vm1585_vm10, %v7430_v17  ;;  %v4465_v17 = vld [vmem:[#allocation2 + $0x28] sm:$0xf]  ;;  %v6240_v19 = vrot.slane %v8598_v61, 9  ;;  %v4515_v49 = vrot.slane %v4513_v62, 5  ;;  %v4537_v54 = vshll.u32 %v4464_v58, 16 }
 0x126   : > { %7418 = vmatprep.subr.msk.bf16.mxu0 %vm1634_vm0, %v8578_v45  ;;  %v7432_v53 = vld [vmem:[#allocation2 + $0x48] sm:$0xff]   ;;  %v8620_v37 = vrot.slane %v4519_v40, 5  ;;  %v4543_v61 = vshll.u32 %v4465_v17, 16  ;;  %v4547_v23 = vshrl.u32 %v4465_v17, 16  ;;  %v8632_v59 = vsel %vm8067_vm3, %v6239_v1, %v2179_v36 }
 0x127   : > { %v4512_v32 = vrot.slane %v4510_v35, 4  ;;  %v7492_v35 = vld [vmem:[#allocation2 + $0x50] sm:$0x1]  ;;  %v2100_v58 = vld [vmem:[#allocation2 + $0x6c] sm:$0xe]  ;;  %v2195_v1 = vrot.slane %v2193_v38, 4  ;;  %v8655_v0 = vsel %vm8067_vm3, %v6241_v25, %v2193_v38 }
 0x128   : > { %v2189_v62 = vrot.slane %v7492_v35, 5  ;;  %v4526_v36 = vor.u32 %v4525_v56, %v8620_v37  ;;  %v4529_v17 = vshll.u32 %v4463_v55, 16  ;;  %v4466_v35 = vld [vmem:[#allocation2 + $0x2c] sm:$0x1]  ;;  %v4539_v15 = vrot.slane %v4537_v54, 5 }
 0x129   : > { %v4516_v6 = vor.u32 %v4515_v49, %v4512_v32  ;;  %v8639_v31 = vrot.slane %v4543_v61, 5  ;;  %v6243_v3 = vrot.slane %v2100_v58, 9  ;;  %v7433_v32 = vld [vmem:[#allocation2 + $0x54] sm:$0xff]   ;;  %v2202_v49 = vrot.slane %v2200_v28, 4  ;;  %v7497_v58 = vld [vmem:[#allocation2 + $0x80] sm:$0x1] }
 0x12a   : > { %v4553_v24 = vshll.u32 %v4466_v35, 16  ;;  %v8643_v56 = vsel %vm8067_vm3, %v2181_v57, %v2182_v20  ;;  %v8647_v54 = vsel %vm8067_vm3, %v6240_v19, %v2186_v13  ;;  %v4531_v50 = vrot.slane %v4529_v17, 5  ;;  %v2101_v20 = vld [vmem:[#allocation2 + $0x78] sm:$0xe]  ;;  %v7496_v57 = vld [vmem:[#allocation2 + $0x7c] sm:$0xf] }
 0x12b   : > { %7056 = vmatmul.mubr.msk.bf16.gmra.mrb[4].mxu0 %vm1585_vm10, %v7431_v12  ;;  %v4549_v12 = vrot.slane %v4547_v23, 4  ;;  %v4517_v46 = vrot.slane %v4516_v6, 4  ;;  %v4527_v23 = vrot.slane %v4526_v36, 4  ;;  %v4540_v55 = vor.u32 %v4539_v15, %v4536_v43  ;;  %v4467_v19 = vld [vmem:[#allocation2 + $0x30] sm:$0xf] }
 0x12c   : > { %6902 = vmatmul.mubr.msk.bf16.gmra.mrb[20].mxu1 %vm1585_vm10, %v6213_v2  ;;  %v7493_v2 = vld [vmem:[#allocation2 + $0x5c] sm:$0x1]  ;;  %7059 = vmatprep.mubr.msk.bf16.mxu0 %vm1585_vm10, %v7432_v53  ;;  %v2209_v53 = vrot.slane %v2207_v27, 4  ;;  %v8676_v38 = vsel %vm8067_vm3, %v6243_v3, %v2207_v27  ;;  %v2217_v27 = vrot.slane %v7497_v58, 5  ;;  %v7498_v6 = vld [vmem:[#allocation2 + $0x88] sm:$0xf] }
 0x12d   : > { %6905 = vmatprep.mubr.msk.bf16.mxu1 %vm1585_vm10, %v6214_v22  ;;  %v2196_v40 = vrot.slane %v7493_v2, 5  ;;  %v2188_v22 = vrot.slane %v2186_v13, 4  ;;  %v6242_v2 = vrot.slane %v2099_v29, 9  ;;  %v4550_v61 = vor.u32 %v4549_v12, %v8639_v31  ;;  %v2102_v35 = vld [vmem:[#allocation2 + $0x84] sm:$0xe]  ;;  %v7435_v12 = vld [vmem:[#allocation2 + $0x6c] sm:$0xff]  }
 0x12e   : > { %v2214_v29 = vrot.slane %v7496_v57, 5  ;;  %v9700_v13 = vcombine.low %v8358_v21, %v8360_v60  ;;  %v8681_v21 = vsel %vm8067_vm3, %v2202_v49, %v2203_v51  ;;  %v4522_v25 = vsel %vm7686_vm11, %v4517_v46, %v8620_v37  ;;  %v8711_v49 = vld [vmem:[#allocation2 + $0x38] sm:$0x1]  ;;  %v8732_v58 = vld [vmem:[#allocation2 + $0x4c] sm:$0xf] }
 0x12f   : > { %v8664_v10 = vsel %vm8067_vm3, %v2188_v22, %v2189_v62  ;;  %v8668_v18 = vsel %vm8067_vm3, %v2195_v1, %v2196_v40  ;;  %v8672_v15 = vsel %vm8067_vm3, %v6242_v2, %v2200_v28  ;;  %v8685_v62 = vsel %vm8067_vm3, %v2209_v53, %v2210_v26  ;;  %v8701_v2 = vld [vmem:[#allocation2 + $0x34] sm:$0xf]  ;;  %9703 = vst [vmem:[#allocation10_spill] sm:$0xff] %v8711_v49  ;;  %v8761_v37 = vld [vmem:[#allocation2 + $0x58] sm:$0xf] }
 0x130   : > { %v4555_v40 = vrot.slane %v4553_v24, 5  ;;  %v4532_v3 = vsel %vm7686_vm11, %v4527_v23, %v4531_v50  ;;  %v6244_v28 = vrot.slane %v2101_v20, 9  ;;  %v2221_v22 = vrot.slane %v7498_v6, 5  ;;  %9701 = vst [vmem:[#allocation8_spill] sm:$0xff] %v8701_v2  ;;  %v4470_v23 = vld [vmem:[#allocation2 + $0x3c] sm:$0xf] }
 0x131   : > { %v4541_v1 = vrot.slane %v4540_v55, 4  ;;  %v4551_v36 = vrot.slane %v4550_v61, 4  ;;  %v2216_v17 = vrot.slane %v2214_v29, 4  ;;  %v4558_v43 = vshrl.u32 %v4467_v19, 16  ;;  %v7436_v50 = vld [vmem:[#allocation2 + $0x78] sm:$0xff]   ;;  %9706 = vst [vmem:[#allocation12_spill] sm:$0xff] %v8732_v58 }
 0x132   : > { %v8705_v26 = vcombine.low %v4522_v25, %v4532_v3  ;;  %v4561_v53 = vshll.u32 %v4467_v19, 16  ;;  %v6245_v55 = vrot.slane %v2102_v35, 9  ;;  %v2223_v61 = vrot.slane %v2221_v22, 4  ;;  %v7499_v20 = vld [vmem:[#allocation2 + $0x8c] sm:$0x1]  ;;  %9708 = vst [vmem:[#allocation13_spill] sm:$0xff] %v8761_v37 }
 0x133   : > { %7060 = vmatmul.mubr.msk.bf16.gmra.mrb[8].mxu0 %vm1585_vm10, %v7433_v32  ;;  %v8709_v32 = vsel %vm1634_vm0, %v8578_v45, 0  ;;  %v2224_v57 = vrot.slane %v7499_v20, 5  ;;  %v9705_v25 = vcombine.low %v8397_v34, %v8399_v41  ;;  %v4546_v45 = vsel %vm7686_vm11, %v4541_v1, %v8639_v31  ;;  %v7438_v24 = vld [vmem:[#allocation2 + $0x90] sm:$0xff]  }
 0x134   : > { %6906 = vmatmul.mubr.msk.bf16.gmra.mrb[24].mxu1 %vm1585_vm10, %v9699_v14  ;;  %7063 = vmatprep.mubr.msk.bf16.mxu0 %vm1585_vm10, %v7434_v7  ;;  %9702 = vst [vmem:[#allocation9_spill] sm:$0xff] %v8709_v32  ;;  %v8715_v14 = vsel %vm8067_vm3, %v6244_v28, %v2214_v29  ;;  %v4556_v19 = vsel %vm7686_vm11, %v4551_v36, %v4555_v40  ;;  %v4560_v3 = vrot.slane %v4558_v43, 4  ;;  %v4473_v28 = vld [vmem:[#allocation2 + $0x48] sm:$0xf]  ;;  %v4567_v6 = vshll.u32 %v8701_v2, 16 }
 0x135   : > { %6909 = vmatprep.mubr.msk.bf16.mxu1 %vm1585_vm10, %v9700_v13  ;;  %v8717_v13 = vld [vmem:[#allocation2 + $0x40] sm:$0xf]  ;;  %v8730_v29 = vsel %vm8067_vm3, %v2216_v17, %v2217_v27  ;;  %v9707_v34 = vcombine.low %v8552_v63, %v8561_v33  ;;  %v4571_v31 = vshrl.u32 %v8701_v2, 16  ;;  %v4582_v1 = vshrl.u32 %v4470_v23, 16  ;;  %v8765_v7 = vld [vmem:[#allocation2 + $0x44] sm:$0x1] }
 0x136   : > { %9704 = vst [vmem:[#allocation11_spill] sm:$0xff] %v8717_v13  ;;  %v4585_v35 = vshll.u32 %v4470_v23, 16  ;;  %v4563_v40 = vrot.slane %v4561_v53, 5  ;;  %v4577_v27 = vshll.u32 %v8711_v49, 16  ;;  %v4591_v36 = vshll.u32 %v8717_v13, 16  ;;  %v7437_v23 = vld [vmem:[#allocation2 + $0x84] sm:$0xff]  }
 0x137   : > { %v4595_v17 = vshrl.u32 %v8717_v13, 16  ;;  %v8747_v63 = vsel %vm8067_vm3, %v6245_v55, %v2221_v22  ;;  %v4606_v33 = vshrl.u32 %v4473_v28, 16  ;;  %v4609_v43 = vshll.u32 %v4473_v28, 16  ;;  %9709 = vst [vmem:[#allocation14_spill] sm:$0xff] %v8765_v7 }
 0x138   : > { %v4615_v20 = vshll.u32 %v8732_v58, 16  ;;  %v8756_v53 = vsel %vm8067_vm3, %v2223_v61, %v2224_v57  ;;  %v8759_v51 = vrot.slane %v4567_v6, 5  ;;  %v4573_v22 = vrot.slane %v4571_v31, 4  ;;  %v8769_v57 = vld [vmem:[#allocation2 + $0x90] sm:$0xe] }
 0x139   : > { %v4584_v55 = vrot.slane %v4582_v1, 4  ;;  %v4587_v28 = vrot.slane %v4585_v35, 5  ;;  %v4597_v61 = vrot.slane %v4595_v17, 4  ;;  %v4608_v46 = vrot.slane %v4606_v33, 4 }
 0x13a   : > { %v4611_v13 = vrot.slane %v4609_v43, 5  ;;  %v8771_v6 = vrot.slane %v4615_v20, 5  ;;  %v9710_v1 = vcombine.low %v8556_v8, %v8565_v47  ;;  %v9712_v17 = vcombine.low %v8569_v44, %v8573_v4  ;;  %v7500_v43 = vld [vmem:[#allocation2 + $0x94] sm:$0xf]  ;;  %v7502_v44 = vld [vmem:[%s9661_s1 + $0x10] sm:$0xf] }
 0x13b   : > { %7064 = vmatmul.mubr.msk.bf16.gmra.mrb[12].mxu0 %vm1585_vm10, %v7435_v12  ;;  %v8767_v12 = vrot.slane %v4591_v36, 5  ;;  %v4643_v36 = vshrl.u32 %v8761_v37, 16  ;;  %v4574_v33 = vor.u32 %v4573_v22, %v8759_v51  ;;  %v4588_v8 = vor.u32 %v4587_v28, %v4584_v55  ;;  %v7503_v4 = vld [vmem:[#allocation2 + $0x98] sm:$0x1]  ;;  %v2104_v55 = vld [vmem:[#allocation2 + $0x9c] sm:$0xe] }
 0x13c   : > { %6910 = vmatmul.mubr.msk.bf16.gmra.mrb[28].mxu1 %vm1585_vm10, %v9705_v25  ;;  %7067 = vmatprep.mubr.msk.bf16.mxu0 %vm1585_vm10, %v7436_v50  ;;  %v8750_v25 = vcombine.low %v4546_v45, %v4556_v19  ;;  %v4619_v50 = vshrl.u32 %v8732_v58, 16  ;;  %v4564_v45 = vor.u32 %v4563_v40, %v4560_v3  ;;  %v8763_v19 = vrot.slane %v4577_v27, 5  ;;  %v8777_v3 = vld [vmem:[#allocation2 + $0x50] sm:$0x1] }
 0x13d   : > { %6915 = vmatprep.mubr.msk.bf16.mxu1 %vm1585_vm10, %v9707_v34  ;;  %v4476_v34 = vld [vmem:[#allocation2 + $0x54] sm:$0xf]  ;;  %9711 = vst [vmem:[#allocation15_spill] sm:$0xff] %v8777_v3  ;;  %v4639_v27 = vshll.u32 %v8761_v37, 16  ;;  %v4601_v47 = vshll.u32 %v8765_v7, 16  ;;  %v2228_v20 = vrot.slane %v7500_v43, 5 }
 0x13e   : > { %v4630_v31 = vshrl.u32 %v4476_v34, 16  ;;  %v4621_v35 = vrot.slane %v4619_v50, 4  ;;  %v4633_v40 = vshll.u32 %v4476_v34, 16  ;;  %v8789_v50 = vrot.slane %v4564_v45, 4 }
 0x13f   : > { %v4598_v34 = vor.u32 %v4597_v61, %v8767_v12  ;;  %v2231_v22 = vrot.slane %v7503_v4, 5  ;;  %v4625_v28 = vshll.u32 %v8777_v3, 16  ;;  %v8802_v43 = vrot.slane %v4639_v27, 5  ;;  %v7440_v3 = vld [vmem:[#allocation2 + $0xa8] sm:$0xff]  }
 0x140   : > { %v4632_v45 = vrot.slane %v4630_v31, 4  ;;  %v4622_v61 = vor.u32 %v4621_v35, %v8771_v6  ;;  %v4575_v7 = vrot.slane %v4574_v33, 4  ;;  %v4589_v2 = vrot.slane %v4588_v8, 4 }
 0x141   : > { %v2230_v37 = vrot.slane %v2228_v20, 4  ;;  %v4599_v58 = vrot.slane %v4598_v34, 4  ;;  %v6247_v4 = vrot.slane %v2104_v55, 9  ;;  %v4627_v35 = vrot.slane %v4625_v28, 5  ;;  %v2105_v55 = vld [vmem:[#allocation2 + $0xa8] sm:$0xe] }
 0x142   : > { %v2242_v27 = vrot.slane %v8360_v60, 5  ;;  %v4623_v8 = vrot.slane %v4622_v61, 4  ;;  %v4570_v60 = vsel %vm7686_vm11, %v8789_v50, %v8759_v51  ;;  %v4479_v51 = vld [vmem:[#allocation2 + $0x60] sm:$0xf]  ;;  %v2245_v50 = vrot.slane %v8366_v30, 5 }
 0x143   : > { %7068 = vmatmul.mubr.msk.bf16.gmra.mrb[16].mxu0 %vm1585_vm10, %v7437_v23  ;;  %v4612_v23 = vor.u32 %v4611_v13, %v4608_v46  ;;  %v7504_v46 = vld [vmem:[#allocation2 + $0xa4] sm:$0x1]  ;;  %v4654_v28 = vshrl.u32 %v4479_v51, 16 }
 0x144   : > { %6916 = vmatmul.mubr.msk.bf16.vlgmr.msra.gmra.mrb[0].mxu1 %vm1585_vm10, %v9710_v1  ;;  %v7501_v1 = vld [vmem:[#allocation2 + $0xa0] sm:$0xf]  ;;  %7071 = vmatprep.mubr.msk.bf16.mxu0 %vm1585_vm10, %v7438_v24  ;;  %v2238_v13 = vrot.slane %v7504_v46, 5  ;;  %v9714_v46 = vcombine.low %v8592_v42, %v8596_v11  ;;  %v8836_v11 = vsel %vm8067_vm3, %v2230_v37, %v2231_v22  ;;  %v2106_v22 = vld [vmem:[#allocation2 + $0xb4] sm:$0xe] }
 0x145   : > { %6948 = vmatpush3.bf16.msra.mxu1 %v8606_v5  ;;  %6919 = vmatprep.mubr.msk.bf16.mxu1 %vm1585_vm10, %v9712_v17  ;;  %v6246_v5 = vrot.slane %v8769_v57, 9  ;;  %v2235_v49 = vrot.slane %v7501_v1, 5  ;;  %v8800_v57 = vld [vmem:[#allocation2 + $0x5c] sm:$0x1]  ;;  %v4635_v17 = vrot.slane %v4633_v40, 5  ;;  %v4645_v1 = vrot.slane %v4643_v36, 4 }
 0x146   : > { %7414 = vmatprep.subr.msk.bf16.mxu1 %vm1634_vm0, %v7502_v44  ;;  %v4603_v44 = vrot.slane %v4601_v47, 5  ;;  %v7439_v24 = vld [vmem:[#allocation2 + $0x9c] sm:$0xff]   ;;  %v4649_v40 = vshll.u32 %v8800_v57, 16  ;;  %v9713_v36 = vcombine.low %v8583_v52, %v8587_v9  ;;  %v4613_v33 = vrot.slane %v4612_v23, 4 }
 0x147   : > { %v2237_v32 = vrot.slane %v2235_v49, 4  ;;  %v4636_v47 = vor.u32 %v4635_v17, %v4632_v45  ;;  %v4646_v34 = vor.u32 %v4645_v1, %v8802_v43  ;;  %v4580_v52 = vsel %vm7686_vm11, %v4575_v7, %v8763_v19  ;;  %v7441_v17 = vld [vmem:[#allocation2 + $0xb4] sm:$0xff]  }
 0x148   : > { %v4594_v9 = vsel %vm7686_vm11, %v4589_v2, %v8767_v12  ;;  %v8829_v23 = vsel %vm8067_vm3, %v6246_v5, %v2228_v20  ;;  %v4604_v42 = vsel %vm7686_vm11, %v4599_v58, %v4603_v44  ;;  %v8840_v7 = vsel %vm8067_vm3, %v6247_v4, %v2235_v49  ;;  %v8846_v12 = vld [vmem:[#allocation2 + $0x64] sm:$0xf]  ;;  %v4482_v4 = vld [vmem:[#allocation2 + $0x6c] sm:$0xf]  ;;  %v8923_v44 = vld [vmem:[#allocation2 + $0x80] sm:$0x1] }
 0x149   : > { %v8844_v2 = vsel %vm8067_vm3, %v2237_v32, %v2238_v13  ;;  %v4651_v19 = vrot.slane %v4649_v40, 5  ;;  %v6248_v20 = vrot.slane %v2105_v55, 9  ;;  %v2244_v58 = vrot.slane %v2242_v27, 4  ;;  %v7442_v13 = vld [vmem:[#allocation2 + $0xc0] sm:$0xff]   ;;  %9719 = vst [vmem:[#allocation18_spill] sm:$0xff] %v8923_v44 }
 0x14a   : > { %v4618_v37 = vsel %vm7686_vm11, %v4613_v33, %v8771_v6  ;;  %v4628_v49 = vsel %vm7686_vm11, %v4623_v8, %v4627_v35  ;;  %v4637_v5 = vrot.slane %v4636_v47, 4  ;;  %v4647_v32 = vrot.slane %v4646_v34, 4  ;;  %v8876_v8 = vld [vmem:[#allocation2 + $0x70] sm:$0xf] }
 0x14b   : > { %7072 = vmatmul.mubr.msk.bf16.gmra.mrb[20].mxu0 %vm1585_vm10, %v7439_v24  ;;  %v4657_v45 = vshll.u32 %v4479_v51, 16  ;;  %v4663_v61 = vshll.u32 %v8846_v12, 16  ;;  %v8857_v1 = vcombine.low %v4570_v60, %v4580_v52  ;;  %v8859_v30 = vcombine.low %v4594_v9, %v4604_v42  ;;  %v8865_v24 = vld [vmem:[#allocation2 + $0x68] sm:$0x1]  ;;  %v4485_v60 = vld [vmem:[#allocation2 + $0x78] sm:$0xf] }
 0x14c   : > { %6920 = vmatmul.mubr.msk.bf16.gmra.mrb[4].mxu1 %vm1585_vm10, %v9713_v36  ;;  %7075 = vmatprep.mubr.msk.bf16.mxu0 %vm1585_vm10, %v7440_v3  ;;  %v4667_v3 = vshrl.u32 %v8846_v12, 16  ;;  %v8869_v35 = vsel %vm8067_vm3, %v6248_v20, %v2242_v27  ;;  %v8873_v40 = vsel %vm8067_vm3, %v2244_v58, %v2245_v50  ;;  %v6249_v36 = vrot.slane %v2106_v22, 9 }
 0x14d   : > { %6923 = vmatprep.mubr.msk.bf16.mxu1 %vm1585_vm10, %v9714_v46  ;;  %v2249_v33 = vrot.slane %v8399_v41, 5  ;;  %v9715_v47 = vcombine.low %v8632_v59, %v8643_v56  ;;  %v8882_v34 = vcombine.low %v4618_v37, %v4628_v49  ;;  %v4642_v27 = vsel %vm7686_vm11, %v4637_v5, %v8802_v43  ;;  %v8890_v41 = vld [vmem:[#allocation2 + $0x7c] sm:$0xf]  ;;  %v8899_v43 = vld [vmem:[#allocation2 + $0x74] sm:$0x1] }
 0x14e   : > { %v4652_v55 = vsel %vm7686_vm11, %v4647_v32, %v4651_v19  ;;  %9716 = vst [vmem:[#allocation16_spill] sm:$0xff] %v8890_v41  ;;  %v9717_v52 = vcombine.low %v8647_v54, %v8664_v10  ;;  %v4656_v59 = vrot.slane %v4654_v28, 4  ;;  %v4659_v56 = vrot.slane %v4657_v45, 5  ;;  %v4488_v28 = vld [vmem:[#allocation2 + $0x84] sm:$0xf] }
 0x14f   : > { %v8896_v9 = vrot.slane %v4663_v61, 5  ;;  %v4669_v42 = vrot.slane %v4667_v3, 4  ;;  %v4678_v51 = vshrl.u32 %v4482_v4, 16  ;;  %v4681_v19 = vshll.u32 %v4482_v4, 16  ;;  %v8917_v4 = vld [vmem:[#allocation2 + $0x88] sm:$0xf] }
 0x150   : > { %v4687_v20 = vshll.u32 %v8876_v8, 16  ;;  %v4691_v58 = vshrl.u32 %v8876_v8, 16  ;;  %v4673_v54 = vshll.u32 %v8865_v24, 16  ;;  %v4702_v10 = vshrl.u32 %v4485_v60, 16  ;;  %9718 = vst [vmem:[#allocation17_spill] sm:$0xff] %v8917_v4 }
 0x151   : > { %v4705_v50 = vshll.u32 %v4485_v60, 16  ;;  %v4711_v37 = vshll.u32 %v8890_v41, 16  ;;  %v8910_v5 = vsel %vm8067_vm3, %v6249_v36, %v2249_v33  ;;  %v2251_v32 = vrot.slane %v2249_v33, 4 }
 0x152   : > { %v4715_v22 = vshrl.u32 %v8890_v41, 16  ;;  %v8913_v45 = vcombine.low %v4642_v27, %v4652_v55  ;;  %v4660_v61 = vor.u32 %v4659_v56, %v4656_v59  ;;  %v4670_v3 = vor.u32 %v4669_v42, %v8896_v9 }
 0x153   : > { %7076 = vmatmul.mubr.msk.bf16.gmra.mrb[24].mxu0 %vm1585_vm10, %v7441_v17  ;;  %v4697_v17 = vshll.u32 %v8899_v43, 16  ;;  %v4680_v60 = vrot.slane %v4678_v51, 4  ;;  %v8919_v49 = vrot.slane %v4687_v20, 5  ;;  %v4693_v36 = vrot.slane %v4691_v58, 4  ;;  %v8932_v20 = vld [vmem:[#allocation2 + $0x94] sm:$0xf] }
 0x154   : > { %6924 = vmatmul.mubr.msk.bf16.gmra.mrb[8].mxu1 %vm1585_vm10, %v9715_v47  ;;  %7079 = vmatprep.mubr.msk.bf16.mxu0 %vm1585_vm10, %v7442_v13  ;;  %v4491_v13 = vld [vmem:[#allocation2 + $0x90] sm:$0xf]  ;;  %v8921_v33 = vrot.slane %v4673_v54, 5  ;;  %v4704_v27 = vrot.slane %v4702_v10, 4  ;;  %v4707_v55 = vrot.slane %v4705_v50, 5  ;;  %v8925_v59 = vrot.slane %v4711_v37, 5 }
 0x155   : > { %6927 = vmatprep.mubr.msk.bf16.mxu1 %vm1585_vm10, %v9717_v52  ;;  %v7443_v47 = vld [vmem:[#allocation2 + $0xcc] sm:$0xff]   ;;  %v4683_v52 = vrot.slane %v4681_v19, 5  ;;  %v9720_v56 = vcombine.low %v8655_v0, %v8668_v18  ;;  %v4717_v42 = vrot.slane %v4715_v22, 4  ;;  %v4726_v6 = vshrl.u32 %v4488_v28, 16  ;;  %9721 = vst [vmem:[#allocation19_spill] sm:$0xff] %v8932_v20 }
 0x156   : > { %v4729_v51 = vshll.u32 %v4488_v28, 16  ;;  %v4735_v19 = vshll.u32 %v8917_v4, 16  ;;  %v9722_v58 = vcombine.low %v8672_v15, %v8681_v21  ;;  %v8938_v54 = vrot.slane %v4660_v61, 4 }
 0x157   : > { %v4739_v10 = vshrl.u32 %v8917_v4, 16  ;;  %v4750_v50 = vshrl.u32 %v4491_v13, 16  ;;  %v4753_v0 = vshll.u32 %v4491_v13, 16  ;;  %v8942_v18 = vrot.slane %v4670_v3, 4 }
 0x158   : > { %v4684_v37 = vor.u32 %v4683_v52, %v4680_v60  ;;  %v4694_v22 = vor.u32 %v4693_v36, %v8919_v49  ;;  %v8945_v28 = vrot.slane %v4697_v17, 5  ;;  %v4708_v15 = vor.u32 %v4707_v55, %v4704_v27  ;;  %v8955_v17 = vld [vmem:[#allocation2 + $0x8c] sm:$0x1] }
 0x159   : > { %v4721_v21 = vshll.u32 %v8923_v44, 16  ;;  %v4759_v61 = vshll.u32 %v8932_v20, 16  ;;  %v4763_v13 = vshrl.u32 %v8932_v20, 16  ;;  %v4718_v3 = vor.u32 %v4717_v42, %v8925_v59 }
 0x15a   : > { %v4731_v60 = vrot.slane %v4729_v51, 5  ;;  %v8953_v52 = vrot.slane %v4735_v19, 5  ;;  %v4741_v36 = vrot.slane %v4739_v10, 4  ;;  %v4752_v31 = vrot.slane %v4750_v50, 4  ;;  %v8967_v10 = vld [vmem:[#allocation2 + $0xa0] sm:$0xf] }
 0x15b   : > { %7080 = vmatmul.mubr.msk.bf16.gmra.mrb[28].mxu0 %vm1585_vm10, %v7443_v47  ;;  %v4728_v47 = vrot.slane %v4726_v6, 4  ;;  %v4755_v46 = vrot.slane %v4753_v0, 5  ;;  %v4685_v55 = vrot.slane %v4684_v37, 4  ;;  %v4695_v4 = vrot.slane %v4694_v22, 4 }
 0x15c   : > { %6928 = vmatmul.mubr.msk.bf16.gmra.mrb[12].mxu1 %vm1585_vm10, %v9720_v56  ;;  %v389_v56 = vld [vmem:[#allocation2 + $0xd4] sm:$0x1]  ;;  %7085 = vmatprep.mubr.msk.bf16.mxu0 %vm1585_vm10, %v8705_v26  ;;  %v9724_v20 = vrot.slane %v8407_v39, 5  ;;  %v4723_v42 = vrot.slane %v4721_v21, 5  ;;  %v8965_v51 = vrot.slane %v4759_v61, 5  ;;  %v4765_v19 = vrot.slane %v4763_v13, 4 }
 0x15d   : > { %6931 = vmatprep.mubr.msk.bf16.mxu1 %vm1585_vm10, %v9722_v58  ;;  %v4494_v58 = vld [vmem:[#allocation2 + $0x9c] sm:$0xf]  ;;  %v390_v27 = vsel %vm7604_vm6, 0, %v389_v56  ;;  %v9725_v50 = vcombine.low %v8676_v38, %v8685_v62  ;;  %v4709_v0 = vrot.slane %v4708_v15, 4  ;;  %v4719_v37 = vrot.slane %v4718_v3, 4 }
 0x15e   : > { %v4774_v44 = vshrl.u32 %v4494_v58, 16  ;;  %v4777_v41 = vshll.u32 %v4494_v58, 16  ;;  %391 = vst [vmem:[#allocation2 + $0xd4] sm:$0x1] %v390_v27  ;;  %v8963_v6 = vsel %vm8067_vm3, %v2251_v32, %v9724_v20  ;;  %v4732_v22 = vor.u32 %v4731_v60, %v4728_v47  ;;  %v8974_v56 = vld [vmem:[#allocation2 + $0x98] sm:$0x1] }
 0x15f   : > { %v4745_v39 = vshll.u32 %v8955_v17, 16  ;;  %v9726_v32 = vcombine.low %v8715_v14, %v8730_v29  ;;  %v4666_v20 = vsel %vm7686_vm11, %v8938_v54, %v8896_v9  ;;  %v4676_v38 = vsel %vm7686_vm11, %v8942_v18, %v8921_v33  ;;  %v8997_v9 = vld [vmem:[#allocation2 + $0xa4] sm:$0x1]  ;;  %v4497_v61 = vld [vmem:[#allocation2 + $0xa8] sm:$0xf] }
 0x160   : > { %v4742_v62 = vor.u32 %v4741_v36, %v8953_v52  ;;  %v4756_v15 = vor.u32 %v4755_v46, %v4752_v31  ;;  %v4690_v14 = vsel %vm7686_vm11, %v4685_v55, %v8919_v49  ;;  %v4700_v29 = vsel %vm7686_vm11, %v4695_v4, %v8945_v28  ;;  %v9727_v33 = vld [vmem:[#allocation9_spill] sm:$0xff] }
 0x161   : > { %v4776_v54 = vrot.slane %v4774_v44, 4  ;;  %v4779_v21 = vrot.slane %v4777_v41, 5  ;;  %v4769_v31 = vshll.u32 %v8974_v56, 16  ;;  %v4783_v46 = vshll.u32 %v8967_v10, 16  ;;  %v9006_v18 = vld [vmem:[#allocation2 + $0xac] sm:$0xf] }
 0x162   : > { %v4787_v49 = vshrl.u32 %v8967_v10, 16  ;;  %v4714_v44 = vsel %vm7686_vm11, %v4709_v0, %v8925_v59  ;;  %v4724_v41 = vsel %vm7686_vm11, %v4719_v37, %v4723_v42  ;;  %v9013_v4 = vrot.slane %v4732_v22, 4 }
 0x163   : > { %7086 = vmatmul.mubr.msk.bf16.vlgmr.msra.gmra.mrb[0].mxu0 %vm1585_vm10, %v8750_v25  ;;  %v4766_v25 = vor.u32 %v4765_v19, %v8965_v51  ;;  %v9017_v28 = vrot.slane %v4742_v62, 4  ;;  %v9019_v13 = vrot.slane %v4756_v15, 4  ;;  %v4793_v58 = vshll.u32 %v8997_v9, 16  ;;  %v5191_v19 = vld [vmem:[#allocation2 + $0x48] sm:$0xe] }
 0x164   : > { %6932 = vmatmul.mubr.msk.bf16.gmra.mrb[16].mxu1 %vm1585_vm10, %v9725_v50  ;;  %7118 = vmatpush3.bf16.msra.mxu0 %v9727_v33  ;;  %v4798_v3 = vshrl.u32 %v4497_v61, 16  ;;  %v6266_v47 = vcombine.low %v8910_v5, %v8963_v6  ;;  %v4780_v60 = vor.u32 %v4779_v21, %v4776_v54  ;;  %v4801_v36 = vshll.u32 %v4497_v61, 16  ;;  %v9061_v15 = vld [vmem:[#allocation2 + $0xb4] sm:$0xf]  ;;  %v5193_v21 = vld [vmem:[#allocation2 + $0x60] sm:$0xe] }
 0x165   : > { %6935 = vmatprep.mubr.msk.bf16.mxu1 %vm1585_vm10, %v9726_v32  ;;  %7089 = vmatprep.mubr.msk.bf16.mxu0 %vm1585_vm10, %v8857_v1  ;;  %v9015_v1 = vrot.slane %v4745_v39, 5  ;;  %v4807_v59 = vshll.u32 %v9006_v18, 16  ;;  %v9025_v26 = vrot.slane %v4766_v25, 4  ;;  %v9027_v27 = vrot.slane %v4769_v31, 5  ;;  %v9045_v32 = vld [vmem:[#allocation2 + $0xb0] sm:$0x1] }
 0x166   : > { %v9029_v55 = vrot.slane %v4783_v46, 5  ;;  %v9031_v42 = vrot.slane %v4787_v49, 4  ;;  %v9728_v50 = vcombine.low %v8747_v63, %v8756_v53  ;;  %v6438_v0 = vcombine.low %v4666_v20, %v4676_v38  ;;  %v9730_v31 = vld [vmem:[#allocation12_spill] sm:$0xff]  ;;  %v9731_v49 = vld [vmem:[#allocation15_spill] sm:$0xff] }
 0x167   : > { %v9037_v37 = vcombine.low %v4690_v14, %v4700_v29  ;;  %v9039_v22 = vcombine.low %v4714_v44, %v4724_v41  ;;  %v4738_v39 = vsel %vm7686_vm11, %v9013_v4, %v8953_v52  ;;  %v9729_v62 = vcombine.low %v8829_v23, %v8836_v11  ;;  %v5192_v14 = vld [vmem:[#allocation2 + $0x54] sm:$0xe] }
 0x168   : > { %v4748_v63 = vsel %vm7686_vm11, %v9017_v28, %v9015_v1  ;;  %v9059_v20 = vrot.slane %v4793_v58, 5  ;;  %v4800_v38 = vrot.slane %v4798_v3, 4  ;;  %v9065_v23 = vrot.slane %v4780_v60, 4  ;;  %v9732_v58 = vld [vmem:[#allocation13_spill] sm:$0xff] }
 0x169   : > { %v4803_v11 = vrot.slane %v4801_v36, 5  ;;  %v9067_v29 = vrot.slane %v4807_v59, 5  ;;  %v6468_v54 = vrot.slane %v5191_v19, 9  ;;  %v4772_v61 = vsel %vm7686_vm11, %v9025_v26, %v9027_v27  ;;  %v5194_v19 = vld [vmem:[#allocation2 + $0x6c] sm:$0xe] }
 0x16a   : > { %v4790_v33 = vor.u32 %v9031_v42, %v9029_v55  ;;  %v4817_v25 = vshll.u32 %v9045_v32, 16  ;;  %v5281_v46 = vrot.slane %v9730_v31, 5  ;;  %v5284_v44 = vrot.slane %v9731_v49, 5  ;;  %v4506_v28 = vld [vmem:[#allocation2 + $0xcc] sm:$0xf] }
 0x16b   : > { %7090 = vmatmul.mubr.msk.bf16.gmra.mrb[4].mxu0 %vm1585_vm10, %v8859_v30  ;;  %v4811_v30 = vshrl.u32 %v9006_v18, 16  ;;  %v6469_v41 = vrot.slane %v5192_v14, 9  ;;  %v5288_v3 = vrot.slane %v9732_v58, 5  ;;  %v5291_v60 = vrot.slane %v8800_v57, 5 }
 0x16c   : > { %6936 = vmatmul.mubr.msk.bf16.gmra.mrb[20].mxu1 %vm1585_vm10, %v9728_v50  ;;  %7093 = vmatprep.mubr.msk.bf16.mxu0 %vm1585_vm10, %v8882_v34  ;;  %v4822_v34 = vshrl.u32 %v9061_v15, 16  ;;  %v6470_v36 = vrot.slane %v5193_v21, 9  ;;  %v5295_v59 = vrot.slane %v8846_v12, 5  ;;  %v4804_v42 = vor.u32 %v4803_v11, %v4800_v38 }
 0x16d   : > { %6939 = vmatprep.mubr.msk.bf16.mxu1 %vm1585_vm10, %v9729_v62  ;;  %v9087_v50 = vsel %vm8067_vm3, %v6468_v54, %v5281_v46  ;;  %v5283_v62 = vrot.slane %v5281_v46, 4  ;;  %v9091_v31 = vsel %vm8067_vm3, %v6469_v41, %v5288_v3  ;;  %v5290_v14 = vrot.slane %v5288_v3, 4 }
 0x16e   : > { %v9095_v49 = vsel %vm8067_vm3, %v6470_v36, %v5295_v59  ;;  %v5297_v57 = vrot.slane %v5295_v59, 4  ;;  %v5298_v21 = vrot.slane %v8865_v24, 5  ;;  %v9733_v12 = vcombine.low %v8840_v7, %v8844_v2  ;;  %v7444_v59 = vld [vmem:[#allocation2 + $0xc] sm:$0xff]  }
 0x16f   : > { %v9104_v38 = vsel %vm8067_vm3, %v5283_v62, %v5284_v44  ;;  %v6471_v11 = vrot.slane %v5194_v19, 9  ;;  %v5302_v54 = vrot.slane %v8876_v8, 5  ;;  %v5305_v46 = vrot.slane %v8899_v43, 5  ;;  %v2933_v8 = vld [vmem:[#allocation2 + $0x78] sm:$0xf] }
 0x170   : > { %v9734_v41 = vcombine.low %v8869_v35, %v8873_v40  ;;  %v4813_v24 = vrot.slane %v4811_v30, 4  ;;  %v9116_v2 = vsel %vm8067_vm3, %v5290_v14, %v5291_v60  ;;  %v9120_v44 = vsel %vm8067_vm3, %v5297_v57, %v5298_v21  ;;  %v9124_v43 = vld [vmem:[#allocation2 + $0xb8] sm:$0xf]  ;;  %v9737_v40 = vld [vmem:[#allocation16_spill] sm:$0xff]  ;;  %v9738_v35 = vld [vmem:[#allocation18_spill] sm:$0xff] }
 0x171   : > { %v9132_v30 = vsel %vm8067_vm3, %v6471_v11, %v5302_v54  ;;  %v5304_v58 = vrot.slane %v5302_v54, 4  ;;  %v4791_v3 = vrot.slane %v4790_v33, 4  ;;  %v9139_v60 = vrot.slane %v4817_v25, 5  ;;  %v5196_v33 = vld [vmem:[#allocation2 + $0x84] sm:$0xe] }
 0x172   : > { %v4825_v36 = vshll.u32 %v9061_v15, 16  ;;  %v9142_v19 = vrot.slane %v4822_v34, 4  ;;  %v3171_v14 = vshrl.u32 %v2933_v8, 16  ;;  %v3174_v57 = vshll.u32 %v2933_v8, 16  ;;  %v4503_v34 = vld [vmem:[#allocation2 + $0xc0] sm:$0xf] }
 0x173   : > { %7094 = vmatmul.mubr.msk.bf16.gmra.mrb[8].mxu0 %vm1585_vm10, %v8913_v45  ;;  %v4786_v45 = vsel %vm7686_vm11, %v9065_v23, %v9029_v55  ;;  %v9146_v62 = vsel %vm8067_vm3, %v5304_v58, %v5305_v46  ;;  %v9148_v21 = vrot.slane %v4804_v42, 4  ;;  %v9151_v55 = vld [vmem:[#allocation2 + $0xbc] sm:$0x1]  ;;  %v4831_v23 = vshll.u32 %v9124_v43, 16 }
 0x174   : > { %6940 = vmatmul.mubr.msk.bf16.gmra.mrb[24].mxu1 %vm1585_vm10, %v9733_v12  ;;  %7097 = vmatprep.mubr.msk.bf16.mxu0 %vm1585_vm10, %v6438_v0  ;;  %v5195_v0 = vld [vmem:[#allocation2 + $0x78] sm:$0xe]  ;;  %v4814_v12 = vor.u32 %v4813_v24, %v9067_v29  ;;  %v4835_v25 = vshrl.u32 %v9124_v43, 16  ;;  %v3173_v11 = vrot.slane %v3171_v14, 4  ;;  %v3176_v54 = vrot.slane %v3174_v57, 5 }
 0x175   : > { %6943 = vmatprep.mubr.msk.bf16.mxu1 %vm1585_vm10, %v9734_v41  ;;  %v9735_v46 = vld [vmem:[#allocation7_spill] sm:$0xff]  ;;  %v9736_v41 = vld [vmem:[#allocation6_spill] sm:$0xff]  ;;  %v4796_v24 = vsel %vm7686_vm11, %v4791_v3, %v9059_v20  ;;  %v9164_v8 = vrot.slane %v4825_v36, 5  ;;  %v6472_v58 = vrot.slane %v5195_v0, 9  ;;  %v5309_v15 = vrot.slane %v9737_v40, 5 }
 0x176   : > { %v3193_v42 = vsel %vm7686_vm11, %v9736_v41, %v9735_v46  ;;  %v9171_v14 = vld [vmem:[#allocation2 + $0xc4] sm:$0xf]  ;;  %v3177_v57 = vor.u32 %v3176_v54, %v3173_v11  ;;  %v5312_v7 = vrot.slane %v9738_v35, 5  ;;  %v6473_v46 = vrot.slane %v5196_v33, 9  ;;  %v9739_v41 = vld [vmem:[#allocation17_spill] sm:$0xff] }
 0x177   : > { %v5316_v53 = vrot.slane %v9739_v41, 5  ;;  %v4841_v20 = vshll.u32 %v9151_v55, 16  ;;  %v4846_v3 = vshrl.u32 %v4503_v34, 16  ;;  %v9179_v40 = vsel %vm8067_vm3, %v6472_v58, %v5309_v15  ;;  %v9740_v54 = vld [vmem:[#allocation5_spill] sm:$0xff] }
 0x178   : > { %v5311_v5 = vrot.slane %v5309_v15, 4  ;;  %v3178_v6 = vrot.slane %v3177_v57, 4  ;;  %v5319_v36 = vrot.slane %v8955_v17, 5  ;;  %v4849_v0 = vshll.u32 %v4503_v34, 16  ;;  %v9221_v41 = vld [vmem:[#allocation2 + $0xc8] sm:$0x1] }
 0x179   : > { %v5318_v35 = vrot.slane %v5316_v53, 4  ;;  %v4855_v33 = vshll.u32 %v9171_v14, 16  ;;  %v4859_v11 = vshrl.u32 %v9171_v14, 16  ;;  %v9205_v34 = vrot.slane %v4831_v23, 5 }
 0x17a   : > { %v9193_v15 = vsel %vm8067_vm3, %v5311_v5, %v5312_v7  ;;  %v4837_v58 = vrot.slane %v4835_v25, 4  ;;  %v9741_v23 = vsel %vm7686_vm11, %v9019_v13, %v8965_v51  ;;  %v6443_v1 = vcombine.low %v4786_v45, %v4796_v24  ;;  %v9243_v13 = vld [vmem:[#allocation2 + $0xd0] sm:$0xf]  ;;  %v9743_v5 = vld [vmem:[#allocation19_spill] sm:$0xff] }
 0x17b   : > { %7098 = vmatmul.mubr.msk.bf16.gmra.mrb[12].mxu0 %vm1585_vm10, %v9037_v37  ;;  %v7445_v37 = vld [vmem:[#allocation2 + $0x18] sm:$0xff]   ;;  %v6489_v17 = vcombine.low %v9179_v40, %v9193_v15  ;;  %v6442_v25 = vcombine.low %v9741_v23, %v4772_v61  ;;  %v4810_v52 = vsel %vm7686_vm11, %v9148_v21, %v9067_v29  ;;  %v4848_v26 = vrot.slane %v4846_v3, 4 }
 0x17c   : > { %6944 = vmatmul.mubr.msk.bf16.gmra.mrb[28].mxu1 %vm1585_vm10, %v6266_v47  ;;  %v9185_v47 = vsel %vm8067_vm3, %v6473_v46, %v5316_v53  ;;  %7101 = vmatprep.mubr.msk.bf16.mxu0 %vm1585_vm10, %v9039_v22  ;;  %v3183_v53 = vsel %vm7686_vm11, %v3178_v6, %v9740_v54  ;;  %v9203_v22 = vsel %vm8067_vm3, %v5318_v35, %v5319_v36  ;;  %v4851_v27 = vrot.slane %v4849_v0, 5  ;;  %v9742_v61 = vld [vmem:[#allocation3_spill] sm:$0xff] }
 0x17d   : > { %6949 = vmatprep.mubr.msk.bf16.mxu1 %vm1585_vm10, %v7444_v59  ;;  %v4815_v59 = vrot.slane %v4814_v12, 4  ;;  %v7446_v12 = vld [vmem:[#allocation2 + $0x24] sm:$0xff]   ;;  %v9207_v7 = vcombine.low %v3183_v53, %v3193_v42  ;;  %v6490_v57 = vcombine.low %v9185_v47, %v9203_v22  ;;  %v6441_v46 = vcombine.low %v4738_v39, %v4748_v63  ;;  %v5197_v39 = vld [vmem:[#allocation2 + $0x90] sm:$0xe]  ;;  %v5198_v35 = vld [vmem:[#allocation2 + $0x9c] sm:$0xe] }
 0x17e   : > { %v9241_v63 = vrot.slane %v4855_v33, 5  ;;  %v4861_v51 = vrot.slane %v4859_v11, 4  ;;  %v4828_v29 = vor.u32 %v9164_v8, %v9142_v19  ;;  %v4838_v45 = vor.u32 %v4837_v58, %v9205_v34  ;;  %v7448_v54 = vld [vmem:[#allocation2 + $0x3c] sm:$0xff]  }
 0x17f   : > { %v4820_v4 = vsel %vm7686_vm11, %v4815_v59, %v9139_v60  ;;  %v4843_v60 = vrot.slane %v4841_v20, 5  ;;  %v4865_v21 = vshll.u32 %v9221_v41, 16  ;;  %v4870_v24 = vshrl.u32 %v4506_v28, 16  ;;  %v7447_v20 = vld [vmem:[#allocation2 + $0x30] sm:$0xff]  }
 0x180   : > { %v6444_v42 = vcombine.low %v4810_v52, %v4820_v4  ;;  %v6474_v3 = vrot.slane %v5197_v39, 9  ;;  %v5323_v6 = vrot.slane %v9743_v5, 5  ;;  %v4873_v36 = vshll.u32 %v4506_v28, 16 }
 0x181   : > { %v4879_v59 = vshll.u32 %v9243_v13, 16  ;;  %v4883_v19 = vshrl.u32 %v9243_v13, 16  ;;  %v5326_v8 = vrot.slane %v8974_v56, 5  ;;  %v4852_v0 = vor.u32 %v4851_v27, %v4848_v26 }
 0x182   : > { %v4862_v33 = vor.u32 %v4861_v51, %v9241_v63  ;;  %v5325_v11 = vrot.slane %v5323_v6, 4  ;;  %v4829_v53 = vrot.slane %v4828_v29, 4  ;;  %v4867_v58 = vrot.slane %v4865_v21, 5  ;;  %v5187_v21 = vld [vmem:[#allocation2 + $0x18] sm:$0xe] }
 0x183   : > { %7102 = vmatmul.mubr.msk.bf16.gmra.mrb[16].mxu0 %vm1585_vm10, %v6441_v46  ;;  %v6475_v46 = vrot.slane %v5198_v35, 9  ;;  %v4872_v23 = vrot.slane %v4870_v24, 4  ;;  %v5330_v56 = vrot.slane %v8967_v10, 5  ;;  %v5333_v52 = vrot.slane %v8997_v9, 5  ;;  %v5199_v35 = vld [vmem:[#allocation2 + $0xa8] sm:$0xe] }
 0x184   : > { %6950 = vmatmul.mubr.msk.bf16.vlgmr.msra.gmra.mrb[0].mxu1 %vm1585_vm10, %v7445_v37  ;;  %7105 = vmatprep.mubr.msk.bf16.mxu0 %vm1585_vm10, %v6442_v25  ;;  %v9260_v37 = vsel %vm8067_vm3, %v6474_v3, %v5323_v6  ;;  %v9264_v25 = vsel %vm8067_vm3, %v5325_v11, %v5326_v8  ;;  %v4875_v4 = vrot.slane %v4873_v36, 5  ;;  %v9268_v28 = vrot.slane %v4879_v59, 5  ;;  %v7505_v59 = vld [vmem:[#allocation2 + $0x1c] sm:$0xf] }
 0x185   : > { %7152 = vmatpush3.bf16.msra.mxu1 %v9742_v61  ;;  %6953 = vmatprep.mubr.msk.bf16.mxu1 %vm1585_vm10, %v7446_v12  ;;  %v4839_v12 = vrot.slane %v4838_v45, 4  ;;  %v4885_v39 = vrot.slane %v4883_v19, 4  ;;  %v6491_v26 = vcombine.low %v9260_v37, %v9264_v25  ;;  %v4853_v27 = vrot.slane %v4852_v0, 4  ;;  %v9273_v61 = vld [vmem:[#allocation2 + $0xd4] sm:$0x1] }
 0x186   : > { %v4863_v51 = vrot.slane %v4862_v33, 4  ;;  %v9277_v29 = vsel %vm8067_vm3, %v6475_v46, %v5330_v56  ;;  %v5332_v10 = vrot.slane %v5330_v56, 4  ;;  %v4834_v9 = vsel %vm7686_vm11, %v4829_v53, %v9205_v34  ;;  %v7449_v34 = vld [vmem:[#allocation2 + $0x48] sm:$0xff]   ;;  %v7506_v0 = vld [vmem:[#allocation2 + $0x20] sm:$0x1] }
 0x187   : > { %v4844_v45 = vsel %vm7686_vm11, %v4839_v12, %v4843_v60  ;;  %v4876_v3 = vor.u32 %v4875_v4, %v4872_v23  ;;  %v4886_v5 = vor.u32 %v4885_v39, %v9268_v28  ;;  %v4889_v6 = vshll.u32 %v9273_v61, 16  ;;  %v5200_v53 = vld [vmem:[#allocation2 + $0xb4] sm:$0xe] }
 0x188   : > { %v9288_v24 = vsel %vm8067_vm3, %v5332_v10, %v5333_v52  ;;  %v4858_v60 = vsel %vm7686_vm11, %v4853_v27, %v9241_v63  ;;  %v4868_v36 = vsel %vm7686_vm11, %v4863_v51, %v4867_v58  ;;  %v5253_v19 = vrot.slane %v7505_v59, 5  ;;  %v5188_v52 = vld [vmem:[#allocation2 + $0x24] sm:$0xe]  ;;  %v7507_v27 = vld [vmem:[#allocation2 + $0x28] sm:$0xf] }
 0x189   : > { %v6464_v8 = vrot.slane %v5187_v21, 9  ;;  %v5256_v33 = vrot.slane %v7506_v0, 5  ;;  %v6476_v11 = vrot.slane %v5199_v35, 9  ;;  %v6446_v12 = vcombine.low %v4858_v60, %v4868_v36  ;;  %v5189_v51 = vld [vmem:[#allocation2 + $0x30] sm:$0xe]  ;;  %v9744_v10 = vld [vmem:[#allocation8_spill] sm:$0xff] }
 0x18a   : > { %v4877_v46 = vrot.slane %v4876_v3, 4  ;;  %v4887_v23 = vrot.slane %v4886_v5, 4  ;;  %v4891_v56 = vrot.slane %v4889_v6, 5  ;;  %v5255_v63 = vrot.slane %v5253_v19, 4  ;;  %v7451_v36 = vld [vmem:[#allocation2 + $0x60] sm:$0xff]  }
 0x18b   : > { %7106 = vmatmul.mubr.msk.bf16.gmra.mrb[20].mxu0 %vm1585_vm10, %v6443_v1  ;;  %v6492_v1 = vcombine.low %v9277_v29, %v9288_v24  ;;  %v5340_v39 = vrot.slane %v9045_v32, 5  ;;  %v5254_v21 = vsel %vm8067_vm3, %v6464_v8, %v5253_v19  ;;  %v6465_v3 = vrot.slane %v5188_v52, 9  ;;  %v7452_v8 = vld [vmem:[#allocation2 + $0x6c] sm:$0xff]  }
 0x18c   : > { %6954 = vmatmul.mubr.msk.bf16.gmra.mrb[4].mxu1 %vm1585_vm10, %v7447_v20  ;;  %7109 = vmatprep.mubr.msk.bf16.mxu0 %vm1585_vm10, %v6444_v42  ;;  %v7450_v42 = vld [vmem:[#allocation2 + $0x54] sm:$0xff]   ;;  %v6445_v20 = vcombine.low %v4834_v9, %v4844_v45  ;;  %v5267_v9 = vrot.slane %v9744_v10, 5  ;;  %v6477_v45 = vrot.slane %v5200_v53, 9  ;;  %v5344_v32 = vrot.slane %v9124_v43, 5 }
 0x18d   : > { %6957 = vmatprep.mubr.msk.bf16.mxu1 %vm1585_vm10, %v7448_v54  ;;  %v5337_v54 = vrot.slane %v9006_v18, 5  ;;  %v5260_v18 = vrot.slane %v7507_v27, 5  ;;  %v4882_v6 = vsel %vm7686_vm11, %v4877_v46, %v9268_v28  ;;  %v4892_v35 = vsel %vm7686_vm11, %v4887_v23, %v4891_v56  ;;  %v5201_v46 = vld [vmem:[#allocation2 + $0xc0] sm:$0xe]  ;;  %v9746_v27 = vld [vmem:[#allocation11_spill] sm:$0xff] }
 0x18e   : > { %v5347_v60 = vrot.slane %v9151_v55, 5  ;;  %v5257_v59 = vsel %vm8067_vm3, %v5255_v63, %v5256_v33  ;;  %v6466_v19 = vrot.slane %v5189_v51, 9  ;;  %v9330_v43 = vsel %vm8067_vm3, %v6477_v45, %v5344_v32  ;;  %v5190_v63 = vld [vmem:[#allocation2 + $0x3c] sm:$0xe]  ;;  %v5202_v45 = vld [vmem:[#allocation2 + $0xcc] sm:$0xe] }
 0x18f   : > { %v9304_v58 = vsel %vm8067_vm3, %v6476_v11, %v5337_v54  ;;  %v5339_v4 = vrot.slane %v5337_v54, 4  ;;  %v5262_v28 = vrot.slane %v5260_v18, 4  ;;  %v5269_v11 = vrot.slane %v5267_v9, 4  ;;  %v9745_v54 = vld [vmem:[#allocation10_spill] sm:$0xff] }
 0x190   : > { %v5270_v53 = vrot.slane %v9745_v54, 5  ;;  %v6481_v33 = vcombine.low %v5254_v21, %v5257_v59  ;;  %v5261_v56 = vsel %vm8067_vm3, %v6465_v3, %v5260_v18  ;;  %v5268_v52 = vsel %vm8067_vm3, %v6466_v19, %v5267_v9  ;;  %v2930_v21 = vld [vmem:[#allocation2 + $0x6c] sm:$0xf]  ;;  %v7454_v19 = vld [vmem:[#allocation2 + $0x84] sm:$0xff]  }
 0x191   : > { %v9314_v5 = vsel %vm8067_vm3, %v5339_v4, %v5340_v39  ;;  %v5274_v51 = vrot.slane %v9746_v27, 5  ;;  %v6478_v10 = vrot.slane %v5201_v46, 9  ;;  %v6467_v18 = vrot.slane %v5190_v63, 9 }
 0x192   : > { %v5271_v39 = vsel %vm8067_vm3, %v5269_v11, %v5270_v53  ;;  %v5351_v9 = vrot.slane %v9171_v14, 5  ;;  %v5354_v3 = vrot.slane %v9221_v41, 5  ;;  %v6479_v59 = vrot.slane %v5202_v45, 9  ;;  %v7509_v14 = vld [vmem:[#allocation2 + $0x70] sm:$0xf] }
 0x193   : > { %7110 = vmatmul.mubr.msk.bf16.gmra.mrb[24].mxu0 %vm1585_vm10, %v6445_v20  ;;  %v7508_v20 = vld [vmem:[#allocation2 + $0x2c] sm:$0x1]  ;;  %v3150_v11 = vshll.u32 %v2930_v21, 16  ;;  %v3156_v54 = vshll.u32 %v7509_v14, 16  ;;  %v5361_v41 = vrot.slane %v9273_v61, 5  ;;  %v3160_v53 = vshrl.u32 %v7509_v14, 16 }
 0x194   : > { %6958 = vmatmul.mubr.msk.bf16.gmra.mrb[8].mxu1 %vm1585_vm10, %v7449_v34  ;;  %7113 = vmatprep.mubr.msk.bf16.mxu0 %vm1585_vm10, %v6446_v12  ;;  %v6493_v34 = vcombine.low %v9304_v58, %v9314_v5  ;;  %v5263_v0 = vrot.slane %v7508_v20, 5  ;;  %v6447_v12 = vcombine.low %v4882_v6, %v4892_v35  ;;  %v6483_v35 = vcombine.low %v5268_v52, %v5271_v39  ;;  %v7455_v45 = vld [vmem:[#allocation2 + $0x90] sm:$0xff]  }
 0x195   : > { %6961 = vmatprep.mubr.msk.bf16.mxu1 %vm1585_vm10, %v7450_v42  ;;  %v5346_v42 = vrot.slane %v5344_v32, 4  ;;  %v7453_v32 = vld [vmem:[#allocation2 + $0x78] sm:$0xff]   ;;  %v5358_v20 = vrot.slane %v9243_v13, 5  ;;  %v3152_v52 = vrot.slane %v3150_v11, 5  ;;  %v3158_v27 = vrot.slane %v3156_v54, 5  ;;  %v7457_v11 = vld [vmem:[#allocation2 + $0xa8] sm:$0xff]  }
 0x196   : > { %v5264_v4 = vsel %vm8067_vm3, %v5262_v28, %v5263_v0  ;;  %v5353_v28 = vrot.slane %v5351_v9, 4  ;;  %v3147_v0 = vshrl.u32 %v2930_v21, 16  ;;  %v7456_v21 = vld [vmem:[#allocation2 + $0x9c] sm:$0xff]   ;;  %v7458_v14 = vld [vmem:[#allocation2 + $0xb4] sm:$0xff]  }
 0x197   : > { %v9335_v55 = vsel %vm8067_vm3, %v5346_v42, %v5347_v60  ;;  %v6482_v6 = vcombine.low %v5261_v56, %v5264_v4  ;;  %v9747_v60 = vld [vmem:[#allocation14_spill] sm:$0xff]  ;;  %v5276_v42 = vrot.slane %v5274_v51, 4  ;;  %v9367_v46 = vsel %vm8067_vm3, %v6479_v59, %v5358_v20 }
 0x198   : > { %v6494_v23 = vcombine.low %v9330_v43, %v9335_v55  ;;  %v3149_v56 = vrot.slane %v3147_v0, 4  ;;  %v5275_v4 = vsel %vm8067_vm3, %v6467_v18, %v5274_v51  ;;  %v7511_v51 = vld [vmem:[#allocation2 + $0x88] sm:$0xf] }
 0x199   : > { %v3204_v18 = vshll.u32 %v7511_v51, 16  ;;  %v3208_v48 = vshrl.u32 %v7511_v51, 16 }
 0x19b   : > { %7114 = vmatmul.mubr.msk.bf16.gmra.mrb[28].mxu0 %vm1585_vm10, %v6447_v12  ;;  %v9363_v12 = vsel %vm8067_vm3, %v5353_v28, %v5354_v3  ;;  %v9748_v28 = vcombine.low %v9087_v50, %v9104_v38  ;;  %v7512_v38 = vld [vmem:[#allocation2 + $0x8c] sm:$0x1] }
 0x19c   : > { %6962 = vmatmul.mubr.msk.bf16.gmra.mrb[12].mxu1 %vm1585_vm10, %v7451_v36  ;;  %7119 = vmatprep.mubr.msk.bf16.mxu0 %vm1585_vm10, %v6481_v33  ;;  %v5277_v36 = vrot.slane %v9747_v60, 5  ;;  %v5360_v33 = vrot.slane %v5358_v20, 4  ;;  %v7510_v60 = vld [vmem:[#allocation2 + $0x74] sm:$0x1] }
 0x19d   : > { %6965 = vmatprep.mubr.msk.bf16.mxu1 %vm1585_vm10, %v7452_v8  ;;  %v9357_v8 = vsel %vm8067_vm3, %v6478_v10, %v5351_v9  ;;  %v3162_v10 = vrot.slane %v3160_v53, 4  ;;  %v2936_v9 = vld [vmem:[#allocation2 + $0x84] sm:$0xf]  ;;  %v3166_v59 = vshll.u32 %v7510_v60, 16 }
 0x19e   : > { %v6495_v13 = vcombine.low %v9357_v8, %v9363_v12  ;;  %v9375_v61 = vsel %vm8067_vm3, %v5360_v33, %v5361_v41  ;;  %v5278_v39 = vsel %vm8067_vm3, %v5276_v42, %v5277_v36  ;;  %v2939_v36 = vld [vmem:[#allocation2 + $0x90] sm:$0xf]  ;;  %v9392_v33 = vrot.slane %v3204_v18, 5 }
 0x19f   : > { %v6496_v63 = vcombine.low %v9367_v46, %v9375_v61  ;;  %v6484_v3 = vcombine.low %v5275_v4, %v5278_v39  ;;  %v3168_v0 = vrot.slane %v3166_v59, 5  ;;  %v3219_v41 = vshrl.u32 %v2939_v36, 16  ;;  %v2942_v4 = vld [vmem:[#allocation2 + $0x9c] sm:$0xf] }
 0x1a0   : > { %v9749_v18 = vcombine.low %v9091_v31, %v9116_v2 }
 0x1a3   : > { %7120 = vmatmul.mubr.msk.bf16.vlgmr.msra.gmra.mrb[0].mxu0 %vm1585_vm10, %v6482_v6  ;;  %v3163_v6 = vor.u32 %v3162_v10, %v3158_v27  ;;  %v3214_v10 = vshll.u32 %v7512_v38, 16 }
 0x1a4   : > { %6966 = vmatmul.mubr.msk.bf16.gmra.mrb[16].mxu1 %vm1585_vm10, %v7453_v32  ;;  %7123 = vmatprep.mubr.msk.bf16.mxu0 %vm1585_vm10, %v6483_v35  ;;  %v3153_v32 = vor.u32 %v3152_v52, %v3149_v56  ;;  %v3198_v35 = vshll.u32 %v2936_v9, 16  ;;  %v3210_v56 = vrot.slane %v3208_v48, 4  ;;  %v3222_v52 = vshll.u32 %v2939_v36, 16  ;;  %v7459_v48 = vld [vmem:[#allocation2 + $0xc0] sm:$0xff]  }
 0x1a5   : > { %6969 = vmatprep.mubr.msk.bf16.mxu1 %vm1585_vm10, %v7454_v19  ;;  %v3195_v19 = vshrl.u32 %v2936_v9, 16  ;;  %v3164_v20 = vrot.slane %v3163_v6, 4  ;;  %v7514_v6 = vld [vmem:[#allocation2 + $0xa0] sm:$0xf]  ;;  %v9750_v36 = vcombine.low %v9095_v49, %v9120_v44  ;;  %v7516_v44 = vld [vmem:[#allocation2 + $0xa4] sm:$0x1] }
 0x1a6   : > { %v3154_v42 = vrot.slane %v3153_v32, 4  ;;  %v3200_v53 = vrot.slane %v3198_v35, 5  ;;  %v3246_v32 = vshll.u32 %v2942_v4, 16  ;;  %v3252_v60 = vshll.u32 %v7514_v6, 16 }
 0x1a7   : > { %v3197_v54 = vrot.slane %v3195_v19, 4  ;;  %v3169_v50 = vsel %vm7686_vm11, %v3164_v20, %v3168_v0  ;;  %v3256_v59 = vshrl.u32 %v7514_v6, 16  ;;  %v3221_v35 = vrot.slane %v3219_v41, 4 }
 0x1a8   : > { %v3159_v39 = vsel %vm7686_vm11, %v3154_v42, %v3158_v27  ;;  %v3211_v27 = vor.u32 %v3210_v56, %v9392_v33  ;;  %v3224_v51 = vrot.slane %v3222_v52, 5  ;;  %v7515_v52 = vld [vmem:[#allocation2 + $0x98] sm:$0x1]  ;;  %v3262_v38 = vshll.u32 %v7516_v44, 16 }
 0x1a9   : > { %v3201_v19 = vor.u32 %v3200_v53, %v3197_v54  ;;  %v6325_v42 = vcombine.low %v3159_v39, %v3169_v50  ;;  %v9411_v54 = vrot.slane %v3252_v60, 5  ;;  %v3258_v41 = vrot.slane %v3256_v59, 4  ;;  %v2945_v53 = vld [vmem:[#allocation2 + $0xa8] sm:$0xf] }
 0x1aa   : > { %v3212_v2 = vrot.slane %v3211_v27, 4  ;;  %v3225_v56 = vor.u32 %v3224_v51, %v3221_v35  ;;  %v3267_v39 = vshrl.u32 %v2945_v53, 16  ;;  %v3270_v50 = vshll.u32 %v2945_v53, 16 }
 0x1ab   : > { %7124 = vmatmul.mubr.msk.bf16.gmra.mrb[4].mxu0 %vm1585_vm10, %v6484_v3  ;;  %v3243_v3 = vshrl.u32 %v2942_v4, 16  ;;  %v3202_v31 = vrot.slane %v3201_v19, 4  ;;  %v3238_v4 = vshll.u32 %v7515_v52, 16  ;;  %v9751_v27 = vcombine.low %v9132_v30, %v9146_v62  ;;  %v2951_v52 = vld [vmem:[#allocation2 + $0xc0] sm:$0xf] }
 0x1ac   : > { %6970 = vmatmul.mubr.msk.bf16.gmra.mrb[20].mxu1 %vm1585_vm10, %v7455_v45  ;;  %7127 = vmatprep.mubr.msk.bf16.mxu0 %vm1585_vm10, %v9748_v28  ;;  %v7513_v45 = vld [vmem:[#allocation2 + $0x94] sm:$0xf]  ;;  %v3216_v28 = vrot.slane %v3214_v10, 5  ;;  %v3226_v59 = vrot.slane %v3225_v56, 4 }
 0x1ad   : > { %6973 = vmatprep.mubr.msk.bf16.mxu1 %vm1585_vm10, %v7456_v21  ;;  %v3228_v21 = vshll.u32 %v7513_v45, 16  ;;  %v3232_v9 = vshrl.u32 %v7513_v45, 16  ;;  %v2948_v10 = vld [vmem:[#allocation2 + $0xb4] sm:$0xf]  ;;  %v3207_v6 = vsel %vm7686_vm11, %v3202_v31, %v9392_v33  ;;  %v3240_v19 = vrot.slane %v3238_v4, 5 }
 0x1ae   : > { %v3217_v60 = vsel %vm7686_vm11, %v3212_v2, %v3216_v28  ;;  %v3291_v35 = vshrl.u32 %v2948_v10, 16  ;;  %v3294_v51 = vshll.u32 %v2948_v10, 16  ;;  %v3269_v28 = vrot.slane %v3267_v39, 4  ;;  %v7520_v10 = vld [vmem:[#allocation2 + $0xc4] sm:$0xf] }
 0x1af   : > { %v9409_v20 = vrot.slane %v3228_v21, 5  ;;  %v3234_v0 = vrot.slane %v3232_v9, 4  ;;  %v3259_v21 = vor.u32 %v3258_v41, %v9411_v54  ;;  %v7517_v9 = vld [vmem:[#allocation2 + $0xac] sm:$0xf]  ;;  %v6327_v62 = vcombine.low %v3207_v6, %v3217_v60 }
 0x1b0   : > { %v3293_v53 = vrot.slane %v3291_v35, 4  ;;  %v3296_v31 = vrot.slane %v3294_v51, 5 }
 0x1b1   : > { %v3235_v49 = vor.u32 %v3234_v0, %v9409_v20  ;;  %v3272_v0 = vrot.slane %v3270_v50, 5  ;;  %v3231_v40 = vsel %vm7686_vm11, %v3226_v59, %v9409_v20  ;;  %v3315_v20 = vshrl.u32 %v2951_v52, 16 }
 0x1b2   : > { %v3318_v50 = vshll.u32 %v2951_v52, 16 }
 0x1b3   : > { %7128 = vmatmul.mubr.msk.bf16.gmra.mrb[8].mxu0 %vm1585_vm10, %v9749_v18  ;;  %v7518_v18 = vld [vmem:[#allocation2 + $0xb8] sm:$0xf]  ;;  %v3236_v33 = vrot.slane %v3235_v49, 4 }
 0x1b4   : > { %6974 = vmatmul.mubr.msk.bf16.gmra.mrb[24].mxu1 %vm1585_vm10, %v7457_v11  ;;  %7131 = vmatprep.mubr.msk.bf16.mxu0 %vm1585_vm10, %v9750_v36  ;;  %v3245_v11 = vrot.slane %v3243_v3, 4  ;;  %v3276_v3 = vshll.u32 %v7517_v9, 16  ;;  %v3304_v36 = vshrl.u32 %v7518_v18, 16  ;;  %v3320_v35 = vrot.slane %v3318_v50, 5 }
 0x1b5   : > { %6977 = vmatprep.mubr.msk.bf16.mxu1 %vm1585_vm10, %v7458_v14  ;;  %v3248_v14 = vrot.slane %v3246_v32, 5  ;;  %v3280_v32 = vshrl.u32 %v7517_v9, 16  ;;  %v3241_v15 = vsel %vm7686_vm11, %v3236_v33, %v3240_v19 }
 0x1b6   : > { %v3278_v41 = vrot.slane %v3276_v3, 5  ;;  %v3306_v56 = vrot.slane %v3304_v36, 4  ;;  %v7522_v36 = vld [vmem:[#allocation2 + $0xc8] sm:$0x1] }
 0x1b7   : > { %v3249_v45 = vor.u32 %v3248_v14, %v3245_v11  ;;  %v3260_v14 = vrot.slane %v3259_v21, 4  ;;  %v3282_v30 = vrot.slane %v3280_v32, 4  ;;  %v3328_v21 = vshrl.u32 %v7520_v10, 16 }
 0x1b8   : > { %v6328_v32 = vcombine.low %v3231_v40, %v3241_v15  ;;  %v3334_v33 = vshll.u32 %v7522_v36, 16 }
 0x1b9   : > { %v3250_v11 = vrot.slane %v3249_v45, 4  ;;  %v3283_v39 = vor.u32 %v3282_v30, %v3278_v41  ;;  %v3324_v45 = vshll.u32 %v7520_v10, 16  ;;  %v3330_v47 = vrot.slane %v3328_v21, 4 }
 0x1ba   : > { %v3336_v30 = vrot.slane %v3334_v33, 5 }
 0x1bb   : > { %7132 = vmatmul.mubr.msk.bf16.gmra.mrb[12].mxu0 %vm1585_vm10, %v9751_v27  ;;  %v3255_v49 = vsel %vm7686_vm11, %v3250_v11, %v9411_v54  ;;  %v7521_v54 = vld [vmem:[#allocation2 + $0xbc] sm:$0x1]  ;;  %v3284_v59 = vrot.slane %v3283_v39, 4  ;;  %v3317_v27 = vrot.slane %v3315_v20, 4  ;;  %v3326_v51 = vrot.slane %v3324_v45, 5 }
 0x1bc   : > { %6978 = vmatmul.mubr.msk.bf16.gmra.mrb[28].mxu1 %vm1585_vm10, %v7459_v48  ;;  %v3300_v48 = vshll.u32 %v7518_v18, 16  ;;  %7135 = vmatprep.mubr.msk.bf16.mxu0 %vm1585_vm10, %v6489_v17  ;;  %v7519_v17 = vld [vmem:[#allocation2 + $0xb0] sm:$0x1]  ;;  %v3310_v3 = vshll.u32 %v7521_v54, 16 }
 0x1bd   : > { %6999 = vmatprep.mubr.msk.bf16.mxu1 %vm1585_vm10, %v6325_v42  ;;  %v3264_v42 = vrot.slane %v3262_v38, 5  ;;  %v3286_v4 = vshll.u32 %v7519_v17, 16  ;;  %v3273_v38 = vor.u32 %v3272_v0, %v3269_v28  ;;  %v3321_v25 = vor.u32 %v3320_v35, %v3317_v27 }
 0x1be   : > { %v3302_v2 = vrot.slane %v3300_v48, 5  ;;  %v3312_v18 = vrot.slane %v3310_v3, 5 }
 0x1bf   : > { %v3265_v44 = vsel %vm7686_vm11, %v3260_v14, %v3264_v42  ;;  %v3274_v60 = vrot.slane %v3273_v38, 4  ;;  %v3288_v19 = vrot.slane %v3286_v4, 5  ;;  %v3322_v14 = vrot.slane %v3321_v25, 4 }
 0x1c0   : > { %v3307_v9 = vor.u32 %v3306_v56, %v3302_v2  ;;  %v6329_v6 = vcombine.low %v3255_v49, %v3265_v44 }
 0x1c1   : > { %v3279_v48 = vsel %vm7686_vm11, %v3274_v60, %v3278_v41  ;;  %v3289_v37 = vsel %vm7686_vm11, %v3284_v59, %v3288_v19  ;;  %v3327_v29 = vsel %vm7686_vm11, %v3322_v14, %v3326_v51 }
 0x1c2   : > { %v6330_v0 = vcombine.low %v3279_v48, %v3289_v37 }
 0x1c3   : > { %7136 = vmatmul.mubr.msk.bf16.gmra.mrb[16].mxu0 %vm1585_vm10, %v6490_v57  ;;  %v3308_v57 = vrot.slane %v3307_v9, 4 }
 0x1c4   : > { %7000 = vmatmul.mubr.msk.bf16.vlgmr.msra.gmra.mrb[16].mxu1 %vm1585_vm10, %v9207_v7  ;;  %v3297_v7 = vor.u32 %v3296_v31, %v3293_v53  ;;  %7139 = vmatprep.mubr.msk.bf16.mxu0 %vm1585_vm10, %v6491_v26  ;;  %v3331_v26 = vor.u32 %v3330_v47, %v3326_v51 }
 0x1c5   : > { %7003 = vmatprep.mubr.msk.bf16.mxu1 %vm1585_vm10, %v6327_v62  ;;  %v3313_v28 = vsel %vm7686_vm11, %v3308_v57, %v3312_v18 }
 0x1c6   : > { %v3298_v22 = vrot.slane %v3297_v7, 4  ;;  %v3332_v41 = vrot.slane %v3331_v26, 4 }
 0x1c8   : > { %v3303_v42 = vsel %vm7686_vm11, %v3298_v22, %v3302_v2  ;;  %v3337_v24 = vsel %vm7686_vm11, %v3332_v41, %v3336_v30 }
 0x1c9   : > { %v6331_v11 = vcombine.low %v3303_v42, %v3313_v28 }
 0x1cb   : > { %7140 = vmatmul.mubr.msk.bf16.gmra.mrb[20].mxu0 %vm1585_vm10, %v6492_v1  ;;  %v6332_v1 = vcombine.low %v3327_v29, %v3337_v24 }
 0x1cc   : > { %7004 = vmatmul.mubr.msk.bf16.gmra.mrb[20].mxu1 %vm1585_vm10, %v6328_v32  ;;  %7143 = vmatprep.mubr.msk.bf16.mxu0 %vm1585_vm10, %v6493_v34 }
 0x1cd   : > { %7007 = vmatprep.mubr.msk.bf16.mxu1 %vm1585_vm10, %v6329_v6 }
 0x1d3   : > { %7144 = vmatmul.mubr.msk.bf16.gmra.mrb[24].mxu0 %vm1585_vm10, %v6494_v23 }
 0x1d4   : > { %7008 = vmatmul.mubr.msk.bf16.gmra.mrb[24].mxu1 %vm1585_vm10, %v6330_v0  ;;  %7147 = vmatprep.mubr.msk.bf16.mxu0 %vm1585_vm10, %v6495_v13 }
 0x1d5   : > { %7011 = vmatprep.mubr.msk.bf16.mxu1 %vm1585_vm10, %v6331_v11 }
 0x1db   : > { %7148 = vmatmul.mubr.msk.bf16.gmra.mrb[28].mxu0 %vm1585_vm10, %v6496_v63 }
 0x1dc   : > { %7012 = vmatmul.mubr.msk.bf16.gmra.mrb[28].mxu1 %vm1585_vm10, %v6332_v1 }
 0x257   : > { %v6951_v16 = vpop.f32.mrb[0].mxu1 }
 0x258   : > { %v2747_v58 = vpop.f32.mrb[1].mxu1 }
 0x259   : > { %v6952_v5 = vpop.f32.mrb[2].mxu1 }
 0x25a   : > { %v2750_v34 = vpop.f32.mrb[3].mxu1 }
 0x25f   : > { %v6955_v43 = vpop.f32.mrb[4].mxu1 }
 0x260   : > { %v2763_v55 = vpop.f32.mrb[5].mxu1 }
 0x261   : > { %v6956_v23 = vpop.f32.mrb[6].mxu1 }
 0x262   : > { %v2766_v62 = vpop.f32.mrb[7].mxu1 }
 0x267   : > { %v9488_v8 = vpop.f32.mrb[8].mxu1 }
 0x268   : > { %v9490_v12 = vpop.f32.mrb[9].mxu1 }
 0x269   : > { %v9492_v13 = vpop.f32.mrb[10].mxu1 }
 0x26a   : > { %v9494_v53 = vpop.f32.mrb[11].mxu1 }
 0x26f   : > { %v9496_v46 = vpop.f32.mrb[12].mxu1 }
 0x270   : > { %v9498_v61 = vpop.f32.mrb[13].mxu1 }
 0x271   : > { %v9500_v63 = vpop.f32.mrb[14].mxu1 }
 0x272   : > { %v9502_v31 = vpop.f32.mrb[15].mxu1 }
 0x276   : > { %v7121_v2 = vpop.f32.mrb[0].mxu0 }
 0x277   : > { %v7153_v56 = vadd.f32 %v7121_v2, %v6951_v16  ;;  %v5498_v52 = vpop.f32.mrb[1].mxu0 }
 0x278   : > { %v7154_v40 = vadd.f32 %v5498_v52, %v2747_v58  ;;  %v7122_v15 = vpop.f32.mrb[2].mxu0 }
 0x279   : > { %v6583_v17 = vpack.c.bf16 %v7153_v56, %v7153_v56  ;;  %v7155_v4 = vadd.f32 %v7122_v15, %v6952_v5  ;;  %v5501_v49 = vpop.f32.mrb[3].mxu0 }
 0x27a   : > { %v6581_v44 = vpack.c.bf16 %v7154_v40, %v7154_v40  ;;  %v7156_v38 = vadd.f32 %v5501_v49, %v2750_v34 }
 0x27b   : > { %5787 = vst.msk [vmem:[%s9509_s20 + $0x8] sm:$0xf] %vm270_vm1, %v6583_v17  ;;  %v5658_v39 = vpack.c.bf16 %v7155_v4, %v7153_v56  ;;  %v6584_v20 = vpack.c.bf16 %v7155_v4, %v7155_v4 }
 0x27c   : > { %5785 = vst.msk [vmem:[%s9509_s20] sm:$0xf] %vm270_vm1, %v6581_v44  ;;  %v5657_v50 = vpack.c.bf16 %v7156_v38, %v7154_v40  ;;  %v6582_v10 = vpack.c.bf16 %v7156_v38, %v7156_v38 }
 0x27d   : > { %5788 = vst.msk [vmem:[%s9509_s20 + $0xc] sm:$0xf] %vm270_vm1, %v6584_v20  ;;  %v5819_v45 = vunpack.c.l.bf16 %v5658_v39  ;;  %v5820_v21 = vunpack.c.h.bf16 %v5658_v39 }
 0x27e   : > { %5786 = vst.msk [vmem:[%s9509_s20 + $0x4] sm:$0xf] %vm270_vm1, %v6582_v10  ;;  %v5817_v7 = vunpack.c.l.bf16 %v5657_v50  ;;  %v5818_v9 = vunpack.c.h.bf16 %v5657_v50  ;;  %v7125_v54 = vpop.f32.mrb[4].mxu0 }
 0x27f   : > { %v5852_v3 = vsel %vm1585_vm10, %v5819_v45, 0.0  ;;  %v5921_v32 = vmul.f32 %v5819_v45, %v5819_v45  ;;  %v5514_v6 = vpop.f32.mrb[5].mxu0  ;;  %v5854_v51 = vsel %vm1585_vm10, %v5820_v21, 0.0  ;;  %v5922_v47 = vmul.f32 %v5820_v21, %v5820_v21 }
 0x280   : > { %v5849_v60 = vsel %vm1585_vm10, %v5817_v7, 0.0  ;;  %v5850_v59 = vsel %vm1585_vm10, %v5818_v9, 0.0  ;;  %v5919_v19 = vmul.f32 %v5817_v7, %v5817_v7  ;;  %v5920_v27 = vmul.f32 %v5818_v9, %v5818_v9  ;;  %v7126_v35 = vpop.f32.mrb[6].mxu0 }
 0x281   : > { %v5851_v22 = vadd.f32 %v5850_v59, %v5849_v60  ;;  %v7157_v57 = vadd.f32 %v7125_v54, %v6955_v43  ;;  %v5517_v18 = vpop.f32.mrb[7].mxu0  ;;  %v7158_v25 = vadd.f32 %v5514_v6, %v2763_v55  ;;  %v7159_v26 = vadd.f32 %v7126_v35, %v6956_v23 }
 0x282   : > { %v5951_v48 = vsel %vm1585_vm10, %v5919_v19, 0.0  ;;  %v5952_v37 = vsel %vm1585_vm10, %v5920_v27, 0.0  ;;  %v7160_v28 = vadd.f32 %v5517_v18, %v2766_v62  ;;  %v5954_v0 = vsel %vm1585_vm10, %v5921_v32, 0.0 }
 0x283   : > { %v5853_v36 = vadd.f32 %v5852_v3, %v5851_v22  ;;  %v5953_v33 = vadd.f32 %v5952_v37, %v5951_v48  ;;  %v6587_v42 = vpack.c.bf16 %v7157_v57, %v7157_v57  ;;  %v6585_v11 = vpack.c.bf16 %v7158_v25, %v7158_v25 }
 0x284   : > { %v5660_v14 = vpack.c.bf16 %v7159_v26, %v7157_v57  ;;  %v6588_v41 = vpack.c.bf16 %v7159_v26, %v7159_v26  ;;  %v5659_v29 = vpack.c.bf16 %v7160_v28, %v7158_v25  ;;  %v6586_v24 = vpack.c.bf16 %v7160_v28, %v7160_v28 }
 0x285   : > { %v5955_v30 = vadd.f32 %v5954_v0, %v5953_v33  ;;  %5791 = vst.msk [vmem:[%s9509_s20 + $0x18] sm:$0xf] %vm270_vm1, %v6587_v42  ;;  %v5855_v1 = vadd.f32 %v5854_v51, %v5853_v36  ;;  %v5956_v16 = vsel %vm1585_vm10, %v5922_v47, 0.0  ;;  %5789 = vst.msk [vmem:[%s9509_s20 + $0x10] sm:$0xf] %vm270_vm1, %v6585_v11 }
 0x286   : > { %5792 = vst.msk [vmem:[%s9509_s20 + $0x1c] sm:$0xf] %vm270_vm1, %v6588_v41  ;;  %v5823_v58 = vunpack.c.l.bf16 %v5660_v14  ;;  %v5824_v5 = vunpack.c.h.bf16 %v5660_v14  ;;  %v7129_v34 = vpop.f32.mrb[8].mxu0  ;;  %5790 = vst.msk [vmem:[%s9509_s20 + $0x14] sm:$0xf] %vm270_vm1, %v6586_v24  ;;  %v5821_v43 = vunpack.c.l.bf16 %v5659_v29  ;;  %v5822_v55 = vunpack.c.h.bf16 %v5659_v29 }
 0x287   : > { %v5957_v23 = vadd.f32 %v5956_v16, %v5955_v30  ;;  %v7161_v62 = vadd.f32 %v7129_v34, %v9488_v8  ;;  %v5530_v2 = vpop.f32.mrb[9].mxu0 }
 0x288   : > { %v7130_v56 = vpop.f32.mrb[10].mxu0  ;;  %v5860_v52 = vsel %vm1585_vm10, %v5823_v58, 0.0  ;;  %v5856_v40 = vsel %vm1585_vm10, %v5821_v43, 0.0  ;;  %v5923_v15 = vmul.f32 %v5821_v43, %v5821_v43  ;;  %v5924_v17 = vmul.f32 %v5822_v55, %v5822_v55 }
 0x289   : > { %v5533_v4 = vpop.f32.mrb[11].mxu0  ;;  %v5862_v49 = vsel %vm1585_vm10, %v5824_v5, 0.0  ;;  %v5925_v44 = vmul.f32 %v5823_v58, %v5823_v58  ;;  %v5857_v38 = vadd.f32 %v5856_v40, %v5855_v1  ;;  %v6591_v39 = vpack.c.bf16 %v7161_v62, %v7161_v62 }
 0x28a   : > { %v5858_v20 = vsel %vm1585_vm10, %v5822_v55, 0.0  ;;  %v5958_v50 = vsel %vm1585_vm10, %v5923_v15, 0.0  ;;  %v7162_v8 = vadd.f32 %v5530_v2, %v9490_v12  ;;  %v7163_v10 = vadd.f32 %v7130_v56, %v9492_v13 }
 0x28b   : > { %v5926_v45 = vmul.f32 %v5824_v5, %v5824_v5  ;;  %v5859_v21 = vadd.f32 %v5858_v20, %v5857_v38  ;;  %v5959_v7 = vadd.f32 %v5958_v50, %v5957_v23  ;;  %5795 = vst.msk [vmem:[%s9509_s20 + $0x28] sm:$0xf] %vm270_vm1, %v6591_v39  ;;  %v7164_v9 = vadd.f32 %v5533_v4, %v9494_v53 }
 0x28c   : > { %v5960_v54 = vsel %vm1585_vm10, %v5924_v17, 0.0  ;;  %v6589_v3 = vpack.c.bf16 %v7162_v8, %v7162_v8  ;;  %v5662_v32 = vpack.c.bf16 %v7163_v10, %v7161_v62  ;;  %v6592_v6 = vpack.c.bf16 %v7163_v10, %v7163_v10 }
 0x28d   : > { %v5861_v60 = vadd.f32 %v5860_v52, %v5859_v21  ;;  %v5961_v59 = vadd.f32 %v5960_v54, %v5959_v7  ;;  %v5661_v12 = vpack.c.bf16 %v7164_v9, %v7162_v8  ;;  %v6590_v19 = vpack.c.bf16 %v7164_v9, %v7164_v9 }
 0x28e   : > { %v7133_v13 = vpop.f32.mrb[12].mxu0  ;;  %v5962_v27 = vsel %vm1585_vm10, %v5925_v44, 0.0  ;;  %5793 = vst.msk [vmem:[%s9509_s20 + $0x20] sm:$0xf] %vm270_vm1, %v6589_v3  ;;  %5796 = vst.msk [vmem:[%s9509_s20 + $0x2c] sm:$0xf] %vm270_vm1, %v6592_v6  ;;  %v5827_v35 = vunpack.c.l.bf16 %v5662_v32  ;;  %v5828_v51 = vunpack.c.h.bf16 %v5662_v32 }
 0x28f   : > { %v7165_v53 = vadd.f32 %v7133_v13, %v9496_v46  ;;  %v5546_v47 = vpop.f32.mrb[13].mxu0  ;;  %v5963_v22 = vadd.f32 %v5962_v27, %v5961_v59  ;;  %5794 = vst.msk [vmem:[%s9509_s20 + $0x24] sm:$0xf] %vm270_vm1, %v6590_v19  ;;  %v5825_v57 = vunpack.c.l.bf16 %v5661_v12  ;;  %v5826_v18 = vunpack.c.h.bf16 %v5661_v12 }
 0x290   : > { %v5863_v48 = vadd.f32 %v5862_v49, %v5861_v60  ;;  %v7134_v37 = vpop.f32.mrb[14].mxu0  ;;  %v5964_v25 = vsel %vm1585_vm10, %v5926_v45, 0.0  ;;  %v5929_v36 = vmul.f32 %v5827_v35, %v5827_v35  ;;  %v5868_v0 = vsel %vm1585_vm10, %v5827_v35, 0.0 }
 0x291   : > { %v5549_v26 = vpop.f32.mrb[15].mxu0  ;;  %v5864_v33 = vsel %vm1585_vm10, %v5825_v57, 0.0  ;;  %v5927_v42 = vmul.f32 %v5825_v57, %v5825_v57  ;;  %v5928_v28 = vmul.f32 %v5826_v18, %v5826_v18  ;;  %v5870_v46 = vsel %vm1585_vm10, %v5828_v51, 0.0 }
 0x292   : > { %v5865_v11 = vadd.f32 %v5864_v33, %v5863_v48  ;;  %v5965_v14 = vadd.f32 %v5964_v25, %v5963_v22  ;;  %v5866_v41 = vsel %vm1585_vm10, %v5826_v18, 0.0  ;;  %v6595_v29 = vpack.c.bf16 %v7165_v53, %v7165_v53 }
 0x293   : > { %v5966_v30 = vsel %vm1585_vm10, %v5927_v42, 0.0  ;;  %v7166_v24 = vadd.f32 %v5546_v47, %v9498_v61  ;;  %v7167_v5 = vadd.f32 %v7134_v37, %v9500_v63  ;;  %v7168_v34 = vadd.f32 %v5549_v26, %v9502_v31 }
 0x294   : > { %v5867_v16 = vadd.f32 %v5866_v41, %v5865_v11  ;;  %v5967_v58 = vadd.f32 %v5966_v30, %v5965_v14  ;;  %v5930_v55 = vmul.f32 %v5828_v51, %v5828_v51  ;;  %v5970_v23 = vsel %vm1585_vm10, %v5929_v36, 0.0  ;;  %5799 = vst.msk [vmem:[%s9509_s20 + $0x38] sm:$0xf] %vm270_vm1, %v6595_v29 }
 0x295   : > { %v5968_v62 = vsel %vm1585_vm10, %v5928_v28, 0.0  ;;  %v6593_v2 = vpack.c.bf16 %v7166_v24, %v7166_v24  ;;  %v5664_v15 = vpack.c.bf16 %v7167_v5, %v7165_v53  ;;  %v6596_v63 = vpack.c.bf16 %v7167_v5, %v7167_v5 }
 0x296   : > { %v7137_v56 = vpop.f32.mrb[16].mxu0  ;;  %v5869_v52 = vadd.f32 %v5868_v0, %v5867_v16  ;;  %v5969_v40 = vadd.f32 %v5968_v62, %v5967_v58  ;;  %v5663_v31 = vpack.c.bf16 %v7168_v34, %v7166_v24  ;;  %v6594_v49 = vpack.c.bf16 %v7168_v34, %v7168_v34 }
 0x297   : > { %v7001_v1 = vpop.f32.mrb[16].mxu1  ;;  %v5562_v17 = vpop.f32.mrb[17].mxu0  ;;  %5797 = vst.msk [vmem:[%s9509_s20 + $0x30] sm:$0xf] %vm270_vm1, %v6593_v2  ;;  %5800 = vst.msk [vmem:[%s9509_s20 + $0x3c] sm:$0xf] %vm270_vm1, %v6596_v63  ;;  %v5831_v50 = vunpack.c.l.bf16 %v5664_v15  ;;  %v5832_v8 = vunpack.c.h.bf16 %v5664_v15 }
 0x298   : > { %v3537_v43 = vpop.f32.mrb[17].mxu1  ;;  %v7169_v44 = vadd.f32 %v7137_v56, %v7001_v1  ;;  %v7138_v39 = vpop.f32.mrb[18].mxu0  ;;  %v5971_v20 = vadd.f32 %v5970_v23, %v5969_v40  ;;  %v5871_v10 = vadd.f32 %v5870_v46, %v5869_v52  ;;  %5798 = vst.msk [vmem:[%s9509_s20 + $0x34] sm:$0xf] %vm270_vm1, %v6594_v49  ;;  %v5829_v21 = vunpack.c.l.bf16 %v5663_v31 }
 0x299   : > { %v7002_v61 = vpop.f32.mrb[18].mxu1  ;;  %v7170_v38 = vadd.f32 %v5562_v17, %v3537_v43  ;;  %v5565_v45 = vpop.f32.mrb[19].mxu0  ;;  %v5830_v7 = vunpack.c.h.bf16 %v5663_v31  ;;  %v5972_v3 = vsel %vm1585_vm10, %v5930_v55, 0.0  ;;  %v5876_v32 = vsel %vm1585_vm10, %v5831_v50, 0.0 }
 0x29a   : > { %v3540_v4 = vpop.f32.mrb[19].mxu1  ;;  %v6599_v9 = vpack.c.bf16 %v7169_v44, %v7169_v44  ;;  %v5933_v6 = vmul.f32 %v5831_v50, %v5831_v50  ;;  %v5878_v60 = vsel %vm1585_vm10, %v5832_v8, 0.0  ;;  %v5872_v59 = vsel %vm1585_vm10, %v5829_v21, 0.0 }
 0x29b   : > { %v6597_v54 = vpack.c.bf16 %v7170_v38, %v7170_v38  ;;  %v5931_v12 = vmul.f32 %v5829_v21, %v5829_v21  ;;  %v5932_v19 = vmul.f32 %v5830_v7, %v5830_v7  ;;  %v5934_v27 = vmul.f32 %v5832_v8, %v5832_v8 }
 0x29c   : > { %5803 = vst.msk [vmem:[%s9509_s20 + $0x48] sm:$0xf] %vm270_vm1, %v6599_v9  ;;  %v5873_v35 = vadd.f32 %v5872_v59, %v5871_v10  ;;  %v5874_v51 = vsel %vm1585_vm10, %v5830_v7, 0.0  ;;  %v5973_v53 = vadd.f32 %v5972_v3, %v5971_v20  ;;  %v5978_v22 = vsel %vm1585_vm10, %v5933_v6, 0.0 }
 0x29d   : > { %5801 = vst.msk [vmem:[%s9509_s20 + $0x40] sm:$0xf] %vm270_vm1, %v6597_v54  ;;  %v5974_v57 = vsel %vm1585_vm10, %v5931_v12, 0.0  ;;  %v7171_v18 = vadd.f32 %v7138_v39, %v7002_v61  ;;  %v7172_v48 = vadd.f32 %v5565_v45, %v3540_v4  ;;  %v5976_v33 = vsel %vm1585_vm10, %v5932_v19, 0.0 }
 0x29e   : > { %v7141_v37 = vpop.f32.mrb[20].mxu0  ;;  %v5875_v26 = vadd.f32 %v5874_v51, %v5873_v35  ;;  %v5975_v36 = vadd.f32 %v5974_v57, %v5973_v53  ;;  %v5980_v61 = vsel %vm1585_vm10, %v5934_v27, 0.0 }
 0x29f   : > { %v7005_v13 = vpop.f32.mrb[20].mxu1  ;;  %v5578_v28 = vpop.f32.mrb[21].mxu0  ;;  %v5666_v46 = vpack.c.bf16 %v7171_v18, %v7169_v44  ;;  %v6600_v11 = vpack.c.bf16 %v7171_v18, %v7171_v18  ;;  %v5665_v14 = vpack.c.bf16 %v7172_v48, %v7170_v38  ;;  %v6598_v41 = vpack.c.bf16 %v7172_v48, %v7172_v48 }
 0x2a0   : > { %v3553_v47 = vpop.f32.mrb[21].mxu1  ;;  %v7173_v42 = vadd.f32 %v7141_v37, %v7005_v13  ;;  %v7142_v30 = vpop.f32.mrb[22].mxu0  ;;  %v5877_v29 = vadd.f32 %v5876_v32, %v5875_v26  ;;  %v5977_v24 = vadd.f32 %v5976_v33, %v5975_v36 }
 0x2a1   : > { %v7006_v25 = vpop.f32.mrb[22].mxu1  ;;  %v7174_v16 = vadd.f32 %v5578_v28, %v3553_v47  ;;  %v5581_v58 = vpop.f32.mrb[23].mxu0  ;;  %5804 = vst.msk [vmem:[%s9509_s20 + $0x4c] sm:$0xf] %vm270_vm1, %v6600_v11  ;;  %v5835_v5 = vunpack.c.l.bf16 %v5666_v46  ;;  %v5836_v34 = vunpack.c.h.bf16 %v5666_v46  ;;  %5802 = vst.msk [vmem:[%s9509_s20 + $0x44] sm:$0xf] %vm270_vm1, %v6598_v41  ;;  %v5833_v43 = vunpack.c.l.bf16 %v5665_v14 }
 0x2a2   : > { %v3556_v0 = vpop.f32.mrb[23].mxu1  ;;  %v6603_v1 = vpack.c.bf16 %v7173_v42, %v7173_v42  ;;  %v5834_v55 = vunpack.c.h.bf16 %v5665_v14  ;;  %v5979_v23 = vadd.f32 %v5978_v22, %v5977_v24  ;;  %v5879_v62 = vadd.f32 %v5878_v60, %v5877_v29 }
 0x2a3   : > { %v6601_v2 = vpack.c.bf16 %v7174_v16, %v7174_v16  ;;  %v7175_v56 = vadd.f32 %v7142_v30, %v7006_v25  ;;  %v5884_v52 = vsel %vm1585_vm10, %v5835_v5, 0.0  ;;  %v5937_v15 = vmul.f32 %v5835_v5, %v5835_v5 }
 0x2a4   : > { %5807 = vst.msk [vmem:[%s9509_s20 + $0x58] sm:$0xf] %vm270_vm1, %v6603_v1  ;;  %v5880_v63 = vsel %vm1585_vm10, %v5833_v43, 0.0  ;;  %v5935_v17 = vmul.f32 %v5833_v43, %v5833_v43  ;;  %v5936_v4 = vmul.f32 %v5834_v55, %v5834_v55  ;;  %v5938_v49 = vmul.f32 %v5836_v34, %v5836_v34 }
 0x2a5   : > { %5805 = vst.msk [vmem:[%s9509_s20 + $0x50] sm:$0xf] %vm270_vm1, %v6601_v2  ;;  %v5881_v44 = vadd.f32 %v5880_v63, %v5879_v62  ;;  %v5882_v38 = vsel %vm1585_vm10, %v5834_v55, 0.0  ;;  %v5981_v39 = vadd.f32 %v5980_v61, %v5979_v23  ;;  %v5668_v45 = vpack.c.bf16 %v7175_v56, %v7173_v42 }
 0x2a6   : > { %v7145_v20 = vpop.f32.mrb[24].mxu0  ;;  %v5982_v8 = vsel %vm1585_vm10, %v5935_v17, 0.0  ;;  %v5984_v10 = vsel %vm1585_vm10, %v5936_v4, 0.0  ;;  %v6604_v21 = vpack.c.bf16 %v7175_v56, %v7175_v56  ;;  %v7176_v32 = vadd.f32 %v5581_v58, %v3556_v0 }
 0x2a7   : > { %v7009_v40 = vpop.f32.mrb[24].mxu1  ;;  %v5594_v7 = vpop.f32.mrb[25].mxu0  ;;  %v5883_v54 = vadd.f32 %v5882_v38, %v5881_v44  ;;  %v5983_v3 = vadd.f32 %v5982_v8, %v5981_v39  ;;  %v5839_v59 = vunpack.c.l.bf16 %v5668_v45  ;;  %v5840_v12 = vunpack.c.h.bf16 %v5668_v45 }
 0x2a8   : > { %v3569_v31 = vpop.f32.mrb[25].mxu1  ;;  %v7177_v6 = vadd.f32 %v7145_v20, %v7009_v40  ;;  %v7146_v60 = vpop.f32.mrb[26].mxu0  ;;  %5808 = vst.msk [vmem:[%s9509_s20 + $0x5c] sm:$0xf] %vm270_vm1, %v6604_v21  ;;  %v5667_v53 = vpack.c.bf16 %v7176_v32, %v7174_v16  ;;  %v6602_v47 = vpack.c.bf16 %v7176_v32, %v7176_v32  ;;  %v5886_v22 = vsel %vm1585_vm10, %v5836_v34, 0.0 }
 0x2a9   : > { %v7010_v50 = vpop.f32.mrb[26].mxu1  ;;  %v7178_v19 = vadd.f32 %v5594_v7, %v3569_v31  ;;  %v5597_v27 = vpop.f32.mrb[27].mxu0  ;;  %v5885_v35 = vadd.f32 %v5884_v52, %v5883_v54  ;;  %v5985_v51 = vadd.f32 %v5984_v10, %v5983_v3  ;;  %v5986_v57 = vsel %vm1585_vm10, %v5937_v15, 0.0 }
 0x2aa   : > { %v3572_v9 = vpop.f32.mrb[27].mxu1  ;;  %v7179_v13 = vadd.f32 %v7146_v60, %v7010_v50  ;;  %v5988_v18 = vsel %vm1585_vm10, %v5938_v49, 0.0  ;;  %5806 = vst.msk [vmem:[%s9509_s20 + $0x54] sm:$0xf] %vm270_vm1, %v6602_v47  ;;  %v5837_v37 = vunpack.c.l.bf16 %v5667_v53  ;;  %v5838_v25 = vunpack.c.h.bf16 %v5667_v53 }
 0x2ab   : > { %v5987_v48 = vadd.f32 %v5986_v57, %v5985_v51  ;;  %v5887_v26 = vadd.f32 %v5886_v22, %v5885_v35  ;;  %v5892_v33 = vsel %vm1585_vm10, %v5839_v59, 0.0  ;;  %v5941_v42 = vmul.f32 %v5839_v59, %v5839_v59 }
 0x2ac   : > { %v6607_v28 = vpack.c.bf16 %v7177_v6, %v7177_v6  ;;  %v6605_v0 = vpack.c.bf16 %v7178_v19, %v7178_v19  ;;  %v5942_v11 = vmul.f32 %v5840_v12, %v5840_v12  ;;  %v5888_v14 = vsel %vm1585_vm10, %v5837_v37, 0.0 }
 0x2ad   : > { %v5939_v41 = vmul.f32 %v5837_v37, %v5837_v37  ;;  %v5940_v30 = vmul.f32 %v5838_v25, %v5838_v25  ;;  %v5889_v1 = vadd.f32 %v5888_v14, %v5887_v26  ;;  %v5989_v16 = vadd.f32 %v5988_v18, %v5987_v48 }
 0x2ae   : > { %v7149_v29 = vpop.f32.mrb[28].mxu0  ;;  %5811 = vst.msk [vmem:[%s9509_s20 + $0x68] sm:$0xf] %vm270_vm1, %v6607_v28  ;;  %5809 = vst.msk [vmem:[%s9509_s20 + $0x60] sm:$0xf] %vm270_vm1, %v6605_v0  ;;  %v5670_v58 = vpack.c.bf16 %v7179_v13, %v7177_v6  ;;  %v6608_v5 = vpack.c.bf16 %v7179_v13, %v7179_v13  ;;  %v5890_v55 = vsel %vm1585_vm10, %v5838_v25, 0.0  ;;  %v7180_v62 = vadd.f32 %v5597_v27, %v3572_v9 }
 0x2af   : > { %v7013_v36 = vpop.f32.mrb[28].mxu1  ;;  %v5610_v34 = vpop.f32.mrb[29].mxu0  ;;  %v5990_v23 = vsel %vm1585_vm10, %v5939_v41, 0.0  ;;  %v5891_v61 = vadd.f32 %v5890_v55, %v5889_v1  ;;  %v5992_v40 = vsel %vm1585_vm10, %v5940_v30, 0.0  ;;  %v5894_v39 = vsel %vm1585_vm10, %v5840_v12, 0.0 }
 0x2b0   : > { %v3585_v46 = vpop.f32.mrb[29].mxu1  ;;  %v7181_v2 = vadd.f32 %v7149_v29, %v7013_v36  ;;  %v7150_v56 = vpop.f32.mrb[30].mxu0  ;;  %v5991_v52 = vadd.f32 %v5990_v23, %v5989_v16  ;;  %5812 = vst.msk [vmem:[%s9509_s20 + $0x6c] sm:$0xf] %vm270_vm1, %v6608_v5  ;;  %v5843_v15 = vunpack.c.l.bf16 %v5670_v58  ;;  %v5669_v17 = vpack.c.bf16 %v7180_v62, %v7178_v19 }
 0x2b1   : > { %v7014_v24 = vpop.f32.mrb[30].mxu1  ;;  %v5613_v63 = vpop.f32.mrb[31].mxu0  ;;  %v6606_v4 = vpack.c.bf16 %v7180_v62, %v7180_v62  ;;  %v7182_v49 = vadd.f32 %v5610_v34, %v3585_v46  ;;  %v5893_v44 = vadd.f32 %v5892_v33, %v5891_v61  ;;  %v5994_v20 = vsel %vm1585_vm10, %v5941_v42, 0.0 }
 0x2b2   : > { %v3588_v43 = vpop.f32.mrb[31].mxu1  ;;  %v6611_v31 = vpack.c.bf16 %v7181_v2, %v7181_v2  ;;  %v5993_v38 = vadd.f32 %v5992_v40, %v5991_v52  ;;  %v5841_v50 = vunpack.c.l.bf16 %v5669_v17  ;;  %v5842_v8 = vunpack.c.h.bf16 %v5669_v17 }
 0x2b3   : > { %5810 = vst.msk [vmem:[%s9509_s20 + $0x64] sm:$0xf] %vm270_vm1, %v6606_v4  ;;  %v5895_v45 = vadd.f32 %v5894_v39, %v5893_v44  ;;  %v6609_v21 = vpack.c.bf16 %v7182_v49, %v7182_v49  ;;  %v7183_v7 = vadd.f32 %v7150_v56, %v7014_v24  ;;  %v5996_v9 = vsel %vm1585_vm10, %v5942_v11, 0.0 }
 0x2b4   : > { %5815 = vst.msk [vmem:[%s9509_s20 + $0x78] sm:$0xf] %vm270_vm1, %v6611_v31  ;;  %v5995_v10 = vadd.f32 %v5994_v20, %v5993_v38  ;;  %v5844_v54 = vunpack.c.h.bf16 %v5670_v58  ;;  %v5945_v3 = vmul.f32 %v5843_v15, %v5843_v15  ;;  %v5896_v32 = vsel %vm1585_vm10, %v5841_v50, 0.0 }
 0x2b5   : > { %v5897_v6 = vadd.f32 %v5896_v32, %v5895_v45  ;;  %v5943_v60 = vmul.f32 %v5841_v50, %v5841_v50  ;;  %v5944_v59 = vmul.f32 %v5842_v8, %v5842_v8  ;;  %5813 = vst.msk [vmem:[%s9509_s20 + $0x70] sm:$0xf] %vm270_vm1, %v6609_v21  ;;  %v5898_v19 = vsel %vm1585_vm10, %v5842_v8, 0.0 }
 0x2b6   : > { %v5997_v12 = vadd.f32 %v5996_v9, %v5995_v10  ;;  %v5672_v13 = vpack.c.bf16 %v7183_v7, %v7181_v2  ;;  %v6612_v27 = vpack.c.bf16 %v7183_v7, %v7183_v7  ;;  %v7184_v35 = vadd.f32 %v5613_v63, %v3588_v43 }
 0x2b7   : > { %v5899_v51 = vadd.f32 %v5898_v19, %v5897_v6  ;;  %v5998_v53 = vsel %vm1585_vm10, %v5943_v60, 0.0  ;;  %v5900_v47 = vsel %vm1585_vm10, %v5843_v15, 0.0  ;;  %v5946_v18 = vmul.f32 %v5844_v54, %v5844_v54 }
 0x2b8   : > { %v5999_v22 = vadd.f32 %v5998_v53, %v5997_v12  ;;  %5816 = vst.msk [vmem:[%s9509_s20 + $0x7c] sm:$0xf] %vm270_vm1, %v6612_v27  ;;  %v5671_v57 = vpack.c.bf16 %v7184_v35, %v7182_v49  ;;  %v6000_v37 = vsel %vm1585_vm10, %v5944_v59, 0.0  ;;  %v6610_v25 = vpack.c.bf16 %v7184_v35, %v7184_v35 }
 0x2b9   : > { %v5901_v48 = vadd.f32 %v5900_v47, %v5899_v51  ;;  %v5902_v26 = vsel %vm1585_vm10, %v5844_v54, 0.0  ;;  %v6002_v36 = vsel %vm1585_vm10, %v5945_v3, 0.0  ;;  %v5847_v42 = vunpack.c.l.bf16 %v5672_v13 }
 0x2ba   : > { %v6001_v33 = vadd.f32 %v6000_v37, %v5999_v22  ;;  %5814 = vst.msk [vmem:[%s9509_s20 + $0x74] sm:$0xf] %vm270_vm1, %v6610_v25  ;;  %v5845_v28 = vunpack.c.l.bf16 %v5671_v57  ;;  %v5846_v0 = vunpack.c.h.bf16 %v5671_v57  ;;  %v6004_v14 = vsel %vm1585_vm10, %v5946_v18, 0.0 }
 0x2bb   : > { %v5903_v46 = vadd.f32 %v5902_v26, %v5901_v48  ;;  %v5848_v41 = vunpack.c.h.bf16 %v5672_v13  ;;  %v5949_v58 = vmul.f32 %v5847_v42, %v5847_v42  ;;  %v5908_v23 = vsel %vm1585_vm10, %v5847_v42, 0.0 }
 0x2bc   : > { %v6003_v11 = vadd.f32 %v6002_v36, %v6001_v33  ;;  %v5904_v30 = vsel %vm1585_vm10, %v5845_v28, 0.0  ;;  %v5947_v29 = vmul.f32 %v5845_v28, %v5845_v28  ;;  %v5948_v1 = vmul.f32 %v5846_v0, %v5846_v0 }
 0x2bd   : > { %v5905_v24 = vadd.f32 %v5904_v30, %v5903_v46  ;;  %v5906_v5 = vsel %vm1585_vm10, %v5846_v0, 0.0  ;;  %v5950_v62 = vmul.f32 %v5848_v41, %v5848_v41  ;;  %v5910_v52 = vsel %vm1585_vm10, %v5848_v41, 0.0 }
 0x2be   : > { %v6005_v16 = vadd.f32 %v6004_v14, %v6003_v11  ;;  %v6006_v34 = vsel %vm1585_vm10, %v5947_v29, 0.0  ;;  %v6008_v2 = vsel %vm1585_vm10, %v5948_v1, 0.0  ;;  %v6010_v40 = vsel %vm1585_vm10, %v5949_v58, 0.0 }
 0x2bf   : > { %v5907_v43 = vadd.f32 %v5906_v5, %v5905_v24  ;;  %v6012_v17 = vsel %vm1585_vm10, %v5950_v62, 0.0 }
 0x2c0   : > { %v6007_v55 = vadd.f32 %v6006_v34, %v6005_v16 }
 0x2c1   : > { %v5909_v56 = vadd.f32 %v5908_v23, %v5907_v43 }
 0x2c2   : > { %v6009_v61 = vadd.f32 %v6008_v2, %v6007_v55 }
 0x2c3   : > { %v5911_v15 = vadd.f32 %v5910_v52, %v5909_v56 }
 0x2c4   : > { %v6011_v63 = vadd.f32 %v6010_v40, %v6009_v61 }
 0x2c5   : > { %v5912_v4 = vrot.slane %v5911_v15, 4 }
 0x2c6   : > { %v6013_v31 = vadd.f32 %v6012_v17, %v6011_v63 }
 0x2c7   : > { %v5913_v49 = vadd.f32 %v5912_v4, %v5911_v15 }
 0x2c8   : > { %v6014_v44 = vrot.slane %v6013_v31, 4 }
 0x2c9   : > { %v5914_v38 = vrot.slane %v5913_v49, 2 }
 0x2ca   : > { %v6015_v39 = vadd.f32 %v6014_v44, %v6013_v31 }
 0x2cb   : > { %v5915_v20 = vadd.f32 %v5914_v38, %v5913_v49 }
 0x2cc   : > { %v6016_v50 = vrot.slane %v6015_v39, 2 }
 0x2cd   : > { %v5916_v8 = vrot.slane %v5915_v20, 1 }
 0x2ce   : > { %v6017_v10 = vadd.f32 %v6016_v50, %v6015_v39 }
 0x2cf   : > { %v5917_v45 = vadd.f32 %v5916_v8, %v5915_v20 }
 0x2d0   : > { %v6018_v21 = vrot.slane %v6017_v10, 1 }
 0x2d1   : > { %5918 = vst.msk [vmem:[%s265_s24] sm:$0x1] %vm273_vm2, %v5917_v45 }
 0x2d2   : > { %v6019_v7 = vadd.f32 %v6018_v21, %v6017_v10 }
 0x2d4   : > { %6020 = vst.msk [vmem:[%s268_s28] sm:$0x1] %vm273_vm2, %v6019_v7 }
 0x2d5 PF: > { %s17_s21 = sadd.s32 1, %s7529_s21  }
 0x2d6   : > { %p14_p4 = scmp.ge.s32.totalorder %s17_s21, 4  }
 0x2d8   :  { %16 = sbr.rel (!%p14_p4) target bundleno = 1 (0x1), region = 101 }

// kernel: double_conv.3
= control target key start
LH: loop header
LB: loop body
LE: loop exit
PB: predicated region body
PF: predicated region fallthrough
CT: control target
= control target key end

     0   :  { %s7342_s21 = smov 0   ;;  %s9313_s0 = inlined_call_operand.vmem [shape: f32[2,16,16,4], index: 0, kind: input, shape index: {}]   ;;  %s9314_s1 = inlined_call_operand.vmem [shape: bf16[9,4,8], index: 1, kind: input, shape index: {}]   ;;  %s9315_s2 = inlined_call_operand.vmem [shape: f32[1,4], index: 2, kind: input, shape index: {}]   ;;  %s9316_s3 = inlined_call_operand.vmem [shape: f32[1,4], index: 3, kind: input, shape index: {}]   ;;  %s9317_s4 = inlined_call_operand.vmem [shape: bf16[2,16,16,8], index: 4, kind: output, shape index: {0}]   ;;  %s9318_s5 = inlined_call_operand.vmem [shape: f32[2,1,8], index: 5, kind: output, shape index: {1}]   ;;  %s9319_s6 = inlined_call_operand.vmem [shape: f32[2,1,8], index: 6, kind: output, shape index: {2}]  }
   0x1 LB: > { %s5987_s2 = sadd.s32 4294967295, %s7304_s21   ;;  %p5991_p0 = scmp.ge.s32.totalorder %s7304_s21, 1  ;;  %s7304_s21 = sphi %s7342_s21, %s17_s21  }
   0x2   : > { %p217_p1 = scmp.lt.s32.totalorder %s7304_s21, 3 }
   0x4   : > { %p218_p2 = pnand %p5991_p0, %p217_p1 }
   0x6   : > { %221 = sbr.rel (%p218_p2) target bundleno = 691 (0x2b3), region = 36 }
   0xd   : > { %v6028_v0 = vld [vmem:[%s9314_s1 + $0x2] sm:$0x3]  ;;  %vm1492_vm0 = vcmask 1041408   ;;  %v6175_v1 = vld [vmem:[%s9314_s1 + $0x8] sm:$0x3]  ;;  %vm270_vm1 = vcmask 27648  }
   0xe   : > { %7189 = vmatprep.subr.msk.bf16.mxu1 %vm1492_vm0, %v6028_v0  ;;  %7193 = vmatprep.subr.msk.bf16.mxu0 %vm1492_vm0, %v6175_v1  ;;  %v1494_v2 = vsel %vm1492_vm0, %v6028_v0, 0  ;;  %v7360_v3 = vsel %vm1492_vm0, %v6175_v1, 0  ;;  %vm273_vm2 = vcmask 24576   ;;  %p253_p3 = scmp.lt.s32.totalorder %s5987_s2, 1  ;;  %v7306_v4 = vmov 0  }
   0xf   : > { %9335 = vst [vmem:[#allocation3_spill] sm:$0xff] %v7360_v3  ;;  %6626 = vmatpush3.bf16.msra.mxu1 %v1494_v2  ;;  %6762 = vmatpush3.bf16.msra.mxu0 %v7360_v3  ;;  %271 = vst.msk [vmem:[#allocation2] sm:$0xf] %vm270_vm1, %v7306_v4  ;;  %vm280_vm3 = vsmask.f32 256  ;;  %v9338_v7 = vmov 0 }
  0x10   : > { %272 = vst.msk [vmem:[#allocation2 + $0x4] sm:$0xf] %vm270_vm1, %v7306_v4  ;;  %vm336_vm4 = vsmask.f32 7938  ;;  %276 = vst.msk [vmem:[#allocation2 + $0xcc] sm:$0xf] %vm270_vm1, %v7306_v4 }
  0x11   : > { %274 = vst.msk [vmem:[#allocation2 + $0x8] sm:$0x1] %vm273_vm2, %v7306_v4  ;;  %278 = vst.msk [vmem:[#allocation2 + $0xd4] sm:$0x1] %vm273_vm2, %v7306_v4  ;;  %s9401_s2 = smov (!%p253_p3, %s5987_s2), 1  ;;  %vm1443_vm12 = vcmask 31744  }
  0x12   : > { %277 = vst.msk [vmem:[#allocation2 + $0xd0] sm:$0xf] %vm270_vm1, %v7306_v4  ;;  %vm7371_vm5 = vmand %vm273_vm2, %vm280_vm3  ;;  %v285_v6 = vld [vmem:[#allocation2 + $0xc] sm:$0x1]  ;;  %v341_v9 = vld [vmem:[#allocation2 + $0x14] sm:$0x1]  ;;  %s265_s29 = scalar_lea.vmem %s9318_s5, %s9401_s2 }
  0x13   : > { %vm7379_vm6 = vmand %vm273_vm2, %vm336_vm4  ;;  %v286_v8 = vsel %vm7371_vm5, 0, %v285_v6  ;;  %s6406_s25 = sshll.u32 %s9401_s2, 8  ;;  %v7391_v11 = vld [vmem:[%s9314_s1] sm:$0x3]  ;;  %v7396_v12 = vld [vmem:[%s9314_s1 + $0xa] sm:$0x3] }
  0x14   : > { %v9339_v7 = vsel %vm7379_vm6, 4294967295, %v9338_v7  ;;  %287 = vst [vmem:[#allocation2 + $0xc] sm:$0x1] %v286_v8  ;;  %v342_v10 = vsel %vm7379_vm6, 0, %v341_v9  ;;  %s7401_s8 = scalar_lea.vmem %s9313_s0, %s6406_s25  ;;  %7190 = vmatprep.subr.msk.bf16.mxu1 %vm1492_vm0, %v7391_v11  ;;  %7195 = vmatprep.subr.msk.bf16.mxu0 %vm1492_vm0, %v7396_v12  ;;  %v288_v13 = vld [vmem:[#allocation2 + $0x18] sm:$0x1]  ;;  %vm7423_vm9 = vmand %vm270_vm1, %vm336_vm4 }
  0x15   : > { %9340 = vst [vmem:[#allocation4_spill] sm:$0xff] %v9339_v7  ;;  %343 = vst [vmem:[#allocation2 + $0x14] sm:$0x1] %v342_v10  ;;  %v344_v14 = vld [vmem:[#allocation2 + $0x20] sm:$0x1]  ;;  %v393_v16 = vld [vmem:[%s7401_s8 + $0x8] sm:$0xff] }
  0x16   : > { %v392_v15 = vld [vmem:[%s7401_s8] sm:$0xff]  ;;  %v289_v17 = vsel %vm7371_vm5, 0, %v288_v13  ;;  %v345_v18 = vsel %vm7379_vm6, 0, %v344_v14  ;;  %v6409_v20 = vpack.c.bf16 %v393_v16, %v393_v16  ;;  %vm520_vm7 = vsmask.f32 4368  ;;  %v394_v21 = vld [vmem:[%s7401_s8 + $0x10] sm:$0xff] }
  0x17   : > { %v6408_v19 = vpack.c.bf16 %v392_v15, %v392_v15  ;;  %290 = vst [vmem:[#allocation2 + $0x18] sm:$0x1] %v289_v17  ;;  %346 = vst [vmem:[#allocation2 + $0x20] sm:$0x1] %v345_v18  ;;  %v395_v22 = vld [vmem:[%s7401_s8 + $0x18] sm:$0xff]  ;;  %v6410_v26 = vpack.c.bf16 %v394_v21, %v394_v21  ;;  %v396_v54 = vld [vmem:[%s7401_s8 + $0x20] sm:$0xff] }
  0x18   : > { %v282_v23 = vld [vmem:[#allocation2] sm:$0x1]  ;;  %v338_v24 = vld [vmem:[#allocation2 + $0x8] sm:$0x1]  ;;  %v958_v25 = vld [vmem:[#allocation2 + $0x4] sm:$0xf]  ;;  %v6411_v27 = vpack.c.bf16 %v395_v22, %v395_v22  ;;  %v6412_v6 = vpack.c.bf16 %v396_v54, %v396_v54 }
  0x19   : > { %v283_v28 = vsel %vm7371_vm5, 0, %v282_v23  ;;  %v339_v29 = vsel %vm7379_vm6, 0, %v338_v24  ;;  %vm1006_vm8 = vsmask.f32 3328  ;;  %v1019_v30 = vshll.u32 %v958_v25, 16  ;;  %vm7430_vm10 = vmor %vm280_vm3, %vm520_vm7  ;;  %v397_v60 = vld [vmem:[%s7401_s8 + $0x28] sm:$0xff] }
  0x1a   : > { %v1023_v31 = vshrl.u32 %v958_v25, 16  ;;  %v291_v32 = vld [vmem:[#allocation2 + $0x24] sm:$0x1]  ;;  %284 = vst [vmem:[#allocation2] sm:$0x1] %v283_v28  ;;  %v523_v33 = vshrl.u32 %v6408_v19, 16  ;;  %v6413_v15 = vpack.c.bf16 %v397_v60, %v397_v60 }
  0x1b   : > { %340 = vst [vmem:[#allocation2 + $0x8] sm:$0x1] %v339_v29  ;;  %v526_v34 = vshll.u32 %v6408_v19, 16  ;;  %v531_v35 = vshrl.u32 %v6409_v20, 16  ;;  %v534_v36 = vshll.u32 %v6409_v20, 16  ;;  %v7419_v38 = vrot.slane %v1019_v30, 5 }
  0x1c   : > { %v347_v37 = vld [vmem:[#allocation2 + $0x2c] sm:$0x1]  ;;  %v1025_v39 = vrot.slane %v1023_v31, 4  ;;  %v540_v40 = vshrl.u32 %v6410_v26, 16  ;;  %v543_v41 = vshll.u32 %v6410_v26, 16  ;;  %v525_v43 = vrot.slane %v523_v33, 7 }
  0x1d   : > { %v533_v44 = vrot.slane %v531_v35, 7  ;;  %v845_v45 = vld [vmem:[#allocation2 + $0xc] sm:$0xf]  ;;  %v548_v46 = vshrl.u32 %v6411_v27, 16  ;;  %v551_v47 = vshll.u32 %v6411_v27, 16  ;;  %v292_v52 = vsel %vm7371_vm5, 0, %v291_v32 }
  0x1e   : > { %v1026_v48 = vor.u32 %v1025_v39, %v7419_v38  ;;  %v849_v50 = vld [vmem:[#allocation2 + $0x14] sm:$0x1]  ;;  %v542_v51 = vrot.slane %v540_v40, 7  ;;  %v348_v53 = vsel %vm7379_vm6, 0, %v347_v37  ;;  %v528_v55 = vor.u32 %v526_v34, %v525_v43  ;;  %v852_v59 = vld [vmem:[#allocation2 + $0x18] sm:$0xf] }
  0x1f   : > { %v529_v56 = vrot.slane %v525_v43, 4  ;;  %v536_v57 = vor.u32 %v534_v36, %v533_v44  ;;  %v538_v58 = vrot.slane %v533_v44, 4  ;;  %293 = vst [vmem:[#allocation2 + $0x24] sm:$0x1] %v292_v52  ;;  %349 = vst [vmem:[#allocation2 + $0x2c] sm:$0x1] %v348_v53 }
  0x20   : > { %vm1007_vm11 = vsmask.f32 7440  ;;  %v545_v61 = vor.u32 %v543_v41, %v542_v51  ;;  %v546_v62 = vrot.slane %v542_v51, 4  ;;  %v550_v63 = vrot.slane %v548_v46, 7  ;;  %v856_v4 = vld [vmem:[#allocation2 + $0x20] sm:$0x1] }
  0x21   : > { %v537_v0 = vsel %vm7430_vm10, %v529_v56, %v536_v57  ;;  %v846_v1 = vsel %vm7423_vm9, %v528_v55, %v845_v45  ;;  %v850_v2 = vsel %vm7371_vm5, %v538_v58, %v849_v50  ;;  %v957_v8 = vld [vmem:[#allocation2] sm:$0xf]  ;;  %v1027_v18 = vrot.slane %v1026_v48, 4  ;;  %v398_v20 = vld [vmem:[%s7401_s8 + $0x30] sm:$0xff]  ;;  %v350_v26 = vld [vmem:[#allocation2 + $0x38] sm:$0x1] }
  0x22   : > { %v990_v9 = vld [vmem:[#allocation2 + $0x8] sm:$0x1]  ;;  %847 = vst [vmem:[#allocation2 + $0xc] sm:$0xf] %v846_v1  ;;  %848 = vst.msk [vmem:[#allocation2 + $0x10] sm:$0xf] %vm270_vm1, %v537_v0  ;;  %v553_v10 = vor.u32 %v551_v47, %v550_v63  ;;  %v853_v14 = vsel %vm7423_vm9, %v545_v61, %v852_v59  ;;  %v7468_v36 = vpack.c.bf16 %v398_v20, %v398_v20 }
  0x23   : > { %851 = vst [vmem:[#allocation2 + $0x14] sm:$0x1] %v850_v2  ;;  %v555_v13 = vrot.slane %v550_v63, 4  ;;  %v1010_v16 = vshrl.u32 %v957_v8, 16  ;;  %v1013_v17 = vshll.u32 %v957_v8, 16  ;;  %v1029_v19 = vshll.u32 %v990_v9, 16  ;;  %vm7456_vm13 = vmor %vm1006_vm8, %vm1007_vm11 }
  0x24   : > { %854 = vst [vmem:[#allocation2 + $0x18] sm:$0xf] %v853_v14  ;;  %v554_v21 = vsel %vm7430_vm10, %v546_v62, %v553_v10  ;;  %v557_v23 = vshrl.u32 %v6412_v6, 16  ;;  %v560_v24 = vshll.u32 %v6412_v6, 16  ;;  %v294_v25 = vld [vmem:[#allocation2 + $0x30] sm:$0x1] }
  0x25   : > { %v857_v22 = vsel %vm7371_vm5, %v555_v13, %v856_v4  ;;  %v1012_v28 = vrot.slane %v1010_v16, 4  ;;  %v1015_v29 = vrot.slane %v1013_v17, 5  ;;  %v1031_v30 = vrot.slane %v1029_v19, 5  ;;  %855 = vst.msk [vmem:[#allocation2 + $0x1c] sm:$0xf] %vm270_vm1, %v554_v21  ;;  %v399_v32 = vld [vmem:[%s7401_s8 + $0x38] sm:$0xff] }
  0x26   : > { %858 = vst [vmem:[#allocation2 + $0x20] sm:$0x1] %v857_v22  ;;  %v565_v31 = vshrl.u32 %v6413_v15, 16  ;;  %v7464_v33 = vsel %vm1492_vm0, %v7391_v11, 0  ;;  %v7466_v34 = vrot.slane %v557_v23, 7  ;;  %v568_v35 = vshll.u32 %v6413_v15, 16 }
  0x27   : > { %v1016_v37 = vor.u32 %v1015_v29, %v1012_v28  ;;  %v7472_v39 = vsel %vm1492_vm0, %v7396_v12, 0  ;;  %v295_v41 = vsel %vm7371_vm5, 0, %v294_v25  ;;  %v1032_v43 = vsel %vm7456_vm13, %v1027_v18, %v1031_v30  ;;  %v400_v46 = vld [vmem:[%s7401_s8 + $0x40] sm:$0xff]  ;;  %s6407_s23 = sshll.u32 %s9401_s2, 7 }
  0x28   : > { %v7474_v40 = vrot.slane %v565_v31, 7  ;;  %v563_v11 = vrot.slane %v7466_v34, 4  ;;  %296 = vst [vmem:[#allocation2 + $0x30] sm:$0x1] %v295_v41  ;;  %v351_v44 = vsel %vm7379_vm6, 0, %v350_v26  ;;  %v7483_v45 = vpack.c.bf16 %v399_v32, %v399_v32  ;;  %s9164_s26 = scalar_lea.vmem %s9317_s4, %s6407_s23 }
  0x29   : > { %v1017_v47 = vrot.slane %v1016_v37, 4  ;;  %v959_v12 = vld [vmem:[#allocation2 + $0xc] sm:$0xf]  ;;  %v960_v48 = vld [vmem:[#allocation2 + $0x10] sm:$0xf]  ;;  %v7487_v50 = vor.u32 %v560_v24, %v7466_v34  ;;  %v574_v52 = vshrl.u32 %v7468_v36, 16  ;;  %v7497_v62 = vpack.c.bf16 %v400_v46, %v400_v46 }
  0x2a   : > { %v7490_v51 = vor.u32 %v568_v35, %v7474_v40  ;;  %352 = vst [vmem:[#allocation2 + $0x38] sm:$0x1] %v351_v44  ;;  %v991_v53 = vld [vmem:[#allocation2 + $0x14] sm:$0x1]  ;;  %v1034_v54 = vshrl.u32 %v959_v12, 16  ;;  %v1037_v55 = vshll.u32 %v959_v12, 16 }
  0x2b   : > { %v1043_v56 = vshll.u32 %v960_v48, 16  ;;  %v1047_v57 = vshrl.u32 %v960_v48, 16  ;;  %v1022_v58 = vsel %vm7456_vm13, %v1017_v47, %v7419_v38  ;;  %v1053_v59 = vshll.u32 %v991_v53, 16  ;;  %v2764_v60 = vld [vmem:[#allocation2 + $0xc] sm:$0xf] }
  0x2c   : > { %v572_v61 = vrot.slane %v7474_v40, 4  ;;  %v6029_v63 = vcombine.low %v1022_v58, %v1032_v43  ;;  %v1036_v0 = vrot.slane %v1034_v54, 4  ;;  %v1039_v1 = vrot.slane %v1037_v55, 5  ;;  %v7499_v4 = vld [vmem:[#allocation2 + $0x10] sm:$0xf] }
  0x2d   : > { %v1045_v2 = vrot.slane %v1043_v56, 5  ;;  %v1049_v6 = vrot.slane %v1047_v57, 4  ;;  %v1055_v8 = vrot.slane %v1053_v59, 5  ;;  %v7501_v9 = vld [vmem:[#allocation2 + $0x14] sm:$0x1]  ;;  %v2813_v10 = vshrl.u32 %v2764_v60, 16 }
  0x2e   : > { %v2816_v13 = vshll.u32 %v2764_v60, 16  ;;  %6627 = vmatprep.mubr.msk.bf16.mxu1 %vm1443_vm12, %v6029_v63  ;;  %v1040_v38 = vor.u32 %v1039_v1, %v1036_v0  ;;  %v2822_v14 = vshll.u32 %v7499_v4, 16  ;;  %v2826_v15 = vshrl.u32 %v7499_v4, 16  ;;  %v2767_v17 = vld [vmem:[#allocation2 + $0x18] sm:$0xf] }
  0x2f   : > { %v2832_v16 = vshll.u32 %v7501_v9, 16  ;;  %v1050_v18 = vor.u32 %v1049_v6, %v1045_v2  ;;  %v2815_v19 = vrot.slane %v2813_v10, 4  ;;  %v3556_v21 = vrot.slane %v7499_v4, 5  ;;  %v7508_v22 = vld [vmem:[#allocation2 + $0x1c] sm:$0xf] }
  0x30   : > { %v2818_v20 = vrot.slane %v2816_v13, 5  ;;  %v1041_v23 = vrot.slane %v1040_v38, 4  ;;  %v2824_v24 = vrot.slane %v2822_v14, 5  ;;  %v2828_v25 = vrot.slane %v2826_v15, 4  ;;  %v7513_v37 = vld [vmem:[#allocation2 + $0x20] sm:$0x1] }
  0x31   : > { %v2834_v26 = vrot.slane %v2832_v16, 5  ;;  %v1051_v28 = vrot.slane %v1050_v18, 4  ;;  %v3559_v30 = vrot.slane %v7501_v9, 5  ;;  %v2837_v31 = vshrl.u32 %v2767_v17, 16  ;;  %v961_v48 = vld [vmem:[#allocation2 + $0x18] sm:$0xf] }
  0x32   : > { %v2819_v29 = vor.u32 %v2818_v20, %v2815_v19  ;;  %v1046_v32 = vsel %vm7456_vm13, %v1041_v23, %v1045_v2  ;;  %v2829_v35 = vor.u32 %v2828_v25, %v2824_v24  ;;  %v2840_v41 = vshll.u32 %v2767_v17, 16  ;;  %v962_v63 = vld [vmem:[#allocation2 + $0x1c] sm:$0xf]  ;;  %v992_v6 = vld [vmem:[#allocation2 + $0x20] sm:$0x1] }
  0x33   : > { %v2846_v43 = vshll.u32 %v7508_v22, 16  ;;  %v1056_v44 = vsel %vm7456_vm13, %v1051_v28, %v1055_v8  ;;  %v2839_v47 = vrot.slane %v2837_v31, 4  ;;  %v2850_v12 = vshrl.u32 %v7508_v22, 16  ;;  %v859_v15 = vld [vmem:[#allocation2 + $0x24] sm:$0xf] }
  0x34   : > { %v2820_v46 = vrot.slane %v2819_v29, 4  ;;  %v6030_v53 = vcombine.low %v1046_v32, %v1056_v44  ;;  %v2830_v54 = vrot.slane %v2829_v35, 4  ;;  %v2842_v55 = vrot.slane %v2840_v41, 5  ;;  %v863_v20 = vld [vmem:[#allocation2 + $0x2c] sm:$0x1] }
  0x35   : > { %v2848_v56 = vrot.slane %v2846_v43, 5  ;;  %v2852_v58 = vrot.slane %v2850_v12, 4  ;;  %v2856_v59 = vshll.u32 %v7513_v37, 16  ;;  %v3563_v60 = vrot.slane %v7508_v22, 5  ;;  %v297_v32 = vld [vmem:[#allocation2 + $0x3c] sm:$0x1] }
  0x36   : > { %v2825_v57 = vsel %vm7456_vm13, %v2820_v46, %v2824_v24  ;;  %6628 = vmatmul.mubr.msk.bf16.vlgmr.msra.gmra.mrb[0].mxu1 %vm1443_vm12, %v6030_v53  ;;  %v2835_v0 = vsel %vm7456_vm13, %v2830_v54, %v2834_v26  ;;  %v2843_v1 = vor.u32 %v2842_v55, %v2839_v47  ;;  %v3566_v2 = vrot.slane %v7513_v37, 5  ;;  %v401_v43 = vld [vmem:[%s7401_s8 + $0x48] sm:$0xff]  ;;  %v866_v12 = vld [vmem:[#allocation2 + $0x30] sm:$0xf] }
  0x37   : > { %v1058_v8 = vshrl.u32 %v961_v48, 16  ;;  %v6176_v10 = vcombine.low %v2825_v57, %v2835_v0  ;;  %6660 = vmatpush3.bf16.msra.mxu1 %v7464_v33  ;;  %v2853_v13 = vor.u32 %v2852_v58, %v2848_v56  ;;  %v2858_v38 = vrot.slane %v2856_v59, 5  ;;  %v7561_v55 = vld [vmem:[%s9314_s1 + $0xc] sm:$0x3]  ;;  %v402_v0 = vld [vmem:[%s7401_s8 + $0x50] sm:$0xff] }
  0x38   : > { %v7530_v14 = vrot.slane %v3563_v60, 4  ;;  %v2844_v16 = vrot.slane %v2843_v1, 4  ;;  %v1061_v18 = vshll.u32 %v961_v48, 16  ;;  %v1067_v19 = vshll.u32 %v962_v63, 16  ;;  %v300_v48 = vld [vmem:[#allocation2 + $0x48] sm:$0x1] }
  0x39   : > { %v1060_v17 = vrot.slane %v1058_v8, 4  ;;  %6763 = vmatprep.mubr.msk.bf16.mxu0 %vm1443_vm12, %v6176_v10  ;;  %v2854_v23 = vrot.slane %v2853_v13, 4  ;;  %v1071_v24 = vshrl.u32 %v962_v63, 16  ;;  %v1077_v25 = vshll.u32 %v992_v6, 16  ;;  %v870_v8 = vld [vmem:[#allocation2 + $0x38] sm:$0x1] }
  0x3a   : > { %v571_v33 = vsel %vm7430_vm10, %v563_v11, %v7490_v51  ;;  %v2849_v26 = vsel %vm7456_vm13, %v2844_v16, %v2848_v56  ;;  %v1063_v28 = vrot.slane %v1061_v18, 5  ;;  %v1069_v29 = vrot.slane %v1067_v19, 5  ;;  %v353_v51 = vld [vmem:[#allocation2 + $0x44] sm:$0x1]  ;;  %v1950_v5 = vld [vmem:[#allocation2 + $0xc] sm:$0xe] }
  0x3b   : > { %v860_v31 = vsel %vm7423_vm9, %v7487_v50, %v859_v15  ;;  %862 = vst.msk [vmem:[#allocation2 + $0x28] sm:$0xf] %vm270_vm1, %v571_v33  ;;  %v2859_v35 = vsel %vm7456_vm13, %v2854_v23, %v2858_v38  ;;  %v1073_v41 = vrot.slane %v1071_v24, 4  ;;  %v1079_v34 = vrot.slane %v1077_v25, 5 }
  0x3c   : > { %861 = vst [vmem:[#allocation2 + $0x24] sm:$0xf] %v860_v31  ;;  %v864_v11 = vsel %vm7371_vm5, %v572_v61, %v863_v20  ;;  %v6177_v44 = vcombine.low %v2849_v26, %v2859_v35  ;;  %v1064_v46 = vor.u32 %v1063_v28, %v1060_v17  ;;  %v576_v50 = vrot.slane %v574_v52, 7 }
  0x3d   : > { %865 = vst [vmem:[#allocation2 + $0x2c] sm:$0x1] %v864_v11  ;;  %v577_v47 = vshll.u32 %v7468_v36, 16  ;;  %v1074_v53 = vor.u32 %v1073_v41, %v1069_v29  ;;  %v582_v54 = vshrl.u32 %v7483_v45, 16  ;;  %v585_v40 = vshll.u32 %v7483_v45, 16 }
  0x3e   : > { %v298_v61 = vsel %vm7371_vm5, 0, %v297_v32  ;;  %6764 = vmatmul.mubr.msk.bf16.vlgmr.msra.gmra.mrb[0].mxu0 %vm1443_vm12, %v6177_v44  ;;  %v1065_v52 = vrot.slane %v1064_v46, 4  ;;  %v580_v56 = vrot.slane %v576_v50, 4  ;;  %v354_v57 = vsel %vm7379_vm6, 0, %v353_v51 }
  0x3f   : > { %v579_v36 = vor.u32 %v577_v47, %v576_v50  ;;  %299 = vst [vmem:[#allocation2 + $0x3c] sm:$0x1] %v298_v61  ;;  %6796 = vmatpush3.bf16.msra.mxu0 %v7472_v39  ;;  %v1075_v45 = vrot.slane %v1074_v53, 4  ;;  %v584_v58 = vrot.slane %v582_v54, 7  ;;  %355 = vst [vmem:[#allocation2 + $0x44] sm:$0x1] %v354_v57  ;;  %v7567_v59 = vpack.c.bf16 %v401_v43, %v401_v43 }
  0x40   : > { %v591_v63 = vshrl.u32 %v7497_v62, 16  ;;  %v1070_v1 = vsel %vm7456_vm13, %v1065_v52, %v1069_v29  ;;  %v594_v10 = vshll.u32 %v7497_v62, 16  ;;  %v301_v39 = vsel %vm7371_vm5, 0, %v300_v48  ;;  %7196 = vmatprep.subr.msk.bf16.mxu0 %vm1492_vm0, %v7561_v55  ;;  %v403_v50 = vld [vmem:[%s7401_s8 + $0x58] sm:$0xff] }
  0x41   : > { %v867_v6 = vsel %vm7423_vm9, %v579_v36, %v866_v12  ;;  %v1080_v13 = vsel %vm7456_vm13, %v1075_v45, %v1079_v34  ;;  %v587_v16 = vor.u32 %v585_v40, %v584_v58  ;;  %v589_v17 = vrot.slane %v584_v58, 4  ;;  %302 = vst [vmem:[#allocation2 + $0x48] sm:$0x1] %v301_v39 }
  0x42   : > { %v964_v38 = vld [vmem:[#allocation2 + $0x28] sm:$0xf]  ;;  %868 = vst [vmem:[#allocation2 + $0x30] sm:$0xf] %v867_v6  ;;  %v7584_v18 = vrot.slane %v591_v63, 7  ;;  %v6031_v19 = vcombine.low %v1070_v1, %v1080_v13  ;;  %v7586_v25 = vpack.c.bf16 %v402_v0, %v402_v0  ;;  %v7601_v0 = vpack.c.bf16 %v403_v50, %v403_v50 }
  0x43   : > { %v7582_v15 = vld [vmem:[#allocation2 + $0x28] sm:$0xf]  ;;  %v963_v62 = vld [vmem:[#allocation2 + $0x24] sm:$0xf]  ;;  %v1091_v20 = vshll.u32 %v964_v38, 16  ;;  %v1095_v23 = vshrl.u32 %v964_v38, 16  ;;  %v588_v29 = vsel %vm7430_vm10, %v580_v56, %v587_v16  ;;  %v871_v31 = vsel %vm7371_vm5, %v589_v17, %v870_v8 }
  0x44   : > { %v2770_v24 = vld [vmem:[#allocation2 + $0x24] sm:$0xf]  ;;  %v993_v33 = vld [vmem:[#allocation2 + $0x2c] sm:$0x1]  ;;  %v1082_v26 = vshrl.u32 %v963_v62, 16  ;;  %v1085_v28 = vshll.u32 %v963_v62, 16  ;;  %6631 = vmatprep.mubr.msk.bf16.mxu1 %vm1443_vm12, %v6031_v19  ;;  %v596_v63 = vor.u32 %v594_v10, %v7584_v18 }
  0x45   : > { %v1093_v32 = vrot.slane %v1091_v20, 5  ;;  %v1097_v35 = vrot.slane %v1095_v23, 4  ;;  %v1101_v41 = vshll.u32 %v993_v33, 16  ;;  %v7593_v34 = vld [vmem:[#allocation2 + $0x2c] sm:$0x1]  ;;  %v2861_v11 = vshrl.u32 %v2770_v24, 16 }
  0x46   : > { %869 = vst.msk [vmem:[#allocation2 + $0x34] sm:$0xf] %vm270_vm1, %v588_v29  ;;  %872 = vst [vmem:[#allocation2 + $0x38] sm:$0x1] %v871_v31  ;;  %v1084_v51 = vrot.slane %v1082_v26, 4  ;;  %v1087_v43 = vrot.slane %v1085_v28, 5 }
  0x47   : > { %v2864_v44 = vshll.u32 %v2770_v24, 16  ;;  %v2870_v46 = vshll.u32 %v7582_v15, 16  ;;  %v1098_v47 = vor.u32 %v1097_v35, %v1093_v32  ;;  %v1103_v12 = vrot.slane %v1101_v41, 5  ;;  %v873_v36 = vld [vmem:[#allocation2 + $0x3c] sm:$0xf] }
  0x48   : > { %v2863_v48 = vrot.slane %v2861_v11, 4  ;;  %v2874_v53 = vshrl.u32 %v7582_v15, 16  ;;  %v1088_v54 = vor.u32 %v1087_v43, %v1084_v51  ;;  %v2880_v52 = vshll.u32 %v7593_v34, 16 }
  0x49   : > { %v2866_v40 = vrot.slane %v2864_v44, 5  ;;  %v2872_v61 = vrot.slane %v2870_v46, 5  ;;  %v1099_v56 = vrot.slane %v1098_v47, 4  ;;  %v2773_v45 = vld [vmem:[#allocation2 + $0x30] sm:$0xf]  ;;  %v874_v24 = vsel %vm7423_vm9, %v596_v63, %v873_v36 }
  0x4a   : > { %v2876_v57 = vrot.slane %v2874_v53, 4  ;;  %v965_v58 = vld [vmem:[#allocation2 + $0x30] sm:$0xf]  ;;  %v1089_v1 = vrot.slane %v1088_v54, 4  ;;  %v2882_v8 = vrot.slane %v2880_v52, 5  ;;  %v2885_v39 = vshrl.u32 %v2773_v45, 16 }
  0x4b   : > { %v2867_v6 = vor.u32 %v2866_v40, %v2863_v48  ;;  %v1104_v13 = vsel %vm7456_vm13, %v1099_v56, %v1103_v12  ;;  %v2888_v16 = vshll.u32 %v2773_v45, 16  ;;  %v1106_v17 = vshrl.u32 %v965_v58, 16  ;;  %875 = vst [vmem:[#allocation2 + $0x3c] sm:$0xf] %v874_v24  ;;  %v356_v47 = vld [vmem:[#allocation2 + $0x50] sm:$0x1] }
  0x4c   : > { %v2877_v38 = vor.u32 %v2876_v57, %v2872_v61  ;;  %v1094_v19 = vsel %vm7456_vm13, %v1089_v1, %v1093_v32  ;;  %v2887_v10 = vrot.slane %v2885_v39, 4  ;;  %v1109_v50 = vshll.u32 %v965_v58, 16  ;;  %v877_v39 = vld [vmem:[#allocation2 + $0x44] sm:$0x1] }
  0x4d   : > { %v2868_v62 = vrot.slane %v2867_v6, 4  ;;  %v7607_v20 = vld [vmem:[#allocation2 + $0x34] sm:$0xf]  ;;  %v7609_v23 = vld [vmem:[#allocation2 + $0x38] sm:$0x1]  ;;  %v6032_v33 = vcombine.low %v1094_v19, %v1104_v13  ;;  %v2890_v28 = vrot.slane %v2888_v16, 5 }
  0x4e   : > { %v2878_v26 = vrot.slane %v2877_v38, 4  ;;  %v2894_v29 = vshll.u32 %v7607_v20, 16  ;;  %v966_v31 = vld [vmem:[#allocation2 + $0x34] sm:$0xf]  ;;  %v2898_v32 = vshrl.u32 %v7607_v20, 16  ;;  %v2904_v41 = vshll.u32 %v7609_v23, 16 }
  0x4f   : > { %v2873_v35 = vsel %vm7456_vm13, %v2868_v62, %v2872_v61  ;;  %v994_v11 = vld [vmem:[#allocation2 + $0x38] sm:$0x1]  ;;  %v1108_v51 = vrot.slane %v1106_v17, 4  ;;  %6632 = vmatmul.mubr.msk.bf16.gmra.mrb[4].mxu1 %vm1443_vm12, %v6032_v33  ;;  %v2891_v44 = vor.u32 %v2890_v28, %v2887_v10  ;;  %v1115_v54 = vshll.u32 %v966_v31, 16 }
  0x50   : > { %v2883_v43 = vsel %vm7456_vm13, %v2878_v26, %v2882_v8  ;;  %v2896_v46 = vrot.slane %v2894_v29, 5  ;;  %v2900_v48 = vrot.slane %v2898_v32, 4  ;;  %v2906_v53 = vrot.slane %v2904_v41, 5  ;;  %v359_v32 = vld [vmem:[#allocation2 + $0x5c] sm:$0x1] }
  0x51   : > { %v6178_v12 = vcombine.low %v2873_v35, %v2883_v43  ;;  %v2892_v40 = vrot.slane %v2891_v44, 4  ;;  %v1111_v61 = vrot.slane %v1109_v50, 5  ;;  %v1119_v52 = vshrl.u32 %v966_v31, 16  ;;  %v303_v35 = vld [vmem:[#allocation2 + $0x54] sm:$0x1]  ;;  %v404_v43 = vld [vmem:[%s7401_s8 + $0x60] sm:$0xff] }
  0x52   : > { %v1125_v36 = vshll.u32 %v994_v11, 16  ;;  %v2901_v56 = vor.u32 %v2900_v48, %v2896_v46  ;;  %v1117_v57 = vrot.slane %v1115_v54, 5  ;;  %v597_v45 = vrot.slane %v7584_v18, 4  ;;  %v967_v17 = vld [vmem:[#allocation2 + $0x3c] sm:$0xf] }
  0x53   : > { %6767 = vmatprep.mubr.msk.bf16.mxu0 %vm1443_vm12, %v6178_v12  ;;  %v599_v63 = vshrl.u32 %v7567_v59, 16  ;;  %v2897_v58 = vsel %vm7456_vm13, %v2892_v40, %v2896_v46  ;;  %v1112_v1 = vor.u32 %v1111_v61, %v1108_v51  ;;  %v1121_v6 = vrot.slane %v1119_v52, 4  ;;  %v2776_v33 = vld [vmem:[#allocation2 + $0x3c] sm:$0xf]  ;;  %v306_v12 = vld [vmem:[#allocation2 + $0x60] sm:$0x1] }
  0x54   : > { %v1127_v8 = vrot.slane %v1125_v36, 5  ;;  %v2902_v13 = vrot.slane %v2901_v56, 4  ;;  %v602_v16 = vshll.u32 %v7567_v59, 16  ;;  %v357_v19 = vsel %vm7379_vm6, 0, %v356_v47  ;;  %v405_v61 = vld [vmem:[%s7401_s8 + $0x68] sm:$0xff] }
  0x55   : > { %v601_v38 = vrot.slane %v599_v63, 7  ;;  %v1113_v62 = vrot.slane %v1112_v1, 4  ;;  %v1122_v18 = vor.u32 %v1121_v6, %v1117_v57  ;;  %v1130_v10 = vshrl.u32 %v967_v17, 16  ;;  %358 = vst [vmem:[#allocation2 + $0x50] sm:$0x1] %v357_v19 }
  0x56   : > { %v1133_v24 = vshll.u32 %v967_v17, 16  ;;  %v2907_v26 = vsel %vm7456_vm13, %v2902_v13, %v2906_v53  ;;  %v2909_v31 = vshrl.u32 %v2776_v33, 16  ;;  %v2912_v53 = vshll.u32 %v2776_v33, 16  ;;  %v7251_v42 = vld [vmem:[#allocation2 + $0x3c] sm:$0xf] }
  0x57   : > { %v604_v28 = vor.u32 %v602_v16, %v601_v38  ;;  %v606_v29 = vrot.slane %v601_v38, 4  ;;  %v6179_v59 = vcombine.low %v2897_v58, %v2907_v26  ;;  %v1118_v41 = vsel %vm7456_vm13, %v1113_v62, %v1117_v57  ;;  %v406_v62 = vld [vmem:[%s7401_s8 + $0x70] sm:$0xff] }
  0x58   : > { %v1123_v11 = vrot.slane %v1122_v18, 4  ;;  %v1132_v51 = vrot.slane %v1130_v10, 4  ;;  %v1135_v50 = vrot.slane %v1133_v24, 5  ;;  %v2911_v47 = vrot.slane %v2909_v31, 4  ;;  %v407_v18 = vld [vmem:[%s7401_s8 + $0x78] sm:$0xff] }
  0x59   : > { %v605_v44 = vsel %vm7430_vm10, %v597_v45, %v604_v28  ;;  %v878_v46 = vsel %vm7371_vm5, %v606_v29, %v877_v39  ;;  %6768 = vmatmul.mubr.msk.bf16.gmra.mrb[4].mxu0 %vm1443_vm12, %v6179_v59  ;;  %v608_v54 = vshrl.u32 %v7586_v25, 16  ;;  %v611_v40 = vshll.u32 %v7586_v25, 16 }
  0x5a   : > { %v1128_v48 = vsel %vm7456_vm13, %v1123_v11, %v1127_v8  ;;  %876 = vst.msk [vmem:[#allocation2 + $0x40] sm:$0xf] %vm270_vm1, %v605_v44  ;;  %879 = vst [vmem:[#allocation2 + $0x44] sm:$0x1] %v878_v46  ;;  %v1136_v36 = vor.u32 %v1135_v50, %v1132_v51  ;;  %v616_v56 = vshrl.u32 %v7601_v0, 16  ;;  %v619_v57 = vshll.u32 %v7601_v0, 16 }
  0x5b   : > { %v6033_v52 = vcombine.low %v1118_v41, %v1128_v48  ;;  %v2914_v45 = vrot.slane %v2912_v53, 5  ;;  %v610_v63 = vrot.slane %v608_v54, 7  ;;  %v304_v58 = vsel %vm7371_vm5, 0, %v303_v35  ;;  %v880_v8 = vld [vmem:[#allocation2 + $0x48] sm:$0xf] }
  0x5c   : > { %v360_v1 = vsel %vm7379_vm6, 0, %v359_v32  ;;  %v7652_v25 = vrot.slane %v1136_v36, 4  ;;  %v618_v6 = vrot.slane %v616_v56, 7  ;;  %305 = vst [vmem:[#allocation2 + $0x54] sm:$0x1] %v304_v58  ;;  %v6420_v39 = vpack.c.bf16 %v404_v43, %v404_v43 }
  0x5d   : > { %6635 = vmatprep.mubr.msk.bf16.mxu1 %vm1443_vm12, %v6033_v52  ;;  %361 = vst [vmem:[#allocation2 + $0x5c] sm:$0x1] %v360_v1  ;;  %v6421_v0 = vpack.c.bf16 %v405_v61, %v405_v61  ;;  %v2915_v13 = vor.u32 %v2914_v45, %v2911_v47  ;;  %v613_v38 = vor.u32 %v611_v40, %v610_v63  ;;  %v614_v16 = vrot.slane %v610_v63, 4  ;;  %v884_v17 = vld [vmem:[#allocation2 + $0x50] sm:$0x1] }
  0x5e   : > { %v307_v19 = vsel %vm7371_vm5, 0, %v306_v12  ;;  %v621_v10 = vor.u32 %v619_v57, %v618_v6  ;;  %v623_v24 = vrot.slane %v618_v6, 4  ;;  %v625_v33 = vshrl.u32 %v6420_v39, 16  ;;  %v6109_v32 = vld [vmem:[%s9314_s1 + $0x4] sm:$0x3] }
  0x5f   : > { %v628_v26 = vshll.u32 %v6420_v39, 16  ;;  %308 = vst [vmem:[#allocation2 + $0x60] sm:$0x1] %v307_v19  ;;  %v7658_v28 = vrot.slane %v2915_v13, 4  ;;  %v881_v29 = vsel %vm7423_vm9, %v613_v38, %v880_v8  ;;  %v633_v31 = vshrl.u32 %v6421_v0, 16  ;;  %7191 = vmatprep.subr.msk.bf16.mxu1 %vm1492_vm0, %v6109_v32 }
  0x60   : > { %v636_v35 = vshll.u32 %v6421_v0, 16  ;;  %v622_v51 = vsel %vm7430_vm10, %v614_v16, %v621_v10  ;;  %882 = vst [vmem:[#allocation2 + $0x48] sm:$0xf] %v881_v29  ;;  %v885_v43 = vsel %vm7371_vm5, %v623_v24, %v884_v17  ;;  %v7671_v44 = vpack.c.bf16 %v406_v62, %v406_v62  ;;  %v362_v36 = vld [vmem:[#allocation2 + $0x68] sm:$0x1]  ;;  %v408_v0 = vld [vmem:[%s7401_s8 + $0x80] sm:$0xff] }
  0x61   : > { %v968_v59 = vld [vmem:[#allocation2 + $0x40] sm:$0xf]  ;;  %v995_v41 = vld [vmem:[#allocation2 + $0x44] sm:$0x1]  ;;  %v7673_v46 = vpack.c.bf16 %v407_v18, %v407_v18  ;;  %883 = vst.msk [vmem:[#allocation2 + $0x4c] sm:$0xf] %vm270_vm1, %v622_v51 }
  0x62   : > { %v7665_v11 = vld [vmem:[#allocation2 + $0x40] sm:$0xf]  ;;  %v1139_v50 = vshll.u32 %v968_v59, 16  ;;  %v1143_v47 = vshrl.u32 %v968_v59, 16  ;;  %v1149_v12 = vshll.u32 %v995_v41, 16  ;;  %v627_v61 = vrot.slane %v625_v33, 7 }
  0x63   : > { %v7676_v48 = vld [vmem:[#allocation2 + $0x44] sm:$0x1]  ;;  %v2918_v53 = vshll.u32 %v7665_v11, 16  ;;  %886 = vst [vmem:[#allocation2 + $0x50] sm:$0x1] %v885_v43  ;;  %v2922_v54 = vshrl.u32 %v7665_v11, 16 }
  0x64   : > { %v2928_v40 = vshll.u32 %v7676_v48, 16  ;;  %v635_v52 = vrot.slane %v633_v31, 7  ;;  %v1141_v56 = vrot.slane %v1139_v50, 5  ;;  %v1145_v57 = vrot.slane %v1143_v47, 4  ;;  %v887_v58 = vld [vmem:[#allocation2 + $0x54] sm:$0xf] }
  0x65   : > { %v1151_v45 = vrot.slane %v1149_v12, 5  ;;  %v2920_v63 = vrot.slane %v2918_v53, 5  ;;  %v2924_v1 = vrot.slane %v2922_v54, 4  ;;  %v630_v8 = vor.u32 %v628_v26, %v627_v61  ;;  %v891_v19 = vld [vmem:[#allocation2 + $0x5c] sm:$0x1]  ;;  %v409_v62 = vld [vmem:[%s7401_s8 + $0x88] sm:$0xff] }
  0x66   : > { %v2930_v6 = vrot.slane %v2928_v40, 5  ;;  %v631_v39 = vrot.slane %v627_v61, 4  ;;  %v1142_v13 = vsel %vm7456_vm13, %v7652_v25, %v1141_v56  ;;  %v1146_v38 = vor.u32 %v1145_v57, %v1141_v56 }
  0x67   : > { %v2921_v16 = vsel %vm7456_vm13, %v7658_v28, %v2920_v63  ;;  %v638_v17 = vor.u32 %v636_v35, %v635_v52  ;;  %v2925_v18 = vor.u32 %v2924_v1, %v2920_v63  ;;  %v640_v10 = vrot.slane %v635_v52, 4  ;;  %v2779_v29 = vld [vmem:[#allocation2 + $0x48] sm:$0xf] }
  0x68   : > { %v888_v24 = vsel %vm7423_vm9, %v630_v8, %v887_v58  ;;  %v363_v33 = vsel %vm7379_vm6, 0, %v362_v36  ;;  %v1147_v26 = vrot.slane %v1146_v38, 4  ;;  %v969_v31 = vld [vmem:[#allocation2 + $0x48] sm:$0xf]  ;;  %v642_v28 = vshrl.u32 %v7671_v44, 16 }
  0x69   : > { %v639_v25 = vsel %vm7430_vm10, %v631_v39, %v638_v17  ;;  %889 = vst [vmem:[#allocation2 + $0x54] sm:$0xf] %v888_v24  ;;  %364 = vst [vmem:[#allocation2 + $0x68] sm:$0x1] %v363_v33  ;;  %v7697_v35 = vpack.c.bf16 %v408_v0, %v408_v0  ;;  %v2926_v32 = vrot.slane %v2925_v18, 4  ;;  %v2933_v51 = vshrl.u32 %v2779_v29, 16 }
  0x6a   : > { %v7699_v59 = vld [vmem:[#allocation2 + $0x4c] sm:$0xf]  ;;  %v7701_v41 = vld [vmem:[#allocation2 + $0x50] sm:$0x1]  ;;  %890 = vst.msk [vmem:[#allocation2 + $0x58] sm:$0xf] %vm270_vm1, %v639_v25  ;;  %v892_v43 = vsel %vm7371_vm5, %v640_v10, %v891_v19  ;;  %v7706_v50 = vpack.c.bf16 %v409_v62, %v409_v62  ;;  %v1152_v47 = vsel %vm7456_vm13, %v1147_v26, %v1151_v45 }
  0x6b   : > { %v2936_v12 = vshll.u32 %v2779_v29, 16  ;;  %v2942_v53 = vshll.u32 %v7699_v59, 16  ;;  %v2946_v54 = vshrl.u32 %v7699_v59, 16  ;;  %v970_v40 = vld [vmem:[#allocation2 + $0x4c] sm:$0xf]  ;;  %v6034_v61 = vcombine.low %v1142_v13, %v1152_v47 }
  0x6c   : > { %893 = vst [vmem:[#allocation2 + $0x5c] sm:$0x1] %v892_v43  ;;  %v2931_v52 = vsel %vm7456_vm13, %v2926_v32, %v2930_v6  ;;  %v2935_v36 = vrot.slane %v2933_v51, 4  ;;  %v2952_v56 = vshll.u32 %v7701_v41, 16  ;;  %v996_v57 = vld [vmem:[#allocation2 + $0x50] sm:$0x1] }
  0x6d   : > { %v6180_v63 = vcombine.low %v2921_v16, %v2931_v52  ;;  %v2938_v58 = vrot.slane %v2936_v12, 5  ;;  %v2944_v1 = vrot.slane %v2942_v53, 5  ;;  %v2948_v8 = vrot.slane %v2946_v54, 4  ;;  %6636 = vmatmul.mubr.msk.bf16.gmra.mrb[8].mxu1 %vm1443_vm12, %v6034_v61  ;;  %v7253_v49 = vld [vmem:[#allocation2 + $0x48] sm:$0xf] }
  0x6e   : > { %v2954_v45 = vrot.slane %v2952_v56, 5  ;;  %v1154_v39 = vshrl.u32 %v969_v31, 16  ;;  %v1157_v0 = vshll.u32 %v969_v31, 16  ;;  %v1163_v38 = vshll.u32 %v970_v40, 16 }
  0x6f   : > { %6771 = vmatprep.mubr.msk.bf16.mxu0 %vm1443_vm12, %v6180_v63  ;;  %v2939_v13 = vor.u32 %v2938_v58, %v2935_v36  ;;  %v2949_v17 = vor.u32 %v2948_v8, %v2944_v1  ;;  %v1167_v19 = vshrl.u32 %v970_v40, 16  ;;  %v1173_v6 = vshll.u32 %v996_v57, 16 }
  0x70   : > { %v1156_v62 = vrot.slane %v1154_v39, 4  ;;  %v1159_v18 = vrot.slane %v1157_v0, 5  ;;  %v1165_v10 = vrot.slane %v1163_v38, 5  ;;  %v971_v24 = vld [vmem:[#allocation2 + $0x54] sm:$0xf]  ;;  %v7717_v16 = vrot.slane %v642_v28, 7 }
  0x71   : > { %v2940_v33 = vrot.slane %v2939_v13, 4  ;;  %v2950_v26 = vrot.slane %v2949_v17, 4  ;;  %v1169_v29 = vrot.slane %v1167_v19, 4  ;;  %v1175_v25 = vrot.slane %v1173_v6, 5  ;;  %v972_v32 = vld [vmem:[#allocation2 + $0x58] sm:$0xf] }
  0x72   : > { %v1160_v51 = vor.u32 %v1159_v18, %v1156_v62  ;;  %v1178_v43 = vshrl.u32 %v971_v24, 16  ;;  %v1181_v47 = vshll.u32 %v971_v24, 16  ;;  %v1187_v12 = vshll.u32 %v972_v32, 16  ;;  %v2782_v28 = vld [vmem:[#allocation2 + $0x54] sm:$0xf] }
  0x73   : > { %v997_v31 = vld [vmem:[#allocation2 + $0x5c] sm:$0x1]  ;;  %v2945_v53 = vsel %vm7456_vm13, %v2940_v33, %v2944_v1  ;;  %v2955_v54 = vsel %vm7456_vm13, %v2950_v26, %v2954_v45  ;;  %v1170_v40 = vor.u32 %v1169_v29, %v1165_v10  ;;  %v1191_v61 = vshrl.u32 %v972_v32, 16  ;;  %v7723_v63 = vld [vmem:[#allocation2 + $0x58] sm:$0xf] }
  0x74   : > { %v6181_v52 = vcombine.low %v2945_v53, %v2955_v54  ;;  %v1161_v36 = vrot.slane %v1160_v51, 4  ;;  %v1180_v56 = vrot.slane %v1178_v43, 4  ;;  %v1183_v57 = vrot.slane %v1181_v47, 5  ;;  %v7728_v38 = vld [vmem:[#allocation2 + $0x5c] sm:$0x1] }
  0x75   : > { %vm1997_vm14 = vcmask 1042432   ;;  %vm1998_vm15 = vcmask 1046532   ;;  %v1171_v58 = vrot.slane %v1170_v40, 4  ;;  %v1189_v8 = vrot.slane %v1187_v12, 5  ;;  %v309_v53 = vld [vmem:[#allocation2 + $0x6c] sm:$0x1] }
  0x76   : > { %v1193_v39 = vrot.slane %v1191_v61, 4  ;;  %v1197_v0 = vshll.u32 %v997_v31, 16  ;;  %6772 = vmatmul.mubr.msk.bf16.gmra.mrb[8].mxu0 %vm1443_vm12, %v6181_v52  ;;  %v1166_v1 = vsel %vm7456_vm13, %v1161_v36, %v1165_v10  ;;  %v1184_v45 = vor.u32 %v1183_v57, %v1180_v56  ;;  %v365_v54 = vld [vmem:[#allocation2 + $0x74] sm:$0x1]  ;;  %v894_v36 = vld [vmem:[#allocation2 + $0x60] sm:$0xf]  ;;  %vm7759_vm2 = vmor %vm1997_vm14, %vm1998_vm15 }
  0x77   : > { %v2957_v13 = vshrl.u32 %v2782_v28, 16  ;;  %v2960_v17 = vshll.u32 %v2782_v28, 16  ;;  %v1176_v19 = vsel %vm7456_vm13, %v1171_v58, %v1175_v25  ;;  %v2966_v18 = vshll.u32 %v7723_v63, 16 }
  0x78   : > { %v1194_v6 = vor.u32 %v1193_v39, %v1189_v8  ;;  %v1199_v62 = vrot.slane %v1197_v0, 5  ;;  %v6035_v24 = vcombine.low %v1166_v1, %v1176_v19  ;;  %v1185_v33 = vrot.slane %v1184_v45, 4  ;;  %v3490_v45 = vld [vmem:[#allocation2 + $0xc] sm:$0xe] }
  0x79   : > { %v2959_v26 = vrot.slane %v2957_v13, 4  ;;  %v2962_v29 = vrot.slane %v2960_v17, 5  ;;  %v2968_v51 = vrot.slane %v2966_v18, 5  ;;  %v2970_v10 = vshrl.u32 %v7723_v63, 16 }
  0x7a   : > { %v1195_v32 = vrot.slane %v1194_v6, 4  ;;  %v2976_v31 = vshll.u32 %v7728_v38, 16  ;;  %6639 = vmatprep.mubr.msk.bf16.mxu1 %vm1443_vm12, %v6035_v24  ;;  %v1190_v43 = vsel %vm7456_vm13, %v1185_v33, %v1189_v8  ;;  %v645_v47 = vshll.u32 %v7671_v44, 16 }
  0x7b   : > { %v2963_v25 = vor.u32 %v2962_v29, %v2959_v26  ;;  %v648_v12 = vrot.slane %v7717_v16, 4  ;;  %v2972_v61 = vrot.slane %v2970_v10, 4  ;;  %v650_v52 = vshrl.u32 %v7673_v46, 16 }
  0x7c   : > { %v1200_v40 = vsel %vm7456_vm13, %v1195_v32, %v1199_v62  ;;  %v2978_v28 = vrot.slane %v2976_v31, 5  ;;  %v647_v58 = vor.u32 %v645_v47, %v7717_v16  ;;  %v653_v8 = vshll.u32 %v7673_v46, 16  ;;  %v898_v16 = vld [vmem:[#allocation2 + $0x68] sm:$0x1]  ;;  %v312_v47 = vld [vmem:[#allocation2 + $0x78] sm:$0x1] }
  0x7d   : > { %v6036_v56 = vcombine.low %v1190_v43, %v1200_v40  ;;  %v2964_v57 = vrot.slane %v2963_v25, 4  ;;  %v2973_v39 = vor.u32 %v2972_v61, %v2968_v51  ;;  %v652_v44 = vrot.slane %v650_v52, 7  ;;  %v368_v61 = vld [vmem:[#allocation2 + $0x80] sm:$0x1] }
  0x7e   : > { %v310_v0 = vsel %vm7371_vm5, 0, %v309_v53  ;;  %v366_v1 = vsel %vm7379_vm6, 0, %v365_v54  ;;  %v895_v17 = vsel %vm7423_vm9, %v647_v58, %v894_v36  ;;  %v659_v46 = vshrl.u32 %v7697_v35, 16 }
  0x7f   : > { %6640 = vmatmul.mubr.msk.bf16.gmra.mrb[12].mxu1 %vm1443_vm12, %v6036_v56  ;;  %v2969_v13 = vsel %vm7456_vm13, %v2964_v57, %v2968_v51  ;;  %311 = vst [vmem:[#allocation2 + $0x6c] sm:$0x1] %v310_v0  ;;  %367 = vst [vmem:[#allocation2 + $0x74] sm:$0x1] %v366_v1  ;;  %v662_v19 = vshll.u32 %v7697_v35, 16  ;;  %v2974_v6 = vrot.slane %v2973_v39, 4  ;;  %v655_v62 = vor.u32 %v653_v8, %v652_v44 }
  0x80   : > { %v657_v18 = vrot.slane %v652_v44, 4  ;;  %896 = vst [vmem:[#allocation2 + $0x60] sm:$0xf] %v895_v17  ;;  %v667_v24 = vshrl.u32 %v7706_v50, 16  ;;  %v661_v26 = vrot.slane %v659_v46, 7  ;;  %v670_v29 = vshll.u32 %v7706_v50, 16 }
  0x81   : > { %v6208_v32 = vrot.slane %v3490_v45, 9  ;;  %v3558_v35 = vrot.slane %v3556_v21, 4  ;;  %v3491_v51 = vld [vmem:[#allocation2 + $0x18] sm:$0xe]  ;;  %v2979_v10 = vsel %vm7456_vm13, %v2974_v6, %v2978_v28  ;;  %v656_v31 = vsel %vm7430_vm10, %v648_v12, %v655_v62  ;;  %v410_v12 = vld [vmem:[%s7401_s8 + $0x90] sm:$0xff] }
  0x82   : > { %v899_v43 = vsel %vm7371_vm5, %v657_v18, %v898_v16  ;;  %v669_v25 = vrot.slane %v667_v24, 7  ;;  %v6182_v53 = vcombine.low %v2969_v13, %v2979_v10  ;;  %897 = vst.msk [vmem:[#allocation2 + $0x64] sm:$0xf] %vm270_vm1, %v656_v31  ;;  %v664_v50 = vor.u32 %v662_v19, %v661_v26  ;;  %v411_v57 = vld [vmem:[%s7401_s8 + $0x98] sm:$0xff]  ;;  %v413_v13 = vld [vmem:[%s7401_s8 + $0xa8] sm:$0xff] }
  0x83   : > { %900 = vst [vmem:[#allocation2 + $0x68] sm:$0x1] %v899_v43  ;;  %v665_v54 = vrot.slane %v661_v26, 4  ;;  %v7777_v40 = vsel %vm7759_vm2, %v6208_v32, %v3556_v21  ;;  %v7784_v36 = vsel %vm7759_vm2, %v3558_v35, %v3559_v30  ;;  %v6209_v56 = vrot.slane %v3491_v51, 9 }
  0x84   : > { %v672_v28 = vor.u32 %v670_v29, %v669_v25  ;;  %v674_v52 = vrot.slane %v669_v25, 4  ;;  %6775 = vmatprep.mubr.msk.bf16.mxu0 %vm1443_vm12, %v6182_v53  ;;  %v6225_v4 = vcombine.low %v7777_v40, %v7784_v36  ;;  %v7795_v21 = vsel %vm7759_vm2, %v7530_v14, %v3566_v2  ;;  %v3493_v36 = vld [vmem:[#allocation2 + $0x30] sm:$0xe] }
  0x85   : > { %v7799_v9 = vsel %vm1492_vm0, %v7561_v55, 0  ;;  %v313_v30 = vsel %vm7371_vm5, 0, %v312_v47  ;;  %v7809_v37 = vsel %vm7759_vm2, %v6209_v56, %v3563_v60  ;;  %v369_v2 = vsel %vm7379_vm6, 0, %v368_v61  ;;  %v412_v55 = vld [vmem:[%s7401_s8 + $0xa0] sm:$0xff] }
  0x86   : > { %v673_v58 = vsel %vm7430_vm10, %v665_v54, %v672_v28  ;;  %v901_v8 = vld [vmem:[#allocation2 + $0x6c] sm:$0xf]  ;;  %v905_v39 = vld [vmem:[#allocation2 + $0x74] sm:$0x1]  ;;  %314 = vst [vmem:[#allocation2 + $0x78] sm:$0x1] %v313_v30  ;;  %v7813_v14 = vpack.c.bf16 %v410_v12, %v410_v12  ;;  %v6226_v60 = vcombine.low %v7809_v37, %v7795_v21  ;;  %v7823_v45 = vpack.c.bf16 %v411_v57, %v411_v57 }
  0x87   : > { %v2785_v44 = vld [vmem:[#allocation2 + $0x60] sm:$0xf]  ;;  %v902_v1 = vsel %vm7423_vm9, %v664_v50, %v901_v8  ;;  %904 = vst.msk [vmem:[#allocation2 + $0x70] sm:$0xf] %vm270_vm1, %v673_v58  ;;  %v906_v22 = vsel %vm7371_vm5, %v674_v52, %v905_v39  ;;  %370 = vst [vmem:[#allocation2 + $0x80] sm:$0x1] %v369_v2  ;;  %v7834_v51 = vpack.c.bf16 %v412_v55, %v412_v55 }
  0x88   : > { %v973_v0 = vld [vmem:[#allocation2 + $0x60] sm:$0xf]  ;;  %v2981_v17 = vshrl.u32 %v2785_v44, 16  ;;  %v2984_v16 = vshll.u32 %v2785_v44, 16  ;;  %903 = vst [vmem:[#allocation2 + $0x6c] sm:$0xf] %v902_v1  ;;  %v7836_v10 = vpack.c.bf16 %v413_v13, %v413_v13 }
  0x89   : > { %v1202_v46 = vshrl.u32 %v973_v0, 16  ;;  %v1205_v19 = vshll.u32 %v973_v0, 16  ;;  %907 = vst [vmem:[#allocation2 + $0x74] sm:$0x1] %v906_v22  ;;  %v676_v6 = vshrl.u32 %v7813_v14, 16  ;;  %v679_v62 = vshll.u32 %v7813_v14, 16 }
  0x8a   : > { %v684_v18 = vshrl.u32 %v7823_v45, 16  ;;  %v687_v24 = vshll.u32 %v7823_v45, 16  ;;  %v7830_v26 = vld [vmem:[#allocation2 + $0x64] sm:$0xf]  ;;  %v7832_v29 = vld [vmem:[#allocation2 + $0x68] sm:$0x1] }
  0x8b   : > { %v2983_v32 = vrot.slane %v2981_v17, 4  ;;  %v2986_v35 = vrot.slane %v2984_v16, 5  ;;  %v2990_v31 = vshll.u32 %v7830_v26, 16  ;;  %v2994_v43 = vshrl.u32 %v7830_v26, 16  ;;  %v974_v47 = vld [vmem:[#allocation2 + $0x64] sm:$0xf] }
  0x8c   : > { %v3000_v25 = vshll.u32 %v7832_v29, 16  ;;  %v1204_v53 = vrot.slane %v1202_v46, 4  ;;  %v998_v54 = vld [vmem:[#allocation2 + $0x68] sm:$0x1]  ;;  %v1207_v61 = vrot.slane %v1205_v19, 5  ;;  %v1211_v12 = vshll.u32 %v974_v47, 16 }
  0x8d   : > { %v2987_v50 = vor.u32 %v2986_v35, %v2983_v32  ;;  %v1215_v28 = vshrl.u32 %v974_v47, 16  ;;  %v414_v52 = vld [vmem:[%s7401_s8 + $0xb0] sm:$0xff]  ;;  %v2992_v56 = vrot.slane %v2990_v31, 5  ;;  %v2996_v57 = vrot.slane %v2994_v43, 4  ;;  %v315_v47 = vld [vmem:[#allocation2 + $0x84] sm:$0x1] }
  0x8e   : > { %v3002_v30 = vrot.slane %v3000_v25, 5  ;;  %v1221_v58 = vshll.u32 %v998_v54, 16  ;;  %v1208_v39 = vor.u32 %v1207_v61, %v1204_v53  ;;  %v1213_v2 = vrot.slane %v1211_v12, 5  ;;  %v976_v55 = vld [vmem:[#allocation2 + $0x70] sm:$0xf] }
  0x8f   : > { %v2988_v8 = vrot.slane %v2987_v50, 4  ;;  %v1217_v14 = vrot.slane %v1215_v28, 4  ;;  %v2997_v44 = vor.u32 %v2996_v57, %v2992_v56  ;;  %v975_v1 = vld [vmem:[#allocation2 + $0x6c] sm:$0xf]  ;;  %v1235_v13 = vshll.u32 %v976_v55, 16 }
  0x90   : > { %v1223_v0 = vrot.slane %v1221_v58, 5  ;;  %v999_v22 = vld [vmem:[#allocation2 + $0x74] sm:$0x1]  ;;  %v7842_v17 = vpack.c.bf16 %v414_v52, %v414_v52  ;;  %v1209_v46 = vrot.slane %v1208_v39, 4  ;;  %v1226_v32 = vshrl.u32 %v975_v1, 16  ;;  %v7215_v3 = vld [vmem:[#allocation2 + $0x6c] sm:$0xff]  }
  0x91   : > { %v2993_v16 = vsel %vm7456_vm13, %v2988_v8, %v2992_v56  ;;  %v1218_v19 = vor.u32 %v1217_v14, %v1213_v2  ;;  %v2998_v35 = vrot.slane %v2997_v44, 4  ;;  %v1229_v31 = vshll.u32 %v975_v1, 16  ;;  %v908_v12 = vld [vmem:[#allocation2 + $0x78] sm:$0xf]  ;;  %v371_v28 = vld [vmem:[#allocation2 + $0x8c] sm:$0x1] }
  0x92   : > { %v1237_v43 = vrot.slane %v1235_v13, 5  ;;  %v1239_v25 = vshrl.u32 %v976_v55, 16  ;;  %v1214_v53 = vsel %vm7456_vm13, %v1209_v46, %v1213_v2  ;;  %v1228_v54 = vrot.slane %v1226_v32, 4  ;;  %v912_v8 = vld [vmem:[#allocation2 + $0x80] sm:$0x1] }
  0x93   : > { %v1219_v50 = vrot.slane %v1218_v19, 4  ;;  %v1245_v61 = vshll.u32 %v999_v22, 16  ;;  %v3003_v52 = vsel %vm7456_vm13, %v2998_v35, %v3002_v30  ;;  %v1231_v56 = vrot.slane %v1229_v31, 5  ;;  %v3492_v22 = vld [vmem:[#allocation2 + $0x24] sm:$0xe] }
  0x94   : > { %v1241_v57 = vrot.slane %v1239_v25, 4  ;;  %v678_v58 = vrot.slane %v676_v6, 7  ;;  %v6183_v39 = vcombine.low %v2993_v16, %v3003_v52  ;;  %v686_v44 = vrot.slane %v684_v18, 7 }
  0x95   : > { %v1224_v14 = vsel %vm7456_vm13, %v1219_v50, %v1223_v0  ;;  %v1247_v55 = vrot.slane %v1245_v61, 5  ;;  %v1232_v2 = vor.u32 %v1231_v56, %v1228_v54  ;;  %v316_v6 = vsel %vm7371_vm5, 0, %v315_v47  ;;  %v318_v61 = vld [vmem:[#allocation2 + $0x90] sm:$0x1]  ;;  %v374_v56 = vld [vmem:[#allocation2 + $0x98] sm:$0x1] }
  0x96   : > { %v6037_v1 = vcombine.low %v1214_v53, %v1224_v14  ;;  %v1242_v13 = vor.u32 %v1241_v57, %v1237_v43  ;;  %v681_v46 = vor.u32 %v679_v62, %v678_v58  ;;  %6776 = vmatmul.mubr.msk.bf16.gmra.mrb[12].mxu0 %vm1443_vm12, %v6183_v39  ;;  %v682_v19 = vrot.slane %v678_v58, 4  ;;  %317 = vst [vmem:[#allocation2 + $0x84] sm:$0x1] %v316_v6  ;;  %v415_v39 = vld [vmem:[%s7401_s8 + $0xb8] sm:$0xff] }
  0x97   : > { %v689_v30 = vor.u32 %v687_v24, %v686_v44  ;;  %v691_v32 = vrot.slane %v686_v44, 4  ;;  %v1233_v0 = vrot.slane %v1232_v2, 4  ;;  %6797 = vmatprep.mubr.msk.bf16.mxu0 %vm1443_vm12, %v6225_v4  ;;  %v372_v45 = vsel %vm7379_vm6, 0, %v371_v28 }
  0x98   : > { %6643 = vmatprep.mubr.msk.bf16.mxu1 %vm1443_vm12, %v6037_v1  ;;  %v1243_v16 = vrot.slane %v1242_v13, 4  ;;  %v909_v62 = vsel %vm7423_vm9, %v681_v46, %v908_v12  ;;  %373 = vst [vmem:[#allocation2 + $0x8c] sm:$0x1] %v372_v45  ;;  %v693_v35 = vshrl.u32 %v7834_v51, 16  ;;  %v696_v40 = vshll.u32 %v7834_v51, 16 }
  0x99   : > { %v690_v18 = vsel %vm7430_vm10, %v682_v19, %v689_v30  ;;  %910 = vst [vmem:[#allocation2 + $0x78] sm:$0xf] %v909_v62  ;;  %v913_v24 = vsel %vm7371_vm5, %v691_v32, %v912_v8  ;;  %v1238_v4 = vsel %vm7456_vm13, %v1233_v0, %v1237_v43  ;;  %v701_v25 = vshrl.u32 %v7836_v10, 16  ;;  %v321_v30 = vld [vmem:[#allocation2 + $0x9c] sm:$0x1] }
  0x9a   : > { %v1248_v31 = vsel %vm7456_vm13, %v1243_v16, %v1247_v55  ;;  %911 = vst.msk [vmem:[#allocation2 + $0x7c] sm:$0xf] %vm270_vm1, %v690_v18  ;;  %914 = vst [vmem:[#allocation2 + $0x80] sm:$0x1] %v913_v24  ;;  %v704_v47 = vshll.u32 %v7836_v10, 16  ;;  %v695_v50 = vrot.slane %v693_v35, 7 }
  0x9b   : > { %v6038_v53 = vcombine.low %v1238_v4, %v1248_v31  ;;  %v6210_v54 = vrot.slane %v3492_v22, 9  ;;  %v3570_v51 = vrot.slane %v7582_v15, 5  ;;  %v703_v12 = vrot.slane %v701_v25, 7 }
  0x9c   : > { %v3573_v43 = vrot.slane %v7593_v34, 5  ;;  %v6211_v28 = vrot.slane %v3493_v36, 9  ;;  %v3577_v52 = vrot.slane %v7607_v20, 5  ;;  %v698_v57 = vor.u32 %v696_v40, %v695_v50  ;;  %v7891_v34 = vld [vmem:[%s9314_s1 + $0xe] sm:$0x3] }
  0x9d   : > { %6644 = vmatmul.mubr.msk.bf16.gmra.mrb[16].mxu1 %vm1443_vm12, %v6038_v53  ;;  %v699_v58 = vrot.slane %v695_v50, 4  ;;  %v3571_v10 = vsel %vm7759_vm2, %v6210_v54, %v3570_v51  ;;  %v3572_v8 = vrot.slane %v3570_v51, 4  ;;  %v706_v14 = vor.u32 %v704_v47, %v703_v12  ;;  %v915_v20 = vld [vmem:[#allocation2 + $0x84] sm:$0xf] }
  0x9e   : > { %v708_v55 = vrot.slane %v703_v12, 4  ;;  %v3578_v15 = vsel %vm7759_vm2, %v6211_v28, %v3577_v52  ;;  %v3579_v44 = vrot.slane %v3577_v52, 4  ;;  %6798 = vmatmul.mubr.msk.bf16.vlgmr.msra.gmra.mrb[0].mxu0 %vm1443_vm12, %v6226_v60  ;;  %v3580_v2 = vrot.slane %v7609_v23, 5  ;;  %v377_v40 = vld [vmem:[#allocation2 + $0xa4] sm:$0x1] }
  0x9f   : > { %v3574_v1 = vsel %vm7759_vm2, %v3572_v8, %v3573_v43  ;;  %v319_v13 = vsel %vm7371_vm5, 0, %v318_v61  ;;  %v375_v46 = vsel %vm7379_vm6, 0, %v374_v56  ;;  %6830 = vmatpush3.bf16.msra.mxu0 %v7799_v9  ;;  %v707_v21 = vsel %vm7430_vm10, %v699_v58, %v706_v14  ;;  %v919_v60 = vld [vmem:[#allocation2 + $0x8c] sm:$0x1]  ;;  %v416_v47 = vld [vmem:[%s7401_s8 + $0xc0] sm:$0xff]  ;;  %v418_v56 = vld [vmem:[%s7401_s8 + $0xd0] sm:$0xff] }
  0xa0   : > { %v7905_v22 = vld [vmem:[#allocation2 + $0x78] sm:$0xf]  ;;  %v916_v37 = vsel %vm7423_vm9, %v698_v57, %v915_v20  ;;  %v6227_v19 = vcombine.low %v3571_v10, %v3574_v1  ;;  %320 = vst [vmem:[#allocation2 + $0x90] sm:$0x1] %v319_v13  ;;  %376 = vst [vmem:[#allocation2 + $0x98] sm:$0x1] %v375_v46  ;;  %v6431_v23 = vpack.c.bf16 %v415_v39, %v415_v39  ;;  %7197 = vmatprep.subr.msk.bf16.mxu0 %vm1492_vm0, %v7891_v34 }
  0xa1   : > { %v7911_v32 = vld [vmem:[#allocation2 + $0x7c] sm:$0xf]  ;;  %v1000_v6 = vld [vmem:[#allocation2 + $0x80] sm:$0x1]  ;;  %v1250_v0 = vshrl.u32 %v7905_v22, 16  ;;  %v1253_v9 = vshll.u32 %v7905_v22, 16  ;;  %v920_v16 = vsel %vm7371_vm5, %v708_v55, %v919_v60  ;;  %v3581_v62 = vsel %vm7759_vm2, %v3579_v44, %v3580_v2 }
  0xa2   : > { %917 = vst [vmem:[#allocation2 + $0x84] sm:$0xf] %v916_v37  ;;  %918 = vst.msk [vmem:[#allocation2 + $0x88] sm:$0xf] %vm270_vm1, %v707_v21  ;;  %v1259_v45 = vshll.u32 %v7911_v32, 16  ;;  %v1263_v18 = vshrl.u32 %v7911_v32, 16  ;;  %6801 = vmatprep.mubr.msk.bf16.mxu0 %vm1443_vm12, %v6227_v19  ;;  %v6228_v35 = vcombine.low %v3578_v15, %v3581_v62  ;;  %v7939_v21 = vpack.c.bf16 %v418_v56, %v418_v56 }
  0xa3   : > { %v1269_v24 = vshll.u32 %v1000_v6, 16  ;;  %921 = vst [vmem:[#allocation2 + $0x8c] sm:$0x1] %v920_v16  ;;  %v1252_v36 = vrot.slane %v1250_v0, 4  ;;  %v1255_v4 = vrot.slane %v1253_v9, 5  ;;  %v710_v31 = vshrl.u32 %v7842_v17, 16 }
  0xa4   : > { %v713_v25 = vshll.u32 %v7842_v17, 16  ;;  %v1261_v53 = vrot.slane %v1259_v45, 5  ;;  %v1265_v50 = vrot.slane %v1263_v18, 4  ;;  %v718_v51 = vshrl.u32 %v6431_v23, 16  ;;  %v417_v61 = vld [vmem:[%s7401_s8 + $0xc8] sm:$0xff] }
  0xa5   : > { %v1271_v54 = vrot.slane %v1269_v24, 5  ;;  %v1256_v12 = vor.u32 %v1255_v4, %v1252_v36  ;;  %v712_v43 = vrot.slane %v710_v31, 7  ;;  %v721_v28 = vshll.u32 %v6431_v23, 16 }
  0xa6   : > { %v322_v52 = vsel %vm7371_vm5, 0, %v321_v30  ;;  %v1266_v57 = vor.u32 %v1265_v50, %v1261_v53  ;;  %v720_v58 = vrot.slane %v718_v51, 7  ;;  %v378_v10 = vsel %vm7379_vm6, 0, %v377_v40  ;;  %6802 = vmatmul.mubr.msk.bf16.gmra.mrb[4].mxu0 %vm1443_vm12, %v6228_v35  ;;  %v3494_v35 = vld [vmem:[#allocation2 + $0x3c] sm:$0xe] }
  0xa7   : > { %323 = vst [vmem:[#allocation2 + $0x9c] sm:$0x1] %v322_v52  ;;  %v6432_v17 = vpack.c.bf16 %v416_v47, %v416_v47  ;;  %v1257_v8 = vrot.slane %v1256_v12, 4  ;;  %v715_v39 = vor.u32 %v713_v25, %v712_v43  ;;  %v716_v14 = vrot.slane %v712_v43, 4  ;;  %v922_v55 = vld [vmem:[#allocation2 + $0x90] sm:$0xf] }
  0xa8   : > { %v926_v15 = vld [vmem:[#allocation2 + $0x98] sm:$0x1]  ;;  %379 = vst [vmem:[#allocation2 + $0xa4] sm:$0x1] %v378_v10  ;;  %v6433_v44 = vpack.c.bf16 %v417_v61, %v417_v61  ;;  %v1267_v20 = vrot.slane %v1266_v57, 4  ;;  %v723_v13 = vor.u32 %v721_v28, %v720_v58  ;;  %v725_v46 = vrot.slane %v720_v58, 4 }
  0xa9   : > { %v7935_v1 = vld [vmem:[#allocation2 + $0x84] sm:$0xf]  ;;  %v7937_v2 = vld [vmem:[#allocation2 + $0x88] sm:$0xf]  ;;  %v1262_v37 = vsel %vm7456_vm13, %v1257_v8, %v1261_v53  ;;  %v923_v4 = vsel %vm7423_vm9, %v715_v39, %v922_v55  ;;  %v727_v47 = vshrl.u32 %v6432_v17, 16  ;;  %v730_v53 = vshll.u32 %v6432_v17, 16 }
  0xaa   : > { %v1001_v60 = vld [vmem:[#allocation2 + $0x8c] sm:$0x1]  ;;  %v1274_v19 = vshrl.u32 %v7935_v1, 16  ;;  %v1277_v23 = vshll.u32 %v7935_v1, 16  ;;  %v1283_v30 = vshll.u32 %v7937_v2, 16  ;;  %v1272_v6 = vsel %vm7456_vm13, %v1267_v20, %v1271_v54 }
  0xab   : > { %v1287_v0 = vshrl.u32 %v7937_v2, 16  ;;  %v1293_v9 = vshll.u32 %v1001_v60, 16  ;;  %v724_v16 = vsel %vm7430_vm10, %v716_v14, %v723_v13  ;;  %v6039_v62 = vcombine.low %v1262_v37, %v1272_v6  ;;  %924 = vst [vmem:[#allocation2 + $0x90] sm:$0xf] %v923_v4  ;;  %v3495_v54 = vld [vmem:[#allocation2 + $0x48] sm:$0xe] }
  0xac   : > { %v1276_v45 = vrot.slane %v1274_v19, 4  ;;  %v1279_v18 = vrot.slane %v1277_v23, 5  ;;  %v1285_v24 = vrot.slane %v1283_v30, 5  ;;  %925 = vst.msk [vmem:[#allocation2 + $0x94] sm:$0xf] %vm270_vm1, %v724_v16  ;;  %v927_v31 = vsel %vm7371_vm5, %v725_v46, %v926_v15  ;;  %v419_v4 = vld [vmem:[%s7401_s8 + $0xd8] sm:$0xff] }
  0xad   : > { %v1289_v40 = vrot.slane %v1287_v0, 4  ;;  %v1295_v36 = vrot.slane %v1293_v9, 5  ;;  %6647 = vmatprep.mubr.msk.bf16.mxu1 %vm1443_vm12, %v6039_v62  ;;  %928 = vst [vmem:[#allocation2 + $0x98] sm:$0x1] %v927_v31  ;;  %v735_v50 = vshrl.u32 %v6433_v44, 16  ;;  %v738_v61 = vshll.u32 %v6433_v44, 16 }
  0xae   : > { %v1280_v25 = vor.u32 %v1279_v18, %v1276_v45  ;;  %v6212_v12 = vrot.slane %v3494_v35, 9  ;;  %v3584_v43 = vrot.slane %v7665_v11, 5  ;;  %v729_v52 = vrot.slane %v727_v47, 7  ;;  %v929_v44 = vld [vmem:[#allocation2 + $0x9c] sm:$0xf] }
  0xaf   : > { %v1290_v51 = vor.u32 %v1289_v40, %v1285_v24  ;;  %v737_v56 = vrot.slane %v735_v50, 7  ;;  %v3587_v57 = vrot.slane %v7676_v48, 5  ;;  %v6213_v39 = vrot.slane %v3495_v54, 9  ;;  %v933_v20 = vld [vmem:[#allocation2 + $0xa4] sm:$0x1] }
  0xb0   : > { %v1281_v28 = vrot.slane %v1280_v25, 4  ;;  %v3585_v10 = vsel %vm7759_vm2, %v6212_v12, %v3584_v43  ;;  %v3586_v8 = vrot.slane %v3584_v43, 4  ;;  %v732_v14 = vor.u32 %v730_v53, %v729_v52  ;;  %v324_v6 = vld [vmem:[#allocation2 + $0xa8] sm:$0x1]  ;;  %v380_v18 = vld [vmem:[#allocation2 + $0xb0] sm:$0x1] }
  0xb1   : > { %v1291_v58 = vrot.slane %v1290_v51, 4  ;;  %v733_v55 = vrot.slane %v729_v52, 4  ;;  %v740_v15 = vor.u32 %v738_v61, %v737_v56  ;;  %v742_v48 = vrot.slane %v737_v56, 4  ;;  %v327_v12 = vld [vmem:[#allocation2 + $0xb4] sm:$0x1] }
  0xb2   : > { %v1286_v17 = vsel %vm7456_vm13, %v1281_v28, %v1285_v24  ;;  %v3588_v46 = vsel %vm7759_vm2, %v3586_v8, %v3587_v57  ;;  %v3591_v37 = vrot.slane %v7699_v59, 5  ;;  %v7974_v0 = vld [vmem:[#allocation2 + $0x90] sm:$0xf]  ;;  %v930_v16 = vsel %vm7423_vm9, %v732_v14, %v929_v44  ;;  %v383_v56 = vld [vmem:[#allocation2 + $0xbc] sm:$0x1]  ;;  %v420_v57 = vld [vmem:[%s7401_s8 + $0xe0] sm:$0xff] }
  0xb3   : > { %v1296_v11 = vsel %vm7456_vm13, %v1291_v58, %v1295_v36  ;;  %v7965_v13 = vld [vmem:[#allocation2 + $0x94] sm:$0xf]  ;;  %v741_v30 = vsel %vm7430_vm10, %v733_v55, %v740_v15  ;;  %v934_v59 = vsel %vm7371_vm5, %v742_v48, %v933_v20  ;;  %v6229_v62 = vcombine.low %v3585_v10, %v3588_v46  ;;  %931 = vst [vmem:[#allocation2 + $0x9c] sm:$0xf] %v930_v16  ;;  %v7286_v33 = vld [vmem:[#allocation2 + $0x88] sm:$0xf] }
  0xb4   : > { %v6040_v60 = vcombine.low %v1286_v17, %v1296_v11  ;;  %v1307_v19 = vshll.u32 %v7965_v13, 16  ;;  %v1311_v23 = vshrl.u32 %v7965_v13, 16  ;;  %v1002_v9 = vld [vmem:[#allocation2 + $0x98] sm:$0x1]  ;;  %932 = vst.msk [vmem:[#allocation2 + $0xa0] sm:$0xf] %vm270_vm1, %v741_v30  ;;  %v3592_v45 = vsel %vm7759_vm2, %v6213_v39, %v3591_v37 }
  0xb5   : > { %v1298_v24 = vshrl.u32 %v7974_v0, 16  ;;  %v1301_v35 = vshll.u32 %v7974_v0, 16  ;;  %935 = vst [vmem:[#allocation2 + $0xa4] sm:$0x1] %v934_v59  ;;  %v1317_v31 = vshll.u32 %v1002_v9, 16  ;;  %6805 = vmatprep.mubr.msk.bf16.mxu0 %vm1443_vm12, %v6229_v62  ;;  %v3593_v25 = vrot.slane %v3591_v37, 4 }
  0xb6   : > { %6648 = vmatmul.mubr.msk.bf16.gmra.mrb[20].mxu1 %vm1443_vm12, %v6040_v60  ;;  %v1309_v40 = vrot.slane %v1307_v19, 5  ;;  %v1313_v36 = vrot.slane %v1311_v23, 4  ;;  %v3594_v47 = vrot.slane %v7701_v41, 5  ;;  %v325_v53 = vsel %vm7371_vm5, 0, %v324_v6  ;;  %v421_v17 = vld [vmem:[%s7401_s8 + $0xe8] sm:$0xff] }
  0xb7   : > { %v1300_v50 = vrot.slane %v1298_v24, 4  ;;  %v1303_v54 = vrot.slane %v1301_v35, 5  ;;  %326 = vst [vmem:[#allocation2 + $0xa8] sm:$0x1] %v325_v53  ;;  %v381_v61 = vsel %vm7379_vm6, 0, %v380_v18  ;;  %v1319_v43 = vrot.slane %v1317_v31, 5 }
  0xb8   : > { %v1314_v51 = vor.u32 %v1313_v36, %v1309_v40  ;;  %v3595_v28 = vsel %vm7759_vm2, %v3593_v25, %v3594_v47  ;;  %382 = vst [vmem:[#allocation2 + $0xb0] sm:$0x1] %v381_v61  ;;  %v6435_v52 = vpack.c.bf16 %v419_v4, %v419_v4  ;;  %v744_v41 = vshrl.u32 %v7939_v21, 16  ;;  %v3496_v53 = vld [vmem:[#allocation2 + $0x54] sm:$0xe] }
  0xb9   : > { %v1304_v58 = vor.u32 %v1303_v54, %v1300_v50  ;;  %v6230_v8 = vcombine.low %v3592_v45, %v3595_v28  ;;  %v747_v39 = vshll.u32 %v7939_v21, 16  ;;  %v328_v44 = vsel %vm7371_vm5, 0, %v327_v12 }
  0xba   : > { %v1315_v10 = vrot.slane %v1314_v51, 4  ;;  %v746_v14 = vrot.slane %v744_v41, 7  ;;  %v752_v55 = vshrl.u32 %v6435_v52, 16  ;;  %v755_v15 = vshll.u32 %v6435_v52, 16  ;;  %329 = vst [vmem:[#allocation2 + $0xb4] sm:$0x1] %v328_v44 }
  0xbb   : > { %v1305_v20 = vrot.slane %v1304_v58, 4  ;;  %v8003_v48 = vld [vmem:[#allocation2 + $0xa0] sm:$0xf]  ;;  %6806 = vmatmul.mubr.msk.bf16.gmra.mrb[8].mxu0 %vm1443_vm12, %v6230_v8  ;;  %v384_v46 = vsel %vm7379_vm6, 0, %v383_v56  ;;  %v6436_v21 = vpack.c.bf16 %v420_v57, %v420_v57  ;;  %v8008_v37 = vld [vmem:[#allocation2 + $0x9c] sm:$0xf]  ;;  %v6437_v6 = vpack.c.bf16 %v421_v17, %v421_v17 }
  0xbc   : > { %v1320_v11 = vsel %vm7456_vm13, %v1315_v10, %v1319_v43  ;;  %v1003_v60 = vld [vmem:[#allocation2 + $0xa4] sm:$0x1]  ;;  %v1331_v19 = vshll.u32 %v8003_v48, 16  ;;  %v1335_v23 = vshrl.u32 %v8003_v48, 16  ;;  %v749_v30 = vor.u32 %v747_v39, %v746_v14  ;;  %385 = vst [vmem:[#allocation2 + $0xbc] sm:$0x1] %v384_v46 }
  0xbd   : > { %v1310_v9 = vsel %vm7456_vm13, %v1305_v20, %v1309_v40  ;;  %v1322_v16 = vshrl.u32 %v8008_v37, 16  ;;  %v1325_v59 = vshll.u32 %v8008_v37, 16  ;;  %v1341_v62 = vshll.u32 %v1003_v60, 16  ;;  %v3497_v46 = vld [vmem:[#allocation2 + $0x60] sm:$0xe] }
  0xbe   : > { %v6041_v45 = vcombine.low %v1310_v9, %v1320_v11  ;;  %v1333_v18 = vrot.slane %v1331_v19, 5  ;;  %v1337_v24 = vrot.slane %v1335_v23, 4  ;;  %v750_v35 = vrot.slane %v746_v14, 4  ;;  %v936_v36 = vld [vmem:[#allocation2 + $0xa8] sm:$0xf] }
  0xbf   : > { %v1324_v4 = vrot.slane %v1322_v16, 4  ;;  %v1327_v31 = vrot.slane %v1325_v59, 5  ;;  %v1343_v25 = vrot.slane %v1341_v62, 5  ;;  %v754_v47 = vrot.slane %v752_v55, 7  ;;  %v940_v54 = vld [vmem:[#allocation2 + $0xb0] sm:$0x1] }
  0xc0   : > { %6651 = vmatprep.mubr.msk.bf16.mxu1 %vm1443_vm12, %v6041_v45  ;;  %v1338_v50 = vor.u32 %v1337_v24, %v1333_v18  ;;  %v937_v40 = vsel %vm7423_vm9, %v749_v30, %v936_v36  ;;  %v761_v51 = vshrl.u32 %v6436_v21, 16  ;;  %v764_v61 = vshll.u32 %v6436_v21, 16  ;;  %v2789_v59 = vld [vmem:[#allocation2 + $0x70] sm:$0xf]  ;;  %v3498_v24 = vld [vmem:[#allocation2 + $0x6c] sm:$0xe] }
  0xc1   : > { %v1328_v12 = vor.u32 %v1327_v31, %v1324_v4  ;;  %v757_v43 = vor.u32 %v755_v15, %v754_v47  ;;  %v759_v28 = vrot.slane %v754_v47, 4  ;;  %938 = vst [vmem:[#allocation2 + $0xa8] sm:$0xf] %v937_v40  ;;  %v769_v52 = vshrl.u32 %v6437_v6, 16  ;;  %v943_v14 = vld [vmem:[#allocation2 + $0xb4] sm:$0xf] }
  0xc2   : > { %v1339_v41 = vrot.slane %v1338_v50, 4  ;;  %v763_v56 = vrot.slane %v761_v51, 7  ;;  %v772_v57 = vshll.u32 %v6437_v6, 16  ;;  %v6214_v58 = vrot.slane %v3496_v53, 9 }
  0xc3   : > { %v1329_v10 = vrot.slane %v1328_v12, 4  ;;  %v758_v8 = vsel %vm7430_vm10, %v750_v35, %v757_v43  ;;  %v941_v39 = vsel %vm7371_vm5, %v759_v28, %v940_v54  ;;  %v771_v17 = vrot.slane %v769_v52, 7  ;;  %v947_v20 = vld [vmem:[#allocation2 + $0xbc] sm:$0x1] }
  0xc4   : > { %v1344_v55 = vsel %vm7456_vm13, %v1339_v41, %v1343_v25  ;;  %939 = vst.msk [vmem:[#allocation2 + $0xac] sm:$0xf] %vm270_vm1, %v758_v8  ;;  %942 = vst [vmem:[#allocation2 + $0xb0] sm:$0x1] %v941_v39  ;;  %v766_v15 = vor.u32 %v764_v61, %v763_v56  ;;  %v767_v44 = vrot.slane %v763_v56, 4  ;;  %v3598_v11 = vrot.slane %v7723_v63, 5 }
  0xc5   : > { %v1334_v21 = vsel %vm7456_vm13, %v1329_v10, %v1333_v18  ;;  %v774_v60 = vor.u32 %v772_v57, %v771_v17  ;;  %v776_v19 = vrot.slane %v771_v17, 4  ;;  %v3601_v23 = vrot.slane %v7728_v38, 5  ;;  %v2790_v38 = vld [vmem:[#allocation2 + $0x74] sm:$0x1] }
  0xc6   : > { %v6042_v30 = vcombine.low %v1334_v21, %v1344_v55  ;;  %v944_v6 = vsel %vm7423_vm9, %v766_v15, %v943_v14  ;;  %v3599_v9 = vsel %vm7759_vm2, %v6214_v58, %v3598_v11  ;;  %v3600_v16 = vrot.slane %v3598_v11, 4 }
  0xc7   : > { %v775_v63 = vsel %vm7430_vm10, %v767_v44, %v774_v60  ;;  %945 = vst [vmem:[#allocation2 + $0xb4] sm:$0xf] %v944_v6  ;;  %v948_v62 = vsel %vm7371_vm5, %v776_v19, %v947_v20  ;;  %v6215_v45 = vrot.slane %v3497_v46, 9  ;;  %v3605_v18 = vrot.slane %v7830_v26, 5 }
  0xc8   : > { %6652 = vmatmul.mubr.msk.bf16.gmra.mrb[24].mxu1 %vm1443_vm12, %v6042_v30  ;;  %v8040_v35 = vld [vmem:[#allocation2 + $0xa8] sm:$0xf]  ;;  %946 = vst.msk [vmem:[#allocation2 + $0xb8] sm:$0xf] %vm270_vm1, %v775_v63  ;;  %949 = vst [vmem:[#allocation2 + $0xbc] sm:$0x1] %v948_v62  ;;  %v3602_v36 = vsel %vm7759_vm2, %v3600_v16, %v3601_v23 }
  0xc9   : > { %v3608_v4 = vrot.slane %v7832_v29, 5  ;;  %v1346_v31 = vshrl.u32 %v8040_v35, 16  ;;  %v1349_v25 = vshll.u32 %v8040_v35, 16  ;;  %v6231_v47 = vcombine.low %v3599_v9, %v3602_v36  ;;  %v3499_v23 = vld [vmem:[#allocation2 + $0x78] sm:$0xe] }
  0xca   : > { %v3606_v26 = vsel %vm7759_vm2, %v6215_v45, %v3605_v18  ;;  %v3607_v53 = vrot.slane %v3605_v18, 4  ;;  %v6216_v50 = vrot.slane %v3498_v24, 9  ;;  %v3612_v40 = vrot.slane %v2789_v59, 5  ;;  %v8078_v59 = vld [vmem:[#allocation2 + $0x7c] sm:$0xf] }
  0xcb   : > { %v3615_v54 = vrot.slane %v2790_v38, 5  ;;  %v8050_v51 = vld [vmem:[#allocation2 + $0xac] sm:$0xf]  ;;  %v8052_v61 = vld [vmem:[#allocation2 + $0xb0] sm:$0x1]  ;;  %v1348_v12 = vrot.slane %v1346_v31, 4  ;;  %6809 = vmatprep.mubr.msk.bf16.mxu0 %vm1443_vm12, %v6231_v47 }
  0xcc   : > { %v1351_v43 = vrot.slane %v1349_v25, 5  ;;  %v1355_v29 = vshll.u32 %v8050_v51, 16  ;;  %v1359_v28 = vshrl.u32 %v8050_v51, 16  ;;  %v1365_v52 = vshll.u32 %v8052_v61, 16  ;;  %v8080_v63 = vld [vmem:[#allocation2 + $0x80] sm:$0x1] }
  0xcd   : > { %v3609_v41 = vsel %vm7759_vm2, %v3607_v53, %v3608_v4  ;;  %v3614_v58 = vrot.slane %v3612_v40, 4  ;;  %v3613_v14 = vsel %vm7759_vm2, %v6216_v50, %v3612_v40  ;;  %v2795_v36 = vld [vmem:[#allocation2 + $0x88] sm:$0xf]  ;;  %v6217_v47 = vrot.slane %v3499_v23, 9  ;;  %v3500_v53 = vld [vmem:[#allocation2 + $0x84] sm:$0xe] }
  0xce   : > { %v1352_v56 = vor.u32 %v1351_v43, %v1348_v12  ;;  %v6232_v57 = vcombine.low %v3606_v26, %v3609_v41  ;;  %v1357_v10 = vrot.slane %v1355_v29, 5  ;;  %v1361_v8 = vrot.slane %v1359_v28, 4  ;;  %v8060_v17 = vld [vmem:[#allocation2 + $0xb4] sm:$0xf]  ;;  %v2796_v26 = vld [vmem:[#allocation2 + $0x8c] sm:$0x1] }
  0xcf   : > { %v1367_v39 = vrot.slane %v1365_v52, 5  ;;  %v8064_v15 = vld [vmem:[#allocation2 + $0xb8] sm:$0xf]  ;;  %v8066_v44 = vld [vmem:[#allocation2 + $0xbc] sm:$0x1]  ;;  %v1370_v20 = vshrl.u32 %v8060_v17, 16  ;;  %v3616_v11 = vsel %vm7759_vm2, %v3614_v58, %v3615_v54 }
  0xd0   : > { %v1353_v55 = vrot.slane %v1352_v56, 4  ;;  %6810 = vmatmul.mubr.msk.bf16.gmra.mrb[12].mxu0 %vm1443_vm12, %v6232_v57  ;;  %v1362_v46 = vor.u32 %v1361_v8, %v1357_v10  ;;  %v1373_v21 = vshll.u32 %v8060_v17, 16  ;;  %v1379_v60 = vshll.u32 %v8064_v15, 16  ;;  %v2798_v40 = vld [vmem:[#allocation2 + $0x94] sm:$0xf] }
  0xd1   : > { %v1383_v19 = vshrl.u32 %v8064_v15, 16  ;;  %v1372_v6 = vrot.slane %v1370_v20, 4  ;;  %v1389_v9 = vshll.u32 %v8066_v44, 16  ;;  %v6233_v16 = vcombine.low %v3613_v14, %v3616_v11  ;;  %v2799_v28 = vld [vmem:[#allocation2 + $0x98] sm:$0x1] }
  0xd2   : > { %v1358_v30 = vsel %vm7456_vm13, %v1353_v55, %v1357_v10  ;;  %v1363_v62 = vrot.slane %v1362_v46, 4  ;;  %v1375_v45 = vrot.slane %v1373_v21, 5  ;;  %v1381_v18 = vrot.slane %v1379_v60, 5  ;;  %v8088_v52 = vld [vmem:[#allocation2 + $0x4] sm:$0xf] }
  0xd3   : > { %v1385_v38 = vrot.slane %v1383_v19, 4  ;;  %v1391_v24 = vrot.slane %v1389_v9, 5  ;;  %6813 = vmatprep.mubr.msk.bf16.mxu0 %vm1443_vm12, %v6233_v16  ;;  %v3619_v43 = vrot.slane %v8078_v59, 5  ;;  %v3622_v29 = vrot.slane %v8080_v63, 5  ;;  %v7241_v41 = vld [vmem:[#allocation2] sm:$0xf] }
  0xd4   : > { %v1368_v4 = vsel %vm7456_vm13, %v1363_v62, %v1367_v39  ;;  %v1376_v31 = vor.u32 %v1375_v45, %v1372_v6  ;;  %v6061_v56 = vcombine.low %v7241_v41, %v8088_v52  ;;  %v6218_v57 = vrot.slane %v3500_v53, 9  ;;  %v3501_v8 = vld [vmem:[#allocation2 + $0x90] sm:$0xe]  ;;  %v3502_v11 = vld [vmem:[#allocation2 + $0x9c] sm:$0xe] }
  0xd5   : > { %v1386_v25 = vor.u32 %v1385_v38, %v1381_v18  ;;  %v6043_v50 = vcombine.low %v1358_v30, %v1368_v4  ;;  %v3626_v58 = vrot.slane %v2795_v36, 5  ;;  %v3629_v10 = vrot.slane %v2796_v26, 5  ;;  %v2801_v19 = vld [vmem:[#allocation2 + $0xa0] sm:$0xf]  ;;  %v2802_v16 = vld [vmem:[#allocation2 + $0xa4] sm:$0x1] }
  0xd6   : > { %v1377_v54 = vrot.slane %v1376_v31, 4  ;;  %v3620_v55 = vsel %vm7759_vm2, %v6217_v47, %v3619_v43  ;;  %v3621_v20 = vrot.slane %v3619_v43, 4  ;;  %v6219_v30 = vrot.slane %v3501_v8, 9  ;;  %v2804_v38 = vld [vmem:[#allocation2 + $0xac] sm:$0xf] }
  0xd7   : > { %v1387_v12 = vrot.slane %v1386_v25, 4  ;;  %6655 = vmatprep.mubr.msk.bf16.mxu1 %vm1443_vm12, %v6043_v50  ;;  %v3627_v21 = vsel %vm7759_vm2, %v6218_v57, %v3626_v58  ;;  %v3628_v60 = vrot.slane %v3626_v58, 4  ;;  %v3633_v6 = vrot.slane %v2798_v40, 5  ;;  %v2807_v25 = vld [vmem:[#allocation2 + $0xb8] sm:$0xf]  ;;  %v422_v57 = vld [vmem:[%s7401_s8 + $0xf0] sm:$0xff] }
  0xd8   : > { %v1382_v39 = vsel %vm7456_vm13, %v1377_v54, %v1381_v18  ;;  %v3623_v23 = vsel %vm7759_vm2, %v3621_v20, %v3622_v29  ;;  %v3636_v9 = vrot.slane %v2799_v28, 5  ;;  %v6220_v18 = vrot.slane %v3502_v11, 9  ;;  %v330_v47 = vld [vmem:[#allocation2 + $0xc0] sm:$0x1]  ;;  %v3503_v40 = vld [vmem:[#allocation2 + $0xa8] sm:$0xe] }
  0xd9   : > { %v1392_v14 = vsel %vm7456_vm13, %v1387_v12, %v1391_v24  ;;  %v6234_v62 = vcombine.low %v3620_v55, %v3623_v23  ;;  %v3630_v45 = vsel %vm7759_vm2, %v3628_v60, %v3629_v10  ;;  %v3635_v36 = vrot.slane %v3633_v6, 4  ;;  %v386_v12 = vld [vmem:[#allocation2 + $0xc8] sm:$0x1]  ;;  %v7242_v43 = vld [vmem:[#allocation2 + $0xc] sm:$0xf]  ;;  %v423_v58 = vld [vmem:[%s7401_s8 + $0xf8] sm:$0xff]  ;;  %s268_s8 = scalar_lea.vmem %s9319_s6, %s9401_s2 }
  0xda   : > { %v6044_v46 = vcombine.low %v1382_v39, %v1392_v14  ;;  %v6235_v24 = vcombine.low %v3627_v21, %v3630_v45  ;;  %v3640_v4 = vrot.slane %v2801_v19, 5  ;;  %v3643_v31 = vrot.slane %v2802_v16, 5  ;;  %v8111_v29 = vld [vmem:[#allocation2 + $0x10] sm:$0xf]  ;;  %v7244_v10 = vld [vmem:[%s9314_s1 + $0x4] sm:$0x3] }
  0xdb   : > { %6814 = vmatmul.mubr.msk.bf16.gmra.mrb[16].mxu0 %vm1443_vm12, %v6234_v62  ;;  %v3634_v26 = vsel %vm7759_vm2, %v6219_v30, %v3633_v6  ;;  %v3637_v53 = vsel %vm7759_vm2, %v3635_v36, %v3636_v9  ;;  %v3647_v54 = vrot.slane %v2804_v38, 5  ;;  %v6062_v28 = vcombine.low %v7242_v43, %v8111_v29  ;;  %v7245_v39 = vld [vmem:[#allocation2 + $0x18] sm:$0xf]  ;;  %v8122_v14 = vld [vmem:[#allocation2 + $0x1c] sm:$0xf] }
  0xdc   : > { %6656 = vmatmul.mubr.msk.bf16.gmra.mrb[28].mxu1 %vm1443_vm12, %v6044_v46  ;;  %6817 = vmatprep.mubr.msk.bf16.mxu0 %vm1443_vm12, %v6235_v24  ;;  %v3642_v50 = vrot.slane %v3640_v4, 4  ;;  %v3641_v41 = vsel %vm7759_vm2, %v6220_v18, %v3640_v4  ;;  %v2211_v8 = vsel %vm1492_vm0, %v7244_v10, 0  ;;  %v6063_v55 = vcombine.low %v7245_v39, %v8122_v14  ;;  %v2808_v11 = vld [vmem:[#allocation2 + $0xbc] sm:$0x1]  ;;  %v3504_v46 = vld [vmem:[#allocation2 + $0xb4] sm:$0xe] }
  0xdd   : > { %6661 = vmatprep.mubr.msk.bf16.mxu1 %vm1443_vm12, %v6061_v56  ;;  %v2805_v56 = vld [vmem:[#allocation2 + $0xb0] sm:$0x1]  ;;  %v3654_v21 = vrot.slane %v2807_v25, 5  ;;  %v6236_v60 = vcombine.low %v3634_v26, %v3637_v53  ;;  %v6221_v19 = vrot.slane %v3503_v40, 9  ;;  %v331_v23 = vsel %vm7371_vm5, 0, %v330_v47 }
  0xde   : > { %v3644_v20 = vsel %vm7759_vm2, %v3642_v50, %v3643_v31  ;;  %v387_v30 = vsel %vm7379_vm6, 0, %v386_v12  ;;  %v3649_v9 = vrot.slane %v3647_v54, 4  ;;  %v3650_v16 = vrot.slane %v2805_v56, 5  ;;  %332 = vst [vmem:[#allocation2 + $0xc0] sm:$0x1] %v331_v23 }
  0xdf   : > { %v6237_v6 = vcombine.low %v3641_v41, %v3644_v20  ;;  %388 = vst [vmem:[#allocation2 + $0xc8] sm:$0x1] %v387_v30  ;;  %v6438_v62 = vpack.c.bf16 %v422_v57, %v422_v57  ;;  %v8134_v45 = vld [vmem:[%s9314_s1 + $0x6] sm:$0x3]  ;;  %v6222_v18 = vrot.slane %v3504_v46, 9  ;;  %v3656_v38 = vrot.slane %v3654_v21, 4 }
  0xe0   : > { %v3657_v24 = vrot.slane %v2808_v11, 5  ;;  %v6439_v36 = vpack.c.bf16 %v423_v58, %v423_v58  ;;  %v3648_v26 = vsel %vm7759_vm2, %v6221_v19, %v3647_v54  ;;  %v3651_v53 = vsel %vm7759_vm2, %v3649_v9, %v3650_v16  ;;  %v8146_v40 = vld [vmem:[#allocation2 + $0x28] sm:$0xf]  ;;  %v7248_v12 = vld [vmem:[#allocation2 + $0x24] sm:$0xf] }
  0xe1   : > { %v778_v4 = vshrl.u32 %v6438_v62, 16  ;;  %v781_v31 = vshll.u32 %v6438_v62, 16  ;;  %v6064_v43 = vcombine.low %v7248_v12, %v8146_v40  ;;  %v7249_v57 = vld [vmem:[#allocation2 + $0x30] sm:$0xf]  ;;  %v8153_v58 = vld [vmem:[#allocation2 + $0x34] sm:$0xf]  ;;  %v6238_v39 = vcombine.low %v3648_v26, %v3651_v53 }
  0xe2   : > { %v786_v25 = vshrl.u32 %v6439_v36, 16  ;;  %v789_v47 = vshll.u32 %v6439_v36, 16  ;;  %v3658_v41 = vsel %vm7759_vm2, %v3656_v38, %v3657_v24  ;;  %v6065_v54 = vcombine.low %v7249_v57, %v8153_v58  ;;  %v8167_v30 = vld [vmem:[#allocation2 + $0x40] sm:$0xf]  ;;  %v8170_v9 = vld [vmem:[#allocation2 + $0x4c] sm:$0xf] }
  0xe3   : > { %6818 = vmatmul.mubr.msk.bf16.gmra.mrb[20].mxu0 %vm1443_vm12, %v6236_v60  ;;  %v780_v50 = vrot.slane %v778_v4, 7  ;;  %v6067_v16 = vcombine.low %v7253_v49, %v8170_v9  ;;  %v2009_v12 = vrot.slane %v8111_v29, 5  ;;  %v1949_v57 = vld [vmem:[#allocation2] sm:$0xe]  ;;  %v7209_v49 = vld [vmem:[#allocation2 + $0x24] sm:$0xff]   ;;  %vm5778_vm3 = vcmask 57344  }
  0xe4   : > { %6662 = vmatmul.mubr.msk.bf16.vlgmr.msra.gmra.mrb[0].mxu1 %vm1443_vm12, %v6062_v28  ;;  %6821 = vmatprep.mubr.msk.bf16.mxu0 %vm1443_vm12, %v6237_v6  ;;  %v3655_v28 = vsel %vm7759_vm2, %v6222_v18, %v3654_v21  ;;  %v788_v56 = vrot.slane %v786_v25, 7  ;;  %v6066_v6 = vcombine.low %v7251_v42, %v8167_v30  ;;  %v333_v18 = vld [vmem:[#allocation2 + $0xcc] sm:$0x1]  ;;  %v3038_v25 = vshll.u32 %v8078_v59, 16  ;;  %v7260_v42 = vld [vmem:[#allocation2 + $0x14] sm:$0x1] }
  0xe5   : > { %6694 = vmatpush3.bf16.msra.mxu1 %v2211_v8  ;;  %6665 = vmatprep.mubr.msk.bf16.mxu1 %vm1443_vm12, %v6063_v55  ;;  %v783_v10 = vor.u32 %v781_v31, %v780_v50  ;;  %v784_v8 = vrot.slane %v780_v50, 4  ;;  %v950_v11 = vld [vmem:[#allocation2 + $0xc0] sm:$0xf]  ;;  %v6239_v60 = vcombine.low %v3655_v28, %v3658_v41  ;;  %v334_v50 = vsel %vm7371_vm5, 0, %v333_v18  ;;  %v8182_v28 = vld [vmem:[#allocation2 + $0x58] sm:$0xf] }
  0xe6   : > { %7192 = vmatprep.subr.msk.bf16.mxu1 %vm1492_vm0, %v8134_v45  ;;  %v791_v55 = vor.u32 %v789_v47, %v788_v56  ;;  %v793_v20 = vrot.slane %v788_v56, 4  ;;  %v954_v46 = vld [vmem:[#allocation2 + $0xc8] sm:$0x1]  ;;  %v3042_v47 = vshrl.u32 %v8078_v59, 16  ;;  %v7208_v56 = vld [vmem:[#allocation2 + $0x18] sm:$0xff]  }
  0xe7   : > { %v951_v21 = vsel %vm7423_vm9, %v783_v10, %v950_v11  ;;  %335 = vst [vmem:[#allocation2 + $0xcc] sm:$0x1] %v334_v50  ;;  %v8187_v10 = vld [vmem:[#allocation2 + $0x64] sm:$0xf]  ;;  %v1953_v50 = vld [vmem:[#allocation2 + $0x30] sm:$0xe] }
  0xe8   : > { %v792_v19 = vsel %vm7430_vm10, %v784_v8, %v791_v55  ;;  %952 = vst [vmem:[#allocation2 + $0xc0] sm:$0xf] %v951_v21  ;;  %v955_v23 = vsel %vm7371_vm5, %v793_v20, %v954_v46  ;;  %v2002_v55 = vrot.slane %v8088_v52, 5  ;;  %v8192_v20 = vrot.slane %v3038_v25, 5  ;;  %v1951_v46 = vld [vmem:[#allocation2 + $0x18] sm:$0xe] }
  0xe9   : > { %953 = vst.msk [vmem:[#allocation2 + $0xc4] sm:$0xf] %vm270_vm1, %v792_v19  ;;  %956 = vst [vmem:[#allocation2 + $0xc8] sm:$0x1] %v955_v23  ;;  %v3044_v11 = vrot.slane %v3042_v47, 4  ;;  %v6094_v23 = vrot.slane %v1950_v5, 9 }
  0xea   : > { %9349 = vst [vmem:[#allocation5_spill] sm:$0xff] %v8192_v20  ;;  %v7259_v21 = vld [vmem:[#allocation2 + $0x8] sm:$0x1]  ;;  %v2012_v52 = vrot.slane %v7260_v42, 5  ;;  %v4850_v25 = vsel %vm1492_vm0, %v7891_v34, 0  ;;  %vm5708_vm1 = vcmask 64512  }
  0xeb   : > { %6822 = vmatmul.mubr.msk.bf16.gmra.mrb[24].mxu0 %vm1443_vm12, %v6238_v39  ;;  %v3048_v39 = vshll.u32 %v8080_v63, 16  ;;  %v2005_v19 = vrot.slane %v7259_v21, 5  ;;  %v6093_v63 = vrot.slane %v1949_v57, 9  ;;  %v3045_v18 = vor.u32 %v3044_v11, %v8192_v20  ;;  %v1954_v34 = vld [vmem:[#allocation2 + $0x3c] sm:$0xe] }
  0xec   : > { %6666 = vmatmul.mubr.msk.bf16.gmra.mrb[4].mxu1 %vm1443_vm12, %v6064_v43  ;;  %6825 = vmatprep.mubr.msk.bf16.mxu0 %vm1443_vm12, %v6239_v60  ;;  %v7255_v43 = vld [vmem:[#allocation2 + $0x54] sm:$0xf]  ;;  %v2016_v60 = vrot.slane %v8122_v14, 5  ;;  %v7262_v14 = vld [vmem:[#allocation2 + $0x6c] sm:$0xf] }
  0xed   : > { %6669 = vmatprep.mubr.msk.bf16.mxu1 %vm1443_vm12, %v6065_v54  ;;  %v6068_v41 = vcombine.low %v7255_v43, %v8182_v28  ;;  %v7257_v54 = vld [vmem:[#allocation2 + $0x60] sm:$0xf]  ;;  %v2030_v43 = vrot.slane %v8153_v58, 5  ;;  %v8215_v57 = vsel %vm7759_vm2, %v6093_v63, %v2002_v55  ;;  %v7264_v58 = vld [vmem:[#allocation2 + $0x2c] sm:$0x1]  ;;  %v6073_v63 = vcombine.low %v7974_v0, %v7965_v13  ;;  %v7213_v13 = vld [vmem:[#allocation2 + $0x54] sm:$0xff]  }
  0xee   : > { %v6069_v8 = vcombine.low %v7257_v54, %v8187_v10  ;;  %v2018_v47 = vrot.slane %v2016_v60, 4  ;;  %v8236_v11 = vld [vmem:[%s9314_s1 + $0x10] sm:$0x3]  ;;  %v1955_v0 = vld [vmem:[#allocation2 + $0x48] sm:$0xe] }
  0xef   : > { %v3505_v62 = vld [vmem:[#allocation2 + $0xc0] sm:$0xe]  ;;  %v2032_v21 = vrot.slane %v2030_v43, 4  ;;  %v7270_v42 = vld [vmem:[#allocation2 + $0x7c] sm:$0xf] }
  0xf0   : > { %v2810_v38 = vld [vmem:[#allocation2 + $0xc4] sm:$0xf]  ;;  %v2811_v24 = vld [vmem:[#allocation2 + $0xc8] sm:$0x1]  ;;  %v6223_v36 = vrot.slane %v3505_v62, 9  ;;  %v2011_v62 = vrot.slane %v2009_v12, 4 }
  0xf1   : > { %v3661_v4 = vrot.slane %v2810_v38, 5  ;;  %v3664_v31 = vrot.slane %v2811_v24, 5  ;;  %v8202_v38 = vld [vmem:[#allocation2 + $0x70] sm:$0xf] }
  0xf2   : > { %v6070_v24 = vcombine.low %v7262_v14, %v8202_v38 }
  0xf3   : > { %v3662_v26 = vsel %vm7759_vm2, %v6223_v36, %v3661_v4  ;;  %v3663_v53 = vrot.slane %v3661_v4, 4  ;;  %v6095_v36 = vrot.slane %v1951_v46, 9  ;;  %v1952_v4 = vld [vmem:[#allocation2 + $0x24] sm:$0xe] }
  0xf4   : > { %6670 = vmatmul.mubr.msk.bf16.gmra.mrb[8].mxu1 %vm1443_vm12, %v6066_v6  ;;  %v8199_v6 = vrot.slane %v3048_v39, 5 }
  0xf5   : > { %6673 = vmatprep.mubr.msk.bf16.mxu1 %vm1443_vm12, %v6067_v16  ;;  %v3665_v59 = vsel %vm7759_vm2, %v3663_v53, %v3664_v31  ;;  %v2004_v16 = vrot.slane %v2002_v55, 4  ;;  %v2023_v31 = vrot.slane %v8146_v40, 5  ;;  %v8219_v40 = vsel %vm7759_vm2, %v6094_v23, %v2009_v12 }
  0xf6   : > { %v6240_v29 = vcombine.low %v3662_v26, %v3665_v59  ;;  %9350 = vst [vmem:[#allocation6_spill] sm:$0xff] %v8199_v6  ;;  %v7263_v26 = vld [vmem:[#allocation2 + $0x20] sm:$0x1]  ;;  %v7210_v59 = vld [vmem:[#allocation2 + $0x30] sm:$0xff]   ;;  %v8231_v5 = vsel %vm7759_vm2, %v6095_v36, %v2016_v60  ;;  %v6097_v12 = vrot.slane %v1953_v50, 9  ;;  %v6098_v60 = vrot.slane %v1954_v34, 9 }
  0xf7   : > { %v2019_v53 = vrot.slane %v7263_v26, 5  ;;  %v8223_v54 = vsel %vm7759_vm2, %v2004_v16, %v2005_v19  ;;  %v2025_v39 = vrot.slane %v2023_v31, 4  ;;  %v2037_v19 = vrot.slane %v8167_v30, 5  ;;  %v4325_v16 = vld [vmem:[#allocation2 + $0x30] sm:$0xf] }
  0xf8   : > { %6826 = vmatmul.mubr.msk.bf16.gmra.mrb[28].mxu0 %vm1443_vm12, %v6240_v29  ;;  %v7265_v29 = vld [vmem:[#allocation2 + $0x38] sm:$0x1]  ;;  %v6074_v23 = vcombine.low %v8008_v37, %v8003_v48  ;;  %v8272_v14 = vsel %vm7759_vm2, %v6097_v12, %v2030_v43  ;;  %v1956_v43 = vld [vmem:[#allocation2 + $0x54] sm:$0xe]  ;;  %v6099_v34 = vrot.slane %v1955_v0, 9  ;;  %v2051_v12 = vrot.slane %v8182_v28, 5 }
  0xf9   : > { %6831 = vmatprep.mubr.msk.bf16.mxu0 %vm1443_vm12, %v7208_v56  ;;  %v6072_v56 = vcombine.low %v7935_v1, %v7937_v2  ;;  %v2033_v55 = vrot.slane %v7265_v29, 5  ;;  %v8242_v46 = vsel %vm7759_vm2, %v2018_v47, %v2019_v53  ;;  %v7212_v47 = vld [vmem:[#allocation2 + $0x48] sm:$0xff]   ;;  %v2039_v50 = vrot.slane %v2037_v19, 4  ;;  %v7271_v37 = vld [vmem:[#allocation2 + $0x74] sm:$0x1] }
  0xfa   : > { %v4323_v29 = vld [vmem:[#allocation2 + $0x28] sm:$0xf]  ;;  %v6100_v0 = vrot.slane %v1956_v43, 9  ;;  %v2053_v2 = vrot.slane %v2051_v12, 4 }
  0xfb   : > { %v8280_v53 = vsel %vm7759_vm2, %v2032_v21, %v2033_v55 }
  0xfc   : > { %6674 = vmatmul.mubr.msk.bf16.gmra.mrb[12].mxu1 %vm1443_vm12, %v6068_v41  ;;  %v6071_v41 = vcombine.low %v7905_v22, %v7911_v32  ;;  %v8227_v22 = vsel %vm7759_vm2, %v2011_v62, %v2012_v52  ;;  %v6096_v32 = vrot.slane %v1952_v4, 9  ;;  %v2044_v52 = vrot.slane %v8170_v9, 5  ;;  %v7211_v62 = vld [vmem:[#allocation2 + $0x3c] sm:$0xff]   ;;  %v4319_v4 = vld [vmem:[#allocation2 + $0x18] sm:$0xf] }
  0xfd   : > { %6677 = vmatprep.mubr.msk.bf16.mxu1 %vm1443_vm12, %v6069_v8  ;;  %v2026_v8 = vrot.slane %v7264_v58, 5 }
  0xff   : > { %v8276_v26 = vsel %vm7759_vm2, %v2025_v39, %v2026_v8  ;;  %v4368_v8 = vshrl.u32 %v4319_v4, 16  ;;  %v4371_v39 = vshll.u32 %v4319_v4, 16  ;;  %v1957_v4 = vld [vmem:[#allocation2 + $0x60] sm:$0xe] }
 0x100   : > { %6832 = vmatmul.mubr.msk.bf16.vlgmr.msra.gmra.mrb[0].mxu0 %vm1443_vm12, %v7209_v49  ;;  %v8253_v49 = vrot.slane %v3045_v18, 4  ;;  %v8268_v18 = vsel %vm7759_vm2, %v6096_v32, %v2023_v31  ;;  %v8284_v31 = vsel %vm7759_vm2, %v6098_v60, %v2037_v19  ;;  %v7267_v32 = vld [vmem:[#allocation2 + $0x50] sm:$0x1]  ;;  %v6101_v21 = vrot.slane %v1957_v4, 9 }
 0x101   : > { %6864 = vmatpush3.bf16.msra.mxu0 %v4850_v25  ;;  %6835 = vmatprep.mubr.msk.bf16.mxu0 %vm1443_vm12, %v7210_v59  ;;  %v4320_v25 = vld [vmem:[#allocation2 + $0x1c] sm:$0xf]  ;;  %v2046_v59 = vrot.slane %v2044_v52, 4  ;;  %v2047_v58 = vrot.slane %v7267_v32, 5  ;;  %v4405_v32 = vshrl.u32 %v4323_v29, 16  ;;  %v4373_v43 = vrot.slane %v4371_v39, 5 }
 0x102   : > { %9351 = vst [vmem:[#allocation7_spill] sm:$0xff] %v8253_v49  ;;  %7198 = vmatprep.subr.msk.bf16.mxu0 %vm1492_vm0, %v8236_v11  ;;  %v4381_v9 = vshrl.u32 %v4320_v25, 16 }
 0x103   : > { %v8308_v1 = vsel %vm7759_vm2, %v2046_v59, %v2047_v58  ;;  %v8318_v59 = vsel %vm7759_vm2, %v6100_v0, %v2051_v12  ;;  %v2058_v58 = vrot.slane %v8187_v10, 5  ;;  %v4407_v39 = vrot.slane %v4405_v32, 4 }
 0x104   : > { %6678 = vmatmul.mubr.msk.bf16.gmra.mrb[16].mxu1 %vm1443_vm12, %v6070_v24  ;;  %v7266_v24 = vld [vmem:[#allocation2 + $0x44] sm:$0x1] }
 0x105   : > { %6681 = vmatprep.mubr.msk.bf16.mxu1 %vm1443_vm12, %v6071_v41  ;;  %v2040_v36 = vrot.slane %v7266_v24, 5  ;;  %v4322_v41 = vld [vmem:[#allocation2 + $0x24] sm:$0xf]  ;;  %v4377_v24 = vshll.u32 %v4320_v25, 16  ;;  %v4401_v25 = vshll.u32 %v4323_v29, 16  ;;  %v8334_v32 = vsel %vm7759_vm2, %v6101_v21, %v2058_v58 }
 0x106   : > { %v4392_v60 = vshrl.u32 %v4322_v41, 16  ;;  %v4395_v19 = vshll.u32 %v4322_v41, 16  ;;  %v8304_v41 = vsel %vm7759_vm2, %v6099_v34, %v2044_v52  ;;  %v4321_v52 = vld [vmem:[#allocation2 + $0x20] sm:$0x1]  ;;  %v9353_v21 = vcombine.low %v8040_v35, %v8050_v51 }
 0x107   : > { %v8298_v28 = vsel %vm7759_vm2, %v2039_v50, %v2040_v36  ;;  %v8310_v36 = vld [vmem:[#allocation2 + $0x6c] sm:$0xe]  ;;  %v4370_v50 = vrot.slane %v4368_v8, 4  ;;  %v8312_v29 = vrot.slane %v4377_v24, 5  ;;  %v8321_v8 = vrot.slane %v4401_v25, 5  ;;  %v7214_v24 = vld [vmem:[#allocation2 + $0x60] sm:$0xff]  }
 0x108   : > { %6836 = vmatmul.mubr.msk.bf16.gmra.mrb[4].mxu0 %vm1443_vm12, %v7211_v62  ;;  %v4394_v34 = vrot.slane %v4392_v60, 4  ;;  %v4397_v55 = vrot.slane %v4395_v19, 5  ;;  %v6102_v60 = vrot.slane %v8310_v36, 9  ;;  %v2065_v19 = vrot.slane %v8202_v38, 5 }
 0x109   : > { %6839 = vmatprep.mubr.msk.bf16.mxu0 %vm1443_vm12, %v7212_v47  ;;  %v7269_v47 = vld [vmem:[#allocation2 + $0x68] sm:$0x1]  ;;  %v4374_v10 = vor.u32 %v4373_v43, %v4370_v50  ;;  %v4387_v25 = vshll.u32 %v4321_v52, 16  ;;  %v2072_v36 = vrot.slane %v7270_v42, 5  ;;  %v2060_v38 = vrot.slane %v2058_v58, 4 }
 0x10a   : > { %v2061_v4 = vrot.slane %v7269_v47, 5  ;;  %v1959_v47 = vld [vmem:[#allocation2 + $0x78] sm:$0xe]  ;;  %v4419_v50 = vshll.u32 %v4325_v16, 16  ;;  %v2067_v48 = vrot.slane %v2065_v19, 4 }
 0x10b   : > { %v8349_v58 = vld [vmem:[#allocation2 + $0x34] sm:$0xf] }
 0x10c   : > { %6682 = vmatmul.mubr.msk.bf16.gmra.mrb[20].mxu1 %vm1443_vm12, %v6072_v56  ;;  %v7268_v56 = vld [vmem:[#allocation2 + $0x5c] sm:$0x1]  ;;  %9354 = vst [vmem:[#allocation9_spill] sm:$0xff] %v8349_v58  ;;  %v4421_v6 = vrot.slane %v4419_v50, 5 }
 0x10d   : > { %6685 = vmatprep.mubr.msk.bf16.mxu1 %vm1443_vm12, %v6073_v63  ;;  %v2054_v62 = vrot.slane %v7268_v56, 5  ;;  %v4383_v63 = vrot.slane %v4381_v9, 4  ;;  %v4324_v56 = vld [vmem:[#allocation2 + $0x2c] sm:$0x1]  ;;  %v4398_v9 = vor.u32 %v4397_v55, %v4394_v34  ;;  %v1960_v55 = vld [vmem:[#allocation2 + $0x84] sm:$0xe] }
 0x10e   : > { %v4411_v30 = vshll.u32 %v4324_v56, 16  ;;  %v4389_v34 = vrot.slane %v4387_v25, 5  ;;  %v6104_v42 = vrot.slane %v1960_v55, 9  ;;  %v4328_v50 = vld [vmem:[#allocation2 + $0x3c] sm:$0xf] }
 0x10f   : > { %v8329_v12 = vsel %vm7759_vm2, %v2053_v2, %v2054_v62  ;;  %v4384_v0 = vor.u32 %v4383_v63, %v8312_v29  ;;  %v4408_v2 = vor.u32 %v4407_v39, %v8321_v8  ;;  %v4416_v62 = vshrl.u32 %v4325_v16, 16 }
 0x110   : > { %9352 = vst [vmem:[#allocation8_spill] sm:$0xff] %v8329_v12  ;;  %6840 = vmatmul.mubr.msk.bf16.gmra.mrb[8].mxu0 %vm1443_vm12, %v7213_v13  ;;  %v7272_v13 = vld [vmem:[#allocation2 + $0x88] sm:$0xf]  ;;  %v4375_v63 = vrot.slane %v4374_v10, 4  ;;  %v6103_v16 = vrot.slane %v1959_v47, 9  ;;  %v4399_v35 = vrot.slane %v4398_v9, 4  ;;  %v8355_v9 = vsel %vm7759_vm2, %v2060_v38, %v2061_v4 }
 0x111   : > { %6843 = vmatprep.mubr.msk.bf16.mxu0 %vm1443_vm12, %v7214_v24  ;;  %v2079_v43 = vrot.slane %v7272_v13, 5  ;;  %v4385_v52 = vrot.slane %v4384_v0, 4  ;;  %v4413_v56 = vrot.slane %v4411_v30, 5  ;;  %v2074_v39 = vrot.slane %v2072_v36, 4  ;;  %v7274_v12 = vld [vmem:[#allocation2 + $0x8c] sm:$0x1] }
 0x112   : > { %v4409_v20 = vrot.slane %v4408_v2, 4  ;;  %v4418_v49 = vrot.slane %v4416_v62, 4  ;;  %v2082_v13 = vrot.slane %v7274_v12, 5  ;;  %v4425_v10 = vshll.u32 %v8349_v58, 16  ;;  %v8368_v47 = vld [vmem:[#allocation2 + $0x38] sm:$0x1] }
 0x113   : > { %v2081_v7 = vrot.slane %v2079_v43, 4  ;;  %v4429_v0 = vshrl.u32 %v8349_v58, 16  ;;  %v8359_v30 = vsel %vm7759_vm2, %v6102_v60, %v2065_v19  ;;  %v4380_v12 = vsel %vm7456_vm13, %v4375_v63, %v8312_v29  ;;  %9355 = vst [vmem:[#allocation10_spill] sm:$0xff] %v8368_v47 }
 0x114   : > { %6686 = vmatmul.mubr.msk.bf16.gmra.mrb[24].mxu1 %vm1443_vm12, %v6074_v23  ;;  %v2068_v23 = vrot.slane %v7271_v37, 5  ;;  %v7216_v37 = vld [vmem:[#allocation2 + $0x78] sm:$0xff]   ;;  %v4390_v2 = vsel %vm7456_vm13, %v4385_v52, %v4389_v34  ;;  %v4404_v4 = vsel %vm7456_vm13, %v4399_v35, %v8321_v8  ;;  %v8377_v60 = vsel %vm7759_vm2, %v6103_v16, %v2072_v36  ;;  %v8424_v52 = vld [vmem:[#allocation2 + $0x4c] sm:$0xf]  ;;  %v4334_v34 = vld [vmem:[#allocation2 + $0x54] sm:$0xf] }
 0x115   : > { %6689 = vmatprep.mubr.msk.bf16.mxu1 %vm1443_vm12, %v9353_v21  ;;  %v7273_v21 = vld [vmem:[#allocation2 + $0x80] sm:$0x1]  ;;  %v9356_v29 = vcombine.low %v8060_v17, %v8064_v15  ;;  %v2569_v38 = vsel %vm1492_vm0, %v8134_v45, 0  ;;  %v4414_v8 = vsel %vm7456_vm13, %v4409_v20, %v4413_v56  ;;  %v8394_v36 = vsel %vm7759_vm2, %v6104_v42, %v2079_v43  ;;  %v7217_v16 = vld [vmem:[#allocation2 + $0x84] sm:$0xff]  }
 0x116   : > { %v2075_v24 = vrot.slane %v7273_v21, 5  ;;  %v8363_v25 = vsel %vm7759_vm2, %v2067_v48, %v2068_v23  ;;  %v4422_v62 = vor.u32 %v4421_v6, %v4418_v49  ;;  %v9357_v48 = vcombine.low %v8215_v57, %v8223_v54  ;;  %v8408_v42 = vld [vmem:[#allocation2 + $0x40] sm:$0xf]  ;;  %v8432_v21 = vld [vmem:[#allocation2 + $0x58] sm:$0xf] }
 0x117   : > { %v8405_v17 = vrot.slane %v4425_v10, 5  ;;  %v4431_v45 = vrot.slane %v4429_v0, 4  ;;  %v4435_v20 = vshll.u32 %v8368_v47, 16  ;;  %9358 = vst [vmem:[#allocation11_spill] sm:$0xff] %v8408_v42  ;;  %v8414_v54 = vcombine.low %v4380_v12, %v4390_v2  ;;  %9359 = vst [vmem:[#allocation12_spill] sm:$0xff] %v8432_v21 }
 0x118   : > { %v8381_v19 = vsel %vm7759_vm2, %v2074_v39, %v2075_v24  ;;  %6844 = vmatmul.mubr.msk.bf16.gmra.mrb[12].mxu0 %vm1443_vm12, %v7215_v3  ;;  %v8403_v3 = vsel %vm7759_vm2, %v2081_v7, %v2082_v13  ;;  %v8418_v49 = vsel %vm1492_vm0, %v8236_v11, 0  ;;  %v4331_v7 = vld [vmem:[#allocation2 + $0x48] sm:$0xf]  ;;  %v8420_v23 = vcombine.low %v4404_v4, %v4414_v8  ;;  %v7218_v24 = vld [vmem:[#allocation2 + $0x90] sm:$0xff]   ;;  %v8437_v10 = vld [vmem:[#allocation2 + $0x44] sm:$0x1] }
 0x119   : > { %6847 = vmatprep.mubr.msk.bf16.mxu0 %vm1443_vm12, %v7216_v37  ;;  %v4440_v43 = vshrl.u32 %v4328_v50, 16  ;;  %v4443_v63 = vshll.u32 %v4328_v50, 16  ;;  %v8428_v56 = vrot.slane %v4422_v62, 4  ;;  %v4449_v11 = vshll.u32 %v8408_v42, 16  ;;  %9360 = vst [vmem:[#allocation13_spill] sm:$0xff] %v8437_v10 }
 0x11a   : > { %v4453_v39 = vshrl.u32 %v8408_v42, 16  ;;  %v4432_v37 = vor.u32 %v4431_v45, %v8405_v17  ;;  %v8435_v13 = vrot.slane %v4435_v20, 5  ;;  %v4464_v0 = vshrl.u32 %v4331_v7, 16  ;;  %v1961_v2 = vld [vmem:[#allocation2 + $0x90] sm:$0xe] }
 0x11b   : > { %v4467_v12 = vshll.u32 %v4331_v7, 16  ;;  %v4473_v4 = vshll.u32 %v8424_v52, 16  ;;  %v4488_v8 = vshrl.u32 %v4334_v34, 16  ;;  %v4491_v62 = vshll.u32 %v4334_v34, 16  ;;  %v7275_v6 = vld [vmem:[#allocation2 + $0x94] sm:$0xf] }
 0x11c   : > { %6690 = vmatmul.mubr.msk.bf16.gmra.mrb[28].mxu1 %vm1443_vm12, %v9356_v29  ;;  %v4477_v29 = vshrl.u32 %v8424_v52, 16  ;;  %v4442_v50 = vrot.slane %v4440_v43, 4  ;;  %v4497_v35 = vshll.u32 %v8432_v21, 16  ;;  %v4501_v55 = vshrl.u32 %v8432_v21, 16 }
 0x11d   : > { %6695 = vmatprep.mubr.msk.bf16.mxu1 %vm1443_vm12, %v9357_v48  ;;  %v4445_v48 = vrot.slane %v4443_v63, 5  ;;  %v9361_v45 = vcombine.low %v8219_v40, %v8227_v22  ;;  %v8448_v20 = vrot.slane %v4449_v11, 5  ;;  %v4455_v7 = vrot.slane %v4453_v39, 4 }
 0x11e   : > { %v4459_v57 = vshll.u32 %v8437_v10, 16  ;;  %v2086_v34 = vrot.slane %v7275_v6, 5  ;;  %v9362_v43 = vcombine.low %v8231_v5, %v8242_v46  ;;  %v4433_v63 = vrot.slane %v4432_v37, 4  ;;  %v1962_v6 = vld [vmem:[#allocation2 + $0x9c] sm:$0xe] }
 0x11f   : > { %v6105_v42 = vrot.slane %v1961_v2, 9  ;;  %v4466_v40 = vrot.slane %v4464_v0, 4  ;;  %v4469_v22 = vrot.slane %v4467_v12, 5  ;;  %v8458_v11 = vrot.slane %v4473_v4, 5  ;;  %v7219_v0 = vld [vmem:[#allocation2 + $0x9c] sm:$0xff]  }
 0x120   : > { %6848 = vmatmul.mubr.msk.bf16.gmra.mrb[16].mxu0 %vm1443_vm12, %v7217_v16  ;;  %v8456_v16 = vld [vmem:[#allocation2 + $0x50] sm:$0x1]  ;;  %v4479_v39 = vrot.slane %v4477_v29, 4  ;;  %v4493_v10 = vrot.slane %v4491_v62, 5  ;;  %v4428_v5 = vsel %vm7456_vm13, %v8428_v56, %v8405_v17  ;;  %v4446_v46 = vor.u32 %v4445_v48, %v4442_v50  ;;  %v7277_v29 = vld [vmem:[#allocation2 + $0x98] sm:$0x1] }
 0x121   : > { %6851 = vmatprep.mubr.msk.bf16.mxu0 %vm1443_vm12, %v7218_v24  ;;  %v8468_v24 = vrot.slane %v4497_v35, 5  ;;  %v4503_v37 = vrot.slane %v4501_v55, 4  ;;  %v4456_v12 = vor.u32 %v4455_v7, %v8448_v20  ;;  %v8471_v2 = vrot.slane %v4459_v57, 5  ;;  %v8473_v62 = vld [vmem:[#allocation2 + $0x5c] sm:$0x1] }
 0x122   : > { %v2088_v4 = vrot.slane %v2086_v34, 4  ;;  %v4438_v17 = vsel %vm7456_vm13, %v4433_v63, %v8435_v13  ;;  %v7278_v56 = vld [vmem:[#allocation2 + $0xa0] sm:$0xf]  ;;  %v4470_v35 = vor.u32 %v4469_v22, %v4466_v40  ;;  %v4483_v55 = vshll.u32 %v8456_v16, 16 }
 0x123   : > { %v2093_v50 = vrot.slane %v7278_v56, 5  ;;  %v8481_v48 = vsel %vm7759_vm2, %v6105_v42, %v2086_v34  ;;  %v4480_v57 = vor.u32 %v4479_v39, %v8458_v11  ;;  %v4447_v47 = vrot.slane %v4446_v46, 4  ;;  %v4337_v22 = vld [vmem:[#allocation2 + $0x60] sm:$0xf] }
 0x124   : > { %6696 = vmatmul.mubr.msk.bf16.vlgmr.msra.gmra.mrb[0].mxu1 %vm1443_vm12, %v9361_v45  ;;  %v4490_v45 = vrot.slane %v4488_v8, 4  ;;  %v2089_v8 = vrot.slane %v7277_v29, 5  ;;  %v2100_v29 = vrot.slane %v8050_v51, 5  ;;  %v6106_v58 = vrot.slane %v1962_v6, 9  ;;  %v7279_v51 = vld [vmem:[#allocation2 + $0xa4] sm:$0x1] }
 0x125   : > { %6728 = vmatpush3.bf16.msra.mxu1 %v2569_v38  ;;  %6699 = vmatprep.mubr.msk.bf16.mxu1 %vm1443_vm12, %v9362_v43  ;;  %v7276_v38 = vld [vmem:[%s9314_s1 + $0x8] sm:$0x3]  ;;  %v4504_v21 = vor.u32 %v4503_v37, %v8468_v24  ;;  %v4507_v13 = vshll.u32 %v8473_v62, 16  ;;  %v9363_v63 = vcombine.low %v8268_v18, %v8276_v26  ;;  %v8492_v42 = vcombine.low %v4428_v5, %v4438_v17 }
 0x126   : > { %7194 = vmatprep.subr.msk.bf16.mxu1 %vm1492_vm0, %v7276_v38  ;;  %v7220_v43 = vld [vmem:[#allocation2 + $0xa8] sm:$0xff]   ;;  %v4494_v7 = vor.u32 %v4493_v10, %v4490_v45  ;;  %v4457_v34 = vrot.slane %v4456_v12, 4  ;;  %v8496_v10 = vsel %vm7759_vm2, %v2088_v4, %v2089_v8  ;;  %v2096_v40 = vrot.slane %v7279_v51, 5  ;;  %v1964_v12 = vld [vmem:[#allocation2 + $0xb4] sm:$0xe] }
 0x127   : > { %v1963_v38 = vld [vmem:[#allocation2 + $0xa8] sm:$0xe]  ;;  %v9364_v39 = vcombine.low %v8272_v14, %v8280_v53  ;;  %v2095_v18 = vrot.slane %v2093_v50, 4  ;;  %v4471_v26 = vrot.slane %v4470_v35, 4  ;;  %v4485_v45 = vrot.slane %v4483_v55, 5  ;;  %v7221_v14 = vld [vmem:[#allocation2 + $0xb4] sm:$0xff]  }
 0x128   : > { %6852 = vmatmul.mubr.msk.bf16.gmra.mrb[20].mxu0 %vm1443_vm12, %v7219_v0  ;;  %v6107_v5 = vrot.slane %v1963_v38, 9  ;;  %v4481_v46 = vrot.slane %v4480_v57, 4  ;;  %v4495_v6 = vrot.slane %v4494_v7, 4  ;;  %v2102_v37 = vrot.slane %v2100_v29, 4  ;;  %v7222_v55 = vld [vmem:[#allocation2 + $0xc0] sm:$0xff]  }
 0x129   : > { %6855 = vmatprep.mubr.msk.bf16.mxu0 %vm1443_vm12, %v7220_v43  ;;  %v2103_v0 = vrot.slane %v8052_v61, 5  ;;  %v4505_v4 = vrot.slane %v4504_v21, 4  ;;  %v4509_v8 = vrot.slane %v4507_v13, 5  ;;  %v2107_v17 = vrot.slane %v8064_v15, 5  ;;  %v8515_v61 = vld [vmem:[#allocation2 + $0x64] sm:$0xf] }
 0x12a   : > { %v4512_v56 = vshrl.u32 %v4337_v22, 16  ;;  %v4452_v53 = vsel %vm7456_vm13, %v4447_v47, %v8448_v20  ;;  %v4462_v43 = vsel %vm7456_vm13, %v4457_v34, %v8471_v2  ;;  %v8513_v35 = vsel %vm7759_vm2, %v6106_v58, %v2093_v50  ;;  %v8528_v57 = vld [vmem:[#allocation2 + $0x68] sm:$0x1]  ;;  %v4340_v58 = vld [vmem:[#allocation2 + $0x6c] sm:$0xf] }
 0x12b   : > { %v4515_v21 = vshll.u32 %v4337_v22, 16  ;;  %v8519_v15 = vsel %vm7759_vm2, %v2095_v18, %v2096_v40  ;;  %v4476_v47 = vsel %vm7456_vm13, %v4471_v26, %v8458_v11  ;;  %v8526_v20 = vsel %vm7759_vm2, %v6107_v5, %v2100_v29  ;;  %9365 = vst [vmem:[#allocation14_spill] sm:$0xff] %v8528_v57  ;;  %v8540_v13 = vld [vmem:[#allocation2 + $0x70] sm:$0xf] }
 0x12c   : > { %6700 = vmatmul.mubr.msk.bf16.gmra.mrb[4].mxu1 %vm1443_vm12, %v9363_v63  ;;  %v6108_v2 = vrot.slane %v1964_v12, 9  ;;  %v4486_v50 = vsel %vm7456_vm13, %v4481_v46, %v4485_v45  ;;  %v4500_v7 = vsel %vm7456_vm13, %v4495_v6, %v8468_v24  ;;  %v8537_v38 = vsel %vm7759_vm2, %v2102_v37, %v2103_v0  ;;  %9366 = vst [vmem:[#allocation15_spill] sm:$0xff] %v8540_v13  ;;  %v4343_v37 = vld [vmem:[#allocation2 + $0x78] sm:$0xf] }
 0x12d   : > { %6703 = vmatprep.mubr.msk.bf16.mxu1 %vm1443_vm12, %v9364_v39  ;;  %v2110_v11 = vrot.slane %v8066_v44, 5  ;;  %v4510_v29 = vsel %vm7456_vm13, %v4505_v4, %v4509_v8  ;;  %v2109_v63 = vrot.slane %v2107_v17, 4  ;;  %v4514_v34 = vrot.slane %v4512_v56, 4  ;;  %v8583_v56 = vld [vmem:[#allocation2 + $0x7c] sm:$0xf] }
 0x12e   : > { %v4521_v51 = vshll.u32 %v8515_v61, 16  ;;  %v9367_v40 = vcombine.low %v8284_v31, %v8298_v28  ;;  %v4517_v24 = vrot.slane %v4515_v21, 5  ;;  %v4525_v22 = vshrl.u32 %v8515_v61, 16  ;;  %9370 = vst [vmem:[#allocation17_spill] sm:$0xff] %v8583_v56 }
 0x12f   : > { %v4531_v44 = vshll.u32 %v8528_v57, 16  ;;  %v4536_v39 = vshrl.u32 %v4340_v58, 16  ;;  %v9368_v18 = vcombine.low %v8304_v41, %v8308_v1  ;;  %v8557_v26 = vcombine.low %v4452_v53, %v4462_v43  ;;  %v8568_v1 = vld [vmem:[#allocation2 + $0x74] sm:$0x1]  ;;  %v7223_v53 = vld [vmem:[#allocation2 + $0xcc] sm:$0xff]  }
 0x130   : > { %6856 = vmatmul.mubr.msk.bf16.gmra.mrb[24].mxu0 %vm1443_vm12, %v7221_v14  ;;  %v4539_v28 = vshll.u32 %v4340_v58, 16  ;;  %v4545_v45 = vshll.u32 %v8540_v13, 16  ;;  %v8564_v46 = vcombine.low %v4476_v47, %v4486_v50  ;;  %9369 = vst [vmem:[#allocation16_spill] sm:$0xff] %v8568_v1  ;;  %v4549_v6 = vshrl.u32 %v8540_v13, 16  ;;  %v4346_v14 = vld [vmem:[#allocation2 + $0x84] sm:$0xf] }
 0x131   : > { %6859 = vmatprep.mubr.msk.bf16.mxu0 %vm1443_vm12, %v7222_v55  ;;  %v8571_v0 = vcombine.low %v4500_v7, %v4510_v29  ;;  %v8575_v12 = vsel %vm7759_vm2, %v6108_v2, %v2107_v17  ;;  %v8579_v4 = vsel %vm7759_vm2, %v2109_v63, %v2110_v11  ;;  %v8581_v8 = vrot.slane %v4521_v51, 5  ;;  %v8587_v58 = vld [vmem:[#allocation2 + $0x88] sm:$0xf]  ;;  %v4349_v11 = vld [vmem:[#allocation2 + $0x90] sm:$0xf] }
 0x132   : > { %v4518_v43 = vor.u32 %v4517_v24, %v4514_v34  ;;  %v4527_v21 = vrot.slane %v4525_v22, 4  ;;  %v8585_v55 = vrot.slane %v4531_v44, 5  ;;  %v4538_v47 = vrot.slane %v4536_v39, 4  ;;  %9371 = vst [vmem:[#allocation18_spill] sm:$0xff] %v8587_v58  ;;  %v8594_v34 = vld [vmem:[#allocation2 + $0x94] sm:$0xf] }
 0x133   : > { %v4541_v50 = vrot.slane %v4539_v28, 5  ;;  %v8589_v17 = vrot.slane %v4545_v45, 5  ;;  %v4555_v2 = vshll.u32 %v8568_v1, 16  ;;  %v4560_v7 = vshrl.u32 %v4343_v37, 16  ;;  %9372 = vst [vmem:[#allocation19_spill] sm:$0xff] %v8594_v34 }
 0x134   : > { %6704 = vmatmul.mubr.msk.bf16.gmra.mrb[8].mxu1 %vm1443_vm12, %v9367_v40  ;;  %v4551_v29 = vrot.slane %v4549_v6, 4  ;;  %v4563_v63 = vshll.u32 %v4343_v37, 16  ;;  %v4569_v51 = vshll.u32 %v8583_v56, 16  ;;  %v4573_v40 = vshrl.u32 %v8583_v56, 16  ;;  %v8627_v56 = vld [vmem:[#allocation2 + $0x98] sm:$0x1] }
 0x135   : > { %6707 = vmatprep.mubr.msk.bf16.mxu1 %vm1443_vm12, %v9368_v18  ;;  %v4584_v24 = vshrl.u32 %v4346_v14, 16  ;;  %v4587_v22 = vshll.u32 %v4346_v14, 16  ;;  %v4593_v44 = vshll.u32 %v8587_v58, 16  ;;  %v4597_v39 = vshrl.u32 %v8587_v58, 16  ;;  %v9373_v18 = vld [vmem:[#allocation8_spill] sm:$0xff] }
 0x136   : > { %v9374_v28 = vcombine.low %v8318_v59, %v9373_v18  ;;  %v8603_v45 = vrot.slane %v4518_v43, 4  ;;  %v4528_v6 = vor.u32 %v4527_v21, %v8581_v8  ;;  %v4608_v37 = vshrl.u32 %v4349_v11, 16  ;;  %v8612_v59 = vld [vmem:[#allocation2 + $0x80] sm:$0x1] }
 0x137   : > { %v4611_v41 = vshll.u32 %v4349_v11, 16  ;;  %v9375_v14 = vcombine.low %v8334_v32, %v8355_v9  ;;  %v4542_v5 = vor.u32 %v4541_v50, %v4538_v47  ;;  %v4562_v18 = vrot.slane %v4560_v7, 4  ;;  %v4352_v32 = vld [vmem:[#allocation2 + $0x9c] sm:$0xf]  ;;  %v8619_v9 = vld [vmem:[#allocation2 + $0x8c] sm:$0x1] }
 0x138   : > { %6860 = vmatmul.mubr.msk.bf16.gmra.mrb[28].mxu0 %vm1443_vm12, %v7223_v53  ;;  %v4617_v53 = vshll.u32 %v8594_v34, 16  ;;  %v4621_v43 = vshrl.u32 %v8594_v34, 16  ;;  %v4552_v21 = vor.u32 %v4551_v29, %v8589_v17  ;;  %v8617_v11 = vrot.slane %v4569_v51, 5 }
 0x139   : > { %6865 = vmatprep.mubr.msk.bf16.mxu0 %vm1443_vm12, %v8414_v54  ;;  %v4575_v31 = vrot.slane %v4573_v40, 4  ;;  %v4589_v58 = vrot.slane %v4587_v22, 5  ;;  %v8621_v54 = vrot.slane %v4593_v44, 5  ;;  %v4599_v47 = vrot.slane %v4597_v39, 4  ;;  %v8631_v40 = vld [vmem:[#allocation2 + $0xa0] sm:$0xf] }
 0x13a   : > { %v8623_v50 = vrot.slane %v4528_v6, 4  ;;  %v8625_v7 = vrot.slane %v4555_v2, 5  ;;  %v4610_v34 = vrot.slane %v4608_v37, 4  ;;  %v4613_v29 = vrot.slane %v4611_v41, 5  ;;  %v389_v2 = vld [vmem:[#allocation2 + $0xd4] sm:$0x1] }
 0x13b   : > { %v4623_v51 = vrot.slane %v4621_v43, 4  ;;  %v4632_v1 = vshrl.u32 %v4352_v32, 16  ;;  %v4635_v13 = vshll.u32 %v4352_v32, 16  ;;  %v8635_v22 = vrot.slane %v4552_v21, 4  ;;  %v8726_v32 = vld [vmem:[#allocation2 + $0xb8] sm:$0xf] }
 0x13c   : > { %6708 = vmatmul.mubr.msk.bf16.gmra.mrb[12].mxu1 %vm1443_vm12, %v9374_v28  ;;  %v4565_v28 = vrot.slane %v4563_v63, 5  ;;  %v8629_v63 = vrot.slane %v4617_v53, 5  ;;  %v4579_v39 = vshll.u32 %v8612_v59, 16  ;;  %v4576_v6 = vor.u32 %v4575_v31, %v8617_v11  ;;  %v4355_v53 = vld [vmem:[#allocation2 + $0xa8] sm:$0xf] }
 0x13d   : > { %6711 = vmatprep.mubr.msk.bf16.mxu1 %vm1443_vm12, %v9375_v14  ;;  %v4586_v14 = vrot.slane %v4584_v24, 4  ;;  %v8633_v24 = vrot.slane %v4542_v5, 4  ;;  %v4600_v41 = vor.u32 %v4599_v47, %v8621_v54  ;;  %v4603_v37 = vshll.u32 %v8619_v9, 16 }
 0x13e   : > { %v4566_v44 = vor.u32 %v4565_v28, %v4562_v18  ;;  %v9376_v43 = vcombine.low %v8359_v30, %v8363_v25  ;;  %v4614_v5 = vor.u32 %v4613_v29, %v4610_v34  ;;  %v4627_v18 = vshll.u32 %v8627_v56, 16 }
 0x13f   : > { %v4590_v57 = vor.u32 %v4589_v58, %v4586_v14  ;;  %v4641_v21 = vshll.u32 %v8631_v40, 16  ;;  %v4645_v31 = vshrl.u32 %v8631_v40, 16  ;;  %v9377_v58 = vcombine.low %v8377_v60, %v8381_v19 }
 0x140   : > { %6866 = vmatmul.mubr.msk.bf16.vlgmr.msra.gmra.mrb[0].mxu0 %vm1443_vm12, %v8420_v23  ;;  %v4624_v30 = vor.u32 %v4623_v51, %v8629_v63  ;;  %v4634_v25 = vrot.slane %v4632_v1, 4  ;;  %v4637_v28 = vrot.slane %v4635_v13, 5  ;;  %v390_v23 = vsel %vm7379_vm6, 0, %v389_v2 }
 0x141   : > { %6898 = vmatpush3.bf16.msra.mxu0 %v8418_v49  ;;  %6869 = vmatprep.mubr.msk.bf16.mxu0 %vm1443_vm12, %v8492_v42  ;;  %v4567_v34 = vrot.slane %v4566_v44, 4  ;;  %v4581_v14 = vrot.slane %v4579_v39, 5  ;;  %v4656_v47 = vshrl.u32 %v4355_v53, 16  ;;  %v4659_v29 = vshll.u32 %v4355_v53, 16  ;;  %391 = vst [vmem:[#allocation2 + $0xd4] sm:$0x1] %v390_v23 }
 0x142   : > { %v4577_v49 = vrot.slane %v4576_v6, 4  ;;  %v4601_v60 = vrot.slane %v4600_v41, 4  ;;  %v4605_v19 = vrot.slane %v4603_v37, 5  ;;  %v4524_v13 = vsel %vm7456_vm13, %v8603_v45, %v8581_v8  ;;  %v8670_v6 = vld [vmem:[#allocation2 + $0xa4] sm:$0x1] }
 0x143   : > { %v4615_v1 = vrot.slane %v4614_v5, 4  ;;  %v8664_v51 = vrot.slane %v4641_v21, 5  ;;  %v4647_v2 = vrot.slane %v4645_v31, 4  ;;  %v4534_v42 = vsel %vm7456_vm13, %v8623_v50, %v8585_v55  ;;  %v8672_v41 = vld [vmem:[#allocation2 + $0xac] sm:$0xf] }
 0x144   : > { %6712 = vmatmul.mubr.msk.bf16.gmra.mrb[16].mxu1 %vm1443_vm12, %v9376_v43  ;;  %v4591_v43 = vrot.slane %v4590_v57, 4  ;;  %v4625_v44 = vrot.slane %v4624_v30, 4  ;;  %v4629_v39 = vrot.slane %v4627_v18, 5  ;;  %v4638_v57 = vor.u32 %v4637_v28, %v4634_v25  ;;  %v8682_v37 = vld [vmem:[#allocation2 + $0xb0] sm:$0x1] }
 0x145   : > { %6715 = vmatprep.mubr.msk.bf16.mxu1 %vm1443_vm12, %v9377_v58  ;;  %v4548_v8 = vsel %vm7456_vm13, %v8633_v24, %v8589_v17  ;;  %v4558_v45 = vsel %vm7456_vm13, %v8635_v22, %v8625_v7  ;;  %v4658_v55 = vrot.slane %v4656_v47, 4  ;;  %v4661_v50 = vrot.slane %v4659_v29, 5  ;;  %v4358_v21 = vld [vmem:[#allocation2 + $0xb4] sm:$0xf] }
 0x146   : > { %v4572_v53 = vsel %vm7456_vm13, %v4567_v34, %v8617_v11  ;;  %v4582_v5 = vsel %vm7456_vm13, %v4577_v49, %v4581_v14  ;;  %v4596_v17 = vsel %vm7456_vm13, %v4591_v43, %v8621_v54  ;;  %v4606_v24 = vsel %vm7456_vm13, %v4601_v60, %v4605_v19  ;;  %v5050_v43 = vld [vmem:[#allocation2 + $0x54] sm:$0xe] }
 0x147   : > { %v9379_v7 = vcombine.low %v8394_v36, %v8403_v3  ;;  %v4620_v11 = vsel %vm7456_vm13, %v4615_v1, %v8629_v63  ;;  %v4648_v22 = vor.u32 %v4647_v2, %v8664_v51  ;;  %v4651_v18 = vshll.u32 %v8670_v6, 16 }
 0x148   : > { %6870 = vmatmul.mubr.msk.bf16.gmra.mrb[4].mxu0 %vm1443_vm12, %v8557_v26  ;;  %v4665_v54 = vshll.u32 %v8672_v41, 16  ;;  %v9380_v31 = vcombine.low %v8481_v48, %v8496_v10  ;;  %v4630_v36 = vsel %vm7456_vm13, %v4625_v44, %v4629_v39  ;;  %v8714_v3 = vrot.slane %v4638_v57, 4  ;;  %v5049_v10 = vld [vmem:[#allocation2 + $0x48] sm:$0xe]  ;;  %v5051_v57 = vld [vmem:[#allocation2 + $0x60] sm:$0xe] }
 0x149   : > { %6873 = vmatprep.mubr.msk.bf16.mxu0 %vm1443_vm12, %v8564_v46  ;;  %v4669_v26 = vshrl.u32 %v8672_v41, 16  ;;  %v4675_v63 = vshll.u32 %v8682_v37, 16  ;;  %v6125_v58 = vcombine.low %v8575_v12, %v8579_v4  ;;  %v6297_v30 = vcombine.low %v4524_v13, %v4534_v42 }
 0x14a   : > { %v8720_v25 = vcombine.low %v4548_v8, %v4558_v45  ;;  %v4662_v48 = vor.u32 %v4661_v50, %v4658_v55  ;;  %v8722_v28 = vcombine.low %v4572_v53, %v4582_v5  ;;  %v8724_v46 = vcombine.low %v4596_v17, %v4606_v24  ;;  %v5052_v53 = vld [vmem:[#allocation2 + $0x6c] sm:$0xe]  ;;  %v9382_v24 = vld [vmem:[#allocation12_spill] sm:$0xff] }
 0x14b   : > { %v4680_v23 = vshrl.u32 %v4358_v21, 16  ;;  %v4683_v34 = vshll.u32 %v4358_v21, 16  ;;  %v8728_v14 = vcombine.low %v4620_v11, %v4630_v36  ;;  %v8730_v47 = vrot.slane %v4648_v22, 4  ;;  %v9384_v22 = vld [vmem:[#allocation14_spill] sm:$0xff]  ;;  %v4361_v36 = vld [vmem:[#allocation2 + $0xc0] sm:$0xf] }
 0x14c   : > { %6716 = vmatmul.mubr.msk.bf16.gmra.mrb[20].mxu1 %vm1443_vm12, %v9379_v7  ;;  %v8732_v29 = vrot.slane %v4651_v18, 5  ;;  %v8734_v49 = vrot.slane %v4665_v54, 5  ;;  %v4644_v60 = vsel %vm7456_vm13, %v8714_v3, %v8664_v51  ;;  %v8740_v19 = vrot.slane %v4669_v26, 4  ;;  %v9393_v51 = vld [vmem:[#allocation19_spill] sm:$0xff] }
 0x14d   : > { %6719 = vmatprep.mubr.msk.bf16.mxu1 %vm1443_vm12, %v9380_v31  ;;  %v8742_v13 = vrot.slane %v4675_v63, 5  ;;  %v6327_v1 = vrot.slane %v5049_v10, 9  ;;  %v8744_v2 = vrot.slane %v4662_v48, 4  ;;  %v4689_v42 = vshll.u32 %v8726_v32, 16  ;;  %v8785_v31 = vld [vmem:[#allocation2 + $0xbc] sm:$0x1] }
 0x14e   : > { %v5139_v44 = vrot.slane %v8424_v52, 5  ;;  %v5142_v39 = vrot.slane %v8456_v16, 5  ;;  %v8749_v8 = vrot.slane %v4680_v23, 4  ;;  %v8751_v45 = vrot.slane %v4683_v34, 5  ;;  %v9385_v63 = vld [vmem:[#allocation15_spill] sm:$0xff]  ;;  %v9386_v34 = vld [vmem:[#allocation16_spill] sm:$0xff] }
 0x14f   : > { %v4693_v55 = vshrl.u32 %v8726_v32, 16  ;;  %v6328_v50 = vrot.slane %v5050_v43, 9  ;;  %v9381_v5 = vcombine.low %v8513_v35, %v8519_v15  ;;  %v4654_v52 = vsel %vm7456_vm13, %v8730_v47, %v8732_v29  ;;  %v8914_v29 = vld [vmem:[#allocation2 + $0xd4] sm:$0x1] }
 0x150   : > { %6874 = vmatmul.mubr.msk.bf16.gmra.mrb[8].mxu0 %vm1443_vm12, %v8571_v0  ;;  %v8766_v16 = vsel %vm7759_vm2, %v6327_v1, %v5139_v44  ;;  %v5141_v17 = vrot.slane %v5139_v44, 4  ;;  %v5146_v7 = vrot.slane %v9382_v24, 5  ;;  %v9383_v35 = vcombine.low %v8526_v20, %v8537_v38  ;;  %v2791_v1 = vld [vmem:[#allocation2 + $0x78] sm:$0xf]  ;;  %v7224_v44 = vld [vmem:[#allocation2 + $0xc] sm:$0xff]  }
 0x151   : > { %6877 = vmatprep.mubr.msk.bf16.mxu0 %vm1443_vm12, %v6297_v30  ;;  %v5149_v15 = vrot.slane %v8473_v62, 5  ;;  %v6329_v0 = vrot.slane %v5051_v57, 9  ;;  %v5153_v11 = vrot.slane %v8515_v61, 5  ;;  %v5156_v18 = vrot.slane %v9384_v22, 5 }
 0x152   : > { %v8779_v54 = vsel %vm7759_vm2, %v5141_v17, %v5142_v39  ;;  %v8783_v21 = vsel %vm7759_vm2, %v6328_v50, %v5146_v7  ;;  %v5148_v20 = vrot.slane %v5146_v7, 4  ;;  %v6330_v38 = vrot.slane %v5052_v53, 9  ;;  %v8803_v39 = vld [vmem:[#allocation2 + $0xc4] sm:$0xf] }
 0x153   : > { %v6344_v62 = vcombine.low %v8766_v16, %v8779_v54  ;;  %v8791_v61 = vsel %vm7759_vm2, %v6329_v0, %v5153_v11  ;;  %v5155_v26 = vrot.slane %v5153_v11, 4  ;;  %v5160_v30 = vrot.slane %v9385_v63, 5  ;;  %v5053_v11 = vld [vmem:[#allocation2 + $0x78] sm:$0xe] }
 0x154   : > { %6720 = vmatmul.mubr.msk.bf16.gmra.mrb[24].mxu1 %vm1443_vm12, %v9381_v5  ;;  %v4672_v48 = vor.u32 %v8740_v19, %v8734_v49  ;;  %v8796_v10 = vrot.slane %v4689_v42, 5  ;;  %v8800_v23 = vsel %vm7759_vm2, %v5148_v20, %v5149_v15  ;;  %v5163_v43 = vrot.slane %v9386_v34, 5  ;;  %v5054_v20 = vld [vmem:[#allocation2 + $0x84] sm:$0xe] }
 0x155   : > { %6723 = vmatprep.mubr.msk.bf16.mxu1 %vm1443_vm12, %v9383_v35  ;;  %v6345_v57 = vcombine.low %v8783_v21, %v8800_v23  ;;  %v8809_v50 = vsel %vm7759_vm2, %v5155_v26, %v5156_v18  ;;  %v8813_v19 = vsel %vm7759_vm2, %v6330_v38, %v5160_v30  ;;  %v5162_v42 = vrot.slane %v5160_v30, 4  ;;  %v9389_v30 = vld [vmem:[#allocation17_spill] sm:$0xff]  ;;  %v7239_v21 = vld [vmem:[#allocation2 + $0xc0] sm:$0xff]  }
 0x156   : > { %v4668_v53 = vsel %vm7456_vm13, %v8744_v2, %v8734_v49  ;;  %v4699_v5 = vshll.u32 %v8785_v31, 16  ;;  %v4704_v17 = vshrl.u32 %v4361_v36, 16  ;;  %v4686_v7 = vor.u32 %v8751_v45, %v8749_v8  ;;  %v8848_v8 = vld [vmem:[#allocation2 + $0xc8] sm:$0x1] }
 0x157   : > { %v4707_v35 = vshll.u32 %v4361_v36, 16  ;;  %v8826_v15 = vsel %vm7759_vm2, %v5162_v42, %v5163_v43  ;;  %v3029_v0 = vshrl.u32 %v2791_v1, 16  ;;  %v4695_v22 = vrot.slane %v4693_v55, 4  ;;  %v9388_v36 = vld [vmem:[#allocation7_spill] sm:$0xff]  ;;  %v9390_v42 = vld [vmem:[#allocation18_spill] sm:$0xff] }
 0x158   : > { %6878 = vmatmul.mubr.msk.bf16.gmra.mrb[12].mxu0 %vm1443_vm12, %v8720_v25  ;;  %v4713_v18 = vshll.u32 %v8803_v39, 16  ;;  %v3032_v45 = vshll.u32 %v2791_v1, 16  ;;  %v4673_v38 = vrot.slane %v4672_v48, 4  ;;  %v4717_v12 = vshrl.u32 %v8803_v39, 16  ;;  %v7225_v48 = vld [vmem:[#allocation2 + $0x18] sm:$0xff]  }
 0x159   : > { %6881 = vmatprep.mubr.msk.bf16.mxu0 %vm1443_vm12, %v8722_v28  ;;  %v3031_v4 = vrot.slane %v3029_v0, 4  ;;  %v4706_v55 = vrot.slane %v4704_v17, 4  ;;  %v6331_v63 = vrot.slane %v5053_v11, 9  ;;  %v5167_v34 = vrot.slane %v9389_v30, 5  ;;  %v7226_v11 = vld [vmem:[#allocation2 + $0x24] sm:$0xff]  }
 0x15a   : > { %v3034_v26 = vrot.slane %v3032_v45, 5  ;;  %v4709_v43 = vrot.slane %v4707_v35, 5  ;;  %v5170_v1 = vrot.slane %v8612_v59, 5  ;;  %v5174_v28 = vrot.slane %v9390_v42, 5 }
 0x15b   : > { %v8850_v0 = vrot.slane %v4713_v18, 5  ;;  %v5169_v17 = vrot.slane %v5167_v34, 4  ;;  %v4719_v45 = vrot.slane %v4717_v12, 4  ;;  %v4678_v18 = vsel %vm7456_vm13, %v4673_v38, %v8742_v13 }
 0x15c   : > { %6724 = vmatmul.mubr.msk.bf16.gmra.mrb[28].mxu1 %vm1443_vm12, %v6125_v58  ;;  %v9387_v58 = vld [vmem:[#allocation6_spill] sm:$0xff]  ;;  %v3035_v24 = vor.u32 %v3034_v26, %v3031_v4  ;;  %v5176_v35 = vrot.slane %v5174_v28, 4  ;;  %v4696_v4 = vor.u32 %v4695_v22, %v8796_v10  ;;  %v4710_v30 = vor.u32 %v4709_v43, %v4706_v55  ;;  %v9391_v22 = vld [vmem:[#allocation5_spill] sm:$0xff]  ;;  %v9392_v43 = vld [vmem:[#allocation3_spill] sm:$0xff] }
 0x15d   : > { %6729 = vmatprep.mubr.msk.bf16.mxu1 %vm1443_vm12, %v7224_v44  ;;  %v3051_v25 = vsel %vm7456_vm13, %v9388_v36, %v9387_v58  ;;  %v6332_v44 = vrot.slane %v5054_v20, 9  ;;  %v8854_v58 = vsel %vm7759_vm2, %v6331_v63, %v5167_v34  ;;  %v4364_v36 = vld [vmem:[#allocation2 + $0xcc] sm:$0xf]  ;;  %v5177_v20 = vrot.slane %v8619_v9, 5  ;;  %v8865_v26 = vld [vmem:[#allocation2 + $0xd0] sm:$0xf] }
 0x15e   : > { %v3036_v63 = vrot.slane %v3035_v24, 4  ;;  %v8869_v12 = vsel %vm7759_vm2, %v5169_v17, %v5170_v1  ;;  %v4723_v34 = vshll.u32 %v8848_v8, 16  ;;  %v4728_v13 = vshrl.u32 %v4364_v36, 16 }
 0x15f   : > { %v8858_v59 = vsel %vm7759_vm2, %v6332_v44, %v5174_v28  ;;  %v6348_v44 = vcombine.low %v8854_v58, %v8869_v12  ;;  %v8876_v9 = vsel %vm7759_vm2, %v5176_v35, %v5177_v20  ;;  %v4731_v24 = vshll.u32 %v4364_v36, 16  ;;  %v5055_v20 = vld [vmem:[#allocation2 + $0x90] sm:$0xe] }
 0x160   : > { %6882 = vmatmul.mubr.msk.bf16.gmra.mrb[16].mxu0 %vm1443_vm12, %v8724_v46  ;;  %v3041_v38 = vsel %vm7456_vm13, %v3036_v63, %v9391_v22  ;;  %v6349_v55 = vcombine.low %v8858_v59, %v8876_v9  ;;  %v4720_v1 = vor.u32 %v4719_v45, %v8850_v0  ;;  %v4737_v42 = vshll.u32 %v8865_v26, 16  ;;  %v7227_v63 = vld [vmem:[#allocation2 + $0x30] sm:$0xff]   ;;  %v7228_v45 = vld [vmem:[#allocation2 + $0x3c] sm:$0xff]  }
 0x161   : > { %v4741_v28 = vshrl.u32 %v8865_v26, 16  ;;  %v8891_v46 = vcombine.low %v3041_v38, %v3051_v25  ;;  %6885 = vmatprep.mubr.msk.bf16.mxu0 %vm1443_vm12, %v8728_v14  ;;  %v4697_v17 = vrot.slane %v4696_v4, 4  ;;  %v4701_v36 = vrot.slane %v4699_v5, 5 }
 0x162   : > { %v4711_v35 = vrot.slane %v4710_v30, 4  ;;  %v6302_v25 = vcombine.low %v4644_v60, %v4654_v52  ;;  %v6303_v14 = vcombine.low %v4668_v53, %v4678_v18  ;;  %v4730_v5 = vrot.slane %v4728_v13, 4 }
 0x163   : > { %v4721_v4 = vrot.slane %v4720_v1, 4  ;;  %v4725_v30 = vrot.slane %v4723_v34, 5  ;;  %v8912_v22 = vrot.slane %v4737_v42, 5  ;;  %v4743_v47 = vrot.slane %v4741_v28, 4  ;;  %v7280_v1 = vld [vmem:[#allocation2 + $0x1c] sm:$0xf] }
 0x164   : > { %6730 = vmatmul.mubr.msk.bf16.vlgmr.msra.gmra.mrb[0].mxu1 %vm1443_vm12, %v7225_v48  ;;  %v4687_v48 = vrot.slane %v4686_v7, 4  ;;  %v4733_v7 = vrot.slane %v4731_v24, 5  ;;  %v6333_v38 = vrot.slane %v5055_v20, 9  ;;  %v5181_v3 = vrot.slane %v9393_v51, 5  ;;  %v5046_v51 = vld [vmem:[#allocation2 + $0x24] sm:$0xe] }
 0x165   : > { %6932 = vmatpush3.bf16.msra.mxu1 %v9392_v43  ;;  %6733 = vmatprep.mubr.msk.bf16.mxu1 %vm1443_vm12, %v7226_v11  ;;  %v5056_v11 = vld [vmem:[#allocation2 + $0x9c] sm:$0xe]  ;;  %v5184_v60 = vrot.slane %v8627_v56, 5  ;;  %v4702_v2 = vsel %vm7456_vm13, %v4697_v17, %v4701_v36  ;;  %v4716_v52 = vsel %vm7456_vm13, %v4711_v35, %v8850_v0  ;;  %v4726_v0 = vsel %vm7456_vm13, %v4721_v4, %v4725_v30  ;;  %v7229_v35 = vld [vmem:[#allocation2 + $0x48] sm:$0xff]   ;;  %v7281_v4 = vld [vmem:[#allocation2 + $0x20] sm:$0x1] }
 0x166   : > { %v4692_v49 = vsel %vm7456_vm13, %v4687_v48, %v8796_v10  ;;  %v6334_v53 = vrot.slane %v5056_v11, 9  ;;  %v4734_v18 = vor.u32 %v4733_v7, %v4730_v5  ;;  %v8930_v56 = vsel %vm7759_vm2, %v6333_v38, %v5181_v3  ;;  %v5057_v38 = vld [vmem:[#allocation2 + $0xa8] sm:$0xe] }
 0x167   : > { %v5183_v34 = vrot.slane %v5181_v3, 4  ;;  %v5188_v10 = vrot.slane %v8631_v40, 5  ;;  %v4744_v13 = vor.u32 %v4743_v47, %v8912_v22  ;;  %v4747_v24 = vshll.u32 %v8914_v29, 16  ;;  %v5045_v40 = vld [vmem:[#allocation2 + $0x18] sm:$0xe] }
 0x168   : > { %6886 = vmatmul.mubr.msk.bf16.gmra.mrb[20].mxu0 %vm1443_vm12, %v6302_v25  ;;  %v5191_v43 = vrot.slane %v8670_v6, 5  ;;  %v5111_v42 = vrot.slane %v7280_v1, 5  ;;  %v6304_v20 = vcombine.low %v4692_v49, %v4702_v2  ;;  %v7230_v25 = vld [vmem:[#allocation2 + $0x54] sm:$0xff]   ;;  %v4735_v6 = vrot.slane %v4734_v18, 4  ;;  %v7282_v3 = vld [vmem:[#allocation2 + $0x28] sm:$0xf] }
 0x169   : > { %6889 = vmatprep.mubr.msk.bf16.mxu0 %vm1443_vm12, %v6303_v14  ;;  %v8942_v28 = vsel %vm7759_vm2, %v5183_v34, %v5184_v60  ;;  %v8948_v17 = vsel %vm7759_vm2, %v6334_v53, %v5188_v10  ;;  %v5190_v36 = vrot.slane %v5188_v10, 4  ;;  %v4745_v14 = vrot.slane %v4744_v13, 4  ;;  %v5058_v18 = vld [vmem:[#allocation2 + $0xb4] sm:$0xe]  ;;  %v9394_v13 = vld [vmem:[#allocation9_spill] sm:$0xff] }
 0x16a   : > { %v6350_v48 = vcombine.low %v8930_v56, %v8942_v28  ;;  %v4749_v5 = vrot.slane %v4747_v24, 5  ;;  %v6323_v11 = vrot.slane %v5045_v40, 9  ;;  %v5114_v30 = vrot.slane %v7281_v4, 5  ;;  %v9395_v4 = vld [vmem:[#allocation10_spill] sm:$0xff] }
 0x16b   : > { %v8952_v7 = vsel %vm7759_vm2, %v5190_v36, %v5191_v43  ;;  %v5118_v60 = vrot.slane %v7282_v3, 5  ;;  %v4740_v49 = vsel %vm7456_vm13, %v4735_v6, %v8912_v22  ;;  %v5195_v53 = vrot.slane %v8672_v41, 5  ;;  %v7231_v36 = vld [vmem:[#allocation2 + $0x60] sm:$0xff]  }
 0x16c   : > { %6734 = vmatmul.mubr.msk.bf16.gmra.mrb[4].mxu1 %vm1443_vm12, %v7227_v63  ;;  %v6305_v63 = vcombine.low %v4716_v52, %v4726_v0  ;;  %v6351_v47 = vcombine.low %v8948_v17, %v8952_v7  ;;  %v4750_v2 = vsel %vm7456_vm13, %v4745_v14, %v4749_v5  ;;  %v6335_v52 = vrot.slane %v5057_v38, 9  ;;  %v5047_v0 = vld [vmem:[#allocation2 + $0x30] sm:$0xe] }
 0x16d   : > { %6737 = vmatprep.mubr.msk.bf16.mxu1 %vm1443_vm12, %v7228_v45  ;;  %v5113_v45 = vrot.slane %v5111_v42, 4  ;;  %v5112_v34 = vsel %vm7759_vm2, %v6323_v11, %v5111_v42  ;;  %v5125_v24 = vrot.slane %v9394_v13, 5  ;;  %v6324_v43 = vrot.slane %v5046_v51, 9  ;;  %v7233_v13 = vld [vmem:[#allocation2 + $0x78] sm:$0xff]  }
 0x16e   : > { %v8973_v22 = vsel %vm7759_vm2, %v6335_v52, %v5195_v53  ;;  %v5197_v1 = vrot.slane %v5195_v53, 4  ;;  %v5198_v40 = vrot.slane %v8682_v37, 5  ;;  %v6306_v41 = vcombine.low %v4740_v49, %v4750_v2  ;;  %v9396_v2 = vld [vmem:[#allocation11_spill] sm:$0xff] }
 0x16f   : > { %v5115_v10 = vsel %vm7759_vm2, %v5113_v45, %v5114_v30  ;;  %v6336_v42 = vrot.slane %v5058_v18, 9  ;;  %v6325_v14 = vrot.slane %v5047_v0, 9  ;;  %v5202_v11 = vrot.slane %v8726_v32, 5  ;;  %v5059_v18 = vld [vmem:[#allocation2 + $0xc0] sm:$0xe] }
 0x170   : > { %6890 = vmatmul.mubr.msk.bf16.gmra.mrb[24].mxu0 %vm1443_vm12, %v6304_v20  ;;  %v7283_v20 = vld [vmem:[#allocation2 + $0x2c] sm:$0x1]  ;;  %v6340_v6 = vcombine.low %v5112_v34, %v5115_v10  ;;  %v8978_v5 = vsel %vm7759_vm2, %v5197_v1, %v5198_v40  ;;  %v5127_v45 = vrot.slane %v5125_v24, 4  ;;  %v5128_v30 = vrot.slane %v9395_v4, 5 }
 0x171   : > { %6893 = vmatprep.mubr.msk.bf16.mxu0 %vm1443_vm12, %v6305_v63  ;;  %v5121_v63 = vrot.slane %v7283_v20, 5  ;;  %v6352_v37 = vcombine.low %v8973_v22, %v8978_v5  ;;  %v5205_v38 = vrot.slane %v8785_v31, 5  ;;  %v8987_v51 = vsel %vm7759_vm2, %v6336_v42, %v5202_v11  ;;  %v5048_v31 = vld [vmem:[#allocation2 + $0x3c] sm:$0xe]  ;;  %v2788_v0 = vld [vmem:[#allocation2 + $0x6c] sm:$0xf] }
 0x172   : > { %v5204_v3 = vrot.slane %v5202_v11, 4  ;;  %v5119_v32 = vsel %vm7759_vm2, %v6324_v43, %v5118_v60  ;;  %v5132_v52 = vrot.slane %v9396_v2, 5  ;;  %v5126_v34 = vsel %vm7759_vm2, %v6325_v14, %v5125_v24  ;;  %v7284_v11 = vld [vmem:[#allocation2 + $0x70] sm:$0xf] }
 0x173   : > { %v5129_v10 = vsel %vm7759_vm2, %v5127_v45, %v5128_v30  ;;  %v6326_v1 = vrot.slane %v5048_v31, 9  ;;  %v6337_v40 = vrot.slane %v5059_v18, 9  ;;  %v5209_v24 = vrot.slane %v8803_v39, 5 }
 0x174   : > { %6738 = vmatmul.mubr.msk.bf16.gmra.mrb[8].mxu1 %vm1443_vm12, %v7229_v35  ;;  %v5120_v35 = vrot.slane %v5118_v60, 4  ;;  %v9000_v53 = vsel %vm7759_vm2, %v5204_v3, %v5205_v38  ;;  %v5134_v20 = vrot.slane %v5132_v52, 4  ;;  %v5212_v14 = vrot.slane %v8848_v8, 5 }
 0x175   : > { %6741 = vmatprep.mubr.msk.bf16.mxu1 %vm1443_vm12, %v7230_v25  ;;  %v7232_v25 = vld [vmem:[#allocation2 + $0x6c] sm:$0xff]   ;;  %v6353_v60 = vcombine.low %v8987_v51, %v9000_v53  ;;  %v3014_v45 = vshll.u32 %v7284_v11, 16  ;;  %v3018_v4 = vshrl.u32 %v7284_v11, 16  ;;  %v9015_v38 = vsel %vm7759_vm2, %v6337_v40, %v5209_v24  ;;  %v2794_v40 = vld [vmem:[#allocation2 + $0x84] sm:$0xf] }
 0x176   : > { %v5122_v49 = vsel %vm7759_vm2, %v5120_v35, %v5121_v63  ;;  %v6342_v35 = vcombine.low %v5126_v34, %v5129_v10  ;;  %v9397_v63 = vld [vmem:[#allocation13_spill] sm:$0xff]  ;;  %v5211_v3 = vrot.slane %v5209_v24, 4  ;;  %v5133_v39 = vsel %vm7759_vm2, %v6326_v1, %v5132_v52  ;;  %v7236_v1 = vld [vmem:[#allocation2 + $0x9c] sm:$0xff]   ;;  %v2797_v11 = vld [vmem:[#allocation2 + $0x90] sm:$0xf] }
 0x177   : > { %v6341_v43 = vcombine.low %v5119_v32, %v5122_v49  ;;  %v5135_v42 = vrot.slane %v9397_v63, 5  ;;  %v5216_v32 = vrot.slane %v8865_v26, 5  ;;  %v5219_v31 = vrot.slane %v8914_v29, 5 }
 0x178   : > { %6894 = vmatmul.mubr.msk.bf16.gmra.mrb[28].mxu0 %vm1443_vm12, %v6306_v41  ;;  %v7234_v41 = vld [vmem:[#allocation2 + $0x84] sm:$0xff]   ;;  %v9027_v18 = vsel %vm7759_vm2, %v5211_v3, %v5212_v14  ;;  %v3016_v10 = vrot.slane %v3014_v45, 5  ;;  %v3066_v24 = vshrl.u32 %v7286_v33, 16  ;;  %v7238_v3 = vld [vmem:[#allocation2 + $0xb4] sm:$0xff]   ;;  %vm5643_vm0 = vcmask 60416  }
 0x179   : > { %6899 = vmatprep.mubr.msk.bf16.mxu0 %vm1443_vm12, %v6340_v6  ;;  %v3008_v6 = vshll.u32 %v2788_v0, 16  ;;  %v5136_v8 = vsel %vm7759_vm2, %v5134_v20, %v5135_v42  ;;  %v5218_v34 = vrot.slane %v5216_v32, 4  ;;  %v6354_v52 = vcombine.low %v9015_v38, %v9027_v18  ;;  %v7285_v20 = vld [vmem:[#allocation2 + $0x74] sm:$0x1] }
 0x17a   : > { %v3024_v63 = vshll.u32 %v7285_v20, 16  ;;  %v3053_v42 = vshrl.u32 %v2794_v40, 16 }
 0x17b   : > { %v3010_v2 = vrot.slane %v3008_v6, 5  ;;  %v9037_v29 = vsel %vm7759_vm2, %v5218_v34, %v5219_v31  ;;  %v3062_v6 = vshll.u32 %v7286_v33, 16  ;;  %v3077_v31 = vshrl.u32 %v2797_v11, 16  ;;  %v2800_v34 = vld [vmem:[#allocation2 + $0x9c] sm:$0xf] }
 0x17c   : > { %6742 = vmatmul.mubr.msk.bf16.gmra.mrb[12].mxu1 %vm1443_vm12, %v7231_v36  ;;  %v5060_v36 = vld [vmem:[#allocation2 + $0xcc] sm:$0xe] }
 0x17d   : > { %6745 = vmatprep.mubr.msk.bf16.mxu1 %vm1443_vm12, %v7232_v25  ;;  %v3005_v25 = vshrl.u32 %v2788_v0, 16  ;;  %v6338_v30 = vrot.slane %v5060_v36, 9  ;;  %v3020_v0 = vrot.slane %v3018_v4, 4  ;;  %v3026_v4 = vrot.slane %v3024_v63, 5 }
 0x17e   : > { %v9398_v63 = vcombine.low %v8791_v61, %v8809_v50  ;;  %v3079_v33 = vrot.slane %v3077_v31, 4  ;;  %v2803_v61 = vld [vmem:[#allocation2 + $0xa8] sm:$0xf]  ;;  %v7291_v31 = vld [vmem:[#allocation2 + $0xa4] sm:$0x1] }
 0x17f   : > { %v3007_v49 = vrot.slane %v3005_v25, 4  ;;  %v9031_v26 = vsel %vm7759_vm2, %v6338_v30, %v5216_v32  ;;  %v3056_v25 = vshll.u32 %v2794_v40, 16  ;;  %v7237_v30 = vld [vmem:[#allocation2 + $0xa8] sm:$0xff]   ;;  %v3055_v32 = vrot.slane %v3053_v42, 4 }
 0x180   : > { %6900 = vmatmul.mubr.msk.bf16.vlgmr.msra.gmra.mrb[0].mxu0 %vm1443_vm12, %v6341_v43  ;;  %v6343_v43 = vcombine.low %v5133_v39, %v5136_v8  ;;  %v6355_v36 = vcombine.low %v9031_v26, %v9037_v29  ;;  %v9048_v8 = vrot.slane %v3062_v6, 5  ;;  %v3101_v40 = vshrl.u32 %v2800_v34, 16 }
 0x181   : > { %6903 = vmatprep.mubr.msk.bf16.mxu0 %vm1443_vm12, %v6342_v35  ;;  %v3021_v35 = vor.u32 %v3020_v0, %v3016_v10  ;;  %v3058_v39 = vrot.slane %v3056_v25, 5 }
 0x183   : > { %v3022_v45 = vrot.slane %v3021_v35, 4  ;;  %v7289_v35 = vld [vmem:[#allocation2 + $0xa0] sm:$0xf]  ;;  %v3059_v42 = vor.u32 %v3058_v39, %v3055_v32 }
 0x184   : > { %6746 = vmatmul.mubr.msk.bf16.gmra.mrb[16].mxu1 %vm1443_vm12, %v7233_v13  ;;  %v7235_v13 = vld [vmem:[#allocation2 + $0x90] sm:$0xff]   ;;  %v3110_v20 = vshll.u32 %v7289_v35, 16 }
 0x185   : > { %6749 = vmatprep.mubr.msk.bf16.mxu1 %vm1443_vm12, %v7234_v41  ;;  %v3011_v41 = vor.u32 %v3010_v2, %v3007_v49  ;;  %v3068_v49 = vrot.slane %v3066_v24, 4  ;;  %v3080_v2 = vshll.u32 %v2797_v11, 16  ;;  %v3027_v54 = vsel %vm7456_vm13, %v3022_v45, %v3026_v4 }
 0x186   : > { %v3103_v45 = vrot.slane %v3101_v40, 4  ;;  %v3060_v50 = vrot.slane %v3059_v42, 4  ;;  %v7292_v40 = vld [vmem:[#allocation2 + $0xac] sm:$0xf]  ;;  %v7293_v42 = vld [vmem:[#allocation2 + $0xb8] sm:$0xf] }
 0x187   : > { %v3012_v14 = vrot.slane %v3011_v41, 4  ;;  %v3104_v41 = vshll.u32 %v2800_v34, 16  ;;  %v3069_v25 = vor.u32 %v3068_v49, %v9048_v8  ;;  %v3082_v6 = vrot.slane %v3080_v2, 5 }
 0x188   : > { %6904 = vmatmul.mubr.msk.bf16.gmra.mrb[4].mxu0 %vm1443_vm12, %v6343_v43  ;;  %v3120_v2 = vshll.u32 %v7291_v31, 16  ;;  %v7294_v31 = vld [vmem:[#allocation2 + $0xb0] sm:$0x1] }
 0x189   : > { %6907 = vmatprep.mubr.msk.bf16.mxu0 %vm1443_vm12, %v6344_v62  ;;  %v3017_v16 = vsel %vm7456_vm13, %v3012_v14, %v3016_v10  ;;  %v7287_v62 = vld [vmem:[#allocation2 + $0x8c] sm:$0x1]  ;;  %v3114_v10 = vshrl.u32 %v7289_v35, 16  ;;  %v7290_v14 = vld [vmem:[#allocation2 + $0x98] sm:$0x1]  ;;  %v3106_v4 = vrot.slane %v3104_v41, 5  ;;  %v3083_v39 = vor.u32 %v3082_v6, %v3079_v33 }
 0x18a   : > { %v3072_v0 = vshll.u32 %v7287_v62, 16  ;;  %v6184_v23 = vcombine.low %v3017_v16, %v3027_v54  ;;  %v3096_v11 = vshll.u32 %v7290_v14, 16  ;;  %v3070_v34 = vrot.slane %v3069_v25, 4  ;;  %v2806_v62 = vld [vmem:[#allocation2 + $0xb4] sm:$0xf] }
 0x18b   : > { %v3125_v16 = vshrl.u32 %v2803_v61, 16  ;;  %v3128_v54 = vshll.u32 %v2803_v61, 16  ;;  %v3138_v41 = vshrl.u32 %v7292_v40, 16  ;;  %v3065_v35 = vsel %vm7456_vm13, %v3060_v50, %v9048_v8  ;;  %v2809_v50 = vld [vmem:[#allocation2 + $0xc0] sm:$0xf] }
 0x18c   : > { %6750 = vmatmul.mubr.msk.bf16.gmra.mrb[20].mxu1 %vm1443_vm12, %v7235_v13  ;;  %v7288_v13 = vld [vmem:[#allocation2 + $0x94] sm:$0xf]  ;;  %v3074_v32 = vrot.slane %v3072_v0, 5  ;;  %v3134_v0 = vshll.u32 %v7292_v40, 16  ;;  %v3158_v25 = vshll.u32 %v7293_v42, 16  ;;  %v3162_v33 = vshrl.u32 %v7293_v42, 16 }
 0x18d   : > { %6753 = vmatprep.mubr.msk.bf16.mxu1 %vm1443_vm12, %v7236_v1  ;;  %v3086_v43 = vshll.u32 %v7288_v13, 16  ;;  %v3090_v1 = vshrl.u32 %v7288_v13, 16  ;;  %v9399_v13 = vcombine.low %v8813_v19, %v8826_v15  ;;  %v3084_v15 = vrot.slane %v3083_v39, 4 }
 0x18e   : > { %v3075_v19 = vsel %vm7456_vm13, %v3070_v34, %v3074_v32  ;;  %v3130_v58 = vrot.slane %v3128_v54, 5  ;;  %v3140_v14 = vrot.slane %v3138_v41, 4  ;;  %v3164_v61 = vrot.slane %v3162_v33, 4  ;;  %v7297_v33 = vld [vmem:[#allocation2 + $0xc8] sm:$0x1] }
 0x18f   : > { %v3092_v24 = vrot.slane %v3090_v1, 4  ;;  %v3173_v59 = vshrl.u32 %v2809_v50, 16  ;;  %v3176_v9 = vshll.u32 %v2809_v50, 16 }
 0x190   : > { %6908 = vmatmul.mubr.msk.bf16.gmra.mrb[8].mxu0 %vm1443_vm12, %v6345_v57  ;;  %v9065_v57 = vrot.slane %v3086_v43, 5  ;;  %v3107_v43 = vor.u32 %v3106_v4, %v3103_v45  ;;  %v6186_v45 = vcombine.low %v3065_v35, %v3075_v19 }
 0x191   : > { %6911 = vmatprep.mubr.msk.bf16.mxu0 %vm1443_vm12, %v9398_v63  ;;  %v3152_v63 = vshll.u32 %v2806_v62, 16  ;;  %v3175_v35 = vrot.slane %v3173_v59, 4  ;;  %v3178_v19 = vrot.slane %v3176_v9, 5 }
 0x192   : > { %v3093_v49 = vor.u32 %v3092_v24, %v9065_v57  ;;  %v3108_v12 = vrot.slane %v3107_v43, 4  ;;  %v3136_v24 = vrot.slane %v3134_v0, 5 }
 0x193   : > { %v3154_v4 = vrot.slane %v3152_v63, 5  ;;  %v3179_v42 = vor.u32 %v3178_v19, %v3175_v35 }
 0x194   : > { %6754 = vmatmul.mubr.msk.bf16.gmra.mrb[24].mxu1 %vm1443_vm12, %v7237_v30  ;;  %v9067_v30 = vrot.slane %v3110_v20, 5  ;;  %v3098_v20 = vrot.slane %v3096_v11, 5  ;;  %v3094_v6 = vrot.slane %v3093_v49, 4  ;;  %v3089_v11 = vsel %vm7456_vm13, %v3084_v15, %v9065_v57 }
 0x195   : > { %6757 = vmatprep.mubr.msk.bf16.mxu1 %vm1443_vm12, %v7238_v3  ;;  %v3116_v3 = vrot.slane %v3114_v10, 4  ;;  %v3149_v10 = vshrl.u32 %v2806_v62, 16  ;;  %v3141_v57 = vor.u32 %v3140_v14, %v3136_v24  ;;  %v7296_v62 = vld [vmem:[#allocation2 + $0xbc] sm:$0x1] }
 0x196   : > { %v3099_v34 = vsel %vm7456_vm13, %v3094_v6, %v3098_v20  ;;  %v3113_v39 = vsel %vm7456_vm13, %v3108_v12, %v9067_v30  ;;  %v3192_v6 = vshll.u32 %v7297_v33, 16 }
 0x197   : > { %v3117_v1 = vor.u32 %v3116_v3, %v9067_v30  ;;  %v3151_v8 = vrot.slane %v3149_v10, 4  ;;  %v3160_v3 = vrot.slane %v3158_v25, 5  ;;  %v6187_v43 = vcombine.low %v3089_v11, %v3099_v34 }
 0x198   : > { %6912 = vmatmul.mubr.msk.bf16.gmra.mrb[12].mxu0 %vm1443_vm12, %v9399_v13  ;;  %v3168_v13 = vshll.u32 %v7296_v62, 16  ;;  %v3142_v0 = vrot.slane %v3141_v57, 4  ;;  %v3194_v12 = vrot.slane %v3192_v6, 5 }
 0x199   : > { %6915 = vmatprep.mubr.msk.bf16.mxu0 %vm1443_vm12, %v6348_v44  ;;  %v3118_v44 = vrot.slane %v3117_v1, 4  ;;  %v3155_v54 = vor.u32 %v3154_v4, %v3151_v8  ;;  %v3165_v30 = vor.u32 %v3164_v61, %v3160_v3 }
 0x19a   : > { %v3170_v20 = vrot.slane %v3168_v13, 5 }
 0x19b   : > { %v3156_v28 = vrot.slane %v3155_v54, 4 }
 0x19c   : > { %6758 = vmatmul.mubr.msk.bf16.gmra.mrb[28].mxu1 %vm1443_vm12, %v7239_v21  ;;  %v3122_v21 = vrot.slane %v3120_v2, 5  ;;  %v3144_v2 = vshll.u32 %v7294_v31, 16 }
 0x19d   : > { %6779 = vmatprep.mubr.msk.bf16.mxu1 %vm1443_vm12, %v6184_v23  ;;  %v3127_v23 = vrot.slane %v3125_v16, 4  ;;  %v3161_v17 = vsel %vm7456_vm13, %v3156_v28, %v3160_v3 }
 0x19e   : > { %v3123_v49 = vsel %vm7456_vm13, %v3118_v44, %v3122_v21  ;;  %v3146_v41 = vrot.slane %v3144_v2, 5 }
 0x19f   : > { %v3131_v32 = vor.u32 %v3130_v58, %v3127_v23  ;;  %v6188_v1 = vcombine.low %v3113_v39, %v3123_v49  ;;  %v3180_v23 = vrot.slane %v3179_v42, 4 }
 0x1a0   : > { %6916 = vmatmul.mubr.msk.bf16.gmra.mrb[16].mxu0 %vm1443_vm12, %v6349_v55  ;;  %v7295_v55 = vld [vmem:[#allocation2 + $0xc4] sm:$0xf]  ;;  %v3147_v63 = vsel %vm7456_vm13, %v3142_v0, %v3146_v41 }
 0x1a1   : > { %6919 = vmatprep.mubr.msk.bf16.mxu0 %vm1443_vm12, %v6350_v48  ;;  %v3186_v16 = vshrl.u32 %v7295_v55, 16  ;;  %v3132_v40 = vrot.slane %v3131_v32, 4  ;;  %v3166_v48 = vrot.slane %v3165_v30, 4 }
 0x1a3   : > { %v3188_v56 = vrot.slane %v3186_v16, 4  ;;  %v3137_v10 = vsel %vm7456_vm13, %v3132_v40, %v3136_v24  ;;  %v3171_v7 = vsel %vm7456_vm13, %v3166_v48, %v3170_v20 }
 0x1a4   : > { %6780 = vmatmul.mubr.msk.bf16.vlgmr.msra.gmra.mrb[16].mxu1 %vm1443_vm12, %v8891_v46  ;;  %v3182_v46 = vshll.u32 %v7295_v55, 16  ;;  %v6190_v21 = vcombine.low %v3161_v17, %v3171_v7 }
 0x1a5   : > { %6783 = vmatprep.mubr.msk.bf16.mxu1 %vm1443_vm12, %v6186_v45 }
 0x1a6   : > { %v3184_v15 = vrot.slane %v3182_v46, 5 }
 0x1a8   : > { %6920 = vmatmul.mubr.msk.bf16.gmra.mrb[20].mxu0 %vm1443_vm12, %v6351_v47  ;;  %v3189_v25 = vor.u32 %v3188_v56, %v3184_v15  ;;  %v6189_v47 = vcombine.low %v3137_v10, %v3147_v63  ;;  %v3185_v22 = vsel %vm7456_vm13, %v3180_v23, %v3184_v15 }
 0x1a9   : > { %6923 = vmatprep.mubr.msk.bf16.mxu0 %vm1443_vm12, %v6352_v37 }
 0x1aa   : > { %v3190_v58 = vrot.slane %v3189_v25, 4 }
 0x1ac   : > { %6784 = vmatmul.mubr.msk.bf16.gmra.mrb[20].mxu1 %vm1443_vm12, %v6187_v43  ;;  %v3195_v5 = vsel %vm7456_vm13, %v3190_v58, %v3194_v12 }
 0x1ad   : > { %6787 = vmatprep.mubr.msk.bf16.mxu1 %vm1443_vm12, %v6188_v1  ;;  %v6191_v37 = vcombine.low %v3185_v22, %v3195_v5 }
 0x1b0   : > { %6924 = vmatmul.mubr.msk.bf16.gmra.mrb[24].mxu0 %vm1443_vm12, %v6353_v60 }
 0x1b1   : > { %6927 = vmatprep.mubr.msk.bf16.mxu0 %vm1443_vm12, %v6354_v52 }
 0x1b4   : > { %6788 = vmatmul.mubr.msk.bf16.gmra.mrb[24].mxu1 %vm1443_vm12, %v6189_v47 }
 0x1b5   : > { %6791 = vmatprep.mubr.msk.bf16.mxu1 %vm1443_vm12, %v6190_v21 }
 0x1b8   : > { %6928 = vmatmul.mubr.msk.bf16.gmra.mrb[28].mxu0 %vm1443_vm12, %v6355_v36 }
 0x1bc   : > { %6792 = vmatmul.mubr.msk.bf16.gmra.mrb[28].mxu1 %vm1443_vm12, %v6191_v37 }
 0x237   : > { %v6731_v51 = vpop.f32.mrb[0].mxu1 }
 0x238   : > { %v2605_v53 = vpop.f32.mrb[1].mxu1 }
 0x239   : > { %v6732_v60 = vpop.f32.mrb[2].mxu1 }
 0x23a   : > { %v2608_v44 = vpop.f32.mrb[3].mxu1 }
 0x23f   : > { %v6735_v27 = vpop.f32.mrb[4].mxu1 }
 0x240   : > { %v2621_v24 = vpop.f32.mrb[5].mxu1 }
 0x241   : > { %v6736_v14 = vpop.f32.mrb[6].mxu1 }
 0x242   : > { %v2624_v45 = vpop.f32.mrb[7].mxu1 }
 0x247   : > { %v9144_v38 = vpop.f32.mrb[8].mxu1 }
 0x248   : > { %v9146_v18 = vpop.f32.mrb[9].mxu1 }
 0x249   : > { %v9148_v52 = vpop.f32.mrb[10].mxu1 }
 0x24a   : > { %v9150_v8 = vpop.f32.mrb[11].mxu1 }
 0x24f   : > { %v9152_v26 = vpop.f32.mrb[12].mxu1 }
 0x250   : > { %v9154_v29 = vpop.f32.mrb[13].mxu1 }
 0x251   : > { %v9156_v36 = vpop.f32.mrb[14].mxu1 }
 0x252   : > { %v9158_v4 = vpop.f32.mrb[15].mxu1 }
 0x253   : > { %v6901_v3 = vpop.f32.mrb[0].mxu0 }
 0x254   : > { %v6933_v61 = vadd.f32 %v6901_v3, %v6731_v51  ;;  %v5356_v50 = vpop.f32.mrb[1].mxu0 }
 0x255   : > { %v6934_v11 = vadd.f32 %v5356_v50, %v2605_v53  ;;  %v6902_v34 = vpop.f32.mrb[2].mxu0 }
 0x256   : > { %v6442_v32 = vpack.c.bf16 %v6933_v61, %v6933_v61  ;;  %v6935_v39 = vadd.f32 %v6902_v34, %v6732_v60  ;;  %v5359_v49 = vpop.f32.mrb[3].mxu0 }
 0x257   : > { %v6440_v57 = vpack.c.bf16 %v6934_v11, %v6934_v11  ;;  %v6936_v31 = vadd.f32 %v5359_v49, %v2608_v44 }
 0x258   : > { %5646 = vst.msk [vmem:[%s9164_s26 + $0x8] sm:$0xf] %vm5643_vm0, %v6442_v32  ;;  %v5516_v2 = vpack.c.bf16 %v6935_v39, %v6933_v61  ;;  %v6443_v59 = vpack.c.bf16 %v6935_v39, %v6935_v39 }
 0x259   : > { %5644 = vst.msk [vmem:[%s9164_s26] sm:$0xf] %vm5643_vm0, %v6440_v57  ;;  %v5515_v9 = vpack.c.bf16 %v6936_v31, %v6934_v11  ;;  %v6441_v55 = vpack.c.bf16 %v6936_v31, %v6936_v31 }
 0x25a   : > { %5647 = vst.msk [vmem:[%s9164_s26 + $0xc] sm:$0xf] %vm5643_vm0, %v6443_v59  ;;  %v5678_v46 = vunpack.c.l.bf16 %v5516_v2  ;;  %v5679_v16 = vunpack.c.h.bf16 %v5516_v2 }
 0x25b   : > { %5645 = vst.msk [vmem:[%s9164_s26 + $0x4] sm:$0xf] %vm5643_vm0, %v6441_v55  ;;  %v5676_v54 = vunpack.c.l.bf16 %v5515_v9  ;;  %v5677_v30 = vunpack.c.h.bf16 %v5515_v9  ;;  %v6905_v62 = vpop.f32.mrb[4].mxu0 }
 0x25c   : > { %v5712_v13 = vsel %vm5708_vm1, %v5678_v46, 0.0  ;;  %v5782_v43 = vmul.f32 %v5678_v46, %v5678_v46  ;;  %v5372_v1 = vpop.f32.mrb[5].mxu0  ;;  %v5714_v15 = vsel %vm5708_vm1, %v5679_v16, 0.0  ;;  %v5783_v56 = vmul.f32 %v5679_v16, %v5679_v16 }
 0x25d   : > { %v5709_v40 = vsel %vm5708_vm1, %v5676_v54, 0.0  ;;  %v5710_v0 = vsel %vm5708_vm1, %v5677_v30, 0.0  ;;  %v5780_v41 = vmul.f32 %v5676_v54, %v5676_v54  ;;  %v5781_v35 = vmul.f32 %v5677_v30, %v5677_v30  ;;  %v6906_v19 = vpop.f32.mrb[6].mxu0 }
 0x25e   : > { %v5711_v28 = vadd.f32 %v5710_v0, %v5709_v40  ;;  %v6937_v48 = vadd.f32 %v6905_v62, %v6735_v27  ;;  %v5375_v20 = vpop.f32.mrb[7].mxu0  ;;  %v6938_v42 = vadd.f32 %v5372_v1, %v2621_v24  ;;  %v6939_v25 = vadd.f32 %v6906_v19, %v6736_v14 }
 0x25f   : > { %v5812_v10 = vsel %vm5708_vm1, %v5780_v41, 0.0  ;;  %v5813_v63 = vsel %vm5708_vm1, %v5781_v35, 0.0  ;;  %v6940_v7 = vadd.f32 %v5375_v20, %v2624_v45  ;;  %v5815_v47 = vsel %vm5708_vm1, %v5782_v43, 0.0 }
 0x260   : > { %v5713_v33 = vadd.f32 %v5712_v13, %v5711_v28  ;;  %v5814_v6 = vadd.f32 %v5813_v63, %v5812_v10  ;;  %v6446_v17 = vpack.c.bf16 %v6937_v48, %v6937_v48  ;;  %v6444_v21 = vpack.c.bf16 %v6938_v42, %v6938_v42 }
 0x261   : > { %v5518_v23 = vpack.c.bf16 %v6939_v25, %v6937_v48  ;;  %v6447_v58 = vpack.c.bf16 %v6939_v25, %v6939_v25  ;;  %v5517_v22 = vpack.c.bf16 %v6940_v7, %v6938_v42  ;;  %v6445_v5 = vpack.c.bf16 %v6940_v7, %v6940_v7 }
 0x262   : > { %v5816_v12 = vadd.f32 %v5815_v47, %v5814_v6  ;;  %5650 = vst.msk [vmem:[%s9164_s26 + $0x18] sm:$0xf] %vm5643_vm0, %v6446_v17  ;;  %v5715_v37 = vadd.f32 %v5714_v15, %v5713_v33  ;;  %v5817_v51 = vsel %vm5708_vm1, %v5783_v56, 0.0  ;;  %5648 = vst.msk [vmem:[%s9164_s26 + $0x10] sm:$0xf] %vm5643_vm0, %v6444_v21 }
 0x263   : > { %5651 = vst.msk [vmem:[%s9164_s26 + $0x1c] sm:$0xf] %vm5643_vm0, %v6447_v58  ;;  %v5682_v53 = vunpack.c.l.bf16 %v5518_v23  ;;  %v5683_v60 = vunpack.c.h.bf16 %v5518_v23  ;;  %v6909_v44 = vpop.f32.mrb[8].mxu0  ;;  %5649 = vst.msk [vmem:[%s9164_s26 + $0x14] sm:$0xf] %vm5643_vm0, %v6445_v5  ;;  %v5680_v27 = vunpack.c.l.bf16 %v5517_v22  ;;  %v5681_v24 = vunpack.c.h.bf16 %v5517_v22 }
 0x264   : > { %v5818_v14 = vadd.f32 %v5817_v51, %v5816_v12  ;;  %v6941_v45 = vadd.f32 %v6909_v44, %v9144_v38  ;;  %v5388_v3 = vpop.f32.mrb[9].mxu0 }
 0x265   : > { %v6910_v61 = vpop.f32.mrb[10].mxu0  ;;  %v5720_v50 = vsel %vm5708_vm1, %v5682_v53, 0.0  ;;  %v5716_v11 = vsel %vm5708_vm1, %v5680_v27, 0.0  ;;  %v5784_v34 = vmul.f32 %v5680_v27, %v5680_v27  ;;  %v5785_v32 = vmul.f32 %v5681_v24, %v5681_v24 }
 0x266   : > { %v5391_v39 = vpop.f32.mrb[11].mxu0  ;;  %v5722_v49 = vsel %vm5708_vm1, %v5683_v60, 0.0  ;;  %v5786_v57 = vmul.f32 %v5682_v53, %v5682_v53  ;;  %v5717_v31 = vadd.f32 %v5716_v11, %v5715_v37  ;;  %v6450_v2 = vpack.c.bf16 %v6941_v45, %v6941_v45 }
 0x267   : > { %v5718_v59 = vsel %vm5708_vm1, %v5681_v24, 0.0  ;;  %v5819_v9 = vsel %vm5708_vm1, %v5784_v34, 0.0  ;;  %v6942_v38 = vadd.f32 %v5388_v3, %v9146_v18  ;;  %v6943_v55 = vadd.f32 %v6910_v61, %v9148_v52 }
 0x268   : > { %v5787_v46 = vmul.f32 %v5683_v60, %v5683_v60  ;;  %v5719_v16 = vadd.f32 %v5718_v59, %v5717_v31  ;;  %v5820_v54 = vadd.f32 %v5819_v9, %v5818_v14  ;;  %5654 = vst.msk [vmem:[%s9164_s26 + $0x28] sm:$0xf] %vm5643_vm0, %v6450_v2  ;;  %v6944_v30 = vadd.f32 %v5391_v39, %v9150_v8 }
 0x269   : > { %v5821_v62 = vsel %vm5708_vm1, %v5785_v32, 0.0  ;;  %v6448_v13 = vpack.c.bf16 %v6942_v38, %v6942_v38  ;;  %v5520_v43 = vpack.c.bf16 %v6943_v55, %v6941_v45  ;;  %v6451_v1 = vpack.c.bf16 %v6943_v55, %v6943_v55 }
 0x26a   : > { %v5721_v40 = vadd.f32 %v5720_v50, %v5719_v16  ;;  %v5822_v0 = vadd.f32 %v5821_v62, %v5820_v54  ;;  %v5519_v18 = vpack.c.bf16 %v6944_v30, %v6942_v38  ;;  %v6449_v41 = vpack.c.bf16 %v6944_v30, %v6944_v30 }
 0x26b   : > { %v6913_v52 = vpop.f32.mrb[12].mxu0  ;;  %v5823_v35 = vsel %vm5708_vm1, %v5786_v57, 0.0  ;;  %5652 = vst.msk [vmem:[%s9164_s26 + $0x20] sm:$0xf] %vm5643_vm0, %v6448_v13  ;;  %5655 = vst.msk [vmem:[%s9164_s26 + $0x2c] sm:$0xf] %vm5643_vm0, %v6451_v1  ;;  %v5686_v19 = vunpack.c.l.bf16 %v5520_v43  ;;  %v5687_v15 = vunpack.c.h.bf16 %v5520_v43 }
 0x26c   : > { %v6945_v8 = vadd.f32 %v6913_v52, %v9152_v26  ;;  %v5404_v56 = vpop.f32.mrb[13].mxu0  ;;  %v5824_v28 = vadd.f32 %v5823_v35, %v5822_v0  ;;  %5653 = vst.msk [vmem:[%s9164_s26 + $0x24] sm:$0xf] %vm5643_vm0, %v6449_v41  ;;  %v5684_v48 = vunpack.c.l.bf16 %v5519_v18  ;;  %v5685_v20 = vunpack.c.h.bf16 %v5519_v18 }
 0x26d   : > { %v5723_v10 = vadd.f32 %v5722_v49, %v5721_v40  ;;  %v6914_v63 = vpop.f32.mrb[14].mxu0  ;;  %v5825_v42 = vsel %vm5708_vm1, %v5787_v46, 0.0  ;;  %v5790_v33 = vmul.f32 %v5686_v19, %v5686_v19  ;;  %v5728_v47 = vsel %vm5708_vm1, %v5686_v19, 0.0 }
 0x26e   : > { %v5407_v25 = vpop.f32.mrb[15].mxu0  ;;  %v5724_v6 = vsel %vm5708_vm1, %v5684_v48, 0.0  ;;  %v5788_v17 = vmul.f32 %v5684_v48, %v5684_v48  ;;  %v5789_v7 = vmul.f32 %v5685_v20, %v5685_v20  ;;  %v5730_v26 = vsel %vm5708_vm1, %v5687_v15, 0.0 }
 0x26f   : > { %v5725_v21 = vadd.f32 %v5724_v6, %v5723_v10  ;;  %v5826_v23 = vadd.f32 %v5825_v42, %v5824_v28  ;;  %v5726_v58 = vsel %vm5708_vm1, %v5685_v20, 0.0  ;;  %v6454_v22 = vpack.c.bf16 %v6945_v8, %v6945_v8 }
 0x270   : > { %v5827_v12 = vsel %vm5708_vm1, %v5788_v17, 0.0  ;;  %v6946_v5 = vadd.f32 %v5404_v56, %v9154_v29  ;;  %v6947_v53 = vadd.f32 %v6914_v63, %v9156_v36  ;;  %v6948_v60 = vadd.f32 %v5407_v25, %v9158_v4 }
 0x271   : > { %v5727_v37 = vadd.f32 %v5726_v58, %v5725_v21  ;;  %v5828_v51 = vadd.f32 %v5827_v12, %v5826_v23  ;;  %v5791_v44 = vmul.f32 %v5687_v15, %v5687_v15  ;;  %v5831_v27 = vsel %vm5708_vm1, %v5790_v33, 0.0  ;;  %5658 = vst.msk [vmem:[%s9164_s26 + $0x38] sm:$0xf] %vm5643_vm0, %v6454_v22 }
 0x272   : > { %v5829_v24 = vsel %vm5708_vm1, %v5789_v7, 0.0  ;;  %v6452_v14 = vpack.c.bf16 %v6946_v5, %v6946_v5  ;;  %v5522_v50 = vpack.c.bf16 %v6947_v53, %v6945_v8  ;;  %v6455_v11 = vpack.c.bf16 %v6947_v53, %v6947_v53 }
 0x273   : > { %v6917_v3 = vpop.f32.mrb[16].mxu0  ;;  %v5729_v61 = vadd.f32 %v5728_v47, %v5727_v37  ;;  %v5830_v29 = vadd.f32 %v5829_v24, %v5828_v51  ;;  %v5521_v4 = vpack.c.bf16 %v6948_v60, %v6946_v5  ;;  %v6453_v32 = vpack.c.bf16 %v6948_v60, %v6948_v60 }
 0x274   : > { %v5420_v36 = vpop.f32.mrb[17].mxu0  ;;  %5656 = vst.msk [vmem:[%s9164_s26 + $0x30] sm:$0xf] %vm5643_vm0, %v6452_v14  ;;  %5659 = vst.msk [vmem:[%s9164_s26 + $0x3c] sm:$0xf] %vm5643_vm0, %v6455_v11  ;;  %v5690_v59 = vunpack.c.l.bf16 %v5522_v50  ;;  %v5691_v9 = vunpack.c.h.bf16 %v5522_v50  ;;  %v5833_v13 = vsel %vm5708_vm1, %v5791_v44, 0.0 }
 0x275   : > { %v6918_v31 = vpop.f32.mrb[18].mxu0  ;;  %v5832_v2 = vadd.f32 %v5831_v27, %v5830_v29  ;;  %v5731_v38 = vadd.f32 %v5730_v26, %v5729_v61  ;;  %5657 = vst.msk [vmem:[%s9164_s26 + $0x34] sm:$0xf] %vm5643_vm0, %v6453_v32  ;;  %v5688_v16 = vunpack.c.l.bf16 %v5521_v4  ;;  %v5689_v54 = vunpack.c.h.bf16 %v5521_v4 }
 0x276   : > { %v5423_v46 = vpop.f32.mrb[19].mxu0  ;;  %v5736_v43 = vsel %vm5708_vm1, %v5690_v59, 0.0  ;;  %v5794_v1 = vmul.f32 %v5690_v59, %v5690_v59  ;;  %v5738_v40 = vsel %vm5708_vm1, %v5691_v9, 0.0  ;;  %v5795_v52 = vmul.f32 %v5691_v9, %v5691_v9 }
 0x277   : > { %v6781_v45 = vpop.f32.mrb[16].mxu1  ;;  %v5732_v0 = vsel %vm5708_vm1, %v5688_v16, 0.0  ;;  %v5792_v18 = vmul.f32 %v5688_v16, %v5688_v16  ;;  %v5793_v41 = vmul.f32 %v5689_v54, %v5689_v54  ;;  %v5734_v19 = vsel %vm5708_vm1, %v5689_v54, 0.0 }
 0x278   : > { %v3395_v34 = vpop.f32.mrb[17].mxu1  ;;  %v6949_v39 = vadd.f32 %v6917_v3, %v6781_v45  ;;  %v5733_v35 = vadd.f32 %v5732_v0, %v5731_v38  ;;  %v5834_v15 = vadd.f32 %v5833_v13, %v5832_v2  ;;  %v5839_v8 = vsel %vm5708_vm1, %v5794_v1, 0.0 }
 0x279   : > { %v6782_v49 = vpop.f32.mrb[18].mxu1  ;;  %v6950_v57 = vadd.f32 %v5420_v36, %v3395_v34  ;;  %v5835_v56 = vsel %vm5708_vm1, %v5792_v18, 0.0  ;;  %v5837_v25 = vsel %vm5708_vm1, %v5793_v41, 0.0  ;;  %v5841_v29 = vsel %vm5708_vm1, %v5795_v52, 0.0 }
 0x27a   : > { %v3398_v55 = vpop.f32.mrb[19].mxu1  ;;  %v6458_v30 = vpack.c.bf16 %v6949_v39, %v6949_v39  ;;  %v6951_v28 = vadd.f32 %v6918_v31, %v6782_v49  ;;  %v5735_v63 = vadd.f32 %v5734_v19, %v5733_v35  ;;  %v5836_v42 = vadd.f32 %v5835_v56, %v5834_v15 }
 0x27b   : > { %v6456_v62 = vpack.c.bf16 %v6950_v57, %v6950_v57  ;;  %v6952_v48 = vadd.f32 %v5423_v46, %v3398_v55  ;;  %v6921_v10 = vpop.f32.mrb[20].mxu0 }
 0x27c   : > { %5662 = vst.msk [vmem:[%s9164_s26 + $0x48] sm:$0xf] %vm5643_vm0, %v6458_v30  ;;  %v5436_v17 = vpop.f32.mrb[21].mxu0  ;;  %v5524_v7 = vpack.c.bf16 %v6951_v28, %v6949_v39  ;;  %v6459_v47 = vpack.c.bf16 %v6951_v28, %v6951_v28  ;;  %v5737_v12 = vadd.f32 %v5736_v43, %v5735_v63  ;;  %v5838_v22 = vadd.f32 %v5837_v25, %v5836_v42 }
 0x27d   : > { %5660 = vst.msk [vmem:[%s9164_s26 + $0x40] sm:$0xf] %vm5643_vm0, %v6456_v62  ;;  %v5523_v26 = vpack.c.bf16 %v6952_v48, %v6950_v57  ;;  %v6457_v21 = vpack.c.bf16 %v6952_v48, %v6952_v48  ;;  %v6922_v58 = vpop.f32.mrb[22].mxu0 }
 0x27e   : > { %v5439_v53 = vpop.f32.mrb[23].mxu0  ;;  %5663 = vst.msk [vmem:[%s9164_s26 + $0x4c] sm:$0xf] %vm5643_vm0, %v6459_v47  ;;  %v5694_v60 = vunpack.c.l.bf16 %v5524_v7  ;;  %v5695_v44 = vunpack.c.h.bf16 %v5524_v7  ;;  %v5840_v14 = vadd.f32 %v5839_v8, %v5838_v22  ;;  %v5739_v45 = vadd.f32 %v5738_v40, %v5737_v12 }
 0x27f   : > { %v6785_v20 = vpop.f32.mrb[20].mxu1  ;;  %5661 = vst.msk [vmem:[%s9164_s26 + $0x44] sm:$0xf] %vm5643_vm0, %v6457_v21  ;;  %v5692_v27 = vunpack.c.l.bf16 %v5523_v26  ;;  %v5693_v24 = vunpack.c.h.bf16 %v5523_v26 }
 0x280   : > { %v3411_v33 = vpop.f32.mrb[21].mxu1  ;;  %v6953_v6 = vadd.f32 %v6921_v10, %v6785_v20  ;;  %v5744_v50 = vsel %vm5708_vm1, %v5694_v60, 0.0  ;;  %v5798_v11 = vmul.f32 %v5694_v60, %v5694_v60  ;;  %v5799_v32 = vmul.f32 %v5695_v44, %v5695_v44 }
 0x281   : > { %v6786_v23 = vpop.f32.mrb[22].mxu1  ;;  %v6954_v37 = vadd.f32 %v5436_v17, %v3411_v33  ;;  %v5740_v34 = vsel %vm5708_vm1, %v5692_v27, 0.0  ;;  %v5796_v36 = vmul.f32 %v5692_v27, %v5692_v27  ;;  %v5797_v4 = vmul.f32 %v5693_v24, %v5693_v24 }
 0x282   : > { %v6462_v5 = vpack.c.bf16 %v6953_v6, %v6953_v6  ;;  %v3414_v51 = vpop.f32.mrb[23].mxu1  ;;  %v6955_v61 = vadd.f32 %v6922_v58, %v6786_v23  ;;  %v5741_v39 = vadd.f32 %v5740_v34, %v5739_v45  ;;  %v5742_v49 = vsel %vm5708_vm1, %v5693_v24, 0.0 }
 0x283   : > { %v6460_v3 = vpack.c.bf16 %v6954_v37, %v6954_v37  ;;  %v5842_v57 = vadd.f32 %v5841_v29, %v5840_v14  ;;  %v6925_v2 = vpop.f32.mrb[24].mxu0  ;;  %v5843_v59 = vsel %vm5708_vm1, %v5796_v36, 0.0  ;;  %v5845_v9 = vsel %vm5708_vm1, %v5797_v4, 0.0 }
 0x284   : > { %5666 = vst.msk [vmem:[%s9164_s26 + $0x58] sm:$0xf] %vm5643_vm0, %v6462_v5  ;;  %v5526_v38 = vpack.c.bf16 %v6955_v61, %v6953_v6  ;;  %v6463_v55 = vpack.c.bf16 %v6955_v61, %v6955_v61  ;;  %v5452_v16 = vpop.f32.mrb[25].mxu0  ;;  %v5743_v54 = vadd.f32 %v5742_v49, %v5741_v39  ;;  %v6956_v62 = vadd.f32 %v5439_v53, %v3414_v51 }
 0x285   : > { %5664 = vst.msk [vmem:[%s9164_s26 + $0x50] sm:$0xf] %vm5643_vm0, %v6460_v3  ;;  %v5844_v30 = vadd.f32 %v5843_v59, %v5842_v57  ;;  %v6926_v1 = vpop.f32.mrb[26].mxu0  ;;  %v5746_v28 = vsel %vm5708_vm1, %v5695_v44, 0.0  ;;  %v5847_v48 = vsel %vm5708_vm1, %v5798_v11, 0.0  ;;  %v5849_v20 = vsel %vm5708_vm1, %v5799_v32, 0.0 }
 0x286   : > { %5667 = vst.msk [vmem:[%s9164_s26 + $0x5c] sm:$0xf] %vm5643_vm0, %v6463_v55  ;;  %v5698_v40 = vunpack.c.l.bf16 %v5526_v38  ;;  %v5699_v0 = vunpack.c.h.bf16 %v5526_v38  ;;  %v5455_v35 = vpop.f32.mrb[27].mxu0  ;;  %v5745_v19 = vadd.f32 %v5744_v50, %v5743_v54  ;;  %v5525_v8 = vpack.c.bf16 %v6956_v62, %v6954_v37 }
 0x287   : > { %v6789_v31 = vpop.f32.mrb[24].mxu1  ;;  %v5846_v15 = vadd.f32 %v5845_v9, %v5844_v30  ;;  %v6461_v56 = vpack.c.bf16 %v6956_v62, %v6956_v62 }
 0x288   : > { %v3427_v46 = vpop.f32.mrb[25].mxu1  ;;  %v6957_v13 = vadd.f32 %v6925_v2, %v6789_v31  ;;  %v5696_v63 = vunpack.c.l.bf16 %v5525_v8  ;;  %v5697_v42 = vunpack.c.h.bf16 %v5525_v8  ;;  %v5747_v25 = vadd.f32 %v5746_v28, %v5745_v19 }
 0x289   : > { %v6790_v43 = vpop.f32.mrb[26].mxu1  ;;  %v6958_v18 = vadd.f32 %v5452_v16, %v3427_v46  ;;  %v5848_v10 = vadd.f32 %v5847_v48, %v5846_v15  ;;  %5665 = vst.msk [vmem:[%s9164_s26 + $0x54] sm:$0xf] %vm5643_vm0, %v6461_v56  ;;  %v5752_v33 = vsel %vm5708_vm1, %v5698_v40, 0.0  ;;  %v5802_v6 = vmul.f32 %v5698_v40, %v5698_v40 }
 0x28a   : > { %v3430_v41 = vpop.f32.mrb[27].mxu1  ;;  %v6959_v52 = vadd.f32 %v6926_v1, %v6790_v43  ;;  %v6466_v17 = vpack.c.bf16 %v6957_v13, %v6957_v13  ;;  %v5803_v47 = vmul.f32 %v5699_v0, %v5699_v0  ;;  %v5748_v26 = vsel %vm5708_vm1, %v5696_v63, 0.0 }
 0x28b   : > { %v6464_v7 = vpack.c.bf16 %v6958_v18, %v6958_v18  ;;  %v5800_v21 = vmul.f32 %v5696_v63, %v5696_v63  ;;  %v5801_v23 = vmul.f32 %v5697_v42, %v5697_v42  ;;  %v6929_v12 = vpop.f32.mrb[28].mxu0  ;;  %v5749_v22 = vadd.f32 %v5748_v26, %v5747_v25 }
 0x28c   : > { %v5850_v5 = vadd.f32 %v5849_v20, %v5848_v10  ;;  %5670 = vst.msk [vmem:[%s9164_s26 + $0x68] sm:$0xf] %vm5643_vm0, %v6466_v17  ;;  %v5528_v37 = vpack.c.bf16 %v6959_v52, %v6957_v13  ;;  %v6467_v51 = vpack.c.bf16 %v6959_v52, %v6959_v52  ;;  %v5468_v60 = vpop.f32.mrb[29].mxu0  ;;  %v5750_v44 = vsel %vm5708_vm1, %v5697_v42, 0.0 }
 0x28d   : > { %5668 = vst.msk [vmem:[%s9164_s26 + $0x60] sm:$0xf] %vm5643_vm0, %v6464_v7  ;;  %v5851_v27 = vsel %vm5708_vm1, %v5800_v21, 0.0  ;;  %v6960_v24 = vadd.f32 %v5455_v35, %v3430_v41  ;;  %v6930_v3 = vpop.f32.mrb[30].mxu0  ;;  %v5751_v61 = vadd.f32 %v5750_v44, %v5749_v22  ;;  %v5853_v50 = vsel %vm5708_vm1, %v5801_v23, 0.0 }
 0x28e   : > { %v5852_v29 = vadd.f32 %v5851_v27, %v5850_v5  ;;  %5671 = vst.msk [vmem:[%s9164_s26 + $0x6c] sm:$0xf] %vm5643_vm0, %v6467_v51  ;;  %v5702_v11 = vunpack.c.l.bf16 %v5528_v37  ;;  %v5471_v36 = vpop.f32.mrb[31].mxu0  ;;  %v5754_v2 = vsel %vm5708_vm1, %v5699_v0, 0.0  ;;  %v5855_v59 = vsel %vm5708_vm1, %v5802_v6, 0.0 }
 0x28f   : > { %v6793_v58 = vpop.f32.mrb[28].mxu1  ;;  %v5527_v4 = vpack.c.bf16 %v6960_v24, %v6958_v18  ;;  %v6465_v32 = vpack.c.bf16 %v6960_v24, %v6960_v24  ;;  %v5753_v57 = vadd.f32 %v5752_v33, %v5751_v61  ;;  %v5857_v30 = vsel %vm5708_vm1, %v5803_v47, 0.0 }
 0x290   : > { %v3443_v53 = vpop.f32.mrb[29].mxu1  ;;  %v6961_v14 = vadd.f32 %v6929_v12, %v6793_v58  ;;  %v5854_v31 = vadd.f32 %v5853_v50, %v5852_v29  ;;  %v5703_v62 = vunpack.c.h.bf16 %v5528_v37  ;;  %v5806_v13 = vmul.f32 %v5702_v11, %v5702_v11 }
 0x291   : > { %v6794_v45 = vpop.f32.mrb[30].mxu1  ;;  %v6962_v49 = vadd.f32 %v5468_v60, %v3443_v53  ;;  %5669 = vst.msk [vmem:[%s9164_s26 + $0x64] sm:$0xf] %vm5643_vm0, %v6465_v32  ;;  %v5700_v9 = vunpack.c.l.bf16 %v5527_v4  ;;  %v5701_v38 = vunpack.c.h.bf16 %v5527_v4  ;;  %v5755_v46 = vadd.f32 %v5754_v2, %v5753_v57 }
 0x292   : > { %v3446_v34 = vpop.f32.mrb[31].mxu1  ;;  %v6470_v39 = vpack.c.bf16 %v6961_v14, %v6961_v14  ;;  %v5856_v55 = vadd.f32 %v5855_v59, %v5854_v31  ;;  %v6963_v54 = vadd.f32 %v6930_v3, %v6794_v45  ;;  %v5760_v56 = vsel %vm5708_vm1, %v5702_v11, 0.0 }
 0x293   : > { %v6468_v16 = vpack.c.bf16 %v6962_v49, %v6962_v49  ;;  %v5756_v43 = vsel %vm5708_vm1, %v5700_v9, 0.0  ;;  %v5804_v40 = vmul.f32 %v5700_v9, %v5700_v9  ;;  %v5805_v0 = vmul.f32 %v5701_v38, %v5701_v38 }
 0x294   : > { %5674 = vst.msk [vmem:[%s9164_s26 + $0x78] sm:$0xf] %vm5643_vm0, %v6470_v39  ;;  %v5757_v1 = vadd.f32 %v5756_v43, %v5755_v46  ;;  %v5858_v18 = vadd.f32 %v5857_v30, %v5856_v55  ;;  %v5758_v41 = vsel %vm5708_vm1, %v5701_v38, 0.0  ;;  %v5530_v52 = vpack.c.bf16 %v6963_v54, %v6961_v14 }
 0x295   : > { %5672 = vst.msk [vmem:[%s9164_s26 + $0x70] sm:$0xf] %vm5643_vm0, %v6468_v16  ;;  %v6471_v35 = vpack.c.bf16 %v6963_v54, %v6963_v54  ;;  %v6964_v19 = vadd.f32 %v5471_v36, %v3446_v34  ;;  %v5859_v8 = vsel %vm5708_vm1, %v5804_v40, 0.0  ;;  %v5807_v20 = vmul.f32 %v5703_v62, %v5703_v62 }
 0x296   : > { %v5759_v15 = vadd.f32 %v5758_v41, %v5757_v1  ;;  %v5860_v28 = vadd.f32 %v5859_v8, %v5858_v18  ;;  %v5861_v63 = vsel %vm5708_vm1, %v5805_v0, 0.0  ;;  %v5762_v25 = vsel %vm5708_vm1, %v5703_v62, 0.0 }
 0x297   : > { %5675 = vst.msk [vmem:[%s9164_s26 + $0x7c] sm:$0xf] %vm5643_vm0, %v6471_v35  ;;  %v5529_v48 = vpack.c.bf16 %v6964_v19, %v6962_v49  ;;  %v6469_v42 = vpack.c.bf16 %v6964_v19, %v6964_v19  ;;  %v5863_v33 = vsel %vm5708_vm1, %v5806_v13, 0.0  ;;  %v5706_v17 = vunpack.c.l.bf16 %v5530_v52 }
 0x298   : > { %v5761_v10 = vadd.f32 %v5760_v56, %v5759_v15  ;;  %v5862_v6 = vadd.f32 %v5861_v63, %v5860_v28  ;;  %v5865_v23 = vsel %vm5708_vm1, %v5807_v20, 0.0  ;;  %v5707_v58 = vunpack.c.h.bf16 %v5530_v52 }
 0x299   : > { %5673 = vst.msk [vmem:[%s9164_s26 + $0x74] sm:$0xf] %vm5643_vm0, %v6469_v42  ;;  %v5704_v7 = vunpack.c.l.bf16 %v5529_v48  ;;  %v5705_v47 = vunpack.c.h.bf16 %v5529_v48  ;;  %v5810_v53 = vmul.f32 %v5706_v17, %v5706_v17  ;;  %v5768_v14 = vsel %vm5708_vm1, %v5706_v17, 0.0 }
 0x29a   : > { %v5763_v26 = vadd.f32 %v5762_v25, %v5761_v10  ;;  %v5864_v21 = vadd.f32 %v5863_v33, %v5862_v6  ;;  %v5811_v45 = vmul.f32 %v5707_v58, %v5707_v58  ;;  %v5770_v50 = vsel %vm5708_vm1, %v5707_v58, 0.0 }
 0x29b   : > { %v5764_v12 = vsel %vm5708_vm1, %v5704_v7, 0.0  ;;  %v5808_v22 = vmul.f32 %v5704_v7, %v5704_v7  ;;  %v5809_v37 = vmul.f32 %v5705_v47, %v5705_v47  ;;  %v5766_v60 = vsel %vm5708_vm1, %v5705_v47, 0.0 }
 0x29c   : > { %v5765_v5 = vadd.f32 %v5764_v12, %v5763_v26  ;;  %v5866_v51 = vadd.f32 %v5865_v23, %v5864_v21  ;;  %v5871_v11 = vsel %vm5708_vm1, %v5810_v53, 0.0  ;;  %v5873_v4 = vsel %vm5708_vm1, %v5811_v45, 0.0 }
 0x29d   : > { %v5867_v44 = vsel %vm5708_vm1, %v5808_v22, 0.0  ;;  %v5869_v3 = vsel %vm5708_vm1, %v5809_v37, 0.0 }
 0x29e   : > { %v5767_v27 = vadd.f32 %v5766_v60, %v5765_v5  ;;  %v5868_v24 = vadd.f32 %v5867_v44, %v5866_v51 }
 0x2a0   : > { %v5769_v61 = vadd.f32 %v5768_v14, %v5767_v27  ;;  %v5870_v29 = vadd.f32 %v5869_v3, %v5868_v24 }
 0x2a2   : > { %v5771_v34 = vadd.f32 %v5770_v50, %v5769_v61  ;;  %v5872_v36 = vadd.f32 %v5871_v11, %v5870_v29 }
 0x2a4   : > { %v5772_v32 = vrot.slane %v5771_v34, 4  ;;  %v5874_v39 = vadd.f32 %v5873_v4, %v5872_v36 }
 0x2a6   : > { %v5773_v49 = vadd.f32 %v5772_v32, %v5771_v34  ;;  %v5875_v57 = vrot.slane %v5874_v39, 4 }
 0x2a8   : > { %v5774_v31 = vrot.slane %v5773_v49, 2  ;;  %v5876_v2 = vadd.f32 %v5875_v57, %v5874_v39 }
 0x2aa   : > { %v5775_v59 = vadd.f32 %v5774_v31, %v5773_v49  ;;  %v5877_v9 = vrot.slane %v5876_v2, 2 }
 0x2ac   : > { %v5776_v38 = vrot.slane %v5775_v59, 1  ;;  %v5878_v55 = vadd.f32 %v5877_v9, %v5876_v2 }
 0x2ae   : > { %v5777_v46 = vadd.f32 %v5776_v38, %v5775_v59  ;;  %v5879_v16 = vrot.slane %v5878_v55, 1 }
 0x2b0   : > { %5779 = vst.msk [vmem:[%s265_s29] sm:$0x1] %vm5778_vm3, %v5777_v46  ;;  %v5880_v54 = vadd.f32 %v5879_v16, %v5878_v55 }
 0x2b2   : > { %5881 = vst.msk [vmem:[%s268_s8] sm:$0x1] %vm5778_vm3, %v5880_v54 }
 0x2b3 PF: > { %s17_s21 = sadd.s32 1, %s7304_s21  }
 0x2b4   : > { %p14_p4 = scmp.ge.s32.totalorder %s17_s21, 4  }
 0x2b6   :  { %16 = sbr.rel (!%p14_p4) target bundleno = 1 (0x1), region = 101 }

</bundles_post_ra>
